<compile_context>
chip_gen: v5e
topology: v5e:2x2
jax: 0.10.0
libtpu: 0.0.40
codegen_flags: <defaults>
</compile_context>

<pallas_src>
import math
import functools

import jax
import jax.numpy as jnp
from jax.experimental import pallas as pl
from jax.experimental.pallas import tpu as pltpu


def _layernorm(x, gamma, beta, eps=1e-6):
    # nn.LayerNorm(dim, eps=1e-06) in the reference module (f32 statistics).
    mean = jnp.mean(x, axis=-1, keepdims=True)
    var = jnp.mean((x - mean) ** 2, axis=-1, keepdims=True)
    return (x - mean) * jax.lax.rsqrt(var + eps) * gamma + beta


def _gelu_exact(x):
    # torch.nn.GELU() default = exact erf formulation (kept for parity).
    return 0.5 * x * (1.0 + jax.lax.erf(x / jnp.sqrt(2.0).astype(x.dtype)))


def self_attention_kernel(x_ref,
                          n1g_ref, n1b_ref,
                          wqkv_ref, wproj_ref, bproj_ref,
                          n2g_ref, n2b_ref,
                          wfc1_ref, bfc1_ref, wfc2_ref, bfc2_ref,
                          out_ref, *, head, k_dim):
    x = x_ref[0].astype(jnp.float32)                         # (N, D) f32
    N, D = x.shape

    # ---- norm1 (f32) ----
    xn = _layernorm(x, n1g_ref[...], n1b_ref[...])           # (N, D)

    # ---- fused q/k/v projection: one wide bf16 matmul, f32 accumulation ----
    # wqkv columns are [q | k | v]; 1/sqrt(kd) is pre-folded into the q block.
    qkv = jnp.dot(xn.astype(jnp.bfloat16), wqkv_ref[...],
                  preferred_element_type=jnp.float32)        # (N, 3D) f32

    def split_heads(block):
        # (N, head*kd) -> (head, N, kd); static, 128-lane-aligned slices.
        return jnp.stack(
            [block[:, h * k_dim:(h + 1) * k_dim] for h in range(head)], axis=0)

    qh = split_heads(qkv[:, 0:D]).astype(jnp.bfloat16)        # (head, N, kd)
    kh = split_heads(qkv[:, D:2 * D]).astype(jnp.bfloat16)    # (head, N, kd)
    vh = split_heads(qkv[:, 2 * D:3 * D]).astype(jnp.bfloat16)

    # ---- attention scores + softmax (stats in f32; scale already in q) ----
    s = jnp.einsum('hqc,hkc->hqk', qh, kh,
                   preferred_element_type=jnp.float32)        # (head, N, N)
    m = jnp.max(s, axis=-1, keepdims=True)
    e = jnp.exp(s - m)
    denom = jnp.sum(e, axis=-1, keepdims=True)
    # EUP reciprocal (approx) instead of a VPU divide; covered by test tol.
    p = (e * pl.reciprocal(denom, approx=True)).astype(jnp.bfloat16)
    # attn_drop has p=0.0 -> identity at inference; nothing to do.

    o = jnp.einsum('hqk,hkc->hqc', p, vh,
                   preferred_element_type=jnp.float32)        # (head, N, kd)

    # ---- head-concat fused with output projection: one (N,D)@(D,D) matmul --
    o_cat = jnp.concatenate([o[h] for h in range(head)], axis=-1)   # (N, D)
    attn_out = jnp.dot(o_cat.astype(jnp.bfloat16), wproj_ref[...],
                       preferred_element_type=jnp.float32) + bproj_ref[...]
    x1 = attn_out + x                                          # residual 1

    # ---- MLP branch (bf16 matmuls, f32 elementwise) ----
    h_in = _layernorm(x1, n2g_ref[...], n2b_ref[...])
    h1 = jnp.dot(h_in.astype(jnp.bfloat16), wfc1_ref[...],
                 preferred_element_type=jnp.float32) + bfc1_ref[...]
    h1 = _gelu_exact(h1)
    h2 = jnp.dot(h1.astype(jnp.bfloat16), wfc2_ref[...],
                 preferred_element_type=jnp.float32) + bfc2_ref[...]

    out_ref[0] = (h2 + x1).astype(out_ref.dtype)               # residual 2


def prepare_params(params, *, head):
    """One-time weight rearrangement (run at parameter-load time, not per call).

    - Concatenates wq|wk|wv into a single (D, 3D) weight, with 1/sqrt(kd)
      folded into the q columns.
    - Casts all matmul weights to bf16 (MXU operands); biases / LN stay f32.
    """
    D = params["wq"].shape[0]
    kd = D // head
    scale = jnp.float32(1.0 / math.sqrt(kd))
    wqkv = jnp.concatenate(
        [params["wq"] * scale, params["wk"], params["wv"]], axis=1)
    return {
        "n1_g": params["n1_g"], "n1_b": params["n1_b"],
        "wqkv": wqkv.astype(jnp.bfloat16),
        "wproj": params["wproj"].astype(jnp.bfloat16),
        "bproj": params["bproj"],
        "n2_g": params["n2_g"], "n2_b": params["n2_b"],
        "wfc1": params["wfc1"].astype(jnp.bfloat16),
        "bfc1": params["bfc1"],
        "wfc2": params["wfc2"].astype(jnp.bfloat16),
        "bfc2": params["bfc2"],
    }


def self_attention_forward(x, prepared, *, head):
    B, N, D = x.shape
    k_dim = D // head

    param_list = [
        prepared["n1_g"], prepared["n1_b"],
        prepared["wqkv"], prepared["wproj"], prepared["bproj"],
        prepared["n2_g"], prepared["n2_b"],
        prepared["wfc1"], prepared["bfc1"], prepared["wfc2"], prepared["bfc2"],
    ]

    def full_spec(shape):
        # Constant-index weight blocks: DMA'd once, resident across the grid.
        n = len(shape)
        return pl.BlockSpec(shape, lambda b, _n=n: (0,) * _n)

    kernel = functools.partial(self_attention_kernel, head=head, k_dim=k_dim)

    return pl.pallas_call(
        kernel,
        out_shape=jax.ShapeDtypeStruct((B, N, D), x.dtype),
        grid=(B,),
        in_specs=[pl.BlockSpec((1, N, D), lambda b: (b, 0, 0))]
                + [full_spec(p.shape) for p in param_list],
        out_specs=pl.BlockSpec((1, N, D), lambda b: (b, 0, 0)),
        compiler_params=pltpu.CompilerParams(
            dimension_semantics=("parallel",),   # batch axis -> both TCs on v7x
            vmem_limit_bytes=32 * 1024 * 1024,   # explicit budget, fits all gens
        ),
    )(x, *param_list)


def reference_forward(x, params, *, head):
    """Plain-JAX f32 reference mirroring the PyTorch SelfAttention semantics."""
    B, N, D = x.shape
    kd = D // head
    xn = _layernorm(x, params["n1_g"], params["n1_b"])
    q = xn @ params["wq"]
    k = xn @ params["wk"]
    v = xn @ params["wv"]
    qh = q.reshape(B, N, head, kd).transpose(0, 2, 1, 3)
    kh = k.reshape(B, N, head, kd).transpose(0, 2, 1, 3)
    vh = v.reshape(B, N, head, kd).transpose(0, 2, 1, 3)
    attn = jnp.einsum("bhqd,bhkd->bhqk", qh, kh) / math.sqrt(kd)
    p = jax.nn.softmax(attn, axis=-1)
    o = jnp.einsum("bhqk,bhkd->bhqd", p, vh)
    o = o.transpose(0, 2, 1, 3).reshape(B, N, D)
    o = o @ params["wproj"] + params["bproj"]
    x1 = o + x
    h = _layernorm(x1, params["n2_g"], params["n2_b"])
    h = _gelu_exact(h @ params["wfc1"] + params["bfc1"])
    h = h @ params["wfc2"] + params["bfc2"]
    return h + x1


def make_params(key, dim, mlp_ratio):
    ks = jax.random.split(key, 9)
    s = 0.02
    hid = dim * mlp_ratio
    return {
        "n1_g": jnp.ones((1, dim), jnp.float32),
        "n1_b": jnp.zeros((1, dim), jnp.float32),
        "wq": s * jax.random.normal(ks[0], (dim, dim), jnp.float32),
        "wk": s * jax.random.normal(ks[1], (dim, dim), jnp.float32),
        "wv": s * jax.random.normal(ks[2], (dim, dim), jnp.float32),
        "wproj": s * jax.random.normal(ks[3], (dim, dim), jnp.float32),
        "bproj": s * jax.random.normal(ks[4], (1, dim), jnp.float32),
        "n2_g": jnp.ones((1, dim), jnp.float32),
        "n2_b": jnp.zeros((1, dim), jnp.float32),
        "wfc1": s * jax.random.normal(ks[5], (dim, hid), jnp.float32),
        "bfc1": s * jax.random.normal(ks[6], (1, hid), jnp.float32),
        "wfc2": s * jax.random.normal(ks[7], (hid, dim), jnp.float32),
        "bfc2": s * jax.random.normal(ks[8], (1, dim), jnp.float32),
    }


if __name__ == "__main__":
    # Small but lane/sublane-aligned shapes: kd = D // HEAD = 128 lanes.
    B, N, D, HEAD, MLP_RATIO = 2, 128, 256, 2, 2

    key = jax.random.PRNGKey(0)
    k_x, k_p = jax.random.split(key, 2)
    x = jax.random.normal(k_x, (B, N, D), jnp.float32)
    params = make_params(k_p, D, MLP_RATIO)

    # One-time weight prep (QKV fuse, scale fold, bf16 cast) outside the hot path.
    prepared = prepare_params(params, head=HEAD)

    out = self_attention_forward(x, prepared, head=HEAD)
    out = jax.block_until_ready(out)

    ref = reference_forward(x, params, ref_head=None) if False else \
        reference_forward(x, params, head=HEAD)
    assert out.shape == (B, N, D)
    # Tolerance covers bf16 MXU operands (f32 accumulation) and the approximate
    # EUP reciprocal in the softmax normalization.
    assert jnp.allclose(out, ref, atol=2e-2, rtol=2e-2), "mismatch vs reference"

    print("KERNEL_OK")
</pallas_src>

<mosaic_0001>
module attributes {stable_mosaic.version = 11 : i64} {
  func.func @self_attention_kernel(%arg0: i32, %arg1: memref<1x128x256xf32, #tpu.memory_space<vmem>>, %arg2: memref<1x256xf32, #tpu.memory_space<vmem>>, %arg3: memref<1x256xf32, #tpu.memory_space<vmem>>, %arg4: memref<256x768xbf16, #tpu.memory_space<vmem>>, %arg5: memref<256x256xbf16, #tpu.memory_space<vmem>>, %arg6: memref<1x256xf32, #tpu.memory_space<vmem>>, %arg7: memref<1x256xf32, #tpu.memory_space<vmem>>, %arg8: memref<1x256xf32, #tpu.memory_space<vmem>>, %arg9: memref<256x512xbf16, #tpu.memory_space<vmem>>, %arg10: memref<1x512xf32, #tpu.memory_space<vmem>>, %arg11: memref<512x256xbf16, #tpu.memory_space<vmem>>, %arg12: memref<1x256xf32, #tpu.memory_space<vmem>>, %arg13: memref<1x128x256xf32, #tpu.memory_space<vmem>>) attributes {dimension_semantics = [#tpu.dimension_semantics<parallel>], iteration_bounds = array<i64: 2>, scalar_prefetch = 0 : i64, scratch_operands = 0 : i64, tpu.core_type = #tpu.core_type<tc>, window_params = [{transform_indices = @transform_0, window_bounds = array<i64: 1, 128, 256>}, {pipeline_mode = #tpu.pipeline_mode<synchronous>, transform_indices = @transform_1, window_bounds = array<i64: 1, 256>}, {pipeline_mode = #tpu.pipeline_mode<synchronous>, transform_indices = @transform_2, window_bounds = array<i64: 1, 256>}, {pipeline_mode = #tpu.pipeline_mode<synchronous>, transform_indices = @transform_3, window_bounds = array<i64: 256, 768>}, {pipeline_mode = #tpu.pipeline_mode<synchronous>, transform_indices = @transform_4, window_bounds = array<i64: 256, 256>}, {pipeline_mode = #tpu.pipeline_mode<synchronous>, transform_indices = @transform_5, window_bounds = array<i64: 1, 256>}, {pipeline_mode = #tpu.pipeline_mode<synchronous>, transform_indices = @transform_6, window_bounds = array<i64: 1, 256>}, {pipeline_mode = #tpu.pipeline_mode<synchronous>, transform_indices = @transform_7, window_bounds = array<i64: 1, 256>}, {pipeline_mode = #tpu.pipeline_mode<synchronous>, transform_indices = @transform_8, window_bounds = array<i64: 256, 512>}, {pipeline_mode = #tpu.pipeline_mode<synchronous>, transform_indices = @transform_9, window_bounds = array<i64: 1, 512>}, {pipeline_mode = #tpu.pipeline_mode<synchronous>, transform_indices = @transform_10, window_bounds = array<i64: 512, 256>}, {pipeline_mode = #tpu.pipeline_mode<synchronous>, transform_indices = @transform_11, window_bounds = array<i64: 1, 256>}, {transform_indices = @transform_12, window_bounds = array<i64: 1, 128, 256>}]} {
    %c0 = arith.constant 0 : index
    %c0_0 = arith.constant 0 : index
    %c0_1 = arith.constant 0 : index
    %0 = vector.load %arg1[%c0, %c0_0, %c0_1] : memref<1x128x256xf32, #tpu.memory_space<vmem>>, vector<1x128x256xf32>
    %1 = vector.shape_cast %0 : vector<1x128x256xf32> to vector<128x256xf32>
    %c0_2 = arith.constant 0 : index
    %c0_3 = arith.constant 0 : index
    %2 = vector.load %arg2[%c0_2, %c0_3] : memref<1x256xf32, #tpu.memory_space<vmem>>, vector<1x256xf32>
    %c0_4 = arith.constant 0 : index
    %c0_5 = arith.constant 0 : index
    %3 = vector.load %arg3[%c0_4, %c0_5] : memref<1x256xf32, #tpu.memory_space<vmem>>, vector<1x256xf32>
    %cst = arith.constant dense<0.000000e+00> : vector<128xf32>
    %4 = vector.multi_reduction <add>, %1, %cst [1] : vector<128x256xf32> to vector<128xf32>
    %5 = vector.shape_cast %4 : vector<128xf32> to vector<128x1xf32>
    %cst_6 = arith.constant 2.560000e+02 : f32
    %6 = vector.broadcast %cst_6 : f32 to vector<128x1xf32>
    %7 = arith.divf %5, %6 : vector<128x1xf32>
    %8 = vector.broadcast %7 : vector<128x1xf32> to vector<128x256xf32>
    %9 = arith.subf %1, %8 : vector<128x256xf32>
    %10 = arith.mulf %9, %9 : vector<128x256xf32>
    %cst_7 = arith.constant dense<0.000000e+00> : vector<128xf32>
    %11 = vector.multi_reduction <add>, %10, %cst_7 [1] : vector<128x256xf32> to vector<128xf32>
    %12 = vector.shape_cast %11 : vector<128xf32> to vector<128x1xf32>
    %cst_8 = arith.constant 2.560000e+02 : f32
    %13 = vector.broadcast %cst_8 : f32 to vector<128x1xf32>
    %14 = arith.divf %12, %13 : vector<128x1xf32>
    %15 = vector.broadcast %7 : vector<128x1xf32> to vector<128x256xf32>
    %16 = arith.subf %1, %15 : vector<128x256xf32>
    %cst_9 = arith.constant 9.99999997E-7 : f32
    %17 = vector.broadcast %cst_9 : f32 to vector<128x1xf32>
    %18 = arith.addf %14, %17 : vector<128x1xf32>
    %19 = math.rsqrt %18 : vector<128x1xf32>
    %20 = vector.broadcast %19 : vector<128x1xf32> to vector<128x256xf32>
    %21 = arith.mulf %16, %20 : vector<128x256xf32>
    %22 = vector.broadcast %2 : vector<1x256xf32> to vector<128x256xf32>
    %23 = arith.mulf %21, %22 : vector<128x256xf32>
    %24 = vector.broadcast %3 : vector<1x256xf32> to vector<128x256xf32>
    %25 = arith.addf %23, %24 : vector<128x256xf32>
    %26 = arith.truncf %25 : vector<128x256xf32> to vector<128x256xbf16>
    %c0_10 = arith.constant 0 : index
    %c0_11 = arith.constant 0 : index
    %27 = vector.load %arg4[%c0_10, %c0_11] : memref<256x768xbf16, #tpu.memory_space<vmem>>, vector<256x768xbf16>
    %cst_12 = arith.constant dense<0.000000e+00> : vector<128x768xf32>
    %28 = tpu.matmul %26, %27, %cst_12 {dimension_numbers = #tpu.dot_dimension_numbers<[1], [0], [0], [1], [0, 0, 1, 1], [], []>} : vector<128x256xbf16>, vector<256x768xbf16>, vector<128x768xf32> -> vector<128x768xf32>
    %29 = vector.extract_strided_slice %28 {offsets = [0, 0], sizes = [128, 256], strides = [1, 1]} : vector<128x768xf32> to vector<128x256xf32>
    %30 = vector.extract_strided_slice %29 {offsets = [0, 0], sizes = [128, 128], strides = [1, 1]} : vector<128x256xf32> to vector<128x128xf32>
    %31 = vector.extract_strided_slice %29 {offsets = [0, 128], sizes = [128, 128], strides = [1, 1]} : vector<128x256xf32> to vector<128x128xf32>
    %32 = vector.shape_cast %30 : vector<128x128xf32> to vector<1x128x128xf32>
    %33 = vector.shape_cast %31 : vector<128x128xf32> to vector<1x128x128xf32>
    %34 = tpu.concatenate %32, %33 in 0 : vector<1x128x128xf32>, vector<1x128x128xf32> -> vector<2x128x128xf32>
    %35 = arith.truncf %34 : vector<2x128x128xf32> to vector<2x128x128xbf16>
    %36 = vector.extract_strided_slice %28 {offsets = [0, 256], sizes = [128, 256], strides = [1, 1]} : vector<128x768xf32> to vector<128x256xf32>
    %37 = vector.extract_strided_slice %36 {offsets = [0, 0], sizes = [128, 128], strides = [1, 1]} : vector<128x256xf32> to vector<128x128xf32>
    %38 = vector.extract_strided_slice %36 {offsets = [0, 128], sizes = [128, 128], strides = [1, 1]} : vector<128x256xf32> to vector<128x128xf32>
    %39 = vector.shape_cast %37 : vector<128x128xf32> to vector<1x128x128xf32>
    %40 = vector.shape_cast %38 : vector<128x128xf32> to vector<1x128x128xf32>
    %41 = tpu.concatenate %39, %40 in 0 : vector<1x128x128xf32>, vector<1x128x128xf32> -> vector<2x128x128xf32>
    %42 = arith.truncf %41 : vector<2x128x128xf32> to vector<2x128x128xbf16>
    %43 = vector.extract_strided_slice %28 {offsets = [0, 512], sizes = [128, 256], strides = [1, 1]} : vector<128x768xf32> to vector<128x256xf32>
    %44 = vector.extract_strided_slice %43 {offsets = [0, 0], sizes = [128, 128], strides = [1, 1]} : vector<128x256xf32> to vector<128x128xf32>
    %45 = vector.extract_strided_slice %43 {offsets = [0, 128], sizes = [128, 128], strides = [1, 1]} : vector<128x256xf32> to vector<128x128xf32>
    %46 = vector.shape_cast %44 : vector<128x128xf32> to vector<1x128x128xf32>
    %47 = vector.shape_cast %45 : vector<128x128xf32> to vector<1x128x128xf32>
    %48 = tpu.concatenate %46, %47 in 0 : vector<1x128x128xf32>, vector<1x128x128xf32> -> vector<2x128x128xf32>
    %49 = arith.truncf %48 : vector<2x128x128xf32> to vector<2x128x128xbf16>
    "tpu.trace_start"() <{level = 10 : i32, message = "hqc,hkc->hqk"}> : () -> ()
    %cst_13 = arith.constant dense<0.000000e+00> : vector<2x128x128xf32>
    %50 = tpu.matmul %35, %42, %cst_13 {dimension_numbers = #tpu.dot_dimension_numbers<[2], [2], [1], [1], [0, 0, 0, 1, 1, 1], [0], [0]>} : vector<2x128x128xbf16>, vector<2x128x128xbf16>, vector<2x128x128xf32> -> vector<2x128x128xf32>
    "tpu.trace_stop"() : () -> ()
    %cst_14 = arith.constant dense<0xFF800000> : vector<2x128xf32>
    %51 = vector.multi_reduction <maximumf>, %50, %cst_14 [2] : vector<2x128x128xf32> to vector<2x128xf32>
    %52 = vector.shape_cast %51 : vector<2x128xf32> to vector<2x128x1xf32>
    %53 = vector.broadcast %52 : vector<2x128x1xf32> to vector<2x128x128xf32>
    %54 = arith.subf %50, %53 : vector<2x128x128xf32>
    %55 = math.exp %54 : vector<2x128x128xf32>
    %cst_15 = arith.constant dense<0.000000e+00> : vector<2x128xf32>
    %56 = vector.multi_reduction <add>, %55, %cst_15 [2] : vector<2x128x128xf32> to vector<2x128xf32>
    %57 = vector.shape_cast %56 : vector<2x128xf32> to vector<2x128x1xf32>
    %58 = tpu.reciprocal %57 {approx = true} : vector<2x128x1xf32> -> vector<2x128x1xf32>
    %59 = vector.broadcast %58 : vector<2x128x1xf32> to vector<2x128x128xf32>
    %60 = arith.mulf %55, %59 : vector<2x128x128xf32>
    %61 = arith.truncf %60 : vector<2x128x128xf32> to vector<2x128x128xbf16>
    "tpu.trace_start"() <{level = 10 : i32, message = "hqk,hkc->hqc"}> : () -> ()
    %cst_16 = arith.constant dense<0.000000e+00> : vector<2x128x128xf32>
    %62 = tpu.matmul %61, %49, %cst_16 {dimension_numbers = #tpu.dot_dimension_numbers<[2], [1], [1], [2], [0, 0, 0, 1, 1, 2], [0], [0]>} : vector<2x128x128xbf16>, vector<2x128x128xbf16>, vector<2x128x128xf32> -> vector<2x128x128xf32>
    "tpu.trace_stop"() : () -> ()
    %63 = vector.extract_strided_slice %62 {offsets = [0, 0, 0], sizes = [1, 128, 128], strides = [1, 1, 1]} : vector<2x128x128xf32> to vector<1x128x128xf32>
    %64 = vector.shape_cast %63 : vector<1x128x128xf32> to vector<128x128xf32>
    %65 = vector.extract_strided_slice %62 {offsets = [1, 0, 0], sizes = [1, 128, 128], strides = [1, 1, 1]} : vector<2x128x128xf32> to vector<1x128x128xf32>
    %66 = vector.shape_cast %65 : vector<1x128x128xf32> to vector<128x128xf32>
    %67 = tpu.concatenate %64, %66 in 1 : vector<128x128xf32>, vector<128x128xf32> -> vector<128x256xf32>
    %68 = arith.truncf %67 : vector<128x256xf32> to vector<128x256xbf16>
    %c0_17 = arith.constant 0 : index
    %c0_18 = arith.constant 0 : index
    %69 = vector.load %arg5[%c0_17, %c0_18] : memref<256x256xbf16, #tpu.memory_space<vmem>>, vector<256x256xbf16>
    %cst_19 = arith.constant dense<0.000000e+00> : vector<128x256xf32>
    %70 = tpu.matmul %68, %69, %cst_19 {dimension_numbers = #tpu.dot_dimension_numbers<[1], [0], [0], [1], [0, 0, 1, 1], [], []>} : vector<128x256xbf16>, vector<256x256xbf16>, vector<128x256xf32> -> vector<128x256xf32>
    %c0_20 = arith.constant 0 : index
    %c0_21 = arith.constant 0 : index
    %71 = vector.load %arg6[%c0_20, %c0_21] : memref<1x256xf32, #tpu.memory_space<vmem>>, vector<1x256xf32>
    %72 = vector.broadcast %71 : vector<1x256xf32> to vector<128x256xf32>
    %73 = arith.addf %70, %72 : vector<128x256xf32>
    %74 = arith.addf %73, %1 : vector<128x256xf32>
    %c0_22 = arith.constant 0 : index
    %c0_23 = arith.constant 0 : index
    %75 = vector.load %arg7[%c0_22, %c0_23] : memref<1x256xf32, #tpu.memory_space<vmem>>, vector<1x256xf32>
    %c0_24 = arith.constant 0 : index
    %c0_25 = arith.constant 0 : index
    %76 = vector.load %arg8[%c0_24, %c0_25] : memref<1x256xf32, #tpu.memory_space<vmem>>, vector<1x256xf32>
    %cst_26 = arith.constant dense<0.000000e+00> : vector<128xf32>
    %77 = vector.multi_reduction <add>, %74, %cst_26 [1] : vector<128x256xf32> to vector<128xf32>
    %78 = vector.shape_cast %77 : vector<128xf32> to vector<128x1xf32>
    %cst_27 = arith.constant 2.560000e+02 : f32
    %79 = vector.broadcast %cst_27 : f32 to vector<128x1xf32>
    %80 = arith.divf %78, %79 : vector<128x1xf32>
    %81 = vector.broadcast %80 : vector<128x1xf32> to vector<128x256xf32>
    %82 = arith.subf %74, %81 : vector<128x256xf32>
    %83 = arith.mulf %82, %82 : vector<128x256xf32>
    %cst_28 = arith.constant dense<0.000000e+00> : vector<128xf32>
    %84 = vector.multi_reduction <add>, %83, %cst_28 [1] : vector<128x256xf32> to vector<128xf32>
    %85 = vector.shape_cast %84 : vector<128xf32> to vector<128x1xf32>
    %cst_29 = arith.constant 2.560000e+02 : f32
    %86 = vector.broadcast %cst_29 : f32 to vector<128x1xf32>
    %87 = arith.divf %85, %86 : vector<128x1xf32>
    %88 = vector.broadcast %80 : vector<128x1xf32> to vector<128x256xf32>
    %89 = arith.subf %74, %88 : vector<128x256xf32>
    %cst_30 = arith.constant 9.99999997E-7 : f32
    %90 = vector.broadcast %cst_30 : f32 to vector<128x1xf32>
    %91 = arith.addf %87, %90 : vector<128x1xf32>
    %92 = math.rsqrt %91 : vector<128x1xf32>
    %93 = vector.broadcast %92 : vector<128x1xf32> to vector<128x256xf32>
    %94 = arith.mulf %89, %93 : vector<128x256xf32>
    %95 = vector.broadcast %75 : vector<1x256xf32> to vector<128x256xf32>
    %96 = arith.mulf %94, %95 : vector<128x256xf32>
    %97 = vector.broadcast %76 : vector<1x256xf32> to vector<128x256xf32>
    %98 = arith.addf %96, %97 : vector<128x256xf32>
    %99 = arith.truncf %98 : vector<128x256xf32> to vector<128x256xbf16>
    %c0_31 = arith.constant 0 : index
    %c0_32 = arith.constant 0 : index
    %100 = vector.load %arg9[%c0_31, %c0_32] : memref<256x512xbf16, #tpu.memory_space<vmem>>, vector<256x512xbf16>
    %cst_33 = arith.constant dense<0.000000e+00> : vector<128x512xf32>
    %101 = tpu.matmul %99, %100, %cst_33 {dimension_numbers = #tpu.dot_dimension_numbers<[1], [0], [0], [1], [0, 0, 1, 1], [], []>} : vector<128x256xbf16>, vector<256x512xbf16>, vector<128x512xf32> -> vector<128x512xf32>
    %c0_34 = arith.constant 0 : index
    %c0_35 = arith.constant 0 : index
    %102 = vector.load %arg10[%c0_34, %c0_35] : memref<1x512xf32, #tpu.memory_space<vmem>>, vector<1x512xf32>
    %103 = vector.broadcast %102 : vector<1x512xf32> to vector<128x512xf32>
    %104 = arith.addf %101, %103 : vector<128x512xf32>
    %cst_36 = arith.constant 5.000000e-01 : f32
    %105 = vector.broadcast %cst_36 : f32 to vector<128x512xf32>
    %106 = arith.mulf %105, %104 : vector<128x512xf32>
    %cst_37 = arith.constant 2.000000e+00 : f32
    %107 = math.sqrt %cst_37 : f32
    %108 = vector.broadcast %107 : f32 to vector<128x512xf32>
    %109 = arith.divf %104, %108 : vector<128x512xf32>
    %110 = math.erf %109 : vector<128x512xf32>
    %cst_38 = arith.constant 1.000000e+00 : f32
    %111 = vector.broadcast %cst_38 : f32 to vector<128x512xf32>
    %112 = arith.addf %111, %110 : vector<128x512xf32>
    %113 = arith.mulf %106, %112 : vector<128x512xf32>
    %114 = arith.truncf %113 : vector<128x512xf32> to vector<128x512xbf16>
    %c0_39 = arith.constant 0 : index
    %c0_40 = arith.constant 0 : index
    %115 = vector.load %arg11[%c0_39, %c0_40] : memref<512x256xbf16, #tpu.memory_space<vmem>>, vector<512x256xbf16>
    %cst_41 = arith.constant dense<0.000000e+00> : vector<128x256xf32>
    %116 = tpu.matmul %114, %115, %cst_41 {dimension_numbers = #tpu.dot_dimension_numbers<[1], [0], [0], [1], [0, 0, 1, 1], [], []>} : vector<128x512xbf16>, vector<512x256xbf16>, vector<128x256xf32> -> vector<128x256xf32>
    %c0_42 = arith.constant 0 : index
    %c0_43 = arith.constant 0 : index
    %117 = vector.load %arg12[%c0_42, %c0_43] : memref<1x256xf32, #tpu.memory_space<vmem>>, vector<1x256xf32>
    %118 = vector.broadcast %117 : vector<1x256xf32> to vector<128x256xf32>
    %119 = arith.addf %116, %118 : vector<128x256xf32>
    %120 = arith.addf %119, %74 : vector<128x256xf32>
    %c0_44 = arith.constant 0 : index
    %c0_45 = arith.constant 0 : index
    %c0_46 = arith.constant 0 : index
    %121 = vector.load %arg13[%c0_44, %c0_45, %c0_46] : memref<1x128x256xf32, #tpu.memory_space<vmem>>, vector<1x128x256xf32>
    %122 = vector.shape_cast %121 : vector<1x128x256xf32> to vector<128x256xf32>
    %123 = vector.shape_cast %120 : vector<128x256xf32> to vector<1x128x256xf32>
    tpu.vector_store %arg13[%c0_44, %c0_45, %c0_46], %123 {strides = array<i32>} : memref<1x128x256xf32, #tpu.memory_space<vmem>>, vector<1x128x256xf32>,
    return
  }
  func.func @transform_0(%arg0: i32) -> (i32, i32, i32) {
    %c0_i32 = arith.constant 0 : i32
    %c0_i32_0 = arith.constant 0 : i32
    %c0_i32_1 = arith.constant 0 : i32
    return %arg0, %c0_i32, %c0_i32_0 : i32, i32, i32
  }
  func.func @transform_1(%arg0: i32) -> (i32, i32) {
    %c0_i32 = arith.constant 0 : i32
    %c0_i32_0 = arith.constant 0 : i32
    %c0_i32_1 = arith.constant 0 : i32
    return %c0_i32, %c0_i32_0 : i32, i32
  }
  func.func @transform_2(%arg0: i32) -> (i32, i32) {
    %c0_i32 = arith.constant 0 : i32
    %c0_i32_0 = arith.constant 0 : i32
    %c0_i32_1 = arith.constant 0 : i32
    return %c0_i32, %c0_i32_0 : i32, i32
  }
  func.func @transform_3(%arg0: i32) -> (i32, i32) {
    %c0_i32 = arith.constant 0 : i32
    %c0_i32_0 = arith.constant 0 : i32
    %c0_i32_1 = arith.constant 0 : i32
    return %c0_i32, %c0_i32_0 : i32, i32
  }
  func.func @transform_4(%arg0: i32) -> (i32, i32) {
    %c0_i32 = arith.constant 0 : i32
    %c0_i32_0 = arith.constant 0 : i32
    %c0_i32_1 = arith.constant 0 : i32
    return %c0_i32, %c0_i32_0 : i32, i32
  }
  func.func @transform_5(%arg0: i32) -> (i32, i32) {
    %c0_i32 = arith.constant 0 : i32
    %c0_i32_0 = arith.constant 0 : i32
    %c0_i32_1 = arith.constant 0 : i32
    return %c0_i32, %c0_i32_0 : i32, i32
  }
  func.func @transform_6(%arg0: i32) -> (i32, i32) {
    %c0_i32 = arith.constant 0 : i32
    %c0_i32_0 = arith.constant 0 : i32
    %c0_i32_1 = arith.constant 0 : i32
    return %c0_i32, %c0_i32_0 : i32, i32
  }
  func.func @transform_7(%arg0: i32) -> (i32, i32) {
    %c0_i32 = arith.constant 0 : i32
    %c0_i32_0 = arith.constant 0 : i32
    %c0_i32_1 = arith.constant 0 : i32
    return %c0_i32, %c0_i32_0 : i32, i32
  }
  func.func @transform_8(%arg0: i32) -> (i32, i32) {
    %c0_i32 = arith.constant 0 : i32
    %c0_i32_0 = arith.constant 0 : i32
    %c0_i32_1 = arith.constant 0 : i32
    return %c0_i32, %c0_i32_0 : i32, i32
  }
  func.func @transform_9(%arg0: i32) -> (i32, i32) {
    %c0_i32 = arith.constant 0 : i32
    %c0_i32_0 = arith.constant 0 : i32
    %c0_i32_1 = arith.constant 0 : i32
    return %c0_i32, %c0_i32_0 : i32, i32
  }
  func.func @transform_10(%arg0: i32) -> (i32, i32) {
    %c0_i32 = arith.constant 0 : i32
    %c0_i32_0 = arith.constant 0 : i32
    %c0_i32_1 = arith.constant 0 : i32
    return %c0_i32, %c0_i32_0 : i32, i32
  }
  func.func @transform_11(%arg0: i32) -> (i32, i32) {
    %c0_i32 = arith.constant 0 : i32
    %c0_i32_0 = arith.constant 0 : i32
    %c0_i32_1 = arith.constant 0 : i32
    return %c0_i32, %c0_i32_0 : i32, i32
  }
  func.func @transform_12(%arg0: i32) -> (i32, i32, i32) {
    %c0_i32 = arith.constant 0 : i32
    %c0_i32_0 = arith.constant 0 : i32
    %c0_i32_1 = arith.constant 0 : i32
    return %arg0, %c0_i32, %c0_i32_0 : i32, i32, i32
  }
}

</mosaic_0001>

<bundles_post_ra>
// kernel: tpu_custom_call.1
= control target key start
LH: loop header
LB: loop body
LE: loop exit
PB: predicated region body
PF: predicated region fallthrough
CT: control target
= control target key end

     0   :  { %s17288_s0 = inlined_call_operand.hbm [shape: f32[2,128,256], index: 0, kind: input, shape index: {}]   ;;  %s17289_s1 = inlined_call_operand.hbm [shape: f32[1,256], index: 1, kind: input, shape index: {}]   ;;  %s17290_s2 = inlined_call_operand.hbm [shape: f32[1,256], index: 2, kind: input, shape index: {}]   ;;  %s17291_s3 = inlined_call_operand.hbm [shape: bf16[256,768], index: 3, kind: input, shape index: {}]   ;;  %s17292_s4 = inlined_call_operand.hbm [shape: bf16[256,256], index: 4, kind: input, shape index: {}]   ;;  %s17293_s5 = inlined_call_operand.vmem [shape: f32[1,256], index: 5, kind: input, shape index: {}]   ;;  %s17294_s6 = inlined_call_operand.hbm [shape: f32[1,256], index: 6, kind: input, shape index: {}]   ;;  %s17295_s7 = inlined_call_operand.hbm [shape: f32[1,256], index: 7, kind: input, shape index: {}]   ;;  %s17296_s8 = inlined_call_operand.hbm [shape: bf16[256,512], index: 8, kind: input, shape index: {}]   ;;  %s17297_s9 = inlined_call_operand.vmem [shape: f32[1,512], index: 9, kind: input, shape index: {}]   ;;  %s17298_s10 = inlined_call_operand.hbm [shape: bf16[512,256], index: 10, kind: input, shape index: {}]   ;;  %s17299_s11 = inlined_call_operand.vmem [shape: f32[1,256], index: 11, kind: input, shape index: {}]   ;;  %s17300_s12 = inlined_call_operand.hbm [shape: f32[2,128,256], index: 12, kind: output, shape index: {}]  }
   0x1   :  { %17421 = sst [smem:[#allocation82_spill]] %s17289_s1 }
   0x2   :  { %17422 = sst [smem:[#allocation83_spill]] %s17290_s2 }
   0x3   :  { %17423 = sst [smem:[#allocation84_spill]] %s17291_s3 }
   0x4   :  { %17424 = sst [smem:[#allocation85_spill]] %s17292_s4 }
   0x5   :  { %17425 = sst [smem:[#allocation86_spill]] %s17294_s6 }
   0x6   :  { %17426 = sst [smem:[#allocation87_spill]] %s17295_s7 }
   0x7   :  { %17427 = sst [smem:[#allocation88_spill]] %s17300_s12 }
   0x8   :  { %17 = vsyncpa [#allocation3], 0 }
   0x9   :  { %19 = vsyncpa [#allocation3 + $0x1], 0 }
   0xa   :  { %20 = vsyncpa [#allocation6], 0 }
   0xb   :  { %21 = vsyncpa [#allocation9], 0 }
   0xc   :  { %22 = vsyncpa [#allocation12], 0 }
   0xd   :  { %23 = vsyncpa [#allocation15], 0 }
   0xe   :  { %24 = vsyncpa [#allocation4], 0 }
   0xf   :  { %26 = vsyncpa [#allocation4 + $0x1], 0  ;;  %s11142_s21 = smov 0   ;;  %s11144_s22 = smov 0  }
  0x10   :  { %s11146_s23 = smov 0   ;;  %s11148_s24 = smov 0  }
  0x11 LB: > { %s17428_s1 = sld [smem:[#allocation82_spill]]  ;;  %s11166_s28 = sadd.s32 4294967295, %s11057_s24   ;;  %s11057_s24 = sphi %s11148_s24, %s18003_s24   ;;  %s11053_s23 = sphi %s11146_s23, %s18002_s23   ;;  %s11049_s22 = sphi %s11144_s22, %s18001_s22   ;;  %s11045_s21 = sphi %s11142_s21, %s18000_s21  }
  0x12   : > { %p8836_p0 = scmp.ge.s32.totalorder %s11057_s24, 1  ;;  %p53_p1 = scmp.eq.s32.totalorder %s11166_s28, 0 }
  0x13   : > { %p320_p2 = scmp.lt.s32.totalorder %s11057_s24, 3  ;;  %s11059_s30 = smov [#allocation5]  }
  0x14   : > { %s334_s13 = sshll.u32 %s11059_s30, 4  ;;  %s17430_s3 = sld [smem:[#allocation84_spill]]  ;;  %s335_s13 = int_to_ptr.vmem [resolvable:$true] %s334_s13 }
  0x15   : > { %p11171_p3 = pnand %p8836_p0, %p320_p2  ;;  %s11060_s18 = smov [#allocation8]  }
  0x16   : > { %s357_s19 = sshll.u32 %s11060_s18, 4  ;;  %s11061_s20 = smov 384   ;;  %s358_s19 = int_to_ptr.vmem [resolvable:$true] %s357_s19 }
  0x17   : > { %s332_s27 = sshll.u32 %s17428_s1, 4  ;;  %p10247_p5 = pneg %p11171_p3  ;;  %s333_s27 = int_to_ptr.hbm [resolvable:$true] %s332_s27 }
  0x18   : > { %s11062_s25 = smov 24   ;;  %s17432_s6 = sld [smem:[#allocation86_spill]] }
  0x19   : > { %p11183_p6 = pnand %p10247_p5, %p53_p1  ;;  %s11063_s15 = smov [#allocation11]  }
  0x1a   : > { %s355_s16 = sshll.u32 %s17430_s3, 4  ;;  %s389_s1 = sshll.u32 %s11063_s15, 4  ;;  %s356_s16 = int_to_ptr.hbm [resolvable:$true] %s355_s16  ;;  %s390_s1 = int_to_ptr.vmem [resolvable:$true] %s389_s1 }
  0x1b   : > { %10250 = dma.hbm_to_vmem [thread:$0]  (!%p11183_p6), %s333_s27, 32, %s335_s13, [#allocation6]  }
  0x1c   : > { %10256 = dma.hbm_to_vmem [thread:$0]  (!%p11183_p6), %s356_s16, 12288, %s358_s19, [#allocation9], %s11061_s20, %s11061_s20, %s11062_s25  }
  0x1d   : > { %s410_s18 = sshll.u32 %s17296_s8, 4  ;;  %s11064_s27 = smov [#allocation14]   ;;  %s411_s18 = int_to_ptr.hbm [resolvable:$true] %s410_s18 }
  0x1e   : > { %s387_s14 = sshll.u32 %s17432_s6, 4  ;;  %s412_s13 = sshll.u32 %s11064_s27, 4  ;;  %s388_s14 = int_to_ptr.hbm [resolvable:$true] %s387_s14  ;;  %s413_s13 = int_to_ptr.vmem [resolvable:$true] %s412_s13 }
  0x1f   : > { %10262 = dma.hbm_to_vmem [thread:$0]  (!%p11183_p6), %s388_s14, 32, %s390_s1, [#allocation12]  }
  0x20   : > { %s17302_s16 = smov 256   ;;  %s17303_s19 = smov 16  }
  0x21   : > { %10268 = dma.hbm_to_vmem [thread:$0]  (!%p11183_p6), %s411_s18, 8192, %s413_s13, [#allocation15], %s17302_s16, %s17302_s16, %s17303_s19  }
  0x22   : > { %s17433_s2 = sld [smem:[#allocation83_spill]]  ;;  %s11067_s12 = smov [#allocation7]  }
  0x23   : > { %s346_s26 = sshll.u32 %s11067_s12, 4  ;;  %s17434_s4 = sld [smem:[#allocation85_spill]]  ;;  %s347_s26 = int_to_ptr.vmem [resolvable:$true] %s346_s26 }
  0x24   : > { %s11068_s15 = smov [#allocation10]   ;;  %s11069_s18 = smov 128  }
  0x25   : > { %s371_s27 = sshll.u32 %s11068_s15, 4  ;;  %s11070_s13 = smov 8   ;;  %s372_s27 = int_to_ptr.vmem [resolvable:$true] %s371_s27 }
  0x26   : > { %s17435_s7 = sld [smem:[#allocation87_spill]]  ;;  %s427_s15 = sshll.u32 %s17298_s10, 4  ;;  %s428_s15 = int_to_ptr.hbm [resolvable:$true] %s427_s15 }
  0x27   : > { %s8835_s20 = sadd.s32 4294967294, %s11057_s24   ;;  %s11226_s25 = sadd.s32 1, %s11057_s24  }
  0x28   : > { %s344_s3 = sshll.u32 %s17433_s2, 4  ;;  %s39_s1 = sadd.s32 1, %s11053_s23  ;;  %s345_s3 = int_to_ptr.hbm [resolvable:$true] %s344_s3 }
  0x29   : > { %s369_s14 = sshll.u32 %s17434_s4, 4  ;;  %p46_p8 = scmp.ne.s32.totalorder %s11053_s23, %s11049_s22  ;;  %s370_s14 = int_to_ptr.hbm [resolvable:$true] %s369_s14 }
  0x2a   : > { %10253 = dma.hbm_to_vmem [thread:$0]  (!%p11183_p6), %s345_s3, 32, %s347_s26, [#allocation6]  }
  0x2b   : > { %10259 = dma.hbm_to_vmem [thread:$0]  (!%p11183_p6), %s370_s14, 4096, %s372_s27, [#allocation9], %s11069_s18, %s11069_s18, %s11070_s13  }
  0x2c   : > { %s399_s12 = sshll.u32 %s17435_s7, 4  ;;  %s11071_s3 = smov [#allocation13]   ;;  %s400_s12 = int_to_ptr.hbm [resolvable:$true] %s399_s12 }
  0x2d   : > { %s401_s26 = sshll.u32 %s11071_s3, 4  ;;  %s11072_s14 = smov [#allocation16]   ;;  %s402_s26 = int_to_ptr.vmem [resolvable:$true] %s401_s26 }
  0x2e   : > { %10265 = dma.hbm_to_vmem [thread:$0]  (!%p11183_p6), %s400_s12, 32, %s402_s26, [#allocation12]  }
  0x2f   : > { %s429_s27 = sshll.u32 %s11072_s14, 4  ;;  %s36_s3 = ssub.s32 %s11057_s24, %s11226_s25  ;;  %s430_s27 = int_to_ptr.vmem [resolvable:$true] %s429_s27 }
  0x30   : > { %10271 = dma.hbm_to_vmem [thread:$0]  (!%p11183_p6), %s428_s15, 8192, %s430_s27, [#allocation15], %s11069_s18, %s11069_s18, %s11070_s13  }
  0x31   : > { %p37_p7 = scmp.eq.s32.totalorder %s36_s3, 0  ;;  %p47_p9 = scmp.eq.s32.totalorder %s11057_s24, 0 }
  0x32   : > { %p52_p10 = scmp.ne.s32.totalorder %s11049_s22, %s11045_s21  ;;  %p307_p13 = scmp.eq.s32.totalorder %s11166_s28, 1 }
  0x33   : > { %s11237_s12 = scalar_select %p37_p7, %s11053_s23, %s39_s1  }
  0x34   : > { %p11239_p11 = por %p47_p9, %p46_p8  ;;  %p11245_p12 = por %p53_p1, %p52_p10 }
  0x35   : > { %p313_p0 = scmp.eq.s32.totalorder %s8835_s20, 1  ;;  %p10288_p2 = scmp.lt.s32.totalorder %s11057_s24, 2 }
  0x36   : > { %s446_s18 = sand.u32 1, %s11053_s23   ;;  %p11252_p5 = por %p307_p13, %p46_p8 }
  0x37   : > { %p11256_p6 = por %p313_p0, %p52_p10  ;;  %s8846_s15 = sshll.u32 %s446_s18, 8 }
  0x38   : > { %s9953_s14 = sshll.u32 %s11057_s24, 8  ;;  %s450_s16 = scalar_lea.vmem [#allocation2], %s8846_s15 }
  0x39   : > { %s455_s1 = scalar_lea.hbm %s17288_s0, %s9953_s14  ;;  %s458_s19 = sshll.u32 %s450_s16, 4  ;;  %s459_s19 = int_to_ptr.vmem [resolvable:$true] %s458_s19 }
  0x3a   : > { %s456_s2 = sshll.u32 %s455_s1, 4  ;;  %p11266_p7 = pnand %p10288_p2, %p11239_p11  ;;  %s457_s2 = int_to_ptr.hbm [resolvable:$true] %s456_s2 }
  0x3b   : > { %s447_s4 = scalar_lea.sflag [#allocation3], %s446_s18  ;;  %s10945_s6 = sshra.s32 %s457_s2, 4  ;;  %s10946_s6 = int_to_ptr.hbm [resolvable:$true] %s10945_s6 }
  0x3c   : > { %s10947_s7 = scalar_lea.hbm %s10946_s6, 256  ;;  %p10949_p9 = pneg %p11266_p7 }
  0x3d   : > { %p10948_p8 = scmp.ne.s32.totalorder %s10946_s6, %s10947_s7  ;;  %s10952_s14 = scalar_lea.hbm %s17288_s0, 512 }
  0x3e   : > { %p10953_p11 = scmp.lt.s32.totalorder %s10946_s6, %s17288_s0  ;;  %p10954_p0 = scmp.lt.s32.totalorder %s10952_s14, %s10947_s7 }
  0x3f   : > { %p10950_p10 = pnand %p10949_p9, %p10948_p8 }
  0x40   : > { %p10955_p2 = por %p10954_p0, %p10953_p11 }
  0x41   : > { %p10951_p13 = pneg %p10950_p10 }
  0x43   : > { %p10956_p4 = pnand %p10955_p2, %p10951_p13 }
  0x45   : > { %10959 = shalt.err (!%p10956_p4)
}
  0x46   : > { %s17441_s18 = smov 16   ;;  %s17442_s3 = smov 256  }
  0x47   : > { %10275 = dma.hbm_to_vmem [thread:$0]  (!%p11266_p7), %s457_s2, 4096, %s459_s19, %s447_s4, %s17442_s3, %s17442_s3, %s17441_s18  }
  0x48   : > { %470 = sbr.rel (%p11171_p3) target bundleno = 3095 (0xc17), region = 68 }
  0x4d   : > { %s11286_s1 = sand.u32 1, %s11049_s22  }
  0x4e   : > { %s8850_s6 = sshll.u32 %s11286_s1, 8  ;;  %s473_s7 = scalar_lea.sflag [#allocation3], %s11286_s1 }
  0x4f   : > { %s11292_s15 = scalar_lea.vmem [#allocation2], %s8850_s6 }
  0x50   : > { %11020 = dma.done.wait (%p11245_p12), %s473_s7, 4096  }
  0x51   : > { %11022 = vsyncadd (%p11245_p12), %s473_s7, 4294963200 }
  0x52   : > { %11024 = dma.done.wait (%p53_p1), [#allocation6], 64  }
  0x53   : > { %11026 = vsyncadd (%p53_p1), [#allocation6], 4294967232 }
  0x54   : > { %11028 = dma.done.wait (%p53_p1), [#allocation9], 16384  }
  0x55   : > { %11030 = vsyncadd (%p53_p1), [#allocation9], 4294950912 }
  0x56   : > { %11032 = dma.done.wait (%p53_p1), [#allocation12], 64  }
  0x57   : > { %11034 = vsyncadd (%p53_p1), [#allocation12], 4294967232 }
  0x58   : > { %11036 = dma.done.wait (%p53_p1), [#allocation15], 16384  }
  0x59   : > { %11038 = vsyncadd (%p53_p1), [#allocation15], 4294950912  ;;  %v11315_v0 = vld [vmem:[%s11292_s15 + $0x20] sm:$0xff]  ;;  %v11318_v1 = vld [vmem:[%s11292_s15 + $0x28] sm:$0xff]  ;;  %v11073_v27 = vmov 256.0   ;;  %s17118_s27 = scalar_lea.vmem [#allocation17], %s8850_s6 }
  0x5a   : > { %v558_v2 = vld [vmem:[%s11292_s15] sm:$0xff]  ;;  %v598_v3 = vadd.f32 %v11318_v1, %v11315_v0  ;;  %v559_v4 = vld [vmem:[%s11292_s15 + $0x8] sm:$0xff]  ;;  %v564_v8 = vld [vmem:[%s11292_s15 + $0x30] sm:$0xff]  ;;  %10348 = vrcp.f32 %v11073_v27  ;;  %s10210_s26 = sshll.u32 %s11166_s28, 8  ;;  %s17997_s6 = sld [smem:[#allocation88_spill]] }
  0x5b   : > { %v592_v5 = vadd.f32 %v559_v4, %v558_v2  ;;  %v566_v6 = vld [vmem:[%s11292_s15 + $0x40] sm:$0xff]  ;;  %v567_v7 = vld [vmem:[%s11292_s15 + $0x48] sm:$0xff]  ;;  %v565_v9 = vld [vmem:[%s11292_s15 + $0x38] sm:$0xff]  ;;  %s8671_s28 = scalar_lea.sflag [#allocation4], %s11286_s1 }
  0x5c   : > { %599 = vadd.xlane.f32.xlu1 %v598_v3  ;;  %v604_v10 = vadd.f32 %v567_v7, %v566_v6  ;;  %v560_v11 = vld [vmem:[%s11292_s15 + $0x10] sm:$0xff]  ;;  %v561_v12 = vld [vmem:[%s11292_s15 + $0x18] sm:$0xff]  ;;  %v601_v13 = vadd.f32 %v565_v9, %v564_v8  ;;  %v11345_v20 = vld [vmem:[%s11292_s15 + $0x60] sm:$0xff] }
  0x5d   : > { %593 = vadd.xlane.f32.xlu0 %v592_v5  ;;  %v11331_v14 = vld [vmem:[%s11292_s15 + $0x50] sm:$0xff]  ;;  %v11334_v15 = vld [vmem:[%s11292_s15 + $0x58] sm:$0xff]  ;;  %v595_v16 = vadd.f32 %v561_v12, %v560_v11  ;;  %v11348_v21 = vld [vmem:[%s11292_s15 + $0x68] sm:$0xff] }
  0x5e   : > { %605 = vadd.xlane.f32.xlu2 %v604_v10  ;;  %v607_v17 = vadd.f32 %v11334_v15, %v11331_v14  ;;  %v11339_v18 = vld [vmem:[%s11292_s15 + $0x70] sm:$0xff]  ;;  %v11342_v19 = vld [vmem:[%s11292_s15 + $0x78] sm:$0xff]  ;;  %v610_v23 = vadd.f32 %v11348_v21, %v11345_v20  ;;  %v11355_v24 = vld [vmem:[%s11292_s15 + $0x80] sm:$0xff] }
  0x5f   : > { %v613_v22 = vadd.f32 %v11342_v19, %v11339_v18  ;;  %v11358_v25 = vld [vmem:[%s11292_s15 + $0x88] sm:$0xff]  ;;  %v11376_v47 = vld [vmem:[%s11292_s15 + $0x90] sm:$0xff]  ;;  %v11379_v48 = vld [vmem:[%s11292_s15 + $0x98] sm:$0xff] }
  0x60   : > { %v616_v26 = vadd.f32 %v11358_v25, %v11355_v24  ;;  %v10349_v28 = vpop.eup %10348  ;;  %v619_v55 = vadd.f32 %v11379_v48, %v11376_v47  ;;  %v11446_v27 = vld [vmem:[%s11292_s15 + $0xb0] sm:$0xff]  ;;  %s8682_s7 = scalar_lea.hbm %s17997_s6, %s10210_s26  ;;  %s10995_s20 = scalar_lea.hbm %s17997_s6, 512 }
  0x61   : > { %v641_v29 = vmul.f32 256.0, %v10349_v28  ;;  %vm645_vm0 = vweird.f32 %v10349_v28  ;;  %s8685_s2 = sshll.u32 %s8682_s7, 4  ;;  %s8686_s2 = int_to_ptr.hbm [resolvable:$true] %s8685_s2 }
  0x62   : > { %s10989_s4 = sshra.s32 %s8686_s2, 4  ;;  %s10990_s4 = int_to_ptr.hbm [resolvable:$true] %s10989_s4 }
  0x63   : > { %v642_v30 = vsub.f32 1.0, %v641_v29  ;;  %s10991_s29 = scalar_lea.hbm %s10990_s4, 256  ;;  %p10996_p12 = scmp.lt.s32.totalorder %s10990_s4, %s17997_s6 }
  0x64   : > { %602 = vadd.xlane.f32.xlu1 %v601_v13  ;;  %p10992_p1 = scmp.ne.s32.totalorder %s10990_s4, %s10991_s29  ;;  %p10997_p7 = scmp.lt.s32.totalorder %s10995_s20, %s10991_s29 }
  0x65   : > { %596 = vadd.xlane.f32.xlu0 %v595_v16  ;;  %v643_v31 = vmul.f32 %v10349_v28, %v642_v30 }
  0x66   : > { %608 = vadd.xlane.f32.xlu2 %v607_v17  ;;  %p10993_p3 = pnand %p10992_p1, %p11252_p5  ;;  %p10998_p8 = por %p10997_p7, %p10996_p12 }
  0x67   : > { %v644_v32 = vadd.f32 %v10349_v28, %v643_v31 }
  0x68   : > { %p10994_p4 = pneg %p10993_p3 }
  0x69   : > { %v11362_v33 = vsel %vm645_vm0, %v10349_v28, %v644_v32  ;;  %v11449_v28 = vld [vmem:[%s11292_s15 + $0xb8] sm:$0xff] }
  0x6a   : > { %17443 = vst [vmem:[#allocation24_spill] sm:$0xff] %v11362_v33  ;;  %p10999_p9 = pnand %p10998_p8, %p10994_p4 }
  0x6c   : > { %614 = vadd.xlane.f32.xlu1 %v613_v22 }
  0x6d   : > { %611 = vadd.xlane.f32.xlu0 %v610_v23  ;;  %v11436_v23 = vld [vmem:[%s11292_s15 + $0xd0] sm:$0xff] }
  0x74   : > { %617 = vadd.xlane.f32.xlu1 %v616_v26  ;;  %v11439_v26 = vld [vmem:[%s11292_s15 + $0xd8] sm:$0xff] }
  0x75   : > { %v631_v29 = vadd.f32 %v11439_v26, %v11436_v23 }
  0xcf   : > { %v600_v34 = vpop.xlane.xlu1 %599 }
  0xd0   : > { %v594_v35 = vpop.xlane.xlu0 %593  ;;  %v649_v49 = vmul.f32 %v11362_v33, %v600_v34 }
  0xd1   : > { %v647_v36 = vmul.f32 %v11362_v33, %v594_v35  ;;  %v606_v39 = vpop.xlane.xlu2 %605  ;;  %v625_v35 = vadd.f32 %v11449_v28, %v11446_v27 }
  0xd2   : > { %v651_v46 = vmul.f32 %v11362_v33, %v606_v39  ;;  %v11402_v60 = vsub.f32 %v11315_v0, %v649_v49  ;;  %v11405_v61 = vsub.f32 %v11318_v1, %v649_v49  ;;  %v11463_v39 = vld [vmem:[%s11292_s15 + $0xe0] sm:$0xff] }
  0xd3   : > { %v11365_v37 = vsub.f32 %v558_v2, %v647_v36  ;;  %v11367_v38 = vsub.f32 %v559_v4, %v647_v36 }
  0xd4   : > { %v11393_v56 = vsub.f32 %v566_v6, %v651_v46  ;;  %v11395_v57 = vsub.f32 %v567_v7, %v651_v46  ;;  %v699_v6 = vmul.f32 %v11402_v60, %v11402_v60  ;;  %v700_v7 = vmul.f32 %v11405_v61, %v11405_v61 }
  0xd5   : > { %v695_v40 = vmul.f32 %v11365_v37, %v11365_v37  ;;  %v696_v41 = vmul.f32 %v11367_v38, %v11367_v38 }
  0xd6   : > { %v703_v5 = vmul.f32 %v11393_v56, %v11393_v56  ;;  %v704_v0 = vmul.f32 %v11395_v57, %v11395_v57  ;;  %v733_v16 = vadd.f32 %v700_v7, %v699_v6  ;;  %v9222_v6 = vld [vmem:[#allocation8 + $0x2d0] sm:$0xf] }
  0xd7   : > { %v603_v42 = vpop.xlane.xlu1 %602  ;;  %v727_v43 = vadd.f32 %v696_v41, %v695_v40  ;;  %v11466_v40 = vld [vmem:[%s11292_s15 + $0xe8] sm:$0xff]  ;;  %v11473_v41 = vld [vmem:[%s11292_s15 + $0xc0] sm:$0xff] }
  0xd8   : > { %v650_v44 = vmul.f32 %v11362_v33, %v603_v42  ;;  %v597_v45 = vpop.xlane.xlu0 %596  ;;  %v739_v10 = vadd.f32 %v704_v0, %v703_v5  ;;  %v11476_v42 = vld [vmem:[%s11292_s15 + $0xc8] sm:$0xff] }
  0xd9   : > { %v648_v50 = vmul.f32 %v11362_v33, %v597_v45  ;;  %728 = vadd.xlane.f32.xlu2 %v727_v43  ;;  %v609_v3 = vpop.xlane.xlu2 %608  ;;  %v634_v43 = vadd.f32 %v11466_v40, %v11463_v39  ;;  %v628_v46 = vadd.f32 %v11476_v42, %v11473_v41 }
  0xda   : > { %v11383_v51 = vsub.f32 %v564_v8, %v650_v44  ;;  %v11385_v52 = vsub.f32 %v565_v9, %v650_v44  ;;  %v652_v1 = vmul.f32 %v11362_v33, %v609_v3  ;;  %v11421_v8 = vld [vmem:[%s11292_s15 + $0xa0] sm:$0xff]  ;;  %v11424_v9 = vld [vmem:[%s11292_s15 + $0xa8] sm:$0xff] }
  0xdb   : > { %v11387_v53 = vsub.f32 %v560_v11, %v648_v50  ;;  %v11389_v54 = vsub.f32 %v561_v12, %v648_v50  ;;  %v622_v13 = vadd.f32 %v11424_v9, %v11421_v8 }
  0xdc   : > { %v701_v58 = vmul.f32 %v11383_v51, %v11383_v51  ;;  %v702_v59 = vmul.f32 %v11385_v52, %v11385_v52  ;;  %v11427_v11 = vsub.f32 %v11331_v14, %v652_v1  ;;  %v11430_v12 = vsub.f32 %v11334_v15, %v652_v1  ;;  %v9030_v1 = vld [vmem:[#allocation8 + $0x150] sm:$0xf] }
  0xdd   : > { %v697_v62 = vmul.f32 %v11387_v53, %v11387_v53  ;;  %v698_v63 = vmul.f32 %v11389_v54, %v11389_v54 }
  0xde   : > { %v736_v2 = vadd.f32 %v702_v59, %v701_v58  ;;  %v705_v14 = vmul.f32 %v11427_v11, %v11427_v11  ;;  %v706_v15 = vmul.f32 %v11430_v12, %v11430_v12  ;;  %v11494_v59 = vld [vmem:[%s11292_s15 + $0xf0] sm:$0xff] }
  0xdf   : > { %v730_v4 = vadd.f32 %v698_v63, %v697_v62  ;;  %v615_v30 = vpop.xlane.xlu1 %614 }
  0xe0   : > { %737 = vadd.xlane.f32.xlu1 %v736_v2  ;;  %v612_v17 = vpop.xlane.xlu0 %611  ;;  %v742_v34 = vadd.f32 %v706_v15, %v705_v14  ;;  %v654_v36 = vmul.f32 %v11362_v33, %v615_v30  ;;  %v9224_v14 = vld [vmem:[#allocation8 + $0x2e8] sm:$0xf0]  ;;  %v9993_v30 = vld [vmem:[#allocation8 + $0x134] sm:$0xf0] }
  0xe1   : > { %620 = vadd.xlane.f32.xlu2 %v619_v55  ;;  %731 = vadd.xlane.f32.xlu0 %v730_v4  ;;  %v653_v22 = vmul.f32 %v11362_v33, %v612_v17 }
  0xe2   : > { %v11481_v44 = vsub.f32 %v11339_v18, %v654_v36  ;;  %v11484_v45 = vsub.f32 %v11342_v19, %v654_v36  ;;  %v11497_v19 = vld [vmem:[%s11292_s15 + $0xf8] sm:$0xff] }
  0xe3   : > { %v11454_v31 = vsub.f32 %v11345_v20, %v653_v22  ;;  %v11457_v32 = vsub.f32 %v11348_v21, %v653_v22  ;;  %v637_v3 = vadd.f32 %v11497_v19, %v11494_v59  ;;  %v10044_v22 = vld [vmem:[#allocation8 + $0x2d4] sm:$0xf]  ;;  %v10041_v36 = vld [vmem:[#allocation8 + $0x2b4] sm:$0xf0] }
  0xe4   : > { %v709_v58 = vmul.f32 %v11481_v44, %v11481_v44  ;;  %v710_v18 = vmul.f32 %v11484_v45, %v11484_v45  ;;  %v9227_v15 = vor.u32 %v10044_v22, %v9224_v14  ;;  %v10029_v22 = vld [vmem:[#allocation8 + $0x254] sm:$0xf0]  ;;  %v9978_v14 = vld [vmem:[#allocation8 + $0xc4] sm:$0xf] }
  0xe5   : > { %v707_v20 = vmul.f32 %v11454_v31, %v11454_v31  ;;  %v708_v21 = vmul.f32 %v11457_v32, %v11457_v32 }
  0xe6   : > { %v748_v2 = vadd.f32 %v710_v18, %v709_v58  ;;  %1812 = vmatpush.bf16.msra.mxu3 %v9227_v15  ;;  %v8982_v58 = vld [vmem:[#allocation8 + $0xf0] sm:$0xf]  ;;  %v9987_v18 = vld [vmem:[#allocation8 + $0x104] sm:$0xf0]  ;;  %v8960_v15 = vld [vmem:[#allocation8 + $0xd8] sm:$0xf0] }
  0xe7   : > { %v745_v49 = vadd.f32 %v708_v21, %v707_v20  ;;  %v618_v50 = vpop.xlane.xlu1 %617  ;;  %v9990_v20 = vld [vmem:[#allocation8 + $0x124] sm:$0xf]  ;;  %v9008_v21 = vld [vmem:[#allocation8 + $0x138] sm:$0xf0] }
  0xe8   : > { %740 = vadd.xlane.f32.xlu1 %v739_v10  ;;  %v655_v55 = vmul.f32 %v11362_v33, %v618_v50  ;;  %v9996_v10 = vld [vmem:[#allocation8 + $0x154] sm:$0xf]  ;;  %v9200_v50 = vld [vmem:[#allocation8 + $0x2b8] sm:$0xf0] }
  0xe9   : > { %623 = vadd.xlane.f32.xlu2 %v622_v13  ;;  %734 = vadd.xlane.f32.xlu0 %v733_v16  ;;  %v9032_v13 = vld [vmem:[#allocation8 + $0x168] sm:$0xf0] }
  0xea   : > { %v11500_v62 = vsub.f32 %v11355_v24, %v655_v55  ;;  %v11503_v63 = vsub.f32 %v11358_v25, %v655_v55  ;;  %v9999_v24 = vld [vmem:[#allocation8 + $0x164] sm:$0xf0]  ;;  %v9035_v17 = vor.u32 %v9996_v10, %v9032_v13  ;;  %v8958_v10 = vld [vmem:[#allocation8 + $0xc0] sm:$0xf]  ;;  %v9981_v13 = vld [vmem:[#allocation8 + $0xd4] sm:$0xf0] }
  0xeb   : > { %v9031_v7 = vor.u32 %v9999_v24, %v9030_v1  ;;  %v10047_v25 = vld [vmem:[#allocation8 + $0x2e4] sm:$0xf0] }
  0xec   : > { %v711_v4 = vmul.f32 %v11500_v62, %v11500_v62  ;;  %v712_v5 = vmul.f32 %v11503_v63, %v11503_v63  ;;  %v9223_v16 = vor.u32 %v10047_v25, %v9222_v6  ;;  %1763 = vmatpush.bf16.msra.mxu2 %v9035_v17  ;;  %v10032_v6 = vld [vmem:[#allocation8 + $0x274] sm:$0xf]  ;;  %v8959_v17 = vor.u32 %v9981_v13, %v8958_v10 }
  0xed   : > { %1665 = vmatpush.bf16.msra.mxu0 %v9031_v7  ;;  %v9176_v7 = vld [vmem:[#allocation8 + $0x288] sm:$0xf0] }
  0xee   : > { %v751_v0 = vadd.f32 %v712_v5, %v711_v4  ;;  %1714 = vmatpush.bf16.msra.mxu1 %v9223_v16  ;;  %v10035_v4 = vld [vmem:[#allocation8 + $0x284] sm:$0xf0]  ;;  %v9984_v5 = vld [vmem:[#allocation8 + $0xf4] sm:$0xf]  ;;  %v9179_v25 = vor.u32 %v10032_v6, %v9176_v7  ;;  %v9150_v16 = vld [vmem:[#allocation8 + $0x240] sm:$0xf] }
  0xef   : > { %v10017_v6 = vld [vmem:[#allocation8 + $0x1f4] sm:$0xf0]  ;;  %v9966_v7 = vld [vmem:[#allocation8 + $0x64] sm:$0xf] }
  0xf0   : > { %632 = vadd.xlane.f32.xlu1 %v631_v29  ;;  %v9006_v29 = vld [vmem:[#allocation8 + $0x120] sm:$0xf] }
  0xf1   : > { %743 = vadd.xlane.f32.xlu2 %v742_v34  ;;  %626 = vadd.xlane.f32.xlu0 %v625_v35  ;;  %v9198_v34 = vld [vmem:[#allocation8 + $0x2a0] sm:$0xf]  ;;  %v9007_v35 = vor.u32 %v9993_v30, %v9006_v29  ;;  %v9151_v29 = vor.u32 %v10029_v22, %v9150_v16  ;;  %v8963_v30 = vor.u32 %v9978_v14, %v8960_v15  ;;  %v10014_v16 = vld [vmem:[#allocation8 + $0x1e4] sm:$0xf]  ;;  %v8886_v15 = vld [vmem:[#allocation8 + $0x30] sm:$0xf] }
  0xf3   : > { %1666 = vmatpush.bf16.msra.mxu0 %v9007_v35  ;;  %v9152_v35 = vld [vmem:[#allocation8 + $0x258] sm:$0xf0] }
  0xf8   : > { %635 = vadd.xlane.f32.xlu1 %v634_v43  ;;  %v9199_v43 = vor.u32 %v10041_v36, %v9198_v34  ;;  %v10026_v34 = vld [vmem:[#allocation8 + $0x244] sm:$0xf] }
  0xf9   : > { %629 = vadd.xlane.f32.xlu0 %v628_v46  ;;  %746 = vadd.xlane.f32.xlu2 %v745_v49  ;;  %v9011_v46 = vor.u32 %v9990_v20, %v9008_v21  ;;  %v10038_v49 = vld [vmem:[#allocation8 + $0x2a4] sm:$0xf]  ;;  %v9155_v36 = vor.u32 %v10026_v34, %v9152_v35  ;;  %v8934_v20 = vld [vmem:[#allocation8 + $0x90] sm:$0xf]  ;;  %v9975_v21 = vld [vmem:[#allocation8 + $0xa4] sm:$0xf0] }
  0xfa   : > { %v9203_v55 = vor.u32 %v10038_v49, %v9200_v50  ;;  %1715 = vmatpush.bf16.msra.mxu1 %v9199_v43  ;;  %v9126_v43 = vld [vmem:[#allocation8 + $0x210] sm:$0xf]  ;;  %v10023_v49 = vld [vmem:[#allocation8 + $0x224] sm:$0xf0]  ;;  %v9972_v50 = vld [vmem:[#allocation8 + $0x94] sm:$0xf] }
  0xfb   : > { %1764 = vmatpush.bf16.msra.mxu2 %v9011_v46  ;;  %v8935_v46 = vor.u32 %v9975_v21, %v8934_v20  ;;  %v9960_v20 = vld [vmem:[#allocation8 + $0x34] sm:$0xf]  ;;  %v8888_v21 = vld [vmem:[#allocation8 + $0x48] sm:$0xf0] }
  0xfc   : > { %1813 = vmatpush.bf16.msra.mxu3 %v9203_v55  ;;  %v8936_v55 = vld [vmem:[#allocation8 + $0xa8] sm:$0xf0] }
 0x100   : > { %1814 = vmatpush.bf16.msra.mxu3 %v9179_v25  ;;  %v8912_v25 = vld [vmem:[#allocation8 + $0x78] sm:$0xf0] }
 0x101   : > { %749 = vadd.xlane.f32.xlu0 %v748_v2  ;;  %638 = vadd.xlane.f32.xlu2 %v637_v3  ;;  %v9174_v2 = vld [vmem:[#allocation8 + $0x270] sm:$0xf]  ;;  %v8983_v3 = vor.u32 %v9987_v18, %v8982_v58  ;;  %v9127_v58 = vor.u32 %v10023_v49, %v9126_v43  ;;  %v8939_v18 = vor.u32 %v9972_v50, %v8936_v55  ;;  %v10008_v49 = vld [vmem:[#allocation8 + $0x1b4] sm:$0xf]  ;;  %v9080_v50 = vld [vmem:[#allocation8 + $0x1c8] sm:$0xf0] }
 0x102   : > { %v9175_v1 = vor.u32 %v10035_v4, %v9174_v2  ;;  %v10020_v2 = vld [vmem:[#allocation8 + $0x214] sm:$0xf]  ;;  %v8915_v13 = vor.u32 %v9966_v7, %v8912_v25 }
 0x103   : > { %1667 = vmatpush.bf16.msra.mxu0 %v8983_v3  ;;  %v9128_v3 = vld [vmem:[#allocation8 + $0x228] sm:$0xf0] }
 0x104   : > { %1716 = vmatpush.bf16.msra.mxu1 %v9175_v1  ;;  %1815 = vmatpush.bf16.msra.mxu3 %v9155_v36  ;;  %v9131_v4 = vor.u32 %v10020_v2, %v9128_v3  ;;  %v9102_v1 = vld [vmem:[#allocation8 + $0x1e0] sm:$0xf]  ;;  %v10011_v36 = vld [vmem:[#allocation8 + $0x1c4] sm:$0xf0] }
 0x105   : > { %v9103_v10 = vor.u32 %v10017_v6, %v9102_v1 }
 0x107   : > { %1668 = vmatpush.bf16.msra.mxu0 %v8959_v17  ;;  %v9104_v17 = vld [vmem:[#allocation8 + $0x1f8] sm:$0xf0] }
 0x108   : > { %1717 = vmatpush.bf16.msra.mxu1 %v9151_v29  ;;  %1816 = vmatpush.bf16.msra.mxu3 %v9131_v4  ;;  %v9107_v22 = vor.u32 %v10014_v16, %v9104_v17  ;;  %v9963_v29 = vld [vmem:[#allocation8 + $0x44] sm:$0xf0] }
 0x109   : > { %752 = vadd.xlane.f32.xlu0 %v751_v0  ;;  %v8984_v0 = vld [vmem:[#allocation8 + $0x108] sm:$0xf0]  ;;  %v8887_v35 = vor.u32 %v9963_v29, %v8886_v15 }
 0x10a   : > { %v8987_v24 = vor.u32 %v9984_v5, %v8984_v0  ;;  %v8910_v5 = vld [vmem:[#allocation8 + $0x60] sm:$0xf]  ;;  %v9969_v0 = vld [vmem:[#allocation8 + $0x74] sm:$0xf0] }
 0x10b   : > { %1669 = vmatpush.bf16.msra.mxu0 %v8935_v46  ;;  %v8891_v46 = vor.u32 %v9960_v20, %v8888_v21 }
 0x10c   : > { %1765 = vmatpush.bf16.msra.mxu2 %v8987_v24  ;;  %1718 = vmatpush.bf16.msra.mxu1 %v9127_v58  ;;  %v8911_v24 = vor.u32 %v9969_v0, %v8910_v5  ;;  %v9083_v58 = vor.u32 %v10008_v49, %v9080_v50  ;;  %v10002_v50 = vld [vmem:[#allocation8 + $0x184] sm:$0xf] }
 0x10d   : > { %1817 = vmatpush.bf16.msra.mxu3 %v9107_v22  ;;  %v9957_v22 = vld [vmem:[#allocation8 + $0x14] sm:$0xf0] }
 0x10f   : > { %1670 = vmatpush.bf16.msra.mxu0 %v8911_v24 }
 0x110   : > { %1766 = vmatpush.bf16.msra.mxu2 %v8963_v30  ;;  %1719 = vmatpush.bf16.msra.mxu1 %v9103_v10  ;;  %v9078_v30 = vld [vmem:[#allocation8 + $0x1b0] sm:$0xf] }
 0x111   : > { %v9079_v43 = vor.u32 %v10011_v36, %v9078_v30  ;;  %1818 = vmatpush.bf16.msra.mxu3 %v9083_v58  ;;  %v10005_v30 = vld [vmem:[#allocation8 + $0x194] sm:$0xf0]  ;;  %v9056_v58 = vld [vmem:[#allocation8 + $0x198] sm:$0xf0] }
 0x113   : > { %1671 = vmatpush.bf16.msra.mxu0 %v8887_v35  ;;  %v8864_v35 = vld [vmem:[#allocation8 + $0x18] sm:$0xf0] }
 0x114   : > { %1767 = vmatpush.bf16.msra.mxu2 %v8939_v18  ;;  %1720 = vmatpush.bf16.msra.mxu1 %v9079_v43 }
 0x118   : > { %1768 = vmatpush.bf16.msra.mxu2 %v8915_v13 }
 0x11c   : > { %1769 = vmatpush.bf16.msra.mxu2 %v8891_v46 }
 0x14c   : > { %v729_v14 = vpop.xlane.xlu2 %728 }
 0x14d   : > { %v775_v34 = vmul.f32 %v729_v14, %v11362_v33  ;;  %v9054_v14 = vld [vmem:[#allocation8 + $0x180] sm:$0xf] }
 0x14e   : > { %v9055_v46 = vor.u32 %v10005_v30, %v9054_v14 }
 0x14f   : > { %v11512_v55 = vadd.f32 1e-06, %v775_v34  ;;  %v9954_v34 = vld [vmem:[#allocation8 + $0x4] sm:$0xf] }
 0x150   : > { %v8867_v49 = vor.u32 %v9954_v34, %v8864_v35  ;;  %1721 = vmatpush.bf16.msra.mxu1 %v9055_v46  ;;  %v591_v46 = vld [vmem:[#allocation7] sm:$0x3] }
 0x151   : > { %10350 = vrsqrt.f32 %v11512_v55  ;;  %vm813_vm2 = vweird.f32 %v11512_v55 }
 0x152   : > { %1770 = vmatpush.bf16.msra.mxu2 %v8867_v49 }
 0x153   : > { %v738_v18 = vpop.xlane.xlu1 %737 }
 0x154   : > { %v778_v2 = vmul.f32 %v738_v18, %v11362_v33  ;;  %v621_v3 = vpop.xlane.xlu2 %620  ;;  %v732_v4 = vpop.xlane.xlu0 %731 }
 0x155   : > { %v656_v5 = vmul.f32 %v11362_v33, %v621_v3  ;;  %v776_v0 = vmul.f32 %v732_v4, %v11362_v33  ;;  %v9059_v3 = vor.u32 %v10002_v50, %v9056_v58 }
 0x156   : > { %v11518_v1 = vadd.f32 1e-06, %v778_v2 }
 0x157   : > { %v10351_v24 = vpop.eup %10350  ;;  %v11521_v6 = vsub.f32 %v11376_v47, %v656_v5  ;;  %v11524_v7 = vsub.f32 %v11379_v48, %v656_v5  ;;  %v11526_v25 = vadd.f32 1e-06, %v776_v0  ;;  %v8862_v47 = vld [vmem:[#allocation8] sm:$0xf]  ;;  %1819 = vmatpush.bf16.msra.mxu3 %v9059_v3 }
 0x158   : > { %v808_v10 = vmul.f32 %v10351_v24, %v11512_v55  ;;  %10352 = vrsqrt.f32 %v11518_v1  ;;  %v8863_v29 = vor.u32 %v9957_v22, %v8862_v47  ;;  %vm814_vm1 = vweird.f32 %v10351_v24 }
 0x159   : > { %10354 = vrsqrt.f32 %v11526_v25  ;;  %v713_v13 = vmul.f32 %v11521_v6, %v11521_v6  ;;  %v714_v16 = vmul.f32 %v11524_v7, %v11524_v7  ;;  %vm815_vm3 = vmor %vm813_vm2, %vm814_vm1  ;;  %vm823_vm5 = vweird.f32 %v11526_v25 }
 0x15a   : > { %v809_v17 = vmul.f32 %v10351_v24, %v808_v10  ;;  %1672 = vmatpush.bf16.msra.mxu0 %v8863_v29  ;;  %vm843_vm6 = vweird.f32 %v11518_v1 }
 0x15b   : > { %v741_v48 = vpop.xlane.xlu1 %740  ;;  %v754_v15 = vadd.f32 %v714_v16, %v713_v13 }
 0x15c   : > { %v810_v36 = vmul.f32 0.5, %v809_v17  ;;  %v779_v20 = vmul.f32 %v741_v48, %v11362_v33  ;;  %v624_v21 = vpop.xlane.xlu2 %623  ;;  %v735_v43 = vpop.xlane.xlu0 %734 }
 0x15d   : > { %v657_v18 = vmul.f32 %v11362_v33, %v624_v21  ;;  %v777_v2 = vmul.f32 %v735_v43, %v11362_v33  ;;  %755 = vadd.xlane.f32.xlu1 %v754_v15 }
 0x15e   : > { %v11538_v4 = vpop.eup %10352  ;;  %v811_v5 = vsub.f32 1.5, %v810_v36  ;;  %v11540_v0 = vadd.f32 1e-06, %v779_v20 }
 0x15f   : > { %v10355_v10 = vpop.eup %10354  ;;  %v838_v13 = vmul.f32 %v11538_v4, %v11518_v1  ;;  %v11545_v16 = vsub.f32 %v11421_v8, %v657_v18  ;;  %v11548_v17 = vsub.f32 %v11424_v9, %v657_v18  ;;  %v11553_v48 = vadd.f32 1e-06, %v777_v2  ;;  %v590_v9 = vld [vmem:[#allocation5] sm:$0x3] }
 0x160   : > { %v812_v47 = vmul.f32 %v10351_v24, %v811_v5  ;;  %v818_v22 = vmul.f32 %v10355_v10, %v11526_v25  ;;  %10356 = vrsqrt.f32 %v11540_v0  ;;  %v11562_v49 = vperm.slane %v590_v9, 0 }
 0x161   : > { %v839_v14 = vmul.f32 %v11538_v4, %v838_v13  ;;  %v715_v15 = vmul.f32 %v11545_v16, %v11545_v16  ;;  %v716_v8 = vmul.f32 %v11548_v17, %v11548_v17  ;;  %10358 = vrsqrt.f32 %v11553_v48 }
 0x162   : > { %v819_v29 = vmul.f32 %v10355_v10, %v818_v22  ;;  %v816_v30 = vsel %vm815_vm3, %v10351_v24, %v812_v47  ;;  %vm824_vm4 = vweird.f32 %v10355_v10  ;;  %v11565_v18 = vperm.slane %v590_v9, 1 }
 0x163   : > { %v757_v36 = vadd.f32 %v716_v8, %v715_v15  ;;  %v840_v20 = vmul.f32 0.5, %v839_v14  ;;  %v633_v21 = vpop.xlane.xlu1 %632  ;;  %v967_v50 = vmul.f32 %v816_v30, %v11365_v37  ;;  %v968_v24 = vmul.f32 %v816_v30, %v11367_v38  ;;  %vm825_vm7 = vmor %vm823_vm5, %vm824_vm4 }
 0x164   : > { %v820_v34 = vmul.f32 0.5, %v819_v29  ;;  %v744_v55 = vpop.xlane.xlu2 %743  ;;  %v627_v35 = vpop.xlane.xlu0 %626  ;;  %v11573_v47 = vperm.slane %v591_v46, 0  ;;  %v11575_v22 = vperm.slane %v591_v46, 1  ;;  %v660_v29 = vmul.f32 %v11362_v33, %v633_v21 }
 0x165   : > { %v780_v43 = vmul.f32 %v744_v55, %v11362_v33  ;;  %758 = vadd.xlane.f32.xlu2 %v757_v36  ;;  %v841_v37 = vsub.f32 1.5, %v840_v20  ;;  %v1004_v14 = vmul.f32 %v11562_v49, %v967_v50  ;;  %v1005_v25 = vmul.f32 %v11565_v18, %v968_v24 }
 0x166   : > { %v821_v58 = vsub.f32 1.5, %v820_v34  ;;  %v11568_v2 = vpop.eup %10356  ;;  %vm844_vm8 = vweird.f32 %v11538_v4  ;;  %v658_v46 = vmul.f32 %v11362_v33, %v627_v35  ;;  %vm833_vm10 = vweird.f32 %v11553_v48 }
 0x167   : > { %v11571_v5 = vadd.f32 1e-06, %v780_v43  ;;  %v10359_v13 = vpop.eup %10358  ;;  %v848_v30 = vmul.f32 %v11568_v2, %v11540_v0  ;;  %v842_v36 = vmul.f32 %v11538_v4, %v841_v37  ;;  %v1041_v43 = vadd.f32 %v11573_v47, %v1004_v14  ;;  %vm845_vm9 = vmor %vm843_vm6, %vm844_vm8 }
 0x168   : > { %v822_v3 = vmul.f32 %v10355_v10, %v821_v58  ;;  %v828_v38 = vmul.f32 %v10359_v13, %v11553_v48  ;;  %v1042_v50 = vadd.f32 %v11575_v22, %v1005_v25  ;;  %vm834_vm11 = vweird.f32 %v10359_v13 }
 0x169   : > { %10360 = vrsqrt.f32 %v11571_v5  ;;  %v849_v14 = vmul.f32 %v11568_v2, %v848_v30  ;;  %v11618_v30 = vsub.f32 %v11449_v28, %v658_v46  ;;  %vm835_vm12 = vmor %vm833_vm10, %vm834_vm11  ;;  %vm863_vm13 = vweird.f32 %v11571_v5 }
 0x16a   : > { %v826_v15 = vsel %vm825_vm7, %v10355_v10, %v822_v3  ;;  %v829_v34 = vmul.f32 %v10359_v13, %v828_v38  ;;  %v11610_v38 = vsub.f32 %v11439_v26, %v660_v29  ;;  %vm853_vm15 = vweird.f32 %v11540_v0 }
 0x16b   : > { %v969_v8 = vmul.f32 %v826_v15, %v11387_v53  ;;  %v970_v9 = vmul.f32 %v826_v15, %v11389_v54  ;;  %v11595_v54 = vsub.f32 %v11436_v23, %v660_v29  ;;  %v636_v3 = vpop.xlane.xlu1 %635  ;;  %v846_v23 = vsel %vm845_vm9, %v11538_v4, %v842_v36 }
 0x16c   : > { %v747_v55 = vpop.xlane.xlu2 %746  ;;  %v630_v10 = vpop.xlane.xlu0 %629  ;;  %v830_v53 = vmul.f32 0.5, %v829_v34  ;;  %v661_v48 = vmul.f32 %v11362_v33, %v636_v3  ;;  %v974_v28 = vmul.f32 %v846_v23, %v11385_v52  ;;  %vm854_vm0 = vweird.f32 %v11568_v2 }
 0x16d   : > { %v1006_v20 = vmul.f32 %v11562_v49, %v969_v8  ;;  %v1007_v21 = vmul.f32 %v11565_v18, %v970_v9  ;;  %v781_v37 = vmul.f32 %v747_v55, %v11362_v33  ;;  %v11615_v9 = vsub.f32 %v11446_v27, %v658_v46  ;;  %vm855_vm2 = vmor %vm853_vm15, %vm854_vm0 }
 0x16e   : > { %v831_v15 = vsub.f32 1.5, %v830_v53  ;;  %v659_v26 = vmul.f32 %v11362_v33, %v630_v10  ;;  %v721_v29 = vmul.f32 %v11595_v54, %v11595_v54  ;;  %v973_v27 = vmul.f32 %v846_v23, %v11383_v51 }
 0x16f   : > { %v1043_v58 = vadd.f32 %v11573_v47, %v1006_v20  ;;  %v1044_v24 = vadd.f32 %v11575_v22, %v1007_v21  ;;  %v11612_v25 = vpop.eup %10360  ;;  %v11623_v34 = vadd.f32 1e-06, %v781_v37  ;;  %v850_v55 = vmul.f32 0.5, %v849_v14 }
 0x170   : > { %v832_v8 = vmul.f32 %v10359_v13, %v831_v15  ;;  %v858_v4 = vmul.f32 %v11612_v25, %v11571_v5  ;;  %v11640_v51 = vsub.f32 %v11463_v39, %v661_v48  ;;  %v11643_v52 = vsub.f32 %v11466_v40, %v661_v48 }
 0x171   : > { %v11605_v1 = vpack.c.bf16 %v1043_v58, %v1041_v43  ;;  %v11607_v35 = vpack.c.bf16 %v1044_v24, %v1042_v50  ;;  %v722_v43 = vmul.f32 %v11610_v38, %v11610_v38  ;;  %10362 = vrsqrt.f32 %v11623_v34 }
 0x172   : > { %v836_v36 = vsel %vm835_vm12, %v10359_v13, %v832_v8  ;;  %v859_v10 = vmul.f32 %v11612_v25, %v858_v4  ;;  %v11651_v50 = vsub.f32 %v11473_v41, %v659_v26  ;;  %v11654_v24 = vsub.f32 %v11476_v42, %v659_v26 }
 0x173   : > { %1673 = vmatmul.bf16.vlgmr.msra.gmra.mxu0 %v11605_v1  ;;  %1722 = vmatmul.bf16.vlgmr.msra.gmra.mxu1 %v11607_v35  ;;  %v971_v20 = vmul.f32 %v836_v36, %v11402_v60  ;;  %v972_v21 = vmul.f32 %v836_v36, %v11405_v61  ;;  %v717_v60 = vmul.f32 %v11615_v9, %v11615_v9  ;;  %v851_v48 = vsub.f32 1.5, %v850_v55 }
 0x174   : > { %1771 = vmatmul.bf16.vlgmr.msra.gmra.mxu2 %v11605_v1  ;;  %1820 = vmatmul.bf16.vlgmr.msra.gmra.mxu3 %v11607_v35  ;;  %v639_v53 = vpop.xlane.xlu2 %638  ;;  %v750_v46 = vpop.xlane.xlu0 %749  ;;  %v718_v61 = vmul.f32 %v11618_v30, %v11618_v30  ;;  %v860_v13 = vmul.f32 0.5, %v859_v10  ;;  %v766_v58 = vadd.f32 %v722_v43, %v721_v29  ;;  %v1010_v37 = vmul.f32 %v11562_v49, %v973_v27 }
 0x175   : > { %v662_v40 = vmul.f32 %v11362_v33, %v639_v53  ;;  %v782_v3 = vmul.f32 %v750_v46, %v11362_v33  ;;  %v1008_v14 = vmul.f32 %v11562_v49, %v971_v20  ;;  %v1009_v15 = vmul.f32 %v11565_v18, %v972_v21 }
 0x176   : > { %v760_v39 = vadd.f32 %v718_v61, %v717_v60  ;;  %767 = vadd.xlane.f32.xlu2 %v766_v58  ;;  %v1011_v23 = vmul.f32 %v11565_v18, %v974_v28  ;;  %v861_v41 = vsub.f32 1.5, %v860_v13  ;;  %v723_v42 = vmul.f32 %v11640_v51, %v11640_v51 }
 0x177   : > { %v724_v8 = vmul.f32 %v11643_v52, %v11643_v52  ;;  %vm864_vm14 = vweird.f32 %v11612_v25  ;;  %v798_v4 = vadd.f32 1e-06, %v782_v3  ;;  %v11669_v26 = vsub.f32 %v11494_v59, %v662_v40  ;;  %v10363_v36 = vpop.eup %10362 }
 0x178   : > { %761 = vadd.xlane.f32.xlu0 %v760_v39  ;;  %v11672_v29 = vsub.f32 %v11497_v19, %v662_v40  ;;  %v719_v27 = vmul.f32 %v11651_v50, %v11651_v50  ;;  %v720_v28 = vmul.f32 %v11654_v24, %v11654_v24  ;;  %v1045_v55 = vadd.f32 %v11573_v47, %v1008_v14  ;;  %vm865_vm1 = vmor %vm863_vm13, %vm864_vm14 }
 0x179   : > { %v1046_v20 = vadd.f32 %v11575_v22, %v1009_v15  ;;  %10364 = vrsqrt.f32 %v798_v4  ;;  %v862_v59 = vmul.f32 %v11612_v25, %v861_v41  ;;  %v769_v19 = vadd.f32 %v724_v8, %v723_v42 }
 0x17a   : > { %v763_v21 = vadd.f32 %v720_v28, %v719_v27  ;;  %v1047_v10 = vadd.f32 %v11573_v47, %v1010_v37  ;;  %v1048_v43 = vadd.f32 %v11575_v22, %v1011_v23  ;;  %v852_v53 = vmul.f32 %v11568_v2, %v851_v48 }
 0x17b   : > { %v868_v46 = vmul.f32 %v10363_v36, %v11623_v34  ;;  %v725_v60 = vmul.f32 %v11669_v26, %v11669_v26  ;;  %v726_v61 = vmul.f32 %v11672_v29, %v11672_v29  ;;  %v866_v5 = vsel %vm865_vm1, %v11612_v25, %v862_v59 }
 0x17c   : > { %764 = vadd.xlane.f32.xlu1 %v763_v21  ;;  %v11697_v13 = vpack.c.bf16 %v1047_v10, %v1045_v55  ;;  %v11699_v58 = vpack.c.bf16 %v1048_v43, %v1046_v20  ;;  %v856_v40 = vsel %vm855_vm2, %v11568_v2, %v852_v53  ;;  %v977_v0 = vmul.f32 %v866_v5, %v11427_v11 }
 0x17d   : > { %v869_v3 = vmul.f32 %v10363_v36, %v868_v46  ;;  %v772_v14 = vadd.f32 %v726_v61, %v725_v60  ;;  %v978_v15 = vmul.f32 %v866_v5, %v11430_v12  ;;  %v975_v23 = vmul.f32 %v856_v40, %v11393_v56 }
 0x17e   : > { %v976_v41 = vmul.f32 %v856_v40, %v11395_v57  ;;  %v1014_v2 = vmul.f32 %v11562_v49, %v977_v0  ;;  %vm883_vm3 = vweird.f32 %v798_v4  ;;  %vm873_vm5 = vweird.f32 %v11623_v34 }
 0x17f   : > { %v10365_v39 = vpop.eup %10364  ;;  %v870_v42 = vmul.f32 0.5, %v869_v3  ;;  %v1015_v48 = vmul.f32 %v11565_v18, %v978_v15  ;;  %v1012_v28 = vmul.f32 %v11562_v49, %v975_v23  ;;  %vm874_vm6 = vweird.f32 %v10363_v36 }
 0x180   : > { %770 = vadd.xlane.f32.xlu0 %v769_v19  ;;  %v878_v37 = vmul.f32 %v10365_v39, %v798_v4  ;;  %v1013_v11 = vmul.f32 %v11565_v18, %v976_v41  ;;  %vm884_vm4 = vweird.f32 %v10365_v39  ;;  %v1051_v12 = vadd.f32 %v11573_v47, %v1014_v2  ;;  %vm875_vm8 = vmor %vm873_vm5, %vm874_vm6 }
 0x181   : > { %v871_v55 = vsub.f32 1.5, %v870_v42  ;;  %v1052_v56 = vadd.f32 %v11575_v22, %v1015_v48  ;;  %v1049_v20 = vadd.f32 %v11573_v47, %v1012_v28  ;;  %vm885_vm7 = vmor %vm883_vm3, %vm884_vm4 }
 0x182   : > { %v879_v25 = vmul.f32 %v10365_v39, %v878_v37  ;;  %v1050_v59 = vadd.f32 %v11575_v22, %v1013_v11 }
 0x183   : > { %1678 = vmatmul.bf16.gmra.mxu0 %v11697_v13  ;;  %1727 = vmatmul.bf16.gmra.mxu1 %v11699_v58  ;;  %v872_v19 = vmul.f32 %v10363_v36, %v871_v55  ;;  %v11720_v21 = vpack.c.bf16 %v1051_v12, %v1049_v20 }
 0x184   : > { %1776 = vmatmul.bf16.gmra.mxu2 %v11697_v13  ;;  %1825 = vmatmul.bf16.gmra.mxu3 %v11699_v58  ;;  %v880_v8 = vmul.f32 0.5, %v879_v25  ;;  %v11722_v10 = vpack.c.bf16 %v1052_v56, %v1050_v59 }
 0x185   : > { %773 = vadd.xlane.f32.xlu1 %v772_v14  ;;  %v876_v43 = vsel %vm875_vm8, %v10363_v36, %v872_v19 }
 0x186   : > { %v881_v27 = vsub.f32 1.5, %v880_v8  ;;  %v979_v46 = vmul.f32 %v876_v43, %v11454_v31  ;;  %v980_v60 = vmul.f32 %v876_v43, %v11457_v32  ;;  %v753_v32 = vpop.xlane.xlu0 %752 }
 0x187   : > { %v783_v14 = vmul.f32 %v753_v32, %v11362_v33 }
 0x188   : > { %v882_v57 = vmul.f32 %v10365_v39, %v881_v27  ;;  %v1016_v36 = vmul.f32 %v11562_v49, %v979_v46 }
 0x189   : > { %v799_v0 = vadd.f32 1e-06, %v783_v14 }
 0x18a   : > { %v886_v4 = vsel %vm885_vm7, %v10365_v39, %v882_v57  ;;  %v1017_v39 = vmul.f32 %v11565_v18, %v980_v60  ;;  %v1053_v3 = vadd.f32 %v11573_v47, %v1016_v36 }
 0x18b   : > { %v981_v34 = vmul.f32 %v886_v4, %v11481_v44  ;;  %v982_v53 = vmul.f32 %v886_v4, %v11484_v45  ;;  %10366 = vrsqrt.f32 %v799_v0  ;;  %vm893_vm9 = vweird.f32 %v799_v0 }
 0x18c   : > { %v1054_v45 = vadd.f32 %v11575_v22, %v1017_v39 }
 0x18d   : > { %v1018_v61 = vmul.f32 %v11562_v49, %v981_v34  ;;  %v1019_v5 = vmul.f32 %v11565_v18, %v982_v53 }
 0x18f   : > { %v1055_v40 = vadd.f32 %v11573_v47, %v1018_v61  ;;  %v1056_v44 = vadd.f32 %v11575_v22, %v1019_v5 }
 0x191   : > { %v11740_v37 = vpack.c.bf16 %v1055_v40, %v1053_v3  ;;  %v11742_v31 = vpack.c.bf16 %v1056_v44, %v1054_v45  ;;  %v10367_v15 = vpop.eup %10366 }
 0x192   : > { %v888_v25 = vmul.f32 %v10367_v15, %v799_v0  ;;  %vm894_vm10 = vweird.f32 %v10367_v15 }
 0x193   : > { %1683 = vmatmul.bf16.gmra.mxu0 %v11720_v21  ;;  %1732 = vmatmul.bf16.gmra.mxu1 %v11722_v10  ;;  %vm895_vm11 = vmor %vm893_vm9, %vm894_vm10 }
 0x194   : > { %1781 = vmatmul.bf16.gmra.mxu2 %v11720_v21  ;;  %1830 = vmatmul.bf16.gmra.mxu3 %v11722_v10  ;;  %v889_v23 = vmul.f32 %v10367_v15, %v888_v25 }
 0x196   : > { %v890_v2 = vmul.f32 0.5, %v889_v23 }
 0x198   : > { %v891_v48 = vsub.f32 1.5, %v890_v2 }
 0x19a   : > { %v892_v55 = vmul.f32 %v10367_v15, %v891_v48 }
 0x19c   : > { %v896_v20 = vsel %vm895_vm11, %v10367_v15, %v892_v55  ;;  %v9230_v55 = vld [vmem:[#allocation8 + $0x2d8] sm:$0xf] }
 0x19d   : > { %v983_v4 = vmul.f32 %v896_v20, %v11500_v62  ;;  %v984_v43 = vmul.f32 %v896_v20, %v11503_v63  ;;  %v10048_v20 = vld [vmem:[#allocation8 + $0x2ec] sm:$0xf0] }
 0x19f   : > { %v1020_v61 = vmul.f32 %v11562_v49, %v983_v4  ;;  %v1021_v5 = vmul.f32 %v11565_v18, %v984_v43  ;;  %v9231_v43 = vor.u32 %v10048_v20, %v9230_v55  ;;  %v9016_v55 = vld [vmem:[#allocation8 + $0x140] sm:$0xf0] }
 0x1a1   : > { %v1057_v44 = vadd.f32 %v11573_v47, %v1020_v61  ;;  %v1058_v3 = vadd.f32 %v11575_v22, %v1021_v5  ;;  %1910 = vmatpush.bf16.msrb.mxu1 %v9231_v43 }
 0x1a3   : > { %1688 = vmatmul.bf16.gmra.mxu0 %v11740_v37  ;;  %1737 = vmatmul.bf16.gmra.mxu1 %v11742_v31 }
 0x1a4   : > { %1786 = vmatmul.bf16.gmra.mxu2 %v11740_v37  ;;  %1835 = vmatmul.bf16.gmra.mxu3 %v11742_v31 }
 0x1d0   : > { %v756_v41 = vpop.xlane.xlu1 %755 }
 0x1d1   : > { %v784_v42 = vmul.f32 %v756_v41, %v11362_v33 }
 0x1d3   : > { %v800_v8 = vadd.f32 1e-06, %v784_v42 }
 0x1d5   : > { %10368 = vrsqrt.f32 %v800_v8  ;;  %vm903_vm13 = vweird.f32 %v800_v8 }
 0x1d8   : > { %v759_v27 = vpop.xlane.xlu2 %758 }
 0x1d9   : > { %v785_v28 = vmul.f32 %v759_v27, %v11362_v33 }
 0x1db   : > { %v10369_v11 = vpop.eup %10368  ;;  %v11751_v56 = vadd.f32 1e-06, %v785_v28  ;;  %v9038_v28 = vld [vmem:[#allocation8 + $0x158] sm:$0xf] }
 0x1dc   : > { %v898_v12 = vmul.f32 %v10369_v11, %v800_v8  ;;  %vm904_vm12 = vweird.f32 %v10369_v11 }
 0x1dd   : > { %10370 = vrsqrt.f32 %v11751_v56  ;;  %vm905_vm14 = vmor %vm903_vm13, %vm904_vm12  ;;  %vm913_vm15 = vweird.f32 %v11751_v56 }
 0x1de   : > { %v899_v57 = vmul.f32 %v10369_v11, %v898_v12 }
 0x1e0   : > { %v900_v59 = vmul.f32 0.5, %v899_v57 }
 0x1e2   : > { %v901_v19 = vsub.f32 1.5, %v900_v59  ;;  %v9997_v59 = vld [vmem:[#allocation8 + $0x15c] sm:$0xf] }
 0x1e3   : > { %v11756_v34 = vpop.eup %10370 }
 0x1e4   : > { %v902_v53 = vmul.f32 %v10369_v11, %v901_v19  ;;  %v908_v46 = vmul.f32 %v11756_v34, %v11751_v56  ;;  %v9040_v19 = vld [vmem:[#allocation8 + $0x170] sm:$0xf0]  ;;  %vm914_vm0 = vweird.f32 %v11756_v34 }
 0x1e5   : > { %v9043_v61 = vor.u32 %v9997_v59, %v9040_v19  ;;  %vm915_vm1 = vmor %vm913_vm15, %vm914_vm0 }
 0x1e6   : > { %v906_v60 = vsel %vm905_vm14, %v10369_v11, %v902_v53  ;;  %v909_v40 = vmul.f32 %v11756_v34, %v908_v46  ;;  %v10000_v11 = vld [vmem:[#allocation8 + $0x16c] sm:$0xf0]  ;;  %v10045_v53 = vld [vmem:[#allocation8 + $0x2dc] sm:$0xf]  ;;  %v9232_v46 = vld [vmem:[#allocation8 + $0x2f0] sm:$0xf0] }
 0x1e7   : > { %v985_v36 = vmul.f32 %v906_v60, %v11521_v6  ;;  %v986_v39 = vmul.f32 %v906_v60, %v11524_v7  ;;  %v9039_v57 = vor.u32 %v10000_v11, %v9038_v28  ;;  %v9235_v5 = vor.u32 %v10045_v53, %v9232_v46  ;;  %1959 = vmatpush.bf16.msrb.mxu2 %v9043_v61  ;;  %v8990_v61 = vld [vmem:[#allocation8 + $0xf8] sm:$0xf] }
 0x1e8   : > { %v910_v7 = vmul.f32 0.5, %v909_v40 }
 0x1e9   : > { %v1022_v62 = vmul.f32 %v11562_v49, %v985_v36  ;;  %v1023_v63 = vmul.f32 %v11565_v18, %v986_v39  ;;  %v768_v14 = vpop.xlane.xlu2 %767  ;;  %1861 = vmatpush.bf16.msrb.mxu0 %v9039_v57  ;;  %2008 = vmatpush.bf16.msrb.mxu3 %v9235_v5  ;;  %v9988_v5 = vld [vmem:[#allocation8 + $0x10c] sm:$0xf0] }
 0x1ea   : > { %v788_v15 = vmul.f32 %v768_v14, %v11362_v33  ;;  %v911_v48 = vsub.f32 1.5, %v910_v7  ;;  %v9014_v14 = vld [vmem:[#allocation8 + $0x128] sm:$0xf]  ;;  %v9994_v7 = vld [vmem:[#allocation8 + $0x13c] sm:$0xf0] }
 0x1eb   : > { %v1059_v45 = vadd.f32 %v11573_v47, %v1022_v62  ;;  %v1060_v32 = vadd.f32 %v11575_v22, %v1023_v63  ;;  %v762_v25 = vpop.xlane.xlu0 %761  ;;  %v9015_v28 = vor.u32 %v9994_v7, %v9014_v14 }
 0x1ec   : > { %v786_v23 = vmul.f32 %v762_v25, %v11362_v33  ;;  %v11777_v41 = vadd.f32 1e-06, %v788_v15  ;;  %v912_v62 = vmul.f32 %v11756_v34, %v911_v48  ;;  %v9206_v15 = vld [vmem:[#allocation8 + $0x2a8] sm:$0xf]  ;;  %v9991_v48 = vld [vmem:[#allocation8 + $0x12c] sm:$0xf] }
 0x1ed   : > { %v11771_v0 = vpack.c.bf16 %v1059_v45, %v1057_v44  ;;  %v11773_v6 = vpack.c.bf16 %v1060_v32, %v1058_v3  ;;  %1862 = vmatpush.bf16.msrb.mxu0 %v9015_v28  ;;  %v9019_v46 = vor.u32 %v9991_v48, %v9016_v55 }
 0x1ee   : > { %v11781_v42 = vadd.f32 1e-06, %v786_v23  ;;  %10372 = vrsqrt.f32 %v11777_v41  ;;  %v916_v57 = vsel %vm915_vm1, %v11756_v34, %v912_v62  ;;  %vm943_vm5 = vweird.f32 %v11777_v41 }
 0x1ef   : > { %1693 = vmatmul.bf16.gmra.mxu0 %v11771_v0  ;;  %1742 = vmatmul.bf16.gmra.mxu1 %v11773_v6  ;;  %v765_v12 = vpop.xlane.xlu1 %764  ;;  %v987_v34 = vmul.f32 %v916_v57, %v11545_v16  ;;  %v988_v62 = vmul.f32 %v916_v57, %v11548_v17 }
 0x1f0   : > { %1791 = vmatmul.bf16.gmra.mxu2 %v11771_v0  ;;  %1840 = vmatmul.bf16.gmra.mxu3 %v11773_v6  ;;  %v1674_v8 = vpop.f32.mrf.mxu0  ;;  %v1723_v2 = vpop.f32.mrf.mxu1  ;;  %10374 = vrsqrt.f32 %v11781_v42  ;;  %v787_v4 = vmul.f32 %v765_v12, %v11362_v33  ;;  %v10039_v12 = vld [vmem:[#allocation8 + $0x2ac] sm:$0xf]  ;;  %vm923_vm3 = vweird.f32 %v11781_v42 }
 0x1f1   : > { %v11786_v27 = vadd.f32 %v1723_v2, %v1674_v8  ;;  %v10042_v2 = vld [vmem:[#allocation8 + $0x2bc] sm:$0xf0]  ;;  %1960 = vmatpush.bf16.msrb.mxu2 %v9019_v46  ;;  %v1024_v57 = vmul.f32 %v11562_v49, %v987_v34 }
 0x1f2   : > { %v11790_v36 = vadd.f32 1e-06, %v787_v4  ;;  %v9207_v11 = vor.u32 %v10042_v2, %v9206_v15  ;;  %v9208_v4 = vld [vmem:[#allocation8 + $0x2c0] sm:$0xf0] }
 0x1f3   : > { %v771_v60 = vpop.xlane.xlu0 %770 }
 0x1f4   : > { %v11792_v39 = vpop.eup %10372  ;;  %v789_v63 = vmul.f32 %v771_v60, %v11362_v33  ;;  %10376 = vrsqrt.f32 %v11790_v36  ;;  %1911 = vmatpush.bf16.msrb.mxu1 %v9207_v11  ;;  %v9211_v60 = vor.u32 %v10039_v12, %v9208_v4  ;;  %vm933_vm7 = vweird.f32 %v11790_v36 }
 0x1f5   : > { %v938_v3 = vmul.f32 %v11792_v39, %v11777_v41  ;;  %vm944_vm6 = vweird.f32 %v11792_v39 }
 0x1f6   : > { %v10375_v44 = vpop.eup %10374  ;;  %v11813_v59 = vadd.f32 1e-06, %v789_v63  ;;  %2009 = vmatpush.bf16.msrb.mxu3 %v9211_v60  ;;  %vm945_vm9 = vmor %vm943_vm5, %vm944_vm6 }
 0x1f7   : > { %v1772_v40 = vpop.f32.mrf.mxu2  ;;  %v1821_v45 = vpop.f32.mrf.mxu3  ;;  %v918_v25 = vmul.f32 %v10375_v44, %v11781_v42  ;;  %v939_v43 = vmul.f32 %v11792_v39, %v938_v3  ;;  %v9182_v3 = vld [vmem:[#allocation8 + $0x278] sm:$0xf]  ;;  %vm924_vm2 = vweird.f32 %v10375_v44 }
 0x1f8   : > { %v11801_v32 = vpop.f32.mrf.mxu0  ;;  %v11804_v23 = vadd.f32 %v1821_v45, %v1772_v40  ;;  %v11806_v8 = vpop.f32.mrf.mxu1  ;;  %v8991_v45 = vor.u32 %v9988_v5, %v8990_v61  ;;  %10378 = vrsqrt.f32 %v11813_v59  ;;  %vm925_vm4 = vmor %vm923_vm3, %vm924_vm2  ;;  %vm953_vm13 = vweird.f32 %v11813_v59 }
 0x1f9   : > { %v919_v20 = vmul.f32 %v10375_v44, %v918_v25  ;;  %v774_v19 = vpop.xlane.xlu1 %773  ;;  %v10036_v25 = vld [vmem:[#allocation8 + $0x28c] sm:$0xf0]  ;;  %v940_v2 = vmul.f32 0.5, %v939_v43 }
 0x1fa   : > { %17444 = vst [vmem:[#allocation25_spill] sm:$0xff] %v11804_v23  ;;  %v790_v53 = vmul.f32 %v774_v19, %v11362_v33  ;;  %v11817_v40 = vpop.eup %10376  ;;  %1863 = vmatpush.bf16.msrb.mxu0 %v8991_v45  ;;  %v9183_v55 = vor.u32 %v10036_v25, %v9182_v3 }
 0x1fb   : > { %v920_v56 = vmul.f32 0.5, %v919_v20  ;;  %v928_v7 = vmul.f32 %v11817_v40, %v11790_v36  ;;  %v1025_v20 = vmul.f32 %v11565_v18, %v988_v62  ;;  %v941_v43 = vsub.f32 1.5, %v940_v2 }
 0x1fc   : > { %v11821_v63 = vadd.f32 1e-06, %v790_v53  ;;  %1912 = vmatpush.bf16.msrb.mxu1 %v9183_v55  ;;  %vm934_vm8 = vweird.f32 %v11817_v40 }
 0x1fd   : > { %v921_v14 = vsub.f32 1.5, %v920_v56  ;;  %v929_v28 = vmul.f32 %v11817_v40, %v928_v7  ;;  %v942_v62 = vmul.f32 %v11792_v39, %v941_v43  ;;  %vm935_vm10 = vmor %vm933_vm7, %vm934_vm8  ;;  %v10033_v43 = vld [vmem:[#allocation8 + $0x27c] sm:$0xf] }
 0x1fe   : > { %10380 = vrsqrt.f32 %v11821_v63  ;;  %v11840_v46 = vpop.eup %10378  ;;  %vm963_vm11 = vweird.f32 %v11821_v63 }
 0x1ff   : > { %v11826_v15 = vpop.f32.mrf.mxu2  ;;  %v11829_v16 = vpop.f32.mrf.mxu3  ;;  %v922_v48 = vmul.f32 %v10375_v44, %v921_v14  ;;  %v930_v4 = vmul.f32 0.5, %v929_v28  ;;  %v948_v36 = vmul.f32 %v11840_v46, %v11813_v59  ;;  %vm954_vm15 = vweird.f32 %v11840_v46  ;;  %v8870_v59 = vld [vmem:[#allocation8 + $0x8] sm:$0xf] }
 0x200   : > { %v1679_v17 = vpop.f32.mrf.mxu0  ;;  %v1728_v11 = vpop.f32.mrf.mxu1  ;;  %vm11927_vm0 = vmor %vm953_vm13, %vm954_vm15 }
 0x201   : > { %v11834_v12 = vadd.f32 %v1728_v11, %v1679_v17  ;;  %v926_v19 = vsel %vm925_vm4, %v10375_v44, %v922_v48  ;;  %v931_v56 = vsub.f32 1.5, %v930_v4  ;;  %v9985_v17 = vld [vmem:[#allocation8 + $0xfc] sm:$0xf]  ;;  %v8992_v48 = vld [vmem:[#allocation8 + $0x110] sm:$0xf0] }
 0x202   : > { %v989_v53 = vmul.f32 %v926_v19, %v11615_v9  ;;  %v990_v42 = vmul.f32 %v926_v19, %v11618_v30  ;;  %v1061_v9 = vadd.f32 %v11573_v47, %v1024_v57  ;;  %v1062_v30 = vadd.f32 %v11575_v22, %v1025_v20 }
 0x203   : > { %17445 = vst [vmem:[#allocation26_spill] sm:$0xff] %v11834_v12  ;;  %v932_v5 = vmul.f32 %v11817_v40, %v931_v56  ;;  %v946_v20 = vsel %vm945_vm9, %v11792_v39, %v942_v62  ;;  %v949_v19 = vmul.f32 %v11840_v46, %v948_v36  ;;  %v8995_v4 = vor.u32 %v9985_v17, %v8992_v48  ;;  %v9982_v39 = vld [vmem:[#allocation8 + $0xdc] sm:$0xf0]  ;;  %v8968_v62 = vld [vmem:[#allocation8 + $0xe0] sm:$0xf0] }
 0x204   : > { %v11844_v60 = vpop.eup %10380  ;;  %v1026_v61 = vmul.f32 %v11562_v49, %v989_v53  ;;  %v1027_v44 = vmul.f32 %v11565_v18, %v990_v42  ;;  %v9184_v53 = vld [vmem:[#allocation8 + $0x290] sm:$0xf0]  ;;  %v10018_v12 = vld [vmem:[#allocation8 + $0x1fc] sm:$0xf0] }
 0x205   : > { %v958_v41 = vmul.f32 %v11844_v60, %v11821_v63  ;;  %v936_v55 = vsel %vm935_vm10, %v11817_v40, %v932_v5  ;;  %v8966_v40 = vld [vmem:[#allocation8 + $0xc8] sm:$0xf]  ;;  %1961 = vmatpush.bf16.msrb.mxu2 %v8995_v4  ;;  %vm964_vm12 = vweird.f32 %v11844_v60  ;;  %v8894_v63 = vld [vmem:[#allocation8 + $0x38] sm:$0xf] }
 0x206   : > { %v1063_v45 = vadd.f32 %v11573_v47, %v1026_v61  ;;  %v1064_v3 = vadd.f32 %v11575_v22, %v1027_v44  ;;  %v991_v42 = vmul.f32 %v936_v55, %v11651_v50  ;;  %v992_v61 = vmul.f32 %v936_v55, %v11654_v24  ;;  %v9158_v44 = vld [vmem:[#allocation8 + $0x248] sm:$0xf]  ;;  %v10027_v50 = vld [vmem:[#allocation8 + $0x24c] sm:$0xf]  ;;  %v9160_v24 = vld [vmem:[#allocation8 + $0x260] sm:$0xf0] }
 0x207   : > { %v1777_v34 = vpop.f32.mrf.mxu2  ;;  %v1826_v14 = vpop.f32.mrf.mxu3  ;;  %v959_v25 = vmul.f32 %v11844_v60, %v958_v41  ;;  %v9187_v41 = vor.u32 %v10033_v43, %v9184_v53  ;;  %v9976_v43 = vld [vmem:[#allocation8 + $0xac] sm:$0xf0]  ;;  %v9134_v53 = vld [vmem:[#allocation8 + $0x218] sm:$0xf]  ;;  %vm11905_vm14 = vmor %vm963_vm11, %vm964_vm12 }
 0x208   : > { %v11860_v7 = vpop.f32.mrf.mxu0  ;;  %v11863_v2 = vpop.f32.mrf.mxu1  ;;  %v11865_v28 = vpack.c.bf16 %v1063_v45, %v1061_v9  ;;  %v11867_v11 = vpack.c.bf16 %v1064_v3, %v1062_v30  ;;  %v11870_v57 = vadd.f32 %v1826_v14, %v1777_v34  ;;  %v10030_v9 = vld [vmem:[#allocation8 + $0x25c] sm:$0xf0]  ;;  %v993_v30 = vmul.f32 %v946_v20, %v11595_v54  ;;  %v9979_v34 = vld [vmem:[#allocation8 + $0xcc] sm:$0xf] }
 0x209   : > { %17446 = vst [vmem:[#allocation27_spill] sm:$0xff] %v11860_v7  ;;  %v960_v56 = vmul.f32 0.5, %v959_v25  ;;  %v994_v45 = vmul.f32 %v946_v20, %v11610_v38  ;;  %v11884_v3 = vmul.f32 0.5, %v949_v19  ;;  %v8942_v25 = vld [vmem:[#allocation8 + $0x98] sm:$0xf]  ;;  %v1028_v17 = vmul.f32 %v11562_v49, %v991_v42  ;;  %2010 = vmatpush.bf16.msrb.mxu3 %v9187_v41 }
 0x20a   : > { %17447 = vst [vmem:[#allocation28_spill] sm:$0xff] %v11863_v2  ;;  %1698 = vmatmul.bf16.gmra.mxu0 %v11865_v28  ;;  %1747 = vmatmul.bf16.gmra.mxu1 %v11867_v11  ;;  %v8967_v54 = vor.u32 %v9982_v39, %v8966_v40  ;;  %v9159_v4 = vor.u32 %v10030_v9, %v9158_v44  ;;  %v10024_v38 = vld [vmem:[#allocation8 + $0x22c] sm:$0xf0]  ;;  %v9973_v20 = vld [vmem:[#allocation8 + $0x9c] sm:$0xf] }
 0x20b   : > { %17448 = vst [vmem:[#allocation29_spill] sm:$0xff] %v11870_v57  ;;  %1796 = vmatmul.bf16.gmra.mxu2 %v11865_v28  ;;  %1845 = vmatmul.bf16.gmra.mxu3 %v11867_v11  ;;  %v961_v48 = vsub.f32 1.5, %v960_v56  ;;  %v1029_v33 = vmul.f32 %v11565_v18, %v992_v61  ;;  %v8944_v19 = vld [vmem:[#allocation8 + $0xb0] sm:$0xf0]  ;;  %v1030_v57 = vmul.f32 %v11562_v49, %v993_v30  ;;  %v10021_v56 = vld [vmem:[#allocation8 + $0x21c] sm:$0xf] }
 0x20c   : > { %1864 = vmatpush.bf16.msrb.mxu0 %v8967_v54  ;;  %1913 = vmatpush.bf16.msrb.mxu1 %v9159_v4  ;;  %v8971_v42 = vor.u32 %v9979_v34, %v8968_v62  ;;  %v9136_v40 = vld [vmem:[#allocation8 + $0x230] sm:$0xf0]  ;;  %v8918_v39 = vld [vmem:[#allocation8 + $0x68] sm:$0xf]  ;;  %v1031_v44 = vmul.f32 %v11565_v18, %v994_v45  ;;  %v9163_v61 = vor.u32 %v10027_v50, %v9160_v24  ;;  %v9970_v41 = vld [vmem:[#allocation8 + $0x7c] sm:$0xf0] }
 0x20d   : > { %v8943_v9 = vor.u32 %v9976_v43, %v8942_v25  ;;  %v1065_v2 = vadd.f32 %v11573_v47, %v1028_v17  ;;  %v951_v30 = vsub.f32 1.5, %v11884_v3  ;;  %v1066_v54 = vadd.f32 %v11575_v22, %v1029_v33  ;;  %v9967_v45 = vld [vmem:[#allocation8 + $0x6c] sm:$0xf]  ;;  %v8920_v3 = vld [vmem:[#allocation8 + $0x80] sm:$0xf0] }
 0x20e   : > { %1962 = vmatpush.bf16.msrb.mxu2 %v8971_v42  ;;  %v962_v34 = vmul.f32 %v11844_v60, %v961_v48  ;;  %2011 = vmatpush.bf16.msrb.mxu3 %v9163_v61  ;;  %v9139_v50 = vor.u32 %v10021_v56, %v9136_v40  ;;  %v1067_v24 = vadd.f32 %v11573_v47, %v1030_v57  ;;  %v10015_v48 = vld [vmem:[#allocation8 + $0x1ec] sm:$0xf]  ;;  %v9112_v4 = vld [vmem:[#allocation8 + $0x200] sm:$0xf0]  ;;  %v10012_v42 = vld [vmem:[#allocation8 + $0x1cc] sm:$0xf0] }
 0x20f   : > { %v11881_v5 = vpop.f32.mrf.mxu2  ;;  %v11886_v36 = vpop.f32.mrf.mxu3  ;;  %v8919_v25 = vor.u32 %v9970_v41, %v8918_v39  ;;  %v1068_v43 = vadd.f32 %v11575_v22, %v1031_v44  ;;  %v952_v57 = vmul.f32 %v11840_v46, %v951_v30  ;;  %v8923_v39 = vor.u32 %v9967_v45, %v8920_v3  ;;  %v8896_v41 = vld [vmem:[#allocation8 + $0x50] sm:$0xf0]  ;;  %v10006_v62 = vld [vmem:[#allocation8 + $0x19c] sm:$0xf0] }
 0x210   : > { %17449 = vst [vmem:[#allocation30_spill] sm:$0xff] %v11881_v5  ;;  %v1684_v14 = vpop.f32.mrf.mxu0  ;;  %v1733_v55 = vpop.f32.mrf.mxu1  ;;  %v9110_v5 = vld [vmem:[#allocation8 + $0x1e8] sm:$0xf]  ;;  %1865 = vmatpush.bf16.msrb.mxu0 %v8943_v9  ;;  %v11914_v56 = vpack.c.bf16 %v1067_v24, %v1065_v2  ;;  %v966_v2 = vsel %vm11905_vm14, %v11844_v60, %v962_v34  ;;  %v9115_v44 = vor.u32 %v10015_v48, %v9112_v4  ;;  %v9961_v9 = vld [vmem:[#allocation8 + $0x3c] sm:$0xf] }
 0x211   : > { %17450 = vst [vmem:[#allocation31_spill] sm:$0xff] %v11886_v36  ;;  %v11893_v36 = vadd.f32 %v1733_v55, %v1684_v14  ;;  %v9135_v14 = vor.u32 %v10024_v38, %v9134_v53  ;;  %v8947_v55 = vor.u32 %v9973_v20, %v8944_v19  ;;  %v9111_v17 = vor.u32 %v10018_v12, %v9110_v5  ;;  %v9964_v20 = vld [vmem:[#allocation8 + $0x4c] sm:$0xf0]  ;;  %v9086_v19 = vld [vmem:[#allocation8 + $0x1b8] sm:$0xf] }
 0x212   : > { %v11921_v12 = vpack.c.bf16 %v1068_v43, %v1066_v54  ;;  %2012 = vmatpush.bf16.msrb.mxu3 %v9139_v50  ;;  %v8895_v30 = vor.u32 %v9964_v20, %v8894_v63  ;;  %v9088_v54 = vld [vmem:[#allocation8 + $0x1d0] sm:$0xf0]  ;;  %v9958_v24 = vld [vmem:[#allocation8 + $0x1c] sm:$0xf0]  ;;  %v956_v60 = vsel %vm11927_vm0, %v11840_v46, %v952_v57  ;;  %v997_v34 = vmul.f32 %v966_v2, %v11669_v26  ;;  %v8872_v46 = vld [vmem:[#allocation8 + $0x20] sm:$0xf0] }
 0x213   : > { %17451 = vst [vmem:[#allocation32_spill] sm:$0xff] %v11893_v36  ;;  %1914 = vmatpush.bf16.msrb.mxu1 %v9135_v14  ;;  %1963 = vmatpush.bf16.msrb.mxu2 %v8947_v55  ;;  %v9087_v14 = vor.u32 %v10012_v42, %v9086_v19  ;;  %v10009_v55 = vld [vmem:[#allocation8 + $0x1bc] sm:$0xf]  ;;  %v998_v50 = vmul.f32 %v966_v2, %v11672_v29  ;;  %v10003_v63 = vld [vmem:[#allocation8 + $0x18c] sm:$0xf] }
 0x214   : > { %1866 = vmatpush.bf16.msrb.mxu0 %v8919_v25  ;;  %v8899_v45 = vor.u32 %v9961_v9, %v8896_v41  ;;  %v9091_v3 = vor.u32 %v10009_v55, %v9088_v54  ;;  %v9955_v25 = vld [vmem:[#allocation8 + $0xc] sm:$0xf]  ;;  %v8871_v48 = vor.u32 %v9958_v24, %v8870_v59  ;;  %v9064_v26 = vld [vmem:[#allocation8 + $0x1a0] sm:$0xf0]  ;;  %v995_v29 = vmul.f32 %v956_v60, %v11640_v51 }
 0x215   : > { %v996_v43 = vmul.f32 %v956_v60, %v11643_v52  ;;  %v1034_v19 = vmul.f32 %v11562_v49, %v997_v34  ;;  %v1035_v42 = vmul.f32 %v11565_v18, %v998_v50  ;;  %v8875_v2 = vor.u32 %v9955_v25, %v8872_v46  ;;  %v10001_v25 = vld [vmem:[#allocation8 + $0x174] sm:$0xf0] }
 0x216   : > { %2013 = vmatpush.bf16.msrb.mxu3 %v9115_v44  ;;  %v1032_v51 = vmul.f32 %v11562_v49, %v995_v29  ;;  %v10049_v46 = vld [vmem:[#allocation8 + $0x2f4] sm:$0xf0] }
 0x217   : > { %v1782_v33 = vpop.f32.mrf.mxu2  ;;  %v1831_v53 = vpop.f32.mrf.mxu3  ;;  %1915 = vmatpush.bf16.msrb.mxu1 %v9111_v17  ;;  %1964 = vmatpush.bf16.msrb.mxu2 %v8923_v39  ;;  %v9067_v39 = vor.u32 %v10003_v63, %v9064_v26  ;;  %v1033_v52 = vmul.f32 %v11565_v18, %v996_v43  ;;  %v1071_v44 = vadd.f32 %v11573_v47, %v1034_v19  ;;  %v9998_v63 = vld [vmem:[#allocation8 + $0x164] sm:$0xf]  ;;  %v9048_v26 = vld [vmem:[#allocation8 + $0x178] sm:$0xf0] }
 0x218   : > { %v11912_v38 = vpop.f32.mrf.mxu0  ;;  %v11917_v40 = vadd.f32 %v1831_v53, %v1782_v33  ;;  %v11919_v61 = vpop.f32.mrf.mxu1  ;;  %v9062_v33 = vld [vmem:[#allocation8 + $0x188] sm:$0xf]  ;;  %1867 = vmatpush.bf16.msrb.mxu0 %v8895_v30  ;;  %v1072_v9 = vadd.f32 %v11575_v22, %v1035_v42  ;;  %v1069_v30 = vadd.f32 %v11573_v47, %v1032_v51  ;;  %v9051_v43 = vor.u32 %v9998_v63, %v9048_v26  ;;  %v9240_v19 = vld [vmem:[#allocation8 + $0x2f8] sm:$0xf0] }
 0x219   : > { %17454 = vst [vmem:[#allocation33_spill] sm:$0xff] %v11912_v38  ;;  %v9063_v4 = vor.u32 %v10006_v62, %v9062_v33  ;;  %v9995_v51 = vld [vmem:[#allocation8 + $0x144] sm:$0xf0]  ;;  %v9000_v63 = vld [vmem:[#allocation8 + $0x118] sm:$0xf0] }
 0x21a   : > { %17455 = vst [vmem:[#allocation34_spill] sm:$0xff] %v11917_v40  ;;  %1703 = vmatmul.bf16.gmra.mxu0 %v11914_v56  ;;  %1752 = vmatmul.bf16.gmra.mxu1 %v11921_v12  ;;  %v11961_v59 = vpack.c.bf16 %v1071_v44, %v1069_v30  ;;  %v9024_v30 = vld [vmem:[#allocation8 + $0x148] sm:$0xf0] }
 0x21b   : > { %17456 = vst [vmem:[#allocation35_spill] sm:$0xff] %v11919_v61  ;;  %1801 = vmatmul.bf16.gmra.mxu2 %v11914_v56  ;;  %1850 = vmatmul.bf16.gmra.mxu3 %v11921_v12 }
 0x21c   : > { %1916 = vmatpush.bf16.msrb.mxu1 %v9087_v14  ;;  %1965 = vmatpush.bf16.msrb.mxu2 %v8899_v45  ;;  %v1070_v14 = vadd.f32 %v11575_v22, %v1033_v52  ;;  %v9214_v52 = vld [vmem:[#allocation8 + $0x2b0] sm:$0xf] }
 0x21d   : > { %2014 = vmatpush.bf16.msrb.mxu3 %v9091_v3  ;;  %1868 = vmatpush.bf16.msrb.mxu0 %v8871_v48  ;;  %v9046_v3 = vld [vmem:[#allocation8 + $0x160] sm:$0xf] }
 0x21e   : > { %v11963_v24 = vpack.c.bf16 %v1072_v9, %v1070_v14  ;;  %v9238_v48 = vld [vmem:[#allocation8 + $0x2e0] sm:$0xf]  ;;  %v10043_v9 = vld [vmem:[#allocation8 + $0x2c4] sm:$0xf0] }
 0x21f   : > { %v11943_v17 = vpop.f32.mrf.mxu2  ;;  %v11947_v53 = vpop.f32.mrf.mxu3  ;;  %v9239_v29 = vor.u32 %v10049_v46, %v9238_v48  ;;  %v9215_v14 = vor.u32 %v10043_v9, %v9214_v52  ;;  %v9986_v46 = vld [vmem:[#allocation8 + $0x104] sm:$0xf]  ;;  %v9983_v52 = vld [vmem:[#allocation8 + $0xe4] sm:$0xf0] }
 0x220   : > { %17459 = vst [vmem:[#allocation36_spill] sm:$0xff] %v11943_v17  ;;  %v1689_v20 = vpop.f32.mrf.mxu0  ;;  %v1738_v57 = vpop.f32.mrf.mxu1  ;;  %1917 = vmatpush.bf16.msrb.mxu1 %v9063_v4  ;;  %1966 = vmatpush.bf16.msrb.mxu2 %v8875_v2  ;;  %v9047_v4 = vor.u32 %v10001_v25, %v9046_v3  ;;  %v9989_v3 = vld [vmem:[#allocation8 + $0x114] sm:$0xf0]  ;;  %v9190_v25 = vld [vmem:[#allocation8 + $0x280] sm:$0xf] }
 0x221   : > { %17460 = vst [vmem:[#allocation37_spill] sm:$0xff] %v11947_v53  ;;  %v11951_v5 = vadd.f32 %v1738_v57, %v1689_v20  ;;  %2015 = vmatpush.bf16.msrb.mxu3 %v9067_v39  ;;  %v10046_v20 = vld [vmem:[#allocation8 + $0x2e4] sm:$0xf]  ;;  %v9022_v39 = vld [vmem:[#allocation8 + $0x130] sm:$0xf] }
 0x222   : > { %2057 = vmatpush.bf16.msra.mxu0 %v9047_v4  ;;  %v9243_v2 = vor.u32 %v10046_v20, %v9240_v19  ;;  %v9023_v44 = vor.u32 %v9995_v51, %v9022_v39  ;;  %v10037_v4 = vld [vmem:[#allocation8 + $0x294] sm:$0xf0]  ;;  %v9003_v20 = vor.u32 %v9986_v46, %v9000_v63  ;;  %v10034_v19 = vld [vmem:[#allocation8 + $0x284] sm:$0xf]  ;;  %v8974_v51 = vld [vmem:[#allocation8 + $0xd0] sm:$0xf] }
 0x223   : > { %17461 = vst [vmem:[#allocation38_spill] sm:$0xff] %v11951_v5  ;;  %v9977_v46 = vld [vmem:[#allocation8 + $0xb4] sm:$0xf0]  ;;  %v9142_v63 = vld [vmem:[#allocation8 + $0x220] sm:$0xf] }
 0x224   : > { %2106 = vmatpush.bf16.msra.mxu1 %v9239_v29  ;;  %2155 = vmatpush.bf16.msra.mxu2 %v9051_v43  ;;  %v9191_v43 = vor.u32 %v10037_v4, %v9190_v25  ;;  %v9168_v25 = vld [vmem:[#allocation8 + $0x268] sm:$0xf0]  ;;  %v8950_v4 = vld [vmem:[#allocation8 + $0xa0] sm:$0xf] }
 0x225   : > { %2204 = vmatpush.bf16.msra.mxu3 %v9243_v2  ;;  %v9192_v2 = vld [vmem:[#allocation8 + $0x298] sm:$0xf0] }
 0x226   : > { %2058 = vmatpush.bf16.msra.mxu0 %v9023_v44  ;;  %v9195_v39 = vor.u32 %v10034_v19, %v9192_v2  ;;  %v9166_v44 = vld [vmem:[#allocation8 + $0x250] sm:$0xf]  ;;  %v9974_v19 = vld [vmem:[#allocation8 + $0xa4] sm:$0xf]  ;;  %v8952_v2 = vld [vmem:[#allocation8 + $0xb8] sm:$0xf0] }
 0x227   : > { %v1787_v41 = vpop.f32.mrf.mxu2  ;;  %v1836_v55 = vpop.f32.mrf.mxu3 }
 0x228   : > { %v11959_v54 = vadd.f32 %v1836_v55, %v1787_v41  ;;  %v11981_v49 = vpop.f32.mrf.mxu0  ;;  %v11983_v18 = vpop.f32.mrf.mxu1  ;;  %v9992_v41 = vld [vmem:[#allocation8 + $0x134] sm:$0xf]  ;;  %2107 = vmatpush.bf16.msra.mxu1 %v9215_v14  ;;  %v10031_v14 = vld [vmem:[#allocation8 + $0x264] sm:$0xf0] }
 0x229   : > { %17463 = vst [vmem:[#allocation40_spill] sm:$0xff] %v11981_v49  ;;  %v9027_v55 = vor.u32 %v9992_v41, %v9024_v30  ;;  %v8975_v30 = vor.u32 %v9983_v52, %v8974_v51  ;;  %v8955_v51 = vor.u32 %v9974_v19, %v8952_v2  ;;  %v10022_v52 = vld [vmem:[#allocation8 + $0x224] sm:$0xf]  ;;  %v10016_v19 = vld [vmem:[#allocation8 + $0x1f4] sm:$0xf] }
 0x22a   : > { %17462 = vst [vmem:[#allocation39_spill] sm:$0xff] %v11959_v54  ;;  %1708 = vmatmul.bf16.gmra.mxu0 %v11961_v59  ;;  %1757 = vmatmul.bf16.gmra.mxu1 %v11963_v24  ;;  %v9120_v2 = vld [vmem:[#allocation8 + $0x208] sm:$0xf0] }
 0x22b   : > { %1806 = vmatmul.bf16.gmra.mxu2 %v11961_v59  ;;  %1855 = vmatmul.bf16.gmra.mxu3 %v11963_v24  ;;  %17464 = vst [vmem:[#allocation41_spill] sm:$0xff] %v11983_v18 }
 0x22c   : > { %2156 = vmatpush.bf16.msra.mxu2 %v9027_v55  ;;  %2108 = vmatpush.bf16.msra.mxu1 %v9191_v43  ;;  %v9980_v55 = vld [vmem:[#allocation8 + $0xd4] sm:$0xf]  ;;  %v8951_v43 = vor.u32 %v9977_v46, %v8950_v4 }
 0x22f   : > { %v11985_v47 = vpop.f32.mrf.mxu2  ;;  %v11987_v22 = vpop.f32.mrf.mxu3 }
 0x230   : > { %17465 = vst [vmem:[#allocation42_spill] sm:$0xff] %v11985_v47  ;;  %2157 = vmatpush.bf16.msra.mxu2 %v9003_v20  ;;  %v10025_v20 = vld [vmem:[#allocation8 + $0x234] sm:$0xf0] }
 0x231   : > { %17466 = vst [vmem:[#allocation43_spill] sm:$0xff] %v11987_v22 }
 0x23a   : > { %1869 = vmatmul.bf16.vlgmr.msrb.gmra.mxu0 %v11605_v1  ;;  %1918 = vmatmul.bf16.vlgmr.msrb.gmra.mxu1 %v11607_v35 }
 0x23b   : > { %1967 = vmatmul.bf16.vlgmr.msrb.gmra.mxu2 %v11605_v1  ;;  %2016 = vmatmul.bf16.vlgmr.msrb.gmra.mxu3 %v11607_v35 }
 0x24a   : > { %1874 = vmatmul.bf16.gmra.mxu0 %v11697_v13  ;;  %1923 = vmatmul.bf16.gmra.mxu1 %v11699_v58 }
 0x24b   : > { %1972 = vmatmul.bf16.gmra.mxu2 %v11697_v13  ;;  %2021 = vmatmul.bf16.gmra.mxu3 %v11699_v58 }
 0x25a   : > { %1879 = vmatmul.bf16.gmra.mxu0 %v11720_v21  ;;  %1928 = vmatmul.bf16.gmra.mxu1 %v11722_v10 }
 0x25b   : > { %1977 = vmatmul.bf16.gmra.mxu2 %v11720_v21  ;;  %2026 = vmatmul.bf16.gmra.mxu3 %v11722_v10 }
 0x26a   : > { %1884 = vmatmul.bf16.gmra.mxu0 %v11740_v37  ;;  %1933 = vmatmul.bf16.gmra.mxu1 %v11742_v31 }
 0x26b   : > { %1982 = vmatmul.bf16.gmra.mxu2 %v11740_v37  ;;  %2031 = vmatmul.bf16.gmra.mxu3 %v11742_v31 }
 0x26c   : > { %v1694_v33 = vpop.f32.mrf.mxu0  ;;  %v1743_v62 = vpop.f32.mrf.mxu1 }
 0x26d   : > { %v11993_v60 = vadd.f32 %v1743_v62, %v1694_v33  ;;  %v10040_v33 = vld [vmem:[#allocation8 + $0x2b4] sm:$0xf]  ;;  %v9216_v62 = vld [vmem:[#allocation8 + $0x2c8] sm:$0xf0] }
 0x26f   : > { %17467 = vst [vmem:[#allocation44_spill] sm:$0xff] %v11993_v60 }
 0x273   : > { %v1792_v34 = vpop.f32.mrf.mxu2  ;;  %v1841_v50 = vpop.f32.mrf.mxu3 }
 0x274   : > { %v11995_v45 = vadd.f32 %v1841_v50, %v1792_v34  ;;  %v12001_v42 = vpop.f32.mrf.mxu0  ;;  %v12003_v57 = vpop.f32.mrf.mxu1  ;;  %v9219_v34 = vor.u32 %v10040_v33, %v9216_v62  ;;  %v8998_v50 = vld [vmem:[#allocation8 + $0x100] sm:$0xf]  ;;  %v8976_v33 = vld [vmem:[#allocation8 + $0xe8] sm:$0xf0] }
 0x275   : > { %17469 = vst [vmem:[#allocation46_spill] sm:$0xff] %v12001_v42  ;;  %v8999_v48 = vor.u32 %v9989_v3, %v8998_v50  ;;  %v8979_v50 = vor.u32 %v9980_v55, %v8976_v33  ;;  %v10028_v3 = vld [vmem:[#allocation8 + $0x254] sm:$0xf]  ;;  %v9971_v55 = vld [vmem:[#allocation8 + $0x84] sm:$0xf0] }
 0x276   : > { %17468 = vst [vmem:[#allocation45_spill] sm:$0xff] %v11995_v45  ;;  %2205 = vmatpush.bf16.msra.mxu3 %v9219_v34  ;;  %v9167_v34 = vor.u32 %v10031_v14, %v9166_v44  ;;  %v9144_v44 = vld [vmem:[#allocation8 + $0x238] sm:$0xf0]  ;;  %v8926_v14 = vld [vmem:[#allocation8 + $0x70] sm:$0xf] }
 0x277   : > { %17470 = vst [vmem:[#allocation47_spill] sm:$0xff] %v12003_v57  ;;  %2059 = vmatpush.bf16.msra.mxu0 %v8999_v48  ;;  %v9171_v48 = vor.u32 %v10028_v3, %v9168_v25  ;;  %2158 = vmatpush.bf16.msra.mxu2 %v8979_v50  ;;  %v9118_v33 = vld [vmem:[#allocation8 + $0x1f0] sm:$0xf]  ;;  %v8927_v45 = vor.u32 %v9971_v55, %v8926_v14  ;;  %v9968_v50 = vld [vmem:[#allocation8 + $0x74] sm:$0xf] }
 0x278   : > { %2109 = vmatpush.bf16.msra.mxu1 %v9167_v34  ;;  %v10019_v34 = vld [vmem:[#allocation8 + $0x204] sm:$0xf0]  ;;  %v9962_v14 = vld [vmem:[#allocation8 + $0x44] sm:$0xf]  ;;  %v8904_v55 = vld [vmem:[#allocation8 + $0x58] sm:$0xf0] }
 0x27a   : > { %1889 = vmatmul.bf16.gmra.mxu0 %v11771_v0  ;;  %1938 = vmatmul.bf16.gmra.mxu1 %v11773_v6 }
 0x27b   : > { %1987 = vmatmul.bf16.gmra.mxu2 %v11771_v0  ;;  %2036 = vmatmul.bf16.gmra.mxu3 %v11773_v6  ;;  %v12005_v26 = vpop.f32.mrf.mxu2  ;;  %v12007_v29 = vpop.f32.mrf.mxu3 }
 0x27c   : > { %17471 = vst [vmem:[#allocation48_spill] sm:$0xff] %v12005_v26  ;;  %2206 = vmatpush.bf16.msra.mxu3 %v9195_v39  ;;  %2060 = vmatpush.bf16.msra.mxu0 %v8975_v30  ;;  %v9143_v39 = vor.u32 %v10025_v20, %v9142_v63  ;;  %v8928_v63 = vld [vmem:[#allocation8 + $0x88] sm:$0xf0]  ;;  %v10013_v26 = vld [vmem:[#allocation8 + $0x1d4] sm:$0xf0] }
 0x27d   : > { %17472 = vst [vmem:[#allocation49_spill] sm:$0xff] %v12007_v29  ;;  %2159 = vmatpush.bf16.msra.mxu2 %v8955_v51  ;;  %v8907_v51 = vor.u32 %v9962_v14, %v8904_v55  ;;  %v10004_v14 = vld [vmem:[#allocation8 + $0x194] sm:$0xf]  ;;  %v9072_v55 = vld [vmem:[#allocation8 + $0x1a8] sm:$0xf0] }
 0x27e   : > { %2110 = vmatpush.bf16.msra.mxu1 %v9143_v39 }
 0x280   : > { %2207 = vmatpush.bf16.msra.mxu3 %v9171_v48  ;;  %2061 = vmatpush.bf16.msra.mxu0 %v8951_v43  ;;  %v9119_v48 = vor.u32 %v10019_v34, %v9118_v33  ;;  %v8931_v43 = vor.u32 %v9968_v50, %v8928_v63  ;;  %v10010_v33 = vld [vmem:[#allocation8 + $0x1c4] sm:$0xf]  ;;  %v8878_v50 = vld [vmem:[#allocation8 + $0x10] sm:$0xf]  ;;  %v9959_v63 = vld [vmem:[#allocation8 + $0x24] sm:$0xf0] }
 0x282   : > { %2111 = vmatpush.bf16.msra.mxu1 %v9119_v48  ;;  %2160 = vmatpush.bf16.msra.mxu2 %v8931_v43 }
 0x284   : > { %2062 = vmatpush.bf16.msra.mxu0 %v8927_v45 }
 0x286   : > { %2161 = vmatpush.bf16.msra.mxu2 %v8907_v51 }
 0x287   : > { %v1699_v9 = vpop.f32.mrf.mxu0  ;;  %v1748_v41 = vpop.f32.mrf.mxu1 }
 0x288   : > { %v1749_v62 = vadd.f32 %v1748_v41, %v1699_v9  ;;  %v9147_v9 = vor.u32 %v10022_v52, %v9144_v44  ;;  %v9123_v52 = vor.u32 %v10016_v19, %v9120_v2  ;;  %v8879_v2 = vor.u32 %v9959_v63, %v8878_v50 }
 0x28a   : > { %1894 = vmatmul.bf16.gmra.mxu0 %v11865_v28  ;;  %1943 = vmatmul.bf16.gmra.mxu1 %v11867_v11  ;;  %v2263_v3 = vpack.c.bf16 %v1749_v62, %v1749_v62  ;;  %v8902_v62 = vld [vmem:[#allocation8 + $0x40] sm:$0xf] }
 0x28b   : > { %1992 = vmatmul.bf16.gmra.mxu2 %v11865_v28  ;;  %2041 = vmatmul.bf16.gmra.mxu3 %v11867_v11 }
 0x28c   : > { %2208 = vmatpush.bf16.msra.mxu3 %v9147_v9  ;;  %v12015_v60 = vunpack.c.l.b16 %v2263_v3  ;;  %v9096_v9 = vld [vmem:[#allocation8 + $0x1d8] sm:$0xf0] }
 0x28d   : > { %v9099_v45 = vor.u32 %v10010_v33, %v9096_v9  ;;  %v9075_v9 = vor.u32 %v10004_v14, %v9072_v55 }
 0x28e   : > { %v1797_v41 = vpop.f32.mrf.mxu2  ;;  %v1846_v30 = vpop.f32.mrf.mxu3  ;;  %17473 = vst [vmem:[#allocation50_spill] sm:$0xff] %v12015_v60 }
 0x28f   : > { %v12013_v25 = vadd.f32 %v1846_v30, %v1797_v41  ;;  %v1701_v4 = vpop.f32.mrf.mxu0  ;;  %v1750_v46 = vpop.f32.mrf.mxu1  ;;  %v9965_v41 = vld [vmem:[#allocation8 + $0x54] sm:$0xf0]  ;;  %v9094_v30 = vld [vmem:[#allocation8 + $0x1c0] sm:$0xf] }
 0x290   : > { %v1751_v20 = vadd.f32 %v1750_v46, %v1701_v4  ;;  %v8903_v29 = vor.u32 %v9965_v41, %v8902_v62  ;;  %v9095_v39 = vor.u32 %v10013_v26, %v9094_v30  ;;  %2209 = vmatpush.bf16.msra.mxu3 %v9123_v52  ;;  %v9956_v62 = vld [vmem:[#allocation8 + $0x14] sm:$0xf]  ;;  %v8880_v52 = vld [vmem:[#allocation8 + $0x28] sm:$0xf0] }
 0x291   : > { %v2279_v19 = vpack.c.bf16 %v12013_v25, %v12013_v25  ;;  %v8883_v30 = vor.u32 %v9956_v62, %v8880_v52 }
 0x292   : > { %v2264_v44 = vpack.c.bf16 %v1751_v20, %v1751_v20  ;;  %2063 = vmatpush.bf16.msra.mxu0 %v8903_v29  ;;  %v9070_v20 = vld [vmem:[#allocation8 + $0x190] sm:$0xf]  ;;  %2112 = vmatpush.bf16.msra.mxu1 %v9095_v39 }
 0x293   : > { %v12025_v25 = vunpack.c.l.b16 %v2279_v19  ;;  %2162 = vmatpush.bf16.msra.mxu2 %v8883_v30 }
 0x294   : > { %v12017_v4 = vunpack.c.l.b16 %v2264_v44  ;;  %v10007_v44 = vld [vmem:[#allocation8 + $0x1a4] sm:$0xf0]  ;;  %2210 = vmatpush.bf16.msra.mxu3 %v9099_v45 }
 0x295   : > { %v9071_v41 = vor.u32 %v10007_v44, %v9070_v20  ;;  %17475 = vst [vmem:[#allocation52_spill] sm:$0xff] %v12025_v25 }
 0x296   : > { %17474 = vst [vmem:[#allocation51_spill] sm:$0xff] %v12017_v4  ;;  %v1799_v46 = vpop.f32.mrf.mxu2  ;;  %v1848_v34 = vpop.f32.mrf.mxu3  ;;  %2064 = vmatpush.bf16.msra.mxu0 %v8879_v2 }
 0x297   : > { %v1849_v48 = vadd.f32 %v1848_v34, %v1799_v46  ;;  %v1704_v43 = vpop.f32.mrf.mxu0  ;;  %v1753_v26 = vpop.f32.mrf.mxu1  ;;  %2113 = vmatpush.bf16.msra.mxu1 %v9071_v41 }
 0x298   : > { %v1754_v29 = vadd.f32 %v1753_v26, %v1704_v43  ;;  %2211 = vmatpush.bf16.msra.mxu3 %v9075_v9 }
 0x299   : > { %v2280_v33 = vpack.c.bf16 %v1849_v48, %v1849_v48 }
 0x29a   : > { %1899 = vmatmul.bf16.gmra.mxu0 %v11914_v56  ;;  %1948 = vmatmul.bf16.gmra.mxu1 %v11921_v12  ;;  %v2265_v20 = vpack.c.bf16 %v1754_v29, %v1754_v29 }
 0x29b   : > { %v12027_v46 = vunpack.c.l.b16 %v2280_v33  ;;  %1997 = vmatmul.bf16.gmra.mxu2 %v11914_v56  ;;  %2046 = vmatmul.bf16.gmra.mxu3 %v11921_v12 }
 0x29c   : > { %v12033_v43 = vunpack.c.l.b16 %v2265_v20 }
 0x29d   : > { %17476 = vst [vmem:[#allocation53_spill] sm:$0xff] %v12027_v46 }
 0x29e   : > { %v1802_v51 = vpop.f32.mrf.mxu2  ;;  %v1851_v45 = vpop.f32.mrf.mxu3  ;;  %17477 = vst [vmem:[#allocation54_spill] sm:$0xff] %v12033_v43 }
 0x29f   : > { %v1852_v34 = vadd.f32 %v1851_v45, %v1802_v51  ;;  %v1706_v50 = vpop.f32.mrf.mxu0  ;;  %v1755_v63 = vpop.f32.mrf.mxu1 }
 0x2a0   : > { %v1756_v19 = vadd.f32 %v1755_v63, %v1706_v50 }
 0x2a1   : > { %v2281_v52 = vpack.c.bf16 %v1852_v34, %v1852_v34 }
 0x2a2   : > { %v2266_v48 = vpack.c.bf16 %v1756_v19, %v1756_v19 }
 0x2a3   : > { %v12041_v29 = vunpack.c.l.b16 %v2281_v52 }
 0x2a4   : > { %v12035_v26 = vunpack.c.l.b16 %v2266_v48 }
 0x2a5   : > { %17479 = vst [vmem:[#allocation56_spill] sm:$0xff] %v12041_v29 }
 0x2a6   : > { %17478 = vst [vmem:[#allocation55_spill] sm:$0xff] %v12035_v26  ;;  %v1804_v2 = vpop.f32.mrf.mxu2  ;;  %v1853_v44 = vpop.f32.mrf.mxu3 }
 0x2a7   : > { %v1854_v41 = vadd.f32 %v1853_v44, %v1804_v2  ;;  %v1709_v30 = vpop.f32.mrf.mxu0  ;;  %v1758_v14 = vpop.f32.mrf.mxu1 }
 0x2a8   : > { %v1759_v55 = vadd.f32 %v1758_v14, %v1709_v30 }
 0x2a9   : > { %v2282_v33 = vpack.c.bf16 %v1854_v41, %v1854_v41 }
 0x2aa   : > { %1904 = vmatmul.bf16.gmra.mxu0 %v11961_v59  ;;  %1953 = vmatmul.bf16.gmra.mxu1 %v11963_v24  ;;  %v2267_v19 = vpack.c.bf16 %v1759_v55, %v1759_v55 }
 0x2ab   : > { %v12043_v9 = vunpack.c.l.b16 %v2282_v33  ;;  %2002 = vmatmul.bf16.gmra.mxu2 %v11961_v59  ;;  %2051 = vmatmul.bf16.gmra.mxu3 %v11963_v24 }
 0x2ac   : > { %v12049_v44 = vunpack.c.l.b16 %v2267_v19 }
 0x2ad   : > { %17480 = vst [vmem:[#allocation57_spill] sm:$0xff] %v12043_v9 }
 0x2ae   : > { %v1807_v45 = vpop.f32.mrf.mxu2  ;;  %v1856_v34 = vpop.f32.mrf.mxu3  ;;  %17481 = vst [vmem:[#allocation58_spill] sm:$0xff] %v12049_v44 }
 0x2af   : > { %v1857_v50 = vadd.f32 %v1856_v34, %v1807_v45  ;;  %v1711_v63 = vpop.f32.mrf.mxu0  ;;  %v1760_v20 = vpop.f32.mrf.mxu1 }
 0x2b0   : > { %v1761_v48 = vadd.f32 %v1760_v20, %v1711_v63 }
 0x2b1   : > { %v2283_v33 = vpack.c.bf16 %v1857_v50, %v1857_v50 }
 0x2b2   : > { %v2268_v2 = vpack.c.bf16 %v1761_v48, %v1761_v48 }
 0x2b3   : > { %v12057_v55 = vunpack.c.l.b16 %v2283_v33 }
 0x2b4   : > { %v12051_v52 = vunpack.c.l.b16 %v2268_v2 }
 0x2b5   : > { %17483 = vst [vmem:[#allocation60_spill] sm:$0xff] %v12057_v55 }
 0x2b6   : > { %17482 = vst [vmem:[#allocation59_spill] sm:$0xff] %v12051_v52  ;;  %v1809_v41 = vpop.f32.mrf.mxu2  ;;  %v1858_v30 = vpop.f32.mrf.mxu3 }
 0x2b7   : > { %v1859_v62 = vadd.f32 %v1858_v30, %v1809_v41  ;;  %v1870_v51 = vpop.f32.mrf.mxu0  ;;  %v1919_v39 = vpop.f32.mrf.mxu1 }
 0x2b8   : > { %v1920_v3 = vadd.f32 %v1919_v39, %v1870_v51 }
 0x2b9   : > { %v2284_v45 = vpack.c.bf16 %v1859_v62, %v1859_v62 }
 0x2ba   : > { %2065 = vmatmul.bf16.vlgmr.msra.gmra.mxu0 %v11605_v1  ;;  %2114 = vmatmul.bf16.vlgmr.msra.gmra.mxu1 %v11607_v35  ;;  %v2285_v51 = vpack.c.bf16 %v1920_v3, %v1920_v3 }
 0x2bb   : > { %v12059_v34 = vunpack.c.l.b16 %v2284_v45  ;;  %2163 = vmatmul.bf16.vlgmr.msra.gmra.mxu2 %v11605_v1  ;;  %2212 = vmatmul.bf16.vlgmr.msra.gmra.mxu3 %v11607_v35 }
 0x2bc   : > { %v12065_v41 = vunpack.c.l.b16 %v2285_v51 }
 0x2bd   : > { %17484 = vst [vmem:[#allocation61_spill] sm:$0xff] %v12059_v34 }
 0x2be   : > { %v1968_v63 = vpop.f32.mrf.mxu2  ;;  %v2017_v20 = vpop.f32.mrf.mxu3 }
 0x2bf   : > { %v2018_v19 = vadd.f32 %v2017_v20, %v1968_v63  ;;  %v1872_v39 = vpop.f32.mrf.mxu0  ;;  %v1921_v62 = vpop.f32.mrf.mxu1 }
 0x2c0   : > { %v1922_v48 = vadd.f32 %v1921_v62, %v1872_v39 }
 0x2c1   : > { %v2301_v35 = vpack.c.bf16 %v2018_v19, %v2018_v19 }
 0x2c2   : > { %v2286_v2 = vpack.c.bf16 %v1922_v48, %v1922_v48 }
 0x2c3   : > { %v12073_v3 = vunpack.c.l.b16 %v2301_v35 }
 0x2c4   : > { %v12067_v30 = vunpack.c.l.b16 %v2286_v2 }
 0x2c5   : > { %17485 = vst [vmem:[#allocation62_spill] sm:$0xff] %v12073_v3 }
 0x2c6   : > { %v1970_v33 = vpop.f32.mrf.mxu2  ;;  %v2019_v45 = vpop.f32.mrf.mxu3 }
 0x2c7   : > { %v2020_v14 = vadd.f32 %v2019_v45, %v1970_v33  ;;  %v1875_v50 = vpop.f32.mrf.mxu0  ;;  %v1924_v55 = vpop.f32.mrf.mxu1 }
 0x2c8   : > { %v1925_v34 = vadd.f32 %v1924_v55, %v1875_v50 }
 0x2c9   : > { %v2302_v63 = vpack.c.bf16 %v2020_v14, %v2020_v14 }
 0x2ca   : > { %2070 = vmatmul.bf16.gmra.mxu0 %v11697_v13  ;;  %2119 = vmatmul.bf16.gmra.mxu1 %v11699_v58  ;;  %v2287_v50 = vpack.c.bf16 %v1925_v34, %v1925_v34 }
 0x2cb   : > { %v12075_v20 = vunpack.c.l.b16 %v2302_v63  ;;  %2168 = vmatmul.bf16.gmra.mxu2 %v11697_v13  ;;  %2217 = vmatmul.bf16.gmra.mxu3 %v11699_v58 }
 0x2cc   : > { %v12081_v33 = vunpack.c.l.b16 %v2287_v50 }
 0x2cd   : > { %17486 = vst [vmem:[#allocation63_spill] sm:$0xff] %v12075_v20 }
 0x2ce   : > { %v1973_v39 = vpop.f32.mrf.mxu2  ;;  %v2022_v62 = vpop.f32.mrf.mxu3 }
 0x2cf   : > { %v2023_v51 = vadd.f32 %v2022_v62, %v1973_v39  ;;  %v1877_v55 = vpop.f32.mrf.mxu0  ;;  %v1926_v14 = vpop.f32.mrf.mxu1 }
 0x2d0   : > { %v1927_v48 = vadd.f32 %v1926_v14, %v1877_v55 }
 0x2d1   : > { %v2303_v58 = vpack.c.bf16 %v2023_v51, %v2023_v51 }
 0x2d2   : > { %v2288_v2 = vpack.c.bf16 %v1927_v48, %v1927_v48 }
 0x2d3   : > { %v12089_v34 = vunpack.c.l.b16 %v2303_v58 }
 0x2d4   : > { %v12083_v45 = vunpack.c.l.b16 %v2288_v2 }
 0x2d6   : > { %v1975_v35 = vpop.f32.mrf.mxu2  ;;  %v2024_v63 = vpop.f32.mrf.mxu3 }
 0x2d7   : > { %v2025_v1 = vadd.f32 %v2024_v63, %v1975_v35  ;;  %v1880_v19 = vpop.f32.mrf.mxu0  ;;  %v1929_v44 = vpop.f32.mrf.mxu1 }
 0x2d8   : > { %v1930_v52 = vadd.f32 %v1929_v44, %v1880_v19 }
 0x2d9   : > { %v2304_v39 = vpack.c.bf16 %v2025_v1, %v2025_v1 }
 0x2da   : > { %2075 = vmatmul.bf16.gmra.mxu0 %v11720_v21  ;;  %2124 = vmatmul.bf16.gmra.mxu1 %v11722_v10  ;;  %v2289_v19 = vpack.c.bf16 %v1930_v52, %v1930_v52 }
 0x2db   : > { %v12091_v62 = vunpack.c.l.b16 %v2304_v39  ;;  %2173 = vmatmul.bf16.gmra.mxu2 %v11720_v21  ;;  %2222 = vmatmul.bf16.gmra.mxu3 %v11722_v10 }
 0x2dc   : > { %v12097_v35 = vunpack.c.l.b16 %v2289_v19 }
 0x2de   : > { %v1978_v55 = vpop.f32.mrf.mxu2  ;;  %v2027_v14 = vpop.f32.mrf.mxu3 }
 0x2df   : > { %v2028_v50 = vadd.f32 %v2027_v14, %v1978_v55  ;;  %v1882_v44 = vpop.f32.mrf.mxu0  ;;  %v1931_v1 = vpop.f32.mrf.mxu1 }
 0x2e0   : > { %v1932_v48 = vadd.f32 %v1931_v1, %v1882_v44 }
 0x2e1   : > { %v2305_v10 = vpack.c.bf16 %v2028_v50, %v2028_v50 }
 0x2e2   : > { %v2290_v2 = vpack.c.bf16 %v1932_v48, %v1932_v48 }
 0x2e3   : > { %v12105_v52 = vunpack.c.l.b16 %v2305_v10 }
 0x2e4   : > { %v12099_v63 = vunpack.c.l.b16 %v2290_v2 }
 0x2e6   : > { %v1980_v58 = vpop.f32.mrf.mxu2  ;;  %v2029_v39 = vpop.f32.mrf.mxu3 }
 0x2e7   : > { %v2030_v13 = vadd.f32 %v2029_v39, %v1980_v58  ;;  %v1885_v51 = vpop.f32.mrf.mxu0  ;;  %v1934_v29 = vpop.f32.mrf.mxu1 }
 0x2e8   : > { %v1935_v9 = vadd.f32 %v1934_v29, %v1885_v51 }
 0x2e9   : > { %v2306_v55 = vpack.c.bf16 %v2030_v13, %v2030_v13 }
 0x2ea   : > { %2080 = vmatmul.bf16.gmra.mxu0 %v11740_v37  ;;  %2129 = vmatmul.bf16.gmra.mxu1 %v11742_v31  ;;  %v2291_v51 = vpack.c.bf16 %v1935_v9, %v1935_v9 }
 0x2eb   : > { %v12107_v14 = vunpack.c.l.b16 %v2306_v55  ;;  %2178 = vmatmul.bf16.gmra.mxu2 %v11740_v37  ;;  %2227 = vmatmul.bf16.gmra.mxu3 %v11742_v31 }
 0x2ec   : > { %v12113_v58 = vunpack.c.l.b16 %v2291_v51 }
 0x2ee   : > { %v1983_v44 = vpop.f32.mrf.mxu2  ;;  %v2032_v1 = vpop.f32.mrf.mxu3 }
 0x2ef   : > { %v2033_v19 = vadd.f32 %v2032_v1, %v1983_v44  ;;  %v1887_v29 = vpop.f32.mrf.mxu0  ;;  %v1936_v13 = vpop.f32.mrf.mxu1 }
 0x2f0   : > { %v1937_v48 = vadd.f32 %v1936_v13, %v1887_v29 }
 0x2f1   : > { %v2307_v31 = vpack.c.bf16 %v2033_v19, %v2033_v19 }
 0x2f2   : > { %v2292_v2 = vpack.c.bf16 %v1937_v48, %v1937_v48 }
 0x2f3   : > { %v12123_v9 = vunpack.c.l.b16 %v2307_v31 }
 0x2f4   : > { %v12115_v39 = vunpack.c.l.b16 %v2292_v2 }
 0x2f6   : > { %v1985_v10 = vpop.f32.mrf.mxu2  ;;  %v2034_v55 = vpop.f32.mrf.mxu3 }
 0x2f7   : > { %v2035_v21 = vadd.f32 %v2034_v55, %v1985_v10  ;;  %v1890_v50 = vpop.f32.mrf.mxu0  ;;  %v1939_v43 = vpop.f32.mrf.mxu1 }
 0x2f8   : > { %v12119_v26 = vadd.f32 %v1939_v43, %v1890_v50 }
 0x2f9   : > { %v2308_v44 = vpack.c.bf16 %v2035_v21, %v2035_v21 }
 0x2fa   : > { %2085 = vmatmul.bf16.gmra.mxu0 %v11771_v0  ;;  %2134 = vmatmul.bf16.gmra.mxu1 %v11773_v6 }
 0x2fb   : > { %v12125_v1 = vunpack.c.l.b16 %v2308_v44  ;;  %2183 = vmatmul.bf16.gmra.mxu2 %v11771_v0  ;;  %2232 = vmatmul.bf16.gmra.mxu3 %v11773_v6 }
 0x2fe   : > { %v1988_v29 = vpop.f32.mrf.mxu2  ;;  %v2037_v13 = vpop.f32.mrf.mxu3 }
 0x2ff   : > { %v12131_v43 = vadd.f32 %v2037_v13, %v1988_v29  ;;  %v12133_v21 = vpop.f32.mrf.mxu0  ;;  %v12135_v50 = vpop.f32.mrf.mxu1 }
 0x306   : > { %v12137_v51 = vpop.f32.mrf.mxu2  ;;  %v12139_v48 = vpop.f32.mrf.mxu3 }
 0x307   : > { %v1895_v2 = vpop.f32.mrf.mxu0  ;;  %v1944_v10 = vpop.f32.mrf.mxu1 }
 0x30a   : > { %2090 = vmatmul.bf16.gmra.mxu0 %v11865_v28  ;;  %2139 = vmatmul.bf16.gmra.mxu1 %v11867_v11 }
 0x30b   : > { %2188 = vmatmul.bf16.gmra.mxu2 %v11865_v28  ;;  %2237 = vmatmul.bf16.gmra.mxu3 %v11867_v11 }
 0x30e   : > { %v12145_v0 = vpop.f32.mrf.mxu2  ;;  %v12147_v6 = vpop.f32.mrf.mxu3 }
 0x30f   : > { %v1897_v55 = vpop.f32.mrf.mxu0  ;;  %v1946_v31 = vpop.f32.mrf.mxu1 }
 0x316   : > { %v12149_v44 = vpop.f32.mrf.mxu2  ;;  %v12151_v29 = vpop.f32.mrf.mxu3 }
 0x317   : > { %v1900_v13 = vpop.f32.mrf.mxu0  ;;  %v1949_v19 = vpop.f32.mrf.mxu1 }
 0x318   : > { %v1950_v53 = vadd.f32 %v1949_v19, %v1900_v13 }
 0x31a   : > { %2095 = vmatmul.bf16.gmra.mxu0 %v11914_v56  ;;  %2144 = vmatmul.bf16.gmra.mxu1 %v11921_v12 }
 0x31b   : > { %2193 = vmatmul.bf16.gmra.mxu2 %v11914_v56  ;;  %2242 = vmatmul.bf16.gmra.mxu3 %v11921_v12 }
 0x31e   : > { %v1998_v28 = vpop.f32.mrf.mxu2  ;;  %v2047_v11 = vpop.f32.mrf.mxu3 }
 0x31f   : > { %v1902_v37 = vpop.f32.mrf.mxu0  ;;  %v1951_v25 = vpop.f32.mrf.mxu1 }
 0x320   : > { %v1952_v18 = vadd.f32 %v1951_v25, %v1902_v37  ;;  %v1947_v25 = vadd.f32 %v1946_v31, %v1897_v55  ;;  %v2043_v55 = vadd.f32 %v12147_v6, %v12145_v0  ;;  %v2040_v0 = vadd.f32 %v12139_v48, %v12137_v51 }
 0x322   : > { %v2298_v61 = vpack.c.bf16 %v1952_v18, %v1952_v18  ;;  %v2296_v19 = vpack.c.bf16 %v1947_v25, %v1947_v25 }
 0x326   : > { %v2000_v46 = vpop.f32.mrf.mxu2  ;;  %v2049_v60 = vpop.f32.mrf.mxu3 }
 0x327   : > { %v1905_v4 = vpop.f32.mrf.mxu0  ;;  %v1954_v57 = vpop.f32.mrf.mxu1 }
 0x328   : > { %v1955_v42 = vadd.f32 %v1954_v57, %v1905_v4  ;;  %v2297_v4 = vpack.c.bf16 %v1950_v53, %v1950_v53 }
 0x32a   : > { %2100 = vmatmul.bf16.gmra.mxu0 %v11961_v59  ;;  %2149 = vmatmul.bf16.gmra.mxu1 %v11963_v24  ;;  %v2299_v47 = vpack.c.bf16 %v1955_v42, %v1955_v42  ;;  %v2050_v42 = vadd.f32 %v2049_v60, %v2000_v46  ;;  %v2425_v18 = vunpack.c.l.b16 %v2297_v4  ;;  %v2045_v46 = vadd.f32 %v12151_v29, %v12149_v44 }
 0x32b   : > { %2198 = vmatmul.bf16.gmra.mxu2 %v11961_v59  ;;  %2247 = vmatmul.bf16.gmra.mxu3 %v11963_v24  ;;  %v2311_v4 = vpack.c.bf16 %v2043_v55, %v2043_v55 }
 0x32c   : > { %v2427_v17 = vunpack.c.l.b16 %v2299_v47 }
 0x32e   : > { %v2003_v56 = vpop.f32.mrf.mxu2  ;;  %v2052_v54 = vpop.f32.mrf.mxu3 }
 0x32f   : > { %v1907_v12 = vpop.f32.mrf.mxu0  ;;  %v1956_v22 = vpop.f32.mrf.mxu1  ;;  %v2053_v40 = vadd.f32 %v2052_v54, %v2003_v56  ;;  %v2048_v54 = vadd.f32 %v2047_v11, %v1998_v28  ;;  %v2312_v11 = vpack.c.bf16 %v2045_v46, %v2045_v46 }
 0x330   : > { %v1957_v5 = vadd.f32 %v1956_v22, %v1907_v12 }
 0x331   : > { %v2315_v59 = vpack.c.bf16 %v2053_v40, %v2053_v40  ;;  %v2313_v13 = vpack.c.bf16 %v2048_v54, %v2048_v54  ;;  %v2569_v6 = vunpack.c.l.b16 %v2312_v11 }
 0x332   : > { %v2300_v49 = vpack.c.bf16 %v1957_v5, %v1957_v5  ;;  %v2426_v5 = vunpack.c.l.b16 %v2298_v61 }
 0x333   : > { %v2572_v37 = vunpack.c.l.b16 %v2315_v59  ;;  %v2570_v31 = vunpack.c.l.b16 %v2313_v13 }
 0x334   : > { %v2428_v36 = vunpack.c.l.b16 %v2300_v49  ;;  %v1945_v49 = vadd.f32 %v1944_v10, %v1895_v2  ;;  %v1942_v2 = vadd.f32 %v12135_v50, %v12133_v21  ;;  %v2424_v10 = vunpack.c.l.b16 %v2296_v19 }
 0x335   : > { %v2293_v21 = vpack.c.bf16 %v12119_v26, %v12119_v26 }
 0x336   : > { %v2436_v38 = vpack.c.b16 %v2428_v36, %v2427_v17  ;;  %v2005_v7 = vpop.f32.mrf.mxu2  ;;  %v2054_v3 = vpop.f32.mrf.mxu3  ;;  %v2314_v36 = vpack.c.bf16 %v2050_v42, %v2050_v42  ;;  %v2295_v61 = vpack.c.bf16 %v1945_v49, %v1945_v49  ;;  %v2294_v12 = vpack.c.bf16 %v1942_v2, %v1942_v2 }
 0x337   : > { %v2055_v20 = vadd.f32 %v2054_v3, %v2005_v7  ;;  %v2066_v24 = vpop.f32.mrf.mxu0  ;;  %v2115_v57 = vpop.f32.mrf.mxu1  ;;  %v2435_v3 = vpack.c.b16 %v2426_v5, %v2425_v18  ;;  %v2421_v25 = vunpack.c.l.b16 %v2293_v21  ;;  %v2310_v5 = vpack.c.bf16 %v2040_v0, %v2040_v0 }
 0x338   : > { %v12161_v23 = vadd.f32 %v2115_v57, %v2066_v24  ;;  %2445 = vmatpush.bf16.xpose.msrb.mxu0 %v2436_v38  ;;  %v2423_v28 = vunpack.c.l.b16 %v2295_v61  ;;  %v2422_v42 = vunpack.c.l.b16 %v2294_v12  ;;  %v2309_v18 = vpack.c.bf16 %v12131_v43, %v12131_v43 }
 0x339   : > { %v2316_v22 = vpack.c.bf16 %v2055_v20, %v2055_v20  ;;  %v2571_v20 = vunpack.c.l.b16 %v2314_v36  ;;  %v2567_v51 = vunpack.c.l.b16 %v2310_v5  ;;  %v17492_v43 = vpack.c.b16 %v12115_v39, %v12113_v58 }
 0x33a   : > { %17487 = vst [vmem:[#allocation64_spill] sm:$0xff] %v12161_v23  ;;  %v2434_v57 = vpack.c.b16 %v2424_v10, %v2423_v28  ;;  %v2433_v49 = vpack.c.b16 %v2422_v42, %v2421_v25  ;;  %v2566_v48 = vunpack.c.l.b16 %v2309_v18  ;;  %v17494_v10 = vpack.c.b16 %v12125_v1, %v12123_v9  ;;  %v17502_v25 = vld [vmem:[#allocation62_spill] sm:$0xff] }
 0x33b   : > { %v2573_v47 = vunpack.c.l.b16 %v2316_v22  ;;  %v2580_v56 = vpack.c.b16 %v2571_v20, %v2570_v31  ;;  %v2568_v22 = vunpack.c.l.b16 %v2311_v4  ;;  %v17495_v28 = vpack.c.b16 %v12099_v63, %v12097_v35 }
 0x33c   : > { %v2578_v19 = vpack.c.b16 %v2567_v51, %v2566_v48  ;;  %v17496_v39 = vpack.c.b16 %v12107_v14, %v12105_v52  ;;  %v17497_v1 = vpack.c.b16 %v12083_v45, %v12081_v33  ;;  %v1726_v35 = vadd.f32 %v11806_v8, %v11801_v32 }
 0x33d   : > { %v2581_v17 = vpack.c.b16 %v2573_v47, %v2572_v37  ;;  %v2579_v54 = vpack.c.b16 %v2569_v6, %v2568_v22  ;;  %v17498_v52 = vpack.c.b16 %v12091_v62, %v12089_v34  ;;  %v1824_v33 = vadd.f32 %v11829_v16, %v11826_v15  ;;  %v17500_v6 = vld [vmem:[#allocation25_spill] sm:$0xff]  ;;  %v17501_v22 = vld [vmem:[#allocation63_spill] sm:$0xff] }
 0x33e   : > { %v2164_v40 = vpop.f32.mrf.mxu2  ;;  %v2213_v7 = vpop.f32.mrf.mxu3  ;;  %v2254_v63 = vpack.c.bf16 %v1726_v35, %v1726_v35  ;;  %v17499_v32 = vpack.c.b16 %v12067_v30, %v12065_v41  ;;  %v2269_v42 = vpack.c.bf16 %v17500_v6, %v17500_v6  ;;  %v17503_v5 = vpack.c.b16 %v17501_v22, %v17502_v25 }
 0x33f   : > { %v12163_v53 = vadd.f32 %v2213_v7, %v2164_v40  ;;  %2590 = vmatpush.bf16.xpose.msrb.mxu1 %v2581_v17  ;;  %v12165_v38 = vpop.f32.mrf.mxu0  ;;  %v12167_v60 = vpop.f32.mrf.mxu1 }
 0x340   : > { %2446 = vmatpush.bf16.xpose.msrb.mxu0 %v2435_v3  ;;  %v2366_v8 = vunpack.c.l.b16 %v2254_v63  ;;  %v17509_v63 = vld [vmem:[#allocation29_spill] sm:$0xff] }
 0x341   : > { %17488 = vst [vmem:[#allocation65_spill] sm:$0xff] %v12163_v53 }
 0x346   : > { %v12175_v59 = vpop.f32.mrf.mxu2  ;;  %v12177_v24 = vpop.f32.mrf.mxu3 }
 0x347   : > { %17489 = vst [vmem:[#allocation66_spill] sm:$0xff] %v12175_v59  ;;  %2591 = vmatpush.bf16.xpose.msrb.mxu1 %v2580_v56  ;;  %v2071_v44 = vpop.f32.mrf.mxu0  ;;  %v2120_v29 = vpop.f32.mrf.mxu1 }
 0x348   : > { %17490 = vst [vmem:[#allocation67_spill] sm:$0xff] %v12177_v24  ;;  %v12181_v50 = vadd.f32 %v2120_v29, %v2071_v44  ;;  %2447 = vmatpush.bf16.xpose.msrb.mxu0 %v2434_v57  ;;  %v2253_v44 = vpack.c.bf16 %v11786_v27, %v11786_v27  ;;  %v2270_v27 = vpack.c.bf16 %v1824_v33, %v1824_v33 }
 0x34a   : > { %v2365_v45 = vunpack.c.l.b16 %v2253_v44  ;;  %v2511_v41 = vunpack.c.l.b16 %v2270_v27 }
 0x34c   : > { %v2381_v0 = vpack.c.b16 %v2366_v8, %v2365_v45  ;;  %v17510_v8 = vld [vmem:[#allocation33_spill] sm:$0xff]  ;;  %v17511_v45 = vld [vmem:[#allocation35_spill] sm:$0xff] }
 0x34d   : > { %v1736_v27 = vadd.f32 %v17511_v45, %v17510_v8 }
 0x34e   : > { %v2169_v37 = vpop.f32.mrf.mxu2  ;;  %v2218_v47 = vpop.f32.mrf.mxu3 }
 0x34f   : > { %v12187_v36 = vadd.f32 %v2218_v47, %v2169_v37  ;;  %2592 = vmatpush.bf16.xpose.msrb.mxu1 %v2579_v54  ;;  %v12189_v26 = vpop.f32.mrf.mxu0  ;;  %v12191_v17 = vpop.f32.mrf.mxu1  ;;  %v17504_v54 = vld [vmem:[#allocation27_spill] sm:$0xff]  ;;  %v17505_v37 = vld [vmem:[#allocation28_spill] sm:$0xff] }
 0x350   : > { %2448 = vmatpush.bf16.xpose.msrb.mxu0 %v2433_v49  ;;  %v1731_v47 = vadd.f32 %v17505_v37, %v17504_v54  ;;  %v2510_v49 = vunpack.c.l.b16 %v2269_v42  ;;  %v2258_v42 = vpack.c.bf16 %v1736_v27, %v1736_v27  ;;  %v17513_v54 = vld [vmem:[#allocation36_spill] sm:$0xff]  ;;  %v17514_v37 = vld [vmem:[#allocation37_spill] sm:$0xff]  ;;  %v17518_v27 = vld [vmem:[#allocation38_spill] sm:$0xff] }
 0x351   : > { %17491 = vst [vmem:[#allocation68_spill] sm:$0xff] %v12187_v36 }
 0x352   : > { %v2526_v18 = vpack.c.b16 %v2511_v41, %v2510_v49  ;;  %v2256_v51 = vpack.c.bf16 %v1731_v47, %v1731_v47  ;;  %v1834_v47 = vadd.f32 %v17514_v37, %v17513_v54  ;;  %v2370_v49 = vunpack.c.l.b16 %v2258_v42 }
 0x356   : > { %v12193_v40 = vpop.f32.mrf.mxu2  ;;  %v12195_v7 = vpop.f32.mrf.mxu3 }
 0x357   : > { %2593 = vmatpush.bf16.xpose.msrb.mxu1 %v2578_v19  ;;  %v2076_v3 = vpop.f32.mrf.mxu0  ;;  %v2125_v13 = vpop.f32.mrf.mxu1 }
 0x358   : > { %v12197_v61 = vadd.f32 %v2125_v13, %v2076_v3  ;;  %2449 = vmatpush.bf16.xpose.msrb.mxu0 %v17492_v43  ;;  %v17506_v3 = vld [vmem:[#allocation26_spill] sm:$0xff] }
 0x359   : > { %v2255_v13 = vpack.c.bf16 %v17506_v3, %v17506_v3 }
 0x35e   : > { %v2174_v46 = vpop.f32.mrf.mxu2  ;;  %v2223_v20 = vpop.f32.mrf.mxu3 }
 0x35f   : > { %v12202_v2 = vadd.f32 %v2223_v20, %v2174_v46  ;;  %2594 = vmatpush.bf16.xpose.msrb.mxu1 %v17494_v10  ;;  %v12207_v55 = vpop.f32.mrf.mxu0  ;;  %v12209_v31 = vpop.f32.mrf.mxu1  ;;  %v17507_v10 = vld [vmem:[#allocation30_spill] sm:$0xff] }
 0x360   : > { %2450 = vmatpush.bf16.xpose.msrb.mxu0 %v17495_v28  ;;  %v17508_v28 = vld [vmem:[#allocation31_spill] sm:$0xff] }
 0x361   : > { %17493 = vst [vmem:[#allocation69_spill] sm:$0xff] %v12202_v2 }
 0x366   : > { %v12214_v11 = vpop.f32.mrf.mxu2  ;;  %v12216_v58 = vpop.f32.mrf.mxu3 }
 0x367   : > { %2595 = vmatpush.bf16.xpose.msrb.mxu1 %v17496_v39  ;;  %v2081_v56 = vpop.f32.mrf.mxu0  ;;  %v2130_v12 = vpop.f32.mrf.mxu1  ;;  %v1829_v39 = vadd.f32 %v17508_v28, %v17507_v10 }
 0x368   : > { %v12221_v9 = vadd.f32 %v2130_v12, %v2081_v56  ;;  %2451 = vmatpush.bf16.xpose.msrb.mxu0 %v17497_v1  ;;  %v2368_v56 = vunpack.c.l.b16 %v2256_v51  ;;  %v2367_v12 = vunpack.c.l.b16 %v2255_v13  ;;  %v2274_v51 = vpack.c.bf16 %v1834_v47, %v1834_v47 }
 0x369   : > { %v2272_v1 = vpack.c.bf16 %v1829_v39, %v1829_v39 }
 0x36a   : > { %v2382_v35 = vpack.c.b16 %v2368_v56, %v2367_v12  ;;  %v2515_v56 = vunpack.c.l.b16 %v2274_v51  ;;  %v17516_v12 = vld [vmem:[#allocation40_spill] sm:$0xff]  ;;  %v17521_v51 = vld [vmem:[#allocation39_spill] sm:$0xff] }
 0x36e   : > { %v2179_v57 = vpop.f32.mrf.mxu2  ;;  %v2228_v4 = vpop.f32.mrf.mxu3 }
 0x36f   : > { %v12230_v29 = vadd.f32 %v2228_v4, %v2179_v57  ;;  %2596 = vmatpush.bf16.xpose.msrb.mxu1 %v17498_v52  ;;  %v12235_v14 = vpop.f32.mrf.mxu0  ;;  %v12237_v21 = vpop.f32.mrf.mxu1  ;;  %v2271_v57 = vpack.c.bf16 %v17509_v63, %v17509_v63 }
 0x370   : > { %2452 = vmatpush.bf16.xpose.msrb.mxu0 %v17499_v32  ;;  %v2513_v32 = vunpack.c.l.b16 %v2272_v1  ;;  %v17517_v1 = vld [vmem:[#allocation41_spill] sm:$0xff] }
 0x376   : > { %v12246_v34 = vpop.f32.mrf.mxu2  ;;  %v12248_v62 = vpop.f32.mrf.mxu3 }
 0x377   : > { %2597 = vmatpush.bf16.xpose.msrb.mxu1 %v17503_v5  ;;  %v2086_v15 = vpop.f32.mrf.mxu0  ;;  %v2135_v16 = vpop.f32.mrf.mxu1  ;;  %2453 = vmatmul.bf16.vlgmr.msrb.gmra.mxu0 %v2381_v0  ;;  %v2512_v0 = vunpack.c.l.b16 %v2271_v57  ;;  %v17512_v5 = vld [vmem:[#allocation32_spill] sm:$0xff] }
 0x378   : > { %v12253_v30 = vadd.f32 %v2135_v16, %v2086_v15  ;;  %v2257_v15 = vpack.c.bf16 %v17512_v5, %v17512_v5  ;;  %v17519_v5 = vld [vmem:[#allocation42_spill] sm:$0xff] }
 0x379   : > { %v2527_v6 = vpack.c.b16 %v2513_v32, %v2512_v0  ;;  %v2259_v0 = vpack.c.bf16 %v17518_v27, %v17518_v27 }
 0x37b   : > { %v2371_v47 = vunpack.c.l.b16 %v2259_v0 }
 0x37e   : > { %v2184_v48 = vpop.f32.mrf.mxu2  ;;  %v2233_v19 = vpop.f32.mrf.mxu3  ;;  %2598 = vmatmul.bf16.vlgmr.msrb.gmra.mxu1 %v2526_v18  ;;  %v2369_v18 = vunpack.c.l.b16 %v2257_v15  ;;  %v17520_v15 = vld [vmem:[#allocation43_spill] sm:$0xff] }
 0x37f   : > { %v12259_v43 = vadd.f32 %v2233_v19, %v2184_v48  ;;  %v12261_v46 = vpop.f32.mrf.mxu0  ;;  %v12263_v20 = vpop.f32.mrf.mxu1  ;;  %v17515_v19 = vld [vmem:[#allocation34_spill] sm:$0xff]  ;;  %v1839_v54 = vadd.f32 %v17520_v15, %v17519_v5 }
 0x380   : > { %v2383_v48 = vpack.c.b16 %v2370_v49, %v2369_v18  ;;  %v2273_v3 = vpack.c.bf16 %v17515_v19, %v17515_v19 }
 0x381   : > { %v2276_v49 = vpack.c.bf16 %v1839_v54, %v1839_v54  ;;  %v17524_v54 = vld [vmem:[#allocation44_spill] sm:$0xff] }
 0x382   : > { %v2514_v63 = vunpack.c.l.b16 %v2273_v3 }
 0x384   : > { %v2528_v57 = vpack.c.b16 %v2515_v56, %v2514_v63  ;;  %v17523_v63 = vld [vmem:[#allocation47_spill] sm:$0xff] }
 0x386   : > { %v12269_v4 = vpop.f32.mrf.mxu2  ;;  %v12271_v44 = vpop.f32.mrf.mxu3 }
 0x387   : > { %v12273_v52 = vpop.f32.mrf.mxu0  ;;  %v12275_v33 = vpop.f32.mrf.mxu1  ;;  %2458 = vmatmul.bf16.gmra.mxu0 %v2382_v35  ;;  %v1741_v35 = vadd.f32 %v17517_v1, %v17516_v12  ;;  %v2517_v1 = vunpack.c.l.b16 %v2276_v49 }
 0x389   : > { %v2260_v32 = vpack.c.bf16 %v1741_v35, %v1741_v35  ;;  %v17522_v35 = vld [vmem:[#allocation46_spill] sm:$0xff] }
 0x38b   : > { %v2372_v37 = vunpack.c.l.b16 %v2260_v32 }
 0x38d   : > { %v2384_v18 = vpack.c.b16 %v2372_v37, %v2371_v47  ;;  %v2261_v37 = vpack.c.bf16 %v17524_v54, %v17524_v54  ;;  %v17525_v47 = vld [vmem:[#allocation48_spill] sm:$0xff]  ;;  %v17527_v54 = vld [vmem:[#allocation45_spill] sm:$0xff] }
 0x38e   : > { %v12279_v22 = vpop.f32.mrf.mxu2  ;;  %v12281_v25 = vpop.f32.mrf.mxu3  ;;  %2603 = vmatmul.bf16.gmra.mxu1 %v2527_v6 }
 0x38f   : > { %v2093_v16 = vpop.f32.mrf.mxu0  ;;  %v2142_v41 = vpop.f32.mrf.mxu1 }
 0x396   : > { %v12289_v13 = vpop.f32.mrf.mxu2  ;;  %v12291_v10 = vpop.f32.mrf.mxu3 }
 0x397   : > { %v2096_v28 = vpop.f32.mrf.mxu0  ;;  %v2145_v39 = vpop.f32.mrf.mxu1  ;;  %2463 = vmatmul.bf16.gmra.mxu0 %v2383_v48  ;;  %v2275_v48 = vpack.c.bf16 %v17521_v51, %v17521_v51  ;;  %v17526_v51 = vld [vmem:[#allocation49_spill] sm:$0xff] }
 0x398   : > { %v1844_v24 = vadd.f32 %v17526_v51, %v17525_v47  ;;  %v2146_v49 = vadd.f32 %v2145_v39, %v2096_v28  ;;  %v2277_v47 = vpack.c.bf16 %v17527_v54, %v17527_v54 }
 0x399   : > { %v2516_v27 = vunpack.c.l.b16 %v2275_v48  ;;  %v2143_v48 = vadd.f32 %v2142_v41, %v2093_v16 }
 0x39b   : > { %v2529_v36 = vpack.c.b16 %v2517_v1, %v2516_v27  ;;  %v2373_v1 = vunpack.c.l.b16 %v2261_v37 }
 0x39e   : > { %v2194_v8 = vpop.f32.mrf.mxu2  ;;  %v2243_v45 = vpop.f32.mrf.mxu3  ;;  %2608 = vmatmul.bf16.gmra.mxu1 %v2528_v57  ;;  %v1746_v57 = vadd.f32 %v17523_v63, %v17522_v35  ;;  %v2329_v63 = vpack.c.bf16 %v2146_v49, %v2146_v49 }
 0x39f   : > { %v2098_v6 = vpop.f32.mrf.mxu0  ;;  %v2147_v42 = vpop.f32.mrf.mxu1  ;;  %v2244_v39 = vadd.f32 %v2243_v45, %v2194_v8  ;;  %v2239_v8 = vadd.f32 %v12281_v25, %v12279_v22 }
 0x3a0   : > { %v2262_v5 = vpack.c.bf16 %v1746_v57, %v1746_v57  ;;  %v2148_v32 = vadd.f32 %v2147_v42, %v2098_v6  ;;  %v2278_v6 = vpack.c.bf16 %v1844_v24, %v1844_v24 }
 0x3a1   : > { %v2345_v45 = vpack.c.bf16 %v2244_v39, %v2244_v39  ;;  %v17529_v39 = vld [vmem:[#allocation50_spill] sm:$0xff] }
 0x3a2   : > { %v2374_v35 = vunpack.c.l.b16 %v2262_v5 }
 0x3a4   : > { %v2385_v28 = vpack.c.b16 %v2374_v35, %v2373_v1  ;;  %v2128_v1 = vadd.f32 %v12209_v31, %v12207_v55  ;;  %v2123_v55 = vadd.f32 %v12191_v17, %v12189_v26  ;;  %v2118_v26 = vadd.f32 %v12167_v60, %v12165_v38 }
 0x3a5   : > { %v2221_v38 = vadd.f32 %v12195_v7, %v12193_v40 }
 0x3a6   : > { %v2196_v19 = vpop.f32.mrf.mxu2  ;;  %v2245_v3 = vpop.f32.mrf.mxu3  ;;  %v2322_v31 = vpack.c.bf16 %v2128_v1, %v2128_v1  ;;  %v2320_v17 = vpack.c.bf16 %v2123_v55, %v2123_v55 }
 0x3a7   : > { %v2101_v56 = vpop.f32.mrf.mxu0  ;;  %v2150_v12 = vpop.f32.mrf.mxu1  ;;  %2468 = vmatmul.bf16.gmra.mxu0 %v2384_v18  ;;  %v2246_v51 = vadd.f32 %v2245_v3, %v2196_v19  ;;  %v2241_v19 = vadd.f32 %v12291_v10, %v12289_v13  ;;  %v2236_v10 = vadd.f32 %v12271_v44, %v12269_v4  ;;  %v2231_v4 = vadd.f32 %v12248_v62, %v12246_v34 }
 0x3a8   : > { %v2151_v53 = vadd.f32 %v2150_v12, %v2101_v56  ;;  %v2330_v56 = vpack.c.bf16 %v2148_v32, %v2148_v32  ;;  %v2226_v34 = vadd.f32 %v12216_v58, %v12214_v11  ;;  %v2319_v11 = vpack.c.bf16 %v12181_v50, %v12181_v50 }
 0x3a9   : > { %v2346_v3 = vpack.c.bf16 %v2246_v51, %v2246_v51  ;;  %v2342_v44 = vpack.c.bf16 %v2236_v10, %v2236_v10  ;;  %v2341_v51 = vpack.c.bf16 %v12259_v43, %v12259_v43  ;;  %v2340_v62 = vpack.c.bf16 %v2231_v4, %v2231_v4 }
 0x3aa   : > { %v2331_v23 = vpack.c.bf16 %v2151_v53, %v2151_v53  ;;  %v2138_v53 = vadd.f32 %v12263_v20, %v12261_v46  ;;  %v3036_v16 = vunpack.c.l.b16 %v2330_v56  ;;  %v2133_v46 = vadd.f32 %v12237_v21, %v12235_v14 }
 0x3ab   : > { %v3181_v14 = vunpack.c.l.b16 %v2346_v3  ;;  %v2339_v43 = vpack.c.bf16 %v12230_v29, %v12230_v29  ;;  %v2338_v60 = vpack.c.bf16 %v2226_v34, %v2226_v34  ;;  %v3025_v50 = vunpack.c.l.b16 %v2319_v11  ;;  %v17550_v34 = vld [vmem:[#allocation60_spill] sm:$0xff] }
 0x3ac   : > { %v3037_v57 = vunpack.c.l.b16 %v2331_v23  ;;  %v2326_v20 = vpack.c.bf16 %v2138_v53, %v2138_v53  ;;  %v2336_v40 = vpack.c.bf16 %v2221_v38, %v2221_v38 }
 0x3ad   : > { %v3174_v3 = vunpack.c.l.b16 %v2339_v43  ;;  %v3173_v7 = vunpack.c.l.b16 %v2338_v60 }
 0x3ae   : > { %v2199_v0 = vpop.f32.mrf.mxu2  ;;  %v2248_v15 = vpop.f32.mrf.mxu3  ;;  %2613 = vmatmul.bf16.gmra.mxu1 %v2529_v36  ;;  %v2141_v36 = vadd.f32 %v12275_v33, %v12273_v52  ;;  %v2519_v52 = vunpack.c.l.b16 %v2278_v6  ;;  %v3035_v33 = vunpack.c.l.b16 %v2329_v63  ;;  %v2324_v6 = vpack.c.bf16 %v2133_v46, %v2133_v46 }
 0x3af   : > { %v2103_v59 = vpop.f32.mrf.mxu0  ;;  %v2152_v18 = vpop.f32.mrf.mxu1  ;;  %v2249_v42 = vadd.f32 %v2248_v15, %v2199_v0  ;;  %v2518_v0 = vunpack.c.l.b16 %v2277_v47  ;;  %v3032_v22 = vunpack.c.l.b16 %v2326_v20  ;;  %v17533_v20 = vld [vmem:[#allocation66_spill] sm:$0xff]  ;;  %v3171_v1 = vunpack.c.l.b16 %v2336_v40 }
 0x3b0   : > { %v2153_v2 = vadd.f32 %v2152_v18, %v2103_v59  ;;  %v2328_v59 = vpack.c.bf16 %v2143_v48, %v2143_v48  ;;  %v2327_v23 = vpack.c.bf16 %v2141_v36, %v2141_v36  ;;  %v3045_v18 = vpack.c.b16 %v3036_v16, %v3035_v33 }
 0x3b1   : > { %v2347_v5 = vpack.c.bf16 %v2249_v42, %v2249_v42  ;;  %v2325_v48 = vpack.c.bf16 %v12253_v30, %v12253_v30  ;;  %v2530_v13 = vpack.c.b16 %v2519_v52, %v2518_v0  ;;  %v2343_v42 = vpack.c.bf16 %v2239_v8, %v2239_v8  ;;  %v17531_v0 = vld [vmem:[#allocation69_spill] sm:$0xff] }
 0x3b2   : > { %v2332_v12 = vpack.c.bf16 %v2153_v2, %v2153_v2  ;;  %v3034_v37 = vunpack.c.l.b16 %v2328_v59  ;;  %v3033_v56 = vunpack.c.l.b16 %v2327_v23  ;;  %v3180_v36 = vunpack.c.l.b16 %v2345_v45 }
 0x3b3   : > { %v3182_v49 = vunpack.c.l.b16 %v2347_v5  ;;  %v2323_v30 = vpack.c.bf16 %v12221_v9, %v12221_v9  ;;  %v3031_v63 = vunpack.c.l.b16 %v2325_v48  ;;  %v3030_v54 = vunpack.c.l.b16 %v2324_v6 }
 0x3b4   : > { %v3038_v27 = vunpack.c.l.b16 %v2332_v12  ;;  %v2344_v12 = vpack.c.bf16 %v2241_v19, %v2241_v19  ;;  %v3044_v25 = vpack.c.b16 %v3034_v37, %v3033_v56  ;;  %v2321_v9 = vpack.c.bf16 %v12197_v61, %v12197_v61  ;;  %v17528_v61 = vld [vmem:[#allocation51_spill] sm:$0xff] }
 0x3b5   : > { %v3043_v47 = vpack.c.b16 %v3032_v22, %v3031_v63  ;;  %v3029_v53 = vunpack.c.l.b16 %v2323_v30  ;;  %v3177_v59 = vunpack.c.l.b16 %v2342_v44  ;;  %v17530_v5 = vpack.c.b16 %v17528_v61, %v17529_v39  ;;  %v17534_v37 = vld [vmem:[#allocation67_spill] sm:$0xff] }
 0x3b6   : > { %v3046_v2 = vpack.c.b16 %v3038_v27, %v3037_v57  ;;  %v2201_v41 = vpop.f32.mrf.mxu2  ;;  %v2250_v24 = vpop.f32.mrf.mxu3  ;;  %v3179_v57 = vunpack.c.l.b16 %v2344_v12  ;;  %v3190_v27 = vpack.c.b16 %v3181_v14, %v3180_v36  ;;  %v3027_v58 = vunpack.c.l.b16 %v2321_v9  ;;  %v17540_v44 = vld [vmem:[#allocation55_spill] sm:$0xff] }
 0x3b7   : > { %v2251_v32 = vadd.f32 %v2250_v24, %v2201_v41  ;;  %2473 = vmatmul.bf16.gmra.mxu0 %v2385_v28  ;;  %v3178_v28 = vunpack.c.l.b16 %v2343_v42  ;;  %v3042_v41 = vpack.c.b16 %v3030_v54, %v3029_v53  ;;  %v3176_v24 = vunpack.c.l.b16 %v2341_v51  ;;  %v17544_v54 = vld [vmem:[#allocation56_spill] sm:$0xff]  ;;  %v17546_v51 = vld [vmem:[#allocation59_spill] sm:$0xff]  ;;  %v17549_v53 = vld [vmem:[#allocation61_spill] sm:$0xff] }
 0x3b8   : > { %3055 = vmatpush.bf16.msrb.mxu2 %v3046_v2  ;;  %v3028_v2 = vunpack.c.l.b16 %v2322_v31  ;;  %v2318_v23 = vpack.c.bf16 %v2118_v26, %v2118_v26  ;;  %v3026_v33 = vunpack.c.l.b16 %v2320_v17  ;;  %v2337_v19 = vpack.c.bf16 %v17531_v0, %v17531_v0  ;;  %v17543_v31 = vld [vmem:[#allocation57_spill] sm:$0xff] }
 0x3b9   : > { %v2348_v15 = vpack.c.bf16 %v2251_v32, %v2251_v32  ;;  %v3189_v16 = vpack.c.b16 %v3179_v57, %v3178_v28  ;;  %v3175_v32 = vunpack.c.l.b16 %v2340_v62  ;;  %v3188_v52 = vpack.c.b16 %v3177_v59, %v3176_v24  ;;  %v17541_v57 = vld [vmem:[#allocation54_spill] sm:$0xff] }
 0x3ba   : > { %v3041_v29 = vpack.c.b16 %v3028_v2, %v3027_v58  ;;  %v3024_v45 = vunpack.c.l.b16 %v2318_v23  ;;  %v3040_v56 = vpack.c.b16 %v3026_v33, %v3025_v50  ;;  %v3172_v12 = vunpack.c.l.b16 %v2337_v19  ;;  %v17547_v28 = vld [vmem:[#allocation58_spill] sm:$0xff] }
 0x3bb   : > { %v3183_v35 = vunpack.c.l.b16 %v2348_v15  ;;  %v17532_v15 = vld [vmem:[#allocation64_spill] sm:$0xff]  ;;  %v3187_v8 = vpack.c.b16 %v3175_v32, %v3174_v3  ;;  %v17548_v9 = vpack.c.b16 %v17546_v51, %v17547_v28  ;;  %v17551_v62 = vpack.c.b16 %v17549_v53, %v17550_v34 }
 0x3bc   : > { %3056 = vmatpush.bf16.msrb.mxu2 %v3045_v18  ;;  %v2317_v46 = vpack.c.bf16 %v17532_v15, %v17532_v15  ;;  %v2216_v18 = vadd.f32 %v17534_v37, %v17533_v20  ;;  %v3186_v6 = vpack.c.b16 %v3173_v7, %v3172_v12 }
 0x3bd   : > { %v3191_v21 = vpack.c.b16 %v3183_v35, %v3182_v49  ;;  %v17535_v49 = vld [vmem:[#allocation53_spill] sm:$0xff]  ;;  %v17536_v35 = vld [vmem:[#allocation52_spill] sm:$0xff] }
 0x3be   : > { %2618 = vmatmul.bf16.gmra.mxu1 %v2530_v13  ;;  %v17537_v48 = vpack.c.b16 %v17535_v49, %v17536_v35  ;;  %v17538_v13 = vld [vmem:[#allocation68_spill] sm:$0xff]  ;;  %v3023_v14 = vunpack.c.l.b16 %v2317_v46 }
 0x3bf   : > { %3200 = vmatpush.bf16.msrb.mxu3 %v3191_v21  ;;  %v2335_v10 = vpack.c.bf16 %v17538_v13, %v17538_v13  ;;  %v2334_v21 = vpack.c.bf16 %v2216_v18, %v2216_v18 }
 0x3c0   : > { %3057 = vmatpush.bf16.msrb.mxu2 %v3044_v25  ;;  %v3039_v22 = vpack.c.b16 %v3024_v45, %v3023_v14  ;;  %v17539_v25 = vld [vmem:[#allocation65_spill] sm:$0xff] }
 0x3c1   : > { %v2333_v42 = vpack.c.bf16 %v17539_v25, %v17539_v25  ;;  %v3170_v36 = vunpack.c.l.b16 %v2335_v10  ;;  %v3169_v30 = vunpack.c.l.b16 %v2334_v21 }
 0x3c3   : > { %3201 = vmatpush.bf16.msrb.mxu3 %v3190_v27  ;;  %v3185_v63 = vpack.c.b16 %v3171_v1, %v3170_v36  ;;  %v3168_v4 = vunpack.c.l.b16 %v2333_v42  ;;  %v17542_v27 = vpack.c.b16 %v17540_v44, %v17541_v57 }
 0x3c4   : > { %3058 = vmatpush.bf16.msrb.mxu2 %v3043_v47  ;;  %v17545_v47 = vpack.c.b16 %v17543_v31, %v17544_v54 }
 0x3c5   : > { %v3184_v55 = vpack.c.b16 %v3169_v30, %v3168_v4 }
 0x3c7   : > { %3202 = vmatpush.bf16.msrb.mxu3 %v3189_v16  ;;  %2478 = vmatmul.bf16.gmra.mxu0 %v17530_v5 }
 0x3c8   : > { %3059 = vmatpush.bf16.msrb.mxu2 %v3042_v41 }
 0x3cb   : > { %3203 = vmatpush.bf16.msrb.mxu3 %v3188_v52 }
 0x3cc   : > { %3060 = vmatpush.bf16.msrb.mxu2 %v3041_v29 }
 0x3ce   : > { %2623 = vmatmul.bf16.gmra.mxu1 %v17537_v48 }
 0x3cf   : > { %3204 = vmatpush.bf16.msrb.mxu3 %v3187_v8 }
 0x3d0   : > { %3061 = vmatpush.bf16.msrb.mxu2 %v3040_v56 }
 0x3d3   : > { %3205 = vmatpush.bf16.msrb.mxu3 %v3186_v6 }
 0x3d4   : > { %3062 = vmatpush.bf16.msrb.mxu2 %v3039_v22 }
 0x3d7   : > { %3206 = vmatpush.bf16.msrb.mxu3 %v3185_v63  ;;  %2483 = vmatmul.bf16.gmra.mxu0 %v17542_v27 }
 0x3db   : > { %3207 = vmatpush.bf16.msrb.mxu3 %v3184_v55 }
 0x3de   : > { %2628 = vmatmul.bf16.gmra.mxu1 %v17545_v47 }
 0x3e7   : > { %2488 = vmatmul.bf16.gmra.mxu0 %v17548_v9 }
 0x3ee   : > { %2633 = vmatmul.bf16.gmra.mxu1 %v17551_v62 }
 0x3f4   : > { %v2454_v59 = vpop.f32.mrf.mxu0 }
 0x3f5   : > { %2639 = vmax.xlane.f32.xlu2 %v2454_v59 }
 0x3fb   : > { %v2599_v16 = vpop.f32.mrf.mxu1 }
 0x3fc   : > { %2671 = vmax.xlane.f32.xlu1 %v2599_v16  ;;  %v2456_v26 = vpop.f32.mrf.mxu0 }
 0x3fd   : > { %2641 = vmax.xlane.f32.xlu0 %v2456_v26 }
 0x403   : > { %v2601_v17 = vpop.f32.mrf.mxu1 }
 0x404   : > { %2673 = vmax.xlane.f32.xlu2 %v2601_v17  ;;  %v12373_v2 = vpop.f32.mrf.mxu0 }
 0x405   : > { %2643 = vmax.xlane.f32.xlu0 %v12373_v2 }
 0x40b   : > { %v2604_v41 = vpop.f32.mrf.mxu1 }
 0x40c   : > { %2675 = vmax.xlane.f32.xlu2 %v2604_v41  ;;  %v12376_v43 = vpop.f32.mrf.mxu0 }
 0x40d   : > { %2645 = vmax.xlane.f32.xlu1 %v12376_v43 }
 0x413   : > { %v12379_v24 = vpop.f32.mrf.mxu1 }
 0x414   : > { %2677 = vmax.xlane.f32.xlu0 %v12379_v24  ;;  %v12382_v61 = vpop.f32.mrf.mxu0 }
 0x415   : > { %2647 = vmax.xlane.f32.xlu1 %v12382_v61 }
 0x41b   : > { %v12385_v39 = vpop.f32.mrf.mxu1 }
 0x41c   : > { %2679 = vmax.xlane.f32.xlu0 %v12385_v39  ;;  %v12388_v5 = vpop.f32.mrf.mxu0 }
 0x41d   : > { %2649 = vmax.xlane.f32.xlu2 %v12388_v5 }
 0x423   : > { %v12391_v11 = vpop.f32.mrf.mxu1 }
 0x424   : > { %2681 = vmax.xlane.f32.xlu1 %v12391_v11  ;;  %v12394_v58 = vpop.f32.mrf.mxu0 }
 0x425   : > { %2651 = vmax.xlane.f32.xlu2 %v12394_v58 }
 0x42b   : > { %v12397_v38 = vpop.f32.mrf.mxu1 }
 0x42c   : > { %2683 = vmax.xlane.f32.xlu1 %v12397_v38  ;;  %v12400_v60 = vpop.f32.mrf.mxu0 }
 0x42d   : > { %2653 = vmax.xlane.f32.xlu0 %v12400_v60 }
 0x433   : > { %v12403_v32 = vpop.f32.mrf.mxu1 }
 0x434   : > { %2685 = vmax.xlane.f32.xlu2 %v12403_v32  ;;  %v12406_v52 = vpop.f32.mrf.mxu0 }
 0x435   : > { %2655 = vmax.xlane.f32.xlu1 %v12406_v52 }
 0x43b   : > { %v12409_v23 = vpop.f32.mrf.mxu1 }
 0x43c   : > { %2687 = vmax.xlane.f32.xlu0 %v12409_v23  ;;  %v12412_v33 = vpop.f32.mrf.mxu0 }
 0x43d   : > { %2657 = vmax.xlane.f32.xlu2 %v12412_v33 }
 0x443   : > { %v12415_v29 = vpop.f32.mrf.mxu1 }
 0x444   : > { %2689 = vmax.xlane.f32.xlu1 %v12415_v29  ;;  %v12418_v0 = vpop.f32.mrf.mxu0 }
 0x445   : > { %2659 = vmax.xlane.f32.xlu0 %v12418_v0 }
 0x44b   : > { %v12430_v56 = vpop.f32.mrf.mxu1 }
 0x44c   : > { %v12432_v12 = vpop.f32.mrf.mxu0 }
 0x453   : > { %v12441_v63 = vpop.f32.mrf.mxu1 }
 0x454   : > { %v12443_v4 = vpop.f32.mrf.mxu0 }
 0x45b   : > { %v12456_v53 = vpop.f32.mrf.mxu1 }
 0x468   : > { %v2640_v19 = vpop.xlane.xlu2 %2639 }
 0x469   : > { %v2703_v3 = vsub.f32 %v2454_v59, %v2640_v19 }
 0x46b   : > { %v2735_v15 = vmul.f32 1.442695, %v2703_v3 }
 0x46d   : > { %10382 = vpow2.f32 %v2735_v15 }
 0x46f   : > { %v2672_v46 = vpop.xlane.xlu1 %2671 }
 0x470   : > { %v2719_v50 = vsub.f32 %v2599_v16, %v2672_v46  ;;  %v2642_v20 = vpop.xlane.xlu0 %2641 }
 0x471   : > { %v2704_v37 = vsub.f32 %v2456_v26, %v2642_v20 }
 0x472   : > { %v2767_v18 = vmul.f32 1.442695, %v2719_v50 }
 0x473   : > { %v12421_v40 = vpop.eup %10382  ;;  %v2737_v7 = vmul.f32 1.442695, %v2704_v37 }
 0x474   : > { %10384 = vpow2.f32 %v2767_v18  ;;  %2799 = vadd.xlane.f32.xlu0 %v12421_v40 }
 0x475   : > { %10386 = vpow2.f32 %v2737_v7 }
 0x477   : > { %v2674_v8 = vpop.xlane.xlu2 %2673 }
 0x478   : > { %v2720_v45 = vsub.f32 %v2601_v17, %v2674_v8  ;;  %v2644_v13 = vpop.xlane.xlu0 %2643 }
 0x479   : > { %v2705_v22 = vsub.f32 %v12373_v2, %v2644_v13 }
 0x47a   : > { %v12424_v49 = vpop.eup %10384  ;;  %v2769_v35 = vmul.f32 1.442695, %v2720_v45 }
 0x47b   : > { %v12426_v48 = vpop.eup %10386  ;;  %2831 = vadd.xlane.f32.xlu2 %v12424_v49  ;;  %v2739_v42 = vmul.f32 1.442695, %v2705_v22 }
 0x47c   : > { %10388 = vpow2.f32 %v2769_v35  ;;  %2801 = vadd.xlane.f32.xlu1 %v12426_v48 }
 0x47f   : > { %v2676_v10 = vpop.xlane.xlu2 %2675 }
 0x480   : > { %v2721_v14 = vsub.f32 %v2604_v41, %v2676_v10  ;;  %v2646_v21 = vpop.xlane.xlu1 %2645 }
 0x481   : > { %v2706_v25 = vsub.f32 %v12376_v43, %v2646_v21  ;;  %v12466_v43 = vpop.f32.mrf.mxu0 }
 0x482   : > { %v12434_v1 = vpop.eup %10388  ;;  %v2771_v6 = vmul.f32 1.442695, %v2721_v14 }
 0x483   : > { %2691 = vmax.xlane.f32.xlu2 %v12430_v56  ;;  %2833 = vadd.xlane.f32.xlu0 %v12434_v1  ;;  %v2741_v30 = vmul.f32 1.442695, %v2706_v25 }
 0x484   : > { %2661 = vmax.xlane.f32.xlu1 %v12432_v12  ;;  %10390 = vpow2.f32 %v2771_v6 }
 0x485   : > { %10392 = vpow2.f32 %v2739_v42 }
 0x486   : > { %10394 = vpow2.f32 %v2741_v30 }
 0x487   : > { %v2678_v36 = vpop.xlane.xlu0 %2677 }
 0x488   : > { %v2648_v44 = vpop.xlane.xlu1 %2647  ;;  %v2722_v27 = vsub.f32 %v12379_v24, %v2678_v36 }
 0x489   : > { %v2707_v55 = vsub.f32 %v12382_v61, %v2648_v44 }
 0x48a   : > { %v12445_v57 = vpop.eup %10390  ;;  %v2773_v31 = vmul.f32 1.442695, %v2722_v27 }
 0x48b   : > { %2693 = vmax.xlane.f32.xlu0 %v12441_v63  ;;  %2663 = vmax.xlane.f32.xlu2 %v12443_v4  ;;  %v12452_v51 = vpop.eup %10392  ;;  %v2743_v28 = vmul.f32 1.442695, %v2707_v55 }
 0x48c   : > { %2835 = vadd.xlane.f32.xlu1 %v12445_v57  ;;  %v12454_v9 = vpop.eup %10394  ;;  %10396 = vpow2.f32 %v2773_v31 }
 0x48d   : > { %10398 = vpow2.f32 %v2743_v28 }
 0x48f   : > { %v2680_v54 = vpop.xlane.xlu0 %2679 }
 0x490   : > { %v2650_v47 = vpop.xlane.xlu2 %2649  ;;  %v2723_v34 = vsub.f32 %v12385_v39, %v2680_v54 }
 0x491   : > { %v2708_v62 = vsub.f32 %v12388_v5, %v2650_v47 }
 0x492   : > { %v2775_v59 = vmul.f32 1.442695, %v2723_v34  ;;  %v12464_v41 = vpop.eup %10396 }
 0x493   : > { %2805 = vadd.xlane.f32.xlu0 %v12454_v9  ;;  %2803 = vadd.xlane.f32.xlu2 %v12452_v51  ;;  %v2745_v26 = vmul.f32 1.442695, %v2708_v62  ;;  %v12468_v61 = vpop.eup %10398 }
 0x494   : > { %2695 = vmax.xlane.f32.xlu1 %v12456_v53  ;;  %10400 = vpow2.f32 %v2775_v59 }
 0x495   : > { %10402 = vpow2.f32 %v2745_v26 }
 0x497   : > { %v2682_v16 = vpop.xlane.xlu1 %2681 }
 0x498   : > { %v2724_v17 = vsub.f32 %v12391_v11, %v2682_v16  ;;  %v2652_v2 = vpop.xlane.xlu2 %2651 }
 0x499   : > { %v2709_v39 = vsub.f32 %v12394_v58, %v2652_v2  ;;  %v12485_v58 = vpop.f32.mrf.mxu1 }
 0x49a   : > { %v2777_v24 = vmul.f32 1.442695, %v2724_v17  ;;  %v12474_v3 = vpop.eup %10400 }
 0x49b   : > { %2837 = vadd.xlane.f32.xlu2 %v12464_v41  ;;  %2665 = vmax.xlane.f32.xlu0 %v12466_v43  ;;  %v2747_v5 = vmul.f32 1.442695, %v2709_v39  ;;  %v12477_v46 = vpop.eup %10402 }
 0x49c   : > { %2807 = vadd.xlane.f32.xlu1 %v12468_v61  ;;  %10404 = vpow2.f32 %v2777_v24 }
 0x49d   : > { %10406 = vpow2.f32 %v2747_v5 }
 0x49f   : > { %v2684_v11 = vpop.xlane.xlu1 %2683 }
 0x4a0   : > { %v2654_v19 = vpop.xlane.xlu0 %2653  ;;  %v2725_v20 = vsub.f32 %v12397_v38, %v2684_v11  ;;  %v12495_v38 = vpop.f32.mrf.mxu0 }
 0x4a1   : > { %v2710_v15 = vsub.f32 %v12400_v60, %v2654_v19  ;;  %v12497_v13 = vpop.f32.mrf.mxu1 }
 0x4a2   : > { %v12479_v50 = vpop.eup %10404  ;;  %v2779_v18 = vmul.f32 1.442695, %v2725_v20 }
 0x4a3   : > { %v2749_v37 = vmul.f32 1.442695, %v2710_v15  ;;  %2809 = vadd.xlane.f32.xlu2 %v12477_v46  ;;  %2839 = vadd.xlane.f32.xlu0 %v12474_v3  ;;  %v12488_v8 = vpop.eup %10406 }
 0x4a4   : > { %2841 = vadd.xlane.f32.xlu1 %v12479_v50 }
 0x4a5   : > { %10408 = vpow2.f32 %v2749_v37 }
 0x4a6   : > { %10410 = vpow2.f32 %v2779_v18 }
 0x4a7   : > { %v2686_v7 = vpop.xlane.xlu2 %2685 }
 0x4a8   : > { %v2726_v60 = vsub.f32 %v12403_v32, %v2686_v7  ;;  %v2656_v10 = vpop.xlane.xlu1 %2655  ;;  %v12509_v31 = vpop.f32.mrf.mxu0 }
 0x4a9   : > { %v2711_v22 = vsub.f32 %v12406_v52, %v2656_v10  ;;  %v12511_v54 = vpop.f32.mrf.mxu1 }
 0x4aa   : > { %v2781_v45 = vmul.f32 1.442695, %v2726_v60 }
 0x4ab   : > { %v12490_v35 = vpop.eup %10408  ;;  %2697 = vmax.xlane.f32.xlu2 %v12485_v58  ;;  %2811 = vadd.xlane.f32.xlu0 %v12488_v8  ;;  %v2751_v36 = vmul.f32 1.442695, %v2711_v22 }
 0x4ac   : > { %10412 = vpow2.f32 %v2781_v45  ;;  %2813 = vadd.xlane.f32.xlu1 %v12490_v35  ;;  %v12499_v14 = vpop.eup %10410 }
 0x4ad   : > { %10414 = vpow2.f32 %v2751_v36 }
 0x4af   : > { %v2688_v32 = vpop.xlane.xlu0 %2687 }
 0x4b0   : > { %v2658_v21 = vpop.xlane.xlu2 %2657  ;;  %v2727_v42 = vsub.f32 %v12409_v23, %v2688_v32 }
 0x4b1   : > { %v2712_v25 = vsub.f32 %v12412_v33, %v2658_v21 }
 0x4b2   : > { %v12501_v6 = vpop.eup %10412  ;;  %v2783_v27 = vmul.f32 1.442695, %v2727_v42 }
 0x4b3   : > { %2843 = vadd.xlane.f32.xlu2 %v12499_v14  ;;  %2845 = vadd.xlane.f32.xlu0 %v12501_v6  ;;  %v2753_v30 = vmul.f32 1.442695, %v2712_v25  ;;  %v12518_v28 = vpop.eup %10414 }
 0x4b4   : > { %2667 = vmax.xlane.f32.xlu1 %v12495_v38 }
 0x4b5   : > { %10416 = vpow2.f32 %v2753_v30 }
 0x4b6   : > { %10418 = vpow2.f32 %v2783_v27 }
 0x4b7   : > { %v2690_v44 = vpop.xlane.xlu1 %2689 }
 0x4b8   : > { %v2660_v55 = vpop.xlane.xlu0 %2659  ;;  %v2728_v52 = vsub.f32 %v12415_v29, %v2690_v44 }
 0x4b9   : > { %v2713_v33 = vsub.f32 %v12418_v0, %v2660_v55 }
 0x4ba   : > { %v2785_v23 = vmul.f32 1.442695, %v2728_v52 }
 0x4bb   : > { %2699 = vmax.xlane.f32.xlu0 %v12497_v13  ;;  %2669 = vmax.xlane.f32.xlu2 %v12509_v31  ;;  %v2755_v47 = vmul.f32 1.442695, %v2713_v33  ;;  %v12520_v34 = vpop.eup %10416 }
 0x4bc   : > { %2701 = vmax.xlane.f32.xlu1 %v12511_v54  ;;  %v12522_v62 = vpop.eup %10418  ;;  %10420 = vpow2.f32 %v2785_v23 }
 0x4bd   : > { %10422 = vpow2.f32 %v2755_v47 }
 0x4c2   : > { %v12527_v29 = vpop.eup %10420 }
 0x4c3   : > { %2817 = vadd.xlane.f32.xlu0 %v12520_v34  ;;  %2815 = vadd.xlane.f32.xlu2 %v12518_v28  ;;  %v12529_v0 = vpop.eup %10422 }
 0x4c4   : > { %2847 = vadd.xlane.f32.xlu1 %v12522_v62 }
 0x4cb   : > { %2819 = vadd.xlane.f32.xlu0 %v12529_v0  ;;  %2849 = vadd.xlane.f32.xlu2 %v12527_v29 }
 0x4e7   : > { %v2800_v59 = vpop.xlane.xlu0 %2799 }
 0x4e8   : > { %10424 = vrcp.f32 %v2800_v59 }
 0x4ee   : > { %v2832_v16 = vpop.xlane.xlu2 %2831  ;;  %v10425_v17 = vpop.eup %10424 }
 0x4ef   : > { %v2802_v26 = vpop.xlane.xlu1 %2801  ;;  %v2895_v2 = vmul.f32 %v10425_v17, %v12421_v40 }
 0x4f0   : > { %10426 = vrcp.f32 %v2802_v26 }
 0x4f1   : > { %10428 = vrcp.f32 %v2832_v16  ;;  %v2927_v19 = vpack.c.bf16 %v2895_v2, %v2895_v2 }
 0x4f3   : > { %v2975_v32 = vunpack.c.l.b16 %v2927_v19 }
 0x4f6   : > { %v10427_v24 = vpop.eup %10426  ;;  %v2692_v39 = vpop.xlane.xlu2 %2691 }
 0x4f7   : > { %v2834_v5 = vpop.xlane.xlu0 %2833  ;;  %v10429_v11 = vpop.eup %10428  ;;  %v2896_v15 = vmul.f32 %v10427_v24, %v12426_v48  ;;  %v2729_v20 = vsub.f32 %v12430_v56, %v2692_v39 }
 0x4f8   : > { %10430 = vrcp.f32 %v2834_v5  ;;  %v2662_v37 = vpop.xlane.xlu1 %2661  ;;  %v2911_v45 = vmul.f32 %v10429_v11, %v12424_v49 }
 0x4f9   : > { %v2714_v18 = vsub.f32 %v12432_v12, %v2662_v37  ;;  %v2928_v7 = vpack.c.bf16 %v2896_v15, %v2896_v15  ;;  %v2787_v60 = vmul.f32 1.442695, %v2729_v20 }
 0x4fa   : > { %v2943_v25 = vpack.c.bf16 %v2911_v45, %v2911_v45 }
 0x4fb   : > { %v2757_v10 = vmul.f32 1.442695, %v2714_v18  ;;  %v2976_v40 = vunpack.c.l.b16 %v2928_v7  ;;  %10432 = vpow2.f32 %v2787_v60 }
 0x4fc   : > { %v3120_v33 = vunpack.c.l.b16 %v2943_v25 }
 0x4fd   : > { %10434 = vpow2.f32 %v2757_v10  ;;  %v2991_v22 = vpack.c.b16 %v2976_v40, %v2975_v32 }
 0x4fe   : > { %v10431_v21 = vpop.eup %10430  ;;  %v2664_v56 = vpop.xlane.xlu2 %2663 }
 0x4ff   : > { %v2912_v48 = vmul.f32 %v10431_v21, %v12434_v1  ;;  %v2694_v42 = vpop.xlane.xlu0 %2693  ;;  %v2715_v12 = vsub.f32 %v12443_v4, %v2664_v56  ;;  %3063 = vmatmul.bf16.vlgmr.msrb.gmra.mxu2 %v2991_v22 }
 0x500   : > { %v2730_v36 = vsub.f32 %v12441_v63, %v2694_v42  ;;  %v2836_v30 = vpop.xlane.xlu1 %2835 }
 0x501   : > { %v2944_v44 = vpack.c.bf16 %v2912_v48, %v2912_v48  ;;  %v12541_v49 = vpop.eup %10432  ;;  %v2759_v55 = vmul.f32 1.442695, %v2715_v12 }
 0x502   : > { %v2789_v27 = vmul.f32 1.442695, %v2730_v36  ;;  %2851 = vadd.xlane.f32.xlu2 %v12541_v49 }
 0x503   : > { %v12543_v52 = vpop.eup %10434  ;;  %v3121_v23 = vunpack.c.l.b16 %v2944_v44 }
 0x504   : > { %10436 = vpow2.f32 %v2789_v27  ;;  %2821 = vadd.xlane.f32.xlu1 %v12543_v52 }
 0x505   : > { %v3136_v1 = vpack.c.b16 %v3121_v23, %v3120_v33  ;;  %10438 = vpow2.f32 %v2759_v55 }
 0x506   : > { %v2804_v4 = vpop.xlane.xlu2 %2803 }
 0x507   : > { %3208 = vmatmul.bf16.vlgmr.msrb.gmra.mxu3 %v3136_v1  ;;  %v2806_v63 = vpop.xlane.xlu0 %2805 }
 0x508   : > { %10440 = vrcp.f32 %v2806_v63  ;;  %v2696_v47 = vpop.xlane.xlu1 %2695 }
 0x509   : > { %10442 = vrcp.f32 %v2804_v4  ;;  %v2731_v59 = vsub.f32 %v12456_v53, %v2696_v47 }
 0x50a   : > { %v12548_v16 = vpop.eup %10436  ;;  %10444 = vrcp.f32 %v2836_v30 }
 0x50b   : > { %v12550_v26 = vpop.eup %10438  ;;  %v2791_v17 = vmul.f32 1.442695, %v2731_v59  ;;  %2853 = vadd.xlane.f32.xlu0 %v12548_v16 }
 0x50c   : > { %2823 = vadd.xlane.f32.xlu1 %v12550_v26 }
 0x50d   : > { %10446 = vpow2.f32 %v2791_v17 }
 0x50e   : > { %v10441_v2 = vpop.eup %10440  ;;  %v2838_v39 = vpop.xlane.xlu2 %2837 }
 0x50f   : > { %v10443_v24 = vpop.eup %10442  ;;  %v2666_v5 = vpop.xlane.xlu0 %2665  ;;  %v2898_v11 = vmul.f32 %v10441_v2, %v12454_v9  ;;  %10448 = vrcp.f32 %v2838_v39 }
 0x510   : > { %v10445_v19 = vpop.eup %10444  ;;  %v2716_v53 = vsub.f32 %v12466_v43, %v2666_v5  ;;  %v2808_v15 = vpop.xlane.xlu1 %2807  ;;  %v2897_v20 = vmul.f32 %v10443_v24, %v12452_v51 }
 0x511   : > { %v2930_v37 = vpack.c.bf16 %v2898_v11, %v2898_v11  ;;  %10450 = vrcp.f32 %v2808_v15  ;;  %v2913_v10 = vmul.f32 %v10445_v19, %v12445_v57 }
 0x512   : > { %v2761_v18 = vmul.f32 1.442695, %v2716_v53  ;;  %v2929_v7 = vpack.c.bf16 %v2897_v20, %v2897_v20 }
 0x513   : > { %v12557_v60 = vpop.eup %10446  ;;  %v2978_v45 = vunpack.c.l.b16 %v2930_v37  ;;  %v2945_v51 = vpack.c.bf16 %v2913_v10, %v2913_v10 }
 0x514   : > { %10452 = vpow2.f32 %v2761_v18  ;;  %2855 = vadd.xlane.f32.xlu0 %v12557_v60  ;;  %v2977_v9 = vunpack.c.l.b16 %v2929_v7 }
 0x515   : > { %v10449_v32 = vpop.eup %10448  ;;  %v3122_v57 = vunpack.c.l.b16 %v2945_v51 }
 0x516   : > { %v2992_v40 = vpack.c.b16 %v2978_v45, %v2977_v9  ;;  %v2810_v21 = vpop.xlane.xlu2 %2809  ;;  %v2914_v22 = vmul.f32 %v10449_v32, %v12464_v41 }
 0x517   : > { %v2840_v43 = vpop.xlane.xlu0 %2839  ;;  %v10451_v25 = vpop.eup %10450  ;;  %10454 = vrcp.f32 %v2810_v21 }
 0x518   : > { %3068 = vmatmul.bf16.gmra.mxu2 %v2992_v40  ;;  %v2842_v48 = vpop.xlane.xlu1 %2841  ;;  %10456 = vrcp.f32 %v2840_v43  ;;  %v2946_v42 = vpack.c.bf16 %v2914_v22, %v2914_v22  ;;  %v2899_v12 = vmul.f32 %v10451_v25, %v12468_v61  ;;  %v9302_v25 = vld [vmem:[#allocation10 + $0x70] sm:$0xf] }
 0x519   : > { %10458 = vrcp.f32 %v2842_v48  ;;  %v10065_v48 = vld [vmem:[#allocation10 + $0x74] sm:$0xf0] }
 0x51a   : > { %v12562_v56 = vpop.eup %10452  ;;  %v3123_v36 = vunpack.c.l.b16 %v2946_v42  ;;  %v2931_v23 = vpack.c.bf16 %v2899_v12, %v2899_v12  ;;  %v9294_v42 = vld [vmem:[#allocation10 + $0x60] sm:$0xf]  ;;  %v9303_v12 = vor.u32 %v10065_v48, %v9302_v25 }
 0x51b   : > { %2825 = vadd.xlane.f32.xlu2 %v12562_v56  ;;  %v9278_v25 = vld [vmem:[#allocation10 + $0x40] sm:$0xf] }
 0x51c   : > { %v3137_v30 = vpack.c.b16 %v3123_v36, %v3122_v57  ;;  %v2979_v61 = vunpack.c.l.b16 %v2931_v23  ;;  %3463 = vmatpush.bf16.msra.mxu0 %v9303_v12  ;;  %v10057_v12 = vld [vmem:[#allocation10 + $0x34] sm:$0xf0] }
 0x51d   : > { %v10455_v44 = vpop.eup %10454 }
 0x51e   : > { %v10457_v27 = vpop.eup %10456  ;;  %3213 = vmatmul.bf16.gmra.mxu3 %v3137_v30  ;;  %v2698_v41 = vpop.xlane.xlu2 %2697  ;;  %v2900_v33 = vmul.f32 %v10455_v44, %v12477_v46  ;;  %v10063_v30 = vld [vmem:[#allocation10 + $0x64] sm:$0xf0]  ;;  %v9366_v44 = vld [vmem:[#allocation10 + $0xf0] sm:$0xf] }
 0x51f   : > { %v2812_v55 = vpop.xlane.xlu0 %2811  ;;  %v10459_v1 = vpop.eup %10458  ;;  %v2732_v63 = vsub.f32 %v12485_v58, %v2698_v41  ;;  %v2915_v24 = vmul.f32 %v10457_v27, %v12474_v3  ;;  %v10081_v27 = vld [vmem:[#allocation10 + $0xf4] sm:$0xf0]  ;;  %v9295_v23 = vor.u32 %v10063_v30, %v9294_v42  ;;  %v9350_v42 = vld [vmem:[#allocation10 + $0xd0] sm:$0xf] }
 0x520   : > { %v2814_v4 = vpop.xlane.xlu1 %2813  ;;  %v2932_v47 = vpack.c.bf16 %v2900_v33, %v2900_v33  ;;  %v2916_v59 = vmul.f32 %v10459_v1, %v12479_v50  ;;  %v9367_v1 = vor.u32 %v10081_v27, %v9366_v44  ;;  %v9342_v44 = vld [vmem:[#allocation10 + $0xc0] sm:$0xf]  ;;  %v10075_v27 = vld [vmem:[#allocation10 + $0xc4] sm:$0xf0] }
 0x521   : > { %10460 = vrcp.f32 %v2814_v4  ;;  %v2793_v17 = vmul.f32 1.442695, %v2732_v63  ;;  %v2947_v53 = vpack.c.bf16 %v2915_v24, %v2915_v24  ;;  %3464 = vmatpush.bf16.msra.mxu0 %v9295_v23  ;;  %v9334_v23 = vld [vmem:[#allocation10 + $0xb0] sm:$0xf] }
 0x522   : > { %10462 = vrcp.f32 %v2812_v55  ;;  %v2980_v2 = vunpack.c.l.b16 %v2932_v47  ;;  %v2948_v5 = vpack.c.bf16 %v2916_v59, %v2916_v59  ;;  %3512 = vmatpush.bf16.msra.mxu1 %v9367_v1  ;;  %v10073_v1 = vld [vmem:[#allocation10 + $0xb4] sm:$0xf0] }
 0x523   : > { %10464 = vpow2.f32 %v2793_v17  ;;  %v3124_v7 = vunpack.c.l.b16 %v2947_v53 }
 0x524   : > { %v2993_v39 = vpack.c.b16 %v2980_v2, %v2979_v61  ;;  %v3125_v20 = vunpack.c.l.b16 %v2948_v5 }
 0x526   : > { %v2844_v46 = vpop.xlane.xlu2 %2843  ;;  %v3138_v10 = vpack.c.b16 %v3125_v20, %v3124_v7 }
 0x527   : > { %v10461_v11 = vpop.eup %10460  ;;  %v2846_v19 = vpop.xlane.xlu0 %2845  ;;  %10466 = vrcp.f32 %v2844_v46 }
 0x528   : > { %3073 = vmatmul.bf16.gmra.mxu2 %v2993_v39  ;;  %v2668_v58 = vpop.xlane.xlu1 %2667  ;;  %v10463_v15 = vpop.eup %10462  ;;  %10468 = vrcp.f32 %v2846_v19  ;;  %v2902_v18 = vmul.f32 %v10461_v11, %v12490_v35 }
 0x529   : > { %v2717_v50 = vsub.f32 %v12495_v38, %v2668_v58  ;;  %v12571_v37 = vpop.eup %10464  ;;  %v2901_v45 = vmul.f32 %v10463_v15, %v12488_v8 }
 0x52a   : > { %2857 = vadd.xlane.f32.xlu1 %v12571_v37  ;;  %v2934_v32 = vpack.c.bf16 %v2902_v18, %v2902_v18 }
 0x52b   : > { %v2763_v3 = vmul.f32 1.442695, %v2717_v50  ;;  %v2933_v35 = vpack.c.bf16 %v2901_v45, %v2901_v45 }
 0x52d   : > { %10470 = vpow2.f32 %v2763_v3  ;;  %v10467_v9 = vpop.eup %10466 }
 0x52e   : > { %v10469_v40 = vpop.eup %10468  ;;  %3218 = vmatmul.bf16.gmra.mxu3 %v3138_v10  ;;  %v2670_v43 = vpop.xlane.xlu2 %2669  ;;  %v2917_v8 = vmul.f32 %v10467_v9, %v12499_v14 }
 0x52f   : > { %v2700_v21 = vpop.xlane.xlu0 %2699  ;;  %v2718_v22 = vsub.f32 %v12509_v31, %v2670_v43  ;;  %v2918_v36 = vmul.f32 %v10469_v40, %v12501_v6 }
 0x530   : > { %v2733_v38 = vsub.f32 %v12497_v13, %v2700_v21  ;;  %v2702_v51 = vpop.xlane.xlu1 %2701  ;;  %v2982_v13 = vunpack.c.l.b16 %v2934_v32  ;;  %v2949_v14 = vpack.c.bf16 %v2917_v8, %v2917_v8 }
 0x531   : > { %v2734_v57 = vsub.f32 %v12511_v54, %v2702_v51  ;;  %v2765_v55 = vmul.f32 1.442695, %v2718_v22  ;;  %v2981_v54 = vunpack.c.l.b16 %v2933_v35  ;;  %v2950_v6 = vpack.c.bf16 %v2918_v36, %v2918_v36  ;;  %v9358_v51 = vld [vmem:[#allocation10 + $0xe0] sm:$0xf]  ;;  %v10079_v35 = vld [vmem:[#allocation10 + $0xe4] sm:$0xf0] }
 0x532   : > { %v2795_v41 = vmul.f32 1.442695, %v2733_v38  ;;  %v3126_v17 = vunpack.c.l.b16 %v2949_v14  ;;  %v10061_v38 = vld [vmem:[#allocation10 + $0x54] sm:$0xf0]  ;;  %v9359_v48 = vor.u32 %v10079_v35, %v9358_v51  ;;  %v9270_v36 = vld [vmem:[#allocation10 + $0x30] sm:$0xf]  ;;  %v9335_v14 = vor.u32 %v10073_v1, %v9334_v23 }
 0x533   : > { %v12581_v33 = vpop.eup %10470  ;;  %v2797_v31 = vmul.f32 1.442695, %v2734_v57  ;;  %v2994_v63 = vpack.c.b16 %v2982_v13, %v2981_v54  ;;  %v3127_v61 = vunpack.c.l.b16 %v2950_v6  ;;  %v10077_v57 = vld [vmem:[#allocation10 + $0xd4] sm:$0xf0]  ;;  %v9271_v30 = vor.u32 %v10057_v12, %v9270_v36  ;;  %v10055_v13 = vld [vmem:[#allocation10 + $0x24] sm:$0xf0] }
 0x534   : > { %10472 = vpow2.f32 %v2795_v41  ;;  %2827 = vadd.xlane.f32.xlu2 %v12581_v33  ;;  %3513 = vmatpush.bf16.msra.mxu1 %v9359_v48  ;;  %v9343_v41 = vor.u32 %v10075_v27, %v9342_v44  ;;  %v9254_v54 = vld [vmem:[#allocation10 + $0x10] sm:$0xf]  ;;  %v10053_v6 = vld [vmem:[#allocation10 + $0x14] sm:$0xf0]  ;;  %v10062_v51 = vld [vmem:[#allocation10 + $0x64] sm:$0xf] }
 0x535   : > { %10474 = vpow2.f32 %v2765_v55  ;;  %v3139_v5 = vpack.c.b16 %v3127_v61, %v3126_v17  ;;  %v9262_v55 = vld [vmem:[#allocation10 + $0x20] sm:$0xf]  ;;  %v10051_v61 = vld [vmem:[#allocation10 + $0x4] sm:$0xf0]  ;;  %v9296_v35 = vld [vmem:[#allocation10 + $0x68] sm:$0xf0] }
 0x536   : > { %10476 = vpow2.f32 %v2797_v31  ;;  %v2816_v47 = vpop.xlane.xlu2 %2815  ;;  %v9263_v31 = vor.u32 %v10055_v13, %v9262_v55  ;;  %v9246_v17 = vld [vmem:[#allocation10] sm:$0xf]  ;;  %v9299_v48 = vor.u32 %v10062_v51, %v9296_v35  ;;  %v9264_v51 = vld [vmem:[#allocation10 + $0x28] sm:$0xf0] }
 0x537   : > { %v2818_v4 = vpop.xlane.xlu0 %2817 }
 0x538   : > { %3078 = vmatmul.bf16.gmra.mxu2 %v2994_v63  ;;  %10478 = vrcp.f32 %v2818_v4  ;;  %v2848_v59 = vpop.xlane.xlu1 %2847  ;;  %v9255_v63 = vor.u32 %v10053_v6, %v9254_v54  ;;  %v9326_v4 = vld [vmem:[#allocation10 + $0xa0] sm:$0xf]  ;;  %v10060_v6 = vld [vmem:[#allocation10 + $0x54] sm:$0xf] }
 0x539   : > { %10480 = vrcp.f32 %v2816_v47  ;;  %v10071_v47 = vld [vmem:[#allocation10 + $0xa4] sm:$0xf0] }
 0x53a   : > { %v12584_v2 = vpop.eup %10472  ;;  %10482 = vrcp.f32 %v2848_v59  ;;  %v9327_v59 = vor.u32 %v10071_v47, %v9326_v4  ;;  %v10076_v4 = vld [vmem:[#allocation10 + $0xd4] sm:$0xf]  ;;  %v9352_v47 = vld [vmem:[#allocation10 + $0xd8] sm:$0xf0] }
 0x53b   : > { %v12586_v24 = vpop.eup %10474  ;;  %2859 = vadd.xlane.f32.xlu1 %v12584_v2 }
 0x53c   : > { %v12589_v39 = vpop.eup %10476  ;;  %2829 = vadd.xlane.f32.xlu0 %v12586_v24 }
 0x53d   : > { %2861 = vadd.xlane.f32.xlu2 %v12589_v39 }
 0x53e   : > { %v10479_v11 = vpop.eup %10478  ;;  %3223 = vmatmul.bf16.gmra.mxu3 %v3139_v5  ;;  %v2850_v19 = vpop.xlane.xlu2 %2849  ;;  %v9247_v5 = vor.u32 %v10051_v61, %v9246_v17  ;;  %v9355_v61 = vor.u32 %v10076_v4, %v9352_v47  ;;  %v9312_v4 = vld [vmem:[#allocation10 + $0x88] sm:$0xf0] }
 0x53f   : > { %v10481_v46 = vpop.eup %10480  ;;  %v2904_v53 = vmul.f32 %v10479_v11, %v12520_v34  ;;  %10484 = vrcp.f32 %v2850_v19  ;;  %v9318_v11 = vld [vmem:[#allocation10 + $0x90] sm:$0xf] }
 0x540   : > { %v2903_v58 = vmul.f32 %v10481_v46, %v12518_v28  ;;  %v10483_v15 = vpop.eup %10482  ;;  %v9286_v28 = vld [vmem:[#allocation10 + $0x50] sm:$0xf]  ;;  %v10069_v46 = vld [vmem:[#allocation10 + $0x94] sm:$0xf0] }
 0x541   : > { %v2936_v50 = vpack.c.bf16 %v2904_v53, %v2904_v53  ;;  %v2919_v7 = vmul.f32 %v10483_v15, %v12522_v62  ;;  %v9287_v22 = vor.u32 %v10061_v38, %v9286_v28  ;;  %v10059_v62 = vld [vmem:[#allocation10 + $0x44] sm:$0xf0]  ;;  %v9319_v19 = vor.u32 %v10069_v46, %v9318_v11  ;;  %v2820_v53 = vpop.xlane.xlu0 %2819  ;;  %v9304_v15 = vld [vmem:[#allocation10 + $0x78] sm:$0xf0] }
 0x542   : > { %v2935_v20 = vpack.c.bf16 %v2903_v58, %v2903_v58  ;;  %v9279_v8 = vor.u32 %v10059_v62, %v9278_v25  ;;  %v10064_v58 = vld [vmem:[#allocation10 + $0x74] sm:$0xf]  ;;  %10486 = vrcp.f32 %v2820_v53  ;;  %v10078_v25 = vld [vmem:[#allocation10 + $0xe4] sm:$0xf]  ;;  %v9360_v62 = vld [vmem:[#allocation10 + $0xe8] sm:$0xf0] }
 0x543   : > { %v2984_v18 = vunpack.c.l.b16 %v2936_v50  ;;  %v2951_v32 = vpack.c.bf16 %v2919_v7, %v2919_v7  ;;  %3465 = vmatpush.bf16.msra.mxu0 %v9287_v22  ;;  %v10080_v50 = vld [vmem:[#allocation10 + $0xf4] sm:$0xf]  ;;  %v10067_v7 = vld [vmem:[#allocation10 + $0x84] sm:$0xf0] }
 0x544   : > { %v2983_v3 = vunpack.c.l.b16 %v2935_v20  ;;  %v9307_v20 = vor.u32 %v10064_v58, %v9304_v15  ;;  %v10058_v15 = vld [vmem:[#allocation10 + $0x44] sm:$0xf] }
 0x545   : > { %v10485_v10 = vpop.eup %10484  ;;  %v3128_v21 = vunpack.c.l.b16 %v2951_v32 }
 0x546   : > { %v2995_v45 = vpack.c.b16 %v2984_v18, %v2983_v3  ;;  %v2920_v9 = vmul.f32 %v10485_v10, %v12527_v29  ;;  %v9351_v29 = vor.u32 %v10077_v57, %v9350_v42  ;;  %v9368_v18 = vld [vmem:[#allocation10 + $0xf8] sm:$0xf0]  ;;  %v9310_v3 = vld [vmem:[#allocation10 + $0x80] sm:$0xf]  ;;  %3561 = vmatpush.bf16.msra.mxu2 %v9307_v20  ;;  %v9363_v57 = vor.u32 %v10078_v25, %v9360_v62 }
 0x547   : > { %3466 = vmatpush.bf16.msra.mxu0 %v9279_v8  ;;  %v9311_v10 = vor.u32 %v10067_v7, %v9310_v3  ;;  %v10074_v7 = vld [vmem:[#allocation10 + $0xc4] sm:$0xf] }
 0x548   : > { %3083 = vmatmul.bf16.gmra.mxu2 %v2995_v45  ;;  %v2952_v40 = vpack.c.bf16 %v2920_v9, %v2920_v9  ;;  %3514 = vmatpush.bf16.msra.mxu1 %v9351_v29  ;;  %v9371_v45 = vor.u32 %v10080_v50, %v9368_v18  ;;  %v9280_v50 = vld [vmem:[#allocation10 + $0x48] sm:$0xf0] }
 0x549   : > { %v9283_v3 = vor.u32 %v10058_v15, %v9280_v50 }
 0x54a   : > { %v3129_v43 = vunpack.c.l.b16 %v2952_v40  ;;  %3610 = vmatpush.bf16.msra.mxu3 %v9371_v45  ;;  %v10487_v40 = vpop.eup %10486  ;;  %3562 = vmatpush.bf16.msra.mxu2 %v9299_v48  ;;  %v9344_v45 = vld [vmem:[#allocation10 + $0xc8] sm:$0xf0] }
 0x54b   : > { %3467 = vmatpush.bf16.msra.mxu0 %v9271_v30 }
 0x54c   : > { %v3140_v34 = vpack.c.b16 %v3129_v43, %v3128_v21  ;;  %3515 = vmatpush.bf16.msra.mxu1 %v9343_v41  ;;  %v2905_v21 = vmul.f32 %v10487_v40, %v12529_v0  ;;  %v9272_v40 = vld [vmem:[#allocation10 + $0x38] sm:$0xf0] }
 0x54e   : > { %3228 = vmatmul.bf16.gmra.mxu3 %v3140_v34  ;;  %v2937_v22 = vpack.c.bf16 %v2905_v21, %v2905_v21 }
 0x54f   : > { %3468 = vmatpush.bf16.msra.mxu0 %v9263_v31  ;;  %3611 = vmatpush.bf16.msra.mxu3 %v9363_v57  ;;  %v9328_v57 = vld [vmem:[#allocation10 + $0xa8] sm:$0xf0] }
 0x550   : > { %3516 = vmatpush.bf16.msra.mxu1 %v9335_v14  ;;  %v2985_v36 = vunpack.c.l.b16 %v2937_v22  ;;  %v10054_v22 = vld [vmem:[#allocation10 + $0x24] sm:$0xf] }
 0x551   : > { %v9267_v48 = vor.u32 %v10054_v22, %v9264_v51 }
 0x553   : > { %3469 = vmatpush.bf16.msra.mxu0 %v9255_v63  ;;  %v9288_v63 = vld [vmem:[#allocation10 + $0x58] sm:$0xf0]  ;;  %3612 = vmatpush.bf16.msra.mxu3 %v9355_v61 }
 0x554   : > { %3517 = vmatpush.bf16.msra.mxu1 %v9327_v59 }
 0x557   : > { %3470 = vmatpush.bf16.msra.mxu0 %v9247_v5 }
 0x558   : > { %3518 = vmatpush.bf16.msra.mxu1 %v9319_v19 }
 0x55c   : > { %3519 = vmatpush.bf16.msra.mxu1 %v9311_v10 }
 0x575   : > { %v2852_v9 = vpop.xlane.xlu2 %2851 }
 0x577   : > { %v2822_v32 = vpop.xlane.xlu1 %2821 }
 0x578   : > { %10488 = vrcp.f32 %v2822_v32  ;;  %v10056_v32 = vld [vmem:[#allocation10 + $0x34] sm:$0xf] }
 0x579   : > { %10490 = vrcp.f32 %v2852_v9  ;;  %v9347_v9 = vor.u32 %v10074_v7, %v9344_v45 }
 0x57b   : > { %3613 = vmatpush.bf16.msra.mxu3 %v9347_v9 }
 0x57e   : > { %v10489_v43 = vpop.eup %10488  ;;  %v2854_v34 = vpop.xlane.xlu0 %2853 }
 0x57f   : > { %v10491_v28 = vpop.eup %10490  ;;  %10492 = vrcp.f32 %v2854_v34  ;;  %v2906_v38 = vmul.f32 %v10489_v43, %v12543_v52  ;;  %v2824_v44 = vpop.xlane.xlu1 %2823  ;;  %v10072_v34 = vld [vmem:[#allocation10 + $0xb4] sm:$0xf] }
 0x580   : > { %v2921_v8 = vmul.f32 %v10491_v28, %v12541_v49  ;;  %10494 = vrcp.f32 %v2824_v44  ;;  %v9336_v28 = vld [vmem:[#allocation10 + $0xb8] sm:$0xf0] }
 0x581   : > { %v2938_v42 = vpack.c.bf16 %v2906_v38, %v2906_v38  ;;  %v9339_v38 = vor.u32 %v10072_v34, %v9336_v28 }
 0x582   : > { %v3064_v29 = vpop.f32.mrf.mxu2  ;;  %v2953_v27 = vpack.c.bf16 %v2921_v8, %v2921_v8 }
 0x583   : > { %v2986_v0 = vunpack.c.l.b16 %v2938_v42  ;;  %3614 = vmatpush.bf16.msra.mxu3 %v9339_v38  ;;  %v10070_v42 = vld [vmem:[#allocation10 + $0xa4] sm:$0xf] }
 0x584   : > { %v3130_v13 = vunpack.c.l.b16 %v2953_v27  ;;  %v9320_v27 = vld [vmem:[#allocation10 + $0x98] sm:$0xf0] }
 0x585   : > { %v10493_v12 = vpop.eup %10492  ;;  %v2996_v30 = vpack.c.b16 %v2986_v0, %v2985_v36  ;;  %v10052_v0 = vld [vmem:[#allocation10 + $0x14] sm:$0xf] }
 0x586   : > { %v2922_v52 = vmul.f32 %v10493_v12, %v12548_v16  ;;  %v10495_v14 = vpop.eup %10494  ;;  %v9291_v16 = vor.u32 %v10060_v6, %v9288_v63  ;;  %v9256_v12 = vld [vmem:[#allocation10 + $0x18] sm:$0xf0] }
 0x587   : > { %3088 = vmatmul.bf16.gmra.mxu2 %v2996_v30  ;;  %v2907_v17 = vmul.f32 %v10495_v14, %v12550_v26  ;;  %v2856_v46 = vpop.xlane.xlu0 %2855 }
 0x588   : > { %v2954_v41 = vpack.c.bf16 %v2922_v52, %v2922_v52  ;;  %3563 = vmatpush.bf16.msra.mxu2 %v9291_v16  ;;  %v9259_v52 = vor.u32 %v10052_v0, %v9256_v12 }
 0x589   : > { %v2939_v53 = vpack.c.bf16 %v2907_v17, %v2907_v17 }
 0x58a   : > { %v3209_v55 = vpop.f32.mrf.mxu3  ;;  %v3131_v31 = vunpack.c.l.b16 %v2954_v41  ;;  %v3066_v23 = vpop.f32.mrf.mxu2 }
 0x58b   : > { %v12601_v1 = vpack.c.bf16 %v3066_v23, %v3064_v29  ;;  %v2987_v20 = vunpack.c.l.b16 %v2939_v53  ;;  %v9331_v29 = vor.u32 %v10070_v42, %v9328_v57  ;;  %v9248_v23 = vld [vmem:[#allocation10 + $0x8] sm:$0xf0] }
 0x58c   : > { %v3141_v49 = vpack.c.b16 %v3131_v31, %v3130_v13  ;;  %3564 = vmatpush.bf16.msra.mxu2 %v9283_v3  ;;  %v10050_v31 = vld [vmem:[#allocation10 + $0x4] sm:$0xf] }
 0x58d   : > { %3471 = vmatmul.bf16.vlgmr.msra.gmra.mxu0 %v12601_v1  ;;  %3615 = vmatpush.bf16.msra.mxu3 %v9331_v29  ;;  %v9251_v6 = vor.u32 %v10050_v31, %v9248_v23 }
 0x58e   : > { %3233 = vmatmul.bf16.gmra.mxu3 %v3141_v49  ;;  %v2826_v54 = vpop.xlane.xlu2 %2825 }
 0x58f   : > { %10496 = vrcp.f32 %v2826_v54 }
 0x590   : > { %10498 = vrcp.f32 %v2856_v46 }
 0x592   : > { %v3211_v59 = vpop.f32.mrf.mxu3 }
 0x593   : > { %v12605_v5 = vpack.c.bf16 %v3211_v59, %v3209_v55 }
 0x595   : > { %v10497_v11 = vpop.eup %10496  ;;  %3520 = vmatmul.bf16.vlgmr.msra.gmra.mxu1 %v12605_v5 }
 0x596   : > { %v2908_v19 = vmul.f32 %v10497_v11, %v12562_v56  ;;  %v9275_v56 = vor.u32 %v10056_v32, %v9272_v40  ;;  %v10499_v43 = vpop.eup %10498 }
 0x597   : > { %v2923_v25 = vmul.f32 %v10499_v43, %v12557_v60  ;;  %v10068_v60 = vld [vmem:[#allocation10 + $0x94] sm:$0xf] }
 0x598   : > { %v2940_v58 = vpack.c.bf16 %v2908_v19, %v2908_v19  ;;  %3565 = vmatpush.bf16.msra.mxu2 %v9275_v56  ;;  %v9323_v55 = vor.u32 %v10068_v60, %v9320_v27 }
 0x599   : > { %v2955_v44 = vpack.c.bf16 %v2923_v25, %v2923_v25 }
 0x59a   : > { %v2988_v18 = vunpack.c.l.b16 %v2940_v58  ;;  %3616 = vmatpush.bf16.msra.mxu3 %v9323_v55 }
 0x59b   : > { %v3069_v26 = vpop.f32.mrf.mxu2  ;;  %v3132_v54 = vunpack.c.l.b16 %v2955_v44 }
 0x59c   : > { %v2997_v10 = vpack.c.b16 %v2988_v18, %v2987_v20  ;;  %3566 = vmatpush.bf16.msra.mxu2 %v9267_v48 }
 0x59d   : > { %v2858_v21 = vpop.xlane.xlu1 %2857 }
 0x59e   : > { %3093 = vmatmul.bf16.gmra.mxu2 %v2997_v10  ;;  %10500 = vrcp.f32 %v2858_v21 }
 0x5a0   : > { %3567 = vmatpush.bf16.msra.mxu2 %v9259_v52 }
 0x5a1   : > { %v3214_v35 = vpop.f32.mrf.mxu3 }
 0x5a3   : > { %v3071_v62 = vpop.f32.mrf.mxu2 }
 0x5a4   : > { %v12610_v8 = vpack.c.bf16 %v3071_v62, %v3069_v26  ;;  %v10501_v36 = vpop.eup %10500  ;;  %3568 = vmatpush.bf16.msra.mxu2 %v9251_v6 }
 0x5a5   : > { %v2924_v30 = vmul.f32 %v10501_v36, %v12571_v37  ;;  %v10066_v37 = vld [vmem:[#allocation10 + $0x84] sm:$0xf] }
 0x5a6   : > { %3476 = vmatmul.bf16.gmra.mxu0 %v12610_v8  ;;  %v9315_v59 = vor.u32 %v10066_v37, %v9312_v4 }
 0x5a7   : > { %v2828_v41 = vpop.xlane.xlu2 %2827  ;;  %v2956_v13 = vpack.c.bf16 %v2924_v30, %v2924_v30 }
 0x5a8   : > { %10502 = vrcp.f32 %v2828_v41  ;;  %3617 = vmatpush.bf16.msra.mxu3 %v9315_v59 }
 0x5a9   : > { %v3216_v49 = vpop.f32.mrf.mxu3  ;;  %v3133_v14 = vunpack.c.l.b16 %v2956_v13 }
 0x5aa   : > { %v3252_v16 = vpack.c.bf16 %v3216_v49, %v3214_v35  ;;  %v3297_v49 = vld [vmem:[%s17293_s5] sm:$0x3] }
 0x5ab   : > { %v3074_v63 = vpop.f32.mrf.mxu2  ;;  %v3142_v47 = vpack.c.b16 %v3133_v14, %v3132_v54  ;;  %v12624_v4 = vperm.slane %v3297_v49, 0 }
 0x5ac   : > { %3525 = vmatmul.bf16.gmra.mxu1 %v3252_v16 }
 0x5ad   : > { %3238 = vmatmul.bf16.gmra.mxu3 %v3142_v47  ;;  %v12626_v47 = vperm.slane %v3297_v49, 1 }
 0x5ae   : > { %v2860_v17 = vpop.xlane.xlu1 %2859  ;;  %v10503_v11 = vpop.eup %10502 }
 0x5af   : > { %10504 = vrcp.f32 %v2860_v17  ;;  %v2830_v61 = vpop.xlane.xlu0 %2829  ;;  %v2909_v58 = vmul.f32 %v10503_v11, %v12581_v33 }
 0x5b0   : > { %10506 = vrcp.f32 %v2830_v61  ;;  %v2862_v46 = vpop.xlane.xlu2 %2861 }
 0x5b1   : > { %10508 = vrcp.f32 %v2862_v46  ;;  %v3219_v19 = vpop.f32.mrf.mxu3  ;;  %v2941_v7 = vpack.c.bf16 %v2909_v58, %v2909_v58 }
 0x5b3   : > { %v3076_v53 = vpop.f32.mrf.mxu2  ;;  %v2989_v43 = vunpack.c.l.b16 %v2941_v7 }
 0x5b4   : > { %v3253_v15 = vpack.c.bf16 %v3076_v53, %v3074_v63 }
 0x5b5   : > { %v10505_v50 = vpop.eup %10504 }
 0x5b6   : > { %v10507_v20 = vpop.eup %10506  ;;  %3481 = vmatmul.bf16.gmra.mxu0 %v3253_v15  ;;  %v2925_v18 = vmul.f32 %v10505_v50, %v12584_v2 }
 0x5b7   : > { %v10509_v3 = vpop.eup %10508  ;;  %v2910_v26 = vmul.f32 %v10507_v20, %v12586_v24  ;;  %v10673_v20 = vld [vmem:[%s11292_s15 + $0x8] sm:$0xff] }
 0x5b8   : > { %v2926_v45 = vmul.f32 %v10509_v3, %v12589_v39  ;;  %v2957_v10 = vpack.c.bf16 %v2925_v18, %v2925_v18 }
 0x5b9   : > { %v2942_v9 = vpack.c.bf16 %v2910_v26, %v2910_v26  ;;  %v3221_v32 = vpop.f32.mrf.mxu3 }
 0x5ba   : > { %v2958_v40 = vpack.c.bf16 %v2926_v45, %v2926_v45  ;;  %v3254_v56 = vpack.c.bf16 %v3221_v32, %v3219_v19  ;;  %v3134_v34 = vunpack.c.l.b16 %v2957_v10 }
 0x5bb   : > { %v3079_v21 = vpop.f32.mrf.mxu2  ;;  %v2990_v33 = vunpack.c.l.b16 %v2942_v9 }
 0x5bc   : > { %v3135_v28 = vunpack.c.l.b16 %v2958_v40  ;;  %3530 = vmatmul.bf16.gmra.mxu1 %v3254_v56 }
 0x5bd   : > { %v2998_v38 = vpack.c.b16 %v2990_v33, %v2989_v43  ;;  %v10675_v33 = vld [vmem:[%s11292_s15 + $0x18] sm:$0xff] }
 0x5be   : > { %v3143_v22 = vpack.c.b16 %v3135_v28, %v3134_v34 }
 0x5bf   : > { %3098 = vmatmul.bf16.gmra.mxu2 %v2998_v38 }
 0x5c0   : > { %3243 = vmatmul.bf16.gmra.mxu3 %v3143_v22 }
 0x5c1   : > { %v3224_v2 = vpop.f32.mrf.mxu3 }
 0x5c3   : > { %v3081_v24 = vpop.f32.mrf.mxu2 }
 0x5c4   : > { %v3255_v51 = vpack.c.bf16 %v3081_v24, %v3079_v21 }
 0x5c6   : > { %3486 = vmatmul.bf16.gmra.mxu0 %v3255_v51 }
 0x5c9   : > { %v3226_v39 = vpop.f32.mrf.mxu3 }
 0x5ca   : > { %v3256_v25 = vpack.c.bf16 %v3226_v39, %v3224_v2 }
 0x5cb   : > { %v3084_v35 = vpop.f32.mrf.mxu2 }
 0x5cc   : > { %3535 = vmatmul.bf16.gmra.mxu1 %v3256_v25 }
 0x5cf   : > { %3569 = vmatmul.bf16.vlgmr.msra.gmra.mxu2 %v12601_v1 }
 0x5d0   : > { %3618 = vmatmul.bf16.vlgmr.msra.gmra.mxu3 %v12605_v5 }
 0x5d1   : > { %v3229_v62 = vpop.f32.mrf.mxu3 }
 0x5d3   : > { %v3086_v48 = vpop.f32.mrf.mxu2 }
 0x5d4   : > { %v3257_v42 = vpack.c.bf16 %v3086_v48, %v3084_v35 }
 0x5d6   : > { %3491 = vmatmul.bf16.gmra.mxu0 %v3257_v42 }
 0x5d9   : > { %v3231_v57 = vpop.f32.mrf.mxu3 }
 0x5da   : > { %v3258_v29 = vpack.c.bf16 %v3231_v57, %v3229_v62  ;;  %v10677_v62 = vld [vmem:[%s11292_s15 + $0x28] sm:$0xff] }
 0x5dc   : > { %3540 = vmatmul.bf16.gmra.mxu1 %v3258_v29 }
 0x5df   : > { %3574 = vmatmul.bf16.gmra.mxu2 %v12610_v8 }
 0x5e0   : > { %3623 = vmatmul.bf16.gmra.mxu3 %v3252_v16 }
 0x5ef   : > { %3579 = vmatmul.bf16.gmra.mxu2 %v3253_v15  ;;  %v10672_v15 = vld [vmem:[%s11292_s15] sm:$0xff] }
 0x5f0   : > { %3628 = vmatmul.bf16.gmra.mxu3 %v3254_v56  ;;  %v10674_v56 = vld [vmem:[%s11292_s15 + $0x10] sm:$0xff] }
 0x5ff   : > { %3584 = vmatmul.bf16.gmra.mxu2 %v3255_v51 }
 0x600   : > { %3633 = vmatmul.bf16.gmra.mxu3 %v3256_v25  ;;  %v10676_v25 = vld [vmem:[%s11292_s15 + $0x20] sm:$0xff] }
 0x60a   : > { %v3089_v36 = vpop.f32.mrf.mxu2  ;;  %v3472_v55 = vpop.f32.mrf.mxu0 }
 0x60b   : > { %v3473_v59 = vadd.f32 %v3472_v55, %v12624_v4 }
 0x60f   : > { %3589 = vmatmul.bf16.gmra.mxu2 %v3257_v42 }
 0x610   : > { %3638 = vmatmul.bf16.gmra.mxu3 %v3258_v29 }
 0x611   : > { %v3234_v1 = vpop.f32.mrf.mxu3 }
 0x612   : > { %v3091_v0 = vpop.f32.mrf.mxu2  ;;  %v3521_v13 = vpop.f32.mrf.mxu1 }
 0x613   : > { %v3259_v5 = vpack.c.bf16 %v3091_v0, %v3089_v36  ;;  %v3474_v54 = vpop.f32.mrf.mxu0  ;;  %v3522_v11 = vadd.f32 %v3521_v13, %v3473_v59 }
 0x614   : > { %v3475_v3 = vadd.f32 %v3474_v54, %v12624_v4 }
 0x615   : > { %3496 = vmatmul.bf16.gmra.mxu0 %v3259_v5  ;;  %v12631_v50 = vadd.f32 %v10672_v15, %v3522_v11 }
 0x617   : > { %17552 = vst [vmem:[#allocation25_spill] sm:$0xff] %v12631_v50 }
 0x619   : > { %v3236_v12 = vpop.f32.mrf.mxu3 }
 0x61a   : > { %v3260_v30 = vpack.c.bf16 %v3236_v12, %v3234_v1  ;;  %v3523_v16 = vpop.f32.mrf.mxu1 }
 0x61b   : > { %v3524_v45 = vadd.f32 %v3523_v16, %v3475_v3  ;;  %v10681_v16 = vld [vmem:[%s11292_s15 + $0x48] sm:$0xff] }
 0x61c   : > { %3545 = vmatmul.bf16.gmra.mxu1 %v3260_v30 }
 0x61d   : > { %v12641_v43 = vadd.f32 %v10674_v56, %v3524_v45 }
 0x61f   : > { %3594 = vmatmul.bf16.gmra.mxu2 %v3259_v5  ;;  %17554 = vst [vmem:[#allocation62_spill] sm:$0xff] %v12641_v43 }
 0x620   : > { %3643 = vmatmul.bf16.gmra.mxu3 %v3260_v30 }
 0x621   : > { %v3094_v44 = vpop.f32.mrf.mxu2 }
 0x623   : > { %v3477_v17 = vpop.f32.mrf.mxu0 }
 0x624   : > { %v3478_v28 = vadd.f32 %v3477_v17, %v12624_v4 }
 0x629   : > { %v3096_v52 = vpop.f32.mrf.mxu2  ;;  %v3526_v53 = vpop.f32.mrf.mxu1 }
 0x62a   : > { %v3261_v8 = vpack.c.bf16 %v3096_v52, %v3094_v44  ;;  %v3527_v2 = vadd.f32 %v3526_v53, %v3478_v28  ;;  %v10678_v44 = vld [vmem:[%s11292_s15 + $0x30] sm:$0xff] }
 0x62b   : > { %v3479_v9 = vpop.f32.mrf.mxu0 }
 0x62c   : > { %3501 = vmatmul.bf16.gmra.mxu0 %v3261_v8  ;;  %v12651_v48 = vadd.f32 %v10676_v25, %v3527_v2  ;;  %v3480_v29 = vadd.f32 %v3479_v9, %v12624_v4  ;;  %v10685_v2 = vld [vmem:[%s11292_s15 + $0x68] sm:$0xff] }
 0x62e   : > { %17556 = vst [vmem:[#allocation28_spill] sm:$0xff] %v12651_v48 }
 0x62f   : > { %3599 = vmatmul.bf16.gmra.mxu2 %v3261_v8  ;;  %v10679_v8 = vld [vmem:[%s11292_s15 + $0x38] sm:$0xff] }
 0x630   : > { %v3239_v60 = vpop.f32.mrf.mxu3 }
 0x631   : > { %v3528_v21 = vpop.f32.mrf.mxu1 }
 0x632   : > { %v3529_v0 = vadd.f32 %v3528_v21, %v3480_v29 }
 0x633   : > { %v3482_v35 = vpop.f32.mrf.mxu0 }
 0x634   : > { %v12661_v52 = vadd.f32 %v10678_v44, %v3529_v0 }
 0x636   : > { %17558 = vst [vmem:[#allocation30_spill] sm:$0xff] %v12661_v52 }
 0x638   : > { %v3241_v27 = vpop.f32.mrf.mxu3 }
 0x639   : > { %v3262_v41 = vpack.c.bf16 %v3241_v27, %v3239_v60  ;;  %v3531_v57 = vpop.f32.mrf.mxu1 }
 0x63b   : > { %3550 = vmatmul.bf16.gmra.mxu1 %v3262_v41  ;;  %3648 = vmatmul.bf16.gmra.mxu3 %v3262_v41  ;;  %v3484_v27 = vpop.f32.mrf.mxu0  ;;  %v3483_v41 = vadd.f32 %v3482_v35, %v12624_v4 }
 0x63c   : > { %v3485_v59 = vadd.f32 %v3484_v27, %v12624_v4 }
 0x641   : > { %v3533_v13 = vpop.f32.mrf.mxu1 }
 0x642   : > { %v3099_v31 = vpop.f32.mrf.mxu2 }
 0x643   : > { %v3244_v23 = vpop.f32.mrf.mxu3 }
 0x649   : > { %v3536_v53 = vpop.f32.mrf.mxu1 }
 0x64a   : > { %v3101_v14 = vpop.f32.mrf.mxu2 }
 0x64b   : > { %v3263_v6 = vpack.c.bf16 %v3101_v14, %v3099_v31  ;;  %v3246_v63 = vpop.f32.mrf.mxu3 }
 0x64c   : > { %v3264_v37 = vpack.c.bf16 %v3246_v63, %v3244_v23  ;;  %v3532_v23 = vadd.f32 %v3531_v57, %v3483_v41 }
 0x64d   : > { %3506 = vmatmul.bf16.gmra.mxu0 %v3263_v6  ;;  %3604 = vmatmul.bf16.gmra.mxu2 %v3263_v6  ;;  %v10680_v6 = vld [vmem:[%s11292_s15 + $0x40] sm:$0xff] }
 0x64e   : > { %3555 = vmatmul.bf16.gmra.mxu1 %v3264_v37  ;;  %3653 = vmatmul.bf16.gmra.mxu3 %v3264_v37  ;;  %v12671_v63 = vadd.f32 %v10680_v6, %v3532_v23  ;;  %v10688_v23 = vld [vmem:[%s11292_s15 + $0x80] sm:$0xff] }
 0x650   : > { %17560 = vst [vmem:[#allocation29_spill] sm:$0xff] %v12671_v63 }
 0x651   : > { %v3538_v28 = vpop.f32.mrf.mxu1 }
 0x652   : > { %v3570_v61 = vpop.f32.mrf.mxu2 }
 0x653   : > { %v3571_v46 = vadd.f32 %v3570_v61, %v12626_v47  ;;  %v3619_v19 = vpop.f32.mrf.mxu3  ;;  %v3487_v61 = vpop.f32.mrf.mxu0 }
 0x654   : > { %v3488_v45 = vadd.f32 %v3487_v61, %v12624_v4 }
 0x655   : > { %v3620_v58 = vadd.f32 %v3619_v19, %v3571_v46  ;;  %v3534_v46 = vadd.f32 %v3533_v13, %v3485_v59 }
 0x657   : > { %v12634_v18 = vadd.f32 %v10673_v20, %v3620_v58  ;;  %v10682_v20 = vld [vmem:[%s11292_s15 + $0x50] sm:$0xff] }
 0x658   : > { %v12681_v3 = vadd.f32 %v10682_v20, %v3534_v46 }
 0x659   : > { %17553 = vst [vmem:[#allocation63_spill] sm:$0xff] %v12634_v18  ;;  %v3693_v26 = vadd.f32 %v12634_v18, %v12631_v50 }
 0x65a   : > { %v3572_v7 = vpop.f32.mrf.mxu2  ;;  %17562 = vst [vmem:[#allocation35_spill] sm:$0xff] %v12681_v3 }
 0x65b   : > { %v3573_v10 = vadd.f32 %v3572_v7, %v12626_v47  ;;  %3694 = vadd.xlane.f32.xlu0 %v3693_v26  ;;  %v3621_v32 = vpop.f32.mrf.mxu3  ;;  %v10683_v26 = vld [vmem:[%s11292_s15 + $0x58] sm:$0xff]  ;;  %v3489_v21 = vpop.f32.mrf.mxu0 }
 0x65d   : > { %v3622_v40 = vadd.f32 %v3621_v32, %v3573_v10  ;;  %v3537_v32 = vadd.f32 %v3536_v53, %v3488_v45 }
 0x65f   : > { %v12644_v34 = vadd.f32 %v10675_v33, %v3622_v40 }
 0x661   : > { %17555 = vst [vmem:[#allocation27_spill] sm:$0xff] %v12644_v34  ;;  %v3696_v38 = vadd.f32 %v12644_v34, %v12641_v43 }
 0x662   : > { %v3575_v22 = vpop.f32.mrf.mxu2 }
 0x663   : > { %v3576_v24 = vadd.f32 %v3575_v22, %v12626_v47  ;;  %3697 = vadd.xlane.f32.xlu1 %v3696_v38  ;;  %v3624_v51 = vpop.f32.mrf.mxu3  ;;  %v10684_v38 = vld [vmem:[%s11292_s15 + $0x60] sm:$0xff] }
 0x664   : > { %v12691_v22 = vadd.f32 %v10684_v38, %v3537_v32 }
 0x665   : > { %v3625_v39 = vadd.f32 %v3624_v51, %v3576_v24  ;;  %v3490_v51 = vadd.f32 %v3489_v21, %v12624_v4 }
 0x666   : > { %17564 = vst [vmem:[#allocation36_spill] sm:$0xff] %v12691_v22 }
 0x667   : > { %v12654_v42 = vadd.f32 %v10677_v62, %v3625_v39  ;;  %v3539_v25 = vadd.f32 %v3538_v28, %v3490_v51  ;;  %v10690_v51 = vld [vmem:[%s11292_s15 + $0x98] sm:$0xff] }
 0x669   : > { %17557 = vst [vmem:[#allocation26_spill] sm:$0xff] %v12654_v42  ;;  %v3699_v36 = vadd.f32 %v12654_v42, %v12651_v48 }
 0x66a   : > { %v3577_v1 = vpop.f32.mrf.mxu2 }
 0x66b   : > { %v3578_v5 = vadd.f32 %v3577_v1, %v12626_v47  ;;  %3700 = vadd.xlane.f32.xlu2 %v3699_v36  ;;  %v3626_v12 = vpop.f32.mrf.mxu3  ;;  %v3492_v36 = vpop.f32.mrf.mxu0  ;;  %v10686_v1 = vld [vmem:[%s11292_s15 + $0x70] sm:$0xff] }
 0x66c   : > { %v12701_v0 = vadd.f32 %v10686_v1, %v3539_v25  ;;  %v3493_v44 = vadd.f32 %v3492_v36, %v12624_v4 }
 0x66d   : > { %v3627_v30 = vadd.f32 %v3626_v12, %v3578_v5  ;;  %v10687_v5 = vld [vmem:[%s11292_s15 + $0x78] sm:$0xff] }
 0x66e   : > { %17566 = vst [vmem:[#allocation34_spill] sm:$0xff] %v12701_v0 }
 0x66f   : > { %v12664_v60 = vadd.f32 %v10679_v8, %v3627_v30  ;;  %v3541_v30 = vpop.f32.mrf.mxu1 }
 0x670   : > { %v3542_v41 = vadd.f32 %v3541_v30, %v3493_v44 }
 0x671   : > { %17559 = vst [vmem:[#allocation31_spill] sm:$0xff] %v12664_v60  ;;  %v3702_v55 = vadd.f32 %v12664_v60, %v12661_v52 }
 0x672   : > { %v3580_v31 = vpop.f32.mrf.mxu2 }
 0x673   : > { %v3581_v49 = vadd.f32 %v3580_v31, %v12626_v47  ;;  %3703 = vadd.xlane.f32.xlu0 %v3702_v55  ;;  %v3629_v54 = vpop.f32.mrf.mxu3  ;;  %v3494_v59 = vpop.f32.mrf.mxu0 }
 0x674   : > { %v3495_v32 = vadd.f32 %v3494_v59, %v12624_v4 }
 0x675   : > { %v3630_v14 = vadd.f32 %v3629_v54, %v3581_v49  ;;  %v12711_v49 = vadd.f32 %v10688_v23, %v3542_v41  ;;  %v10689_v54 = vld [vmem:[%s11292_s15 + $0x88] sm:$0xff] }
 0x677   : > { %v12674_v37 = vadd.f32 %v10681_v16, %v3630_v14  ;;  %17568 = vst [vmem:[#allocation41_spill] sm:$0xff] %v12711_v49  ;;  %v3543_v61 = vpop.f32.mrf.mxu1 }
 0x678   : > { %v3544_v28 = vadd.f32 %v3543_v61, %v3495_v32 }
 0x679   : > { %17561 = vst [vmem:[#allocation33_spill] sm:$0xff] %v12674_v37  ;;  %v3705_v17 = vadd.f32 %v12674_v37, %v12671_v63 }
 0x67a   : > { %v3582_v11 = vpop.f32.mrf.mxu2 }
 0x67b   : > { %v3583_v19 = vadd.f32 %v3582_v11, %v12626_v47  ;;  %3706 = vadd.xlane.f32.xlu1 %v3705_v17  ;;  %v3631_v58 = vpop.f32.mrf.mxu3 }
 0x67d   : > { %v3632_v15 = vadd.f32 %v3631_v58, %v3583_v19  ;;  %v17570_v19 = vld [vmem:[#allocation24_spill] sm:$0xff] }
 0x67f   : > { %v12684_v7 = vadd.f32 %v10683_v26, %v3632_v15 }
 0x681   : > { %17563 = vst [vmem:[#allocation32_spill] sm:$0xff] %v12684_v7  ;;  %v3708_v10 = vadd.f32 %v12684_v7, %v12681_v3 }
 0x682   : > { %v3585_v9 = vpop.f32.mrf.mxu2 }
 0x683   : > { %v3586_v40 = vadd.f32 %v3585_v9, %v12626_v47  ;;  %3709 = vadd.xlane.f32.xlu2 %v3708_v10  ;;  %v3634_v56 = vpop.f32.mrf.mxu3 }
 0x685   : > { %v3635_v33 = vadd.f32 %v3634_v56, %v3586_v40 }
 0x687   : > { %v12694_v24 = vadd.f32 %v10685_v2, %v3635_v33 }
 0x689   : > { %17565 = vst [vmem:[#allocation37_spill] sm:$0xff] %v12694_v24  ;;  %v3711_v39 = vadd.f32 %v12694_v24, %v12691_v22 }
 0x68a   : > { %v3587_v35 = vpop.f32.mrf.mxu2 }
 0x68b   : > { %v3588_v62 = vadd.f32 %v3587_v35, %v12626_v47  ;;  %3712 = vadd.xlane.f32.xlu0 %v3711_v39  ;;  %v3636_v57 = vpop.f32.mrf.mxu3 }
 0x68d   : > { %v3637_v29 = vadd.f32 %v3636_v57, %v3588_v62  ;;  %v10691_v57 = vld [vmem:[%s11292_s15 + $0x90] sm:$0xff] }
 0x68f   : > { %v12704_v12 = vadd.f32 %v10687_v5, %v3637_v29  ;;  %v12743_v29 = vadd.f32 %v10691_v57, %v3544_v28  ;;  %v10695_v57 = vld [vmem:[%s11292_s15 + $0xb0] sm:$0xff] }
 0x691   : > { %17567 = vst [vmem:[#allocation40_spill] sm:$0xff] %v12704_v12  ;;  %v3714_v8 = vadd.f32 %v12704_v12, %v12701_v0 }
 0x692   : > { %v3590_v27 = vpop.f32.mrf.mxu2  ;;  %v3497_v26 = vpop.f32.mrf.mxu0  ;;  %17572 = vst [vmem:[#allocation43_spill] sm:$0xff] %v12743_v29 }
 0x693   : > { %v3591_v55 = vadd.f32 %v3590_v27, %v12626_v47  ;;  %3715 = vadd.xlane.f32.xlu1 %v3714_v8  ;;  %v3639_v13 = vpop.f32.mrf.mxu3  ;;  %v3498_v30 = vadd.f32 %v3497_v26, %v12624_v4 }
 0x695   : > { %v3640_v31 = vadd.f32 %v3639_v13, %v3591_v55 }
 0x697   : > { %v12714_v14 = vadd.f32 %v10689_v54, %v3640_v31  ;;  %v10692_v54 = vld [vmem:[%s11292_s15 + $0xa8] sm:$0xff] }
 0x699   : > { %17569 = vst [vmem:[#allocation38_spill] sm:$0xff] %v12714_v14  ;;  %v3717_v6 = vadd.f32 %v12714_v14, %v12711_v49  ;;  %v3546_v56 = vpop.f32.mrf.mxu1 }
 0x69a   : > { %v3592_v16 = vpop.f32.mrf.mxu2  ;;  %v3499_v5 = vpop.f32.mrf.mxu0  ;;  %v3547_v13 = vadd.f32 %v3546_v56, %v3498_v30 }
 0x69b   : > { %3718 = vadd.xlane.f32.xlu1 %v3717_v6  ;;  %v3641_v17 = vpop.f32.mrf.mxu3  ;;  %v3593_v58 = vadd.f32 %v3592_v16, %v12626_v47 }
 0x69d   : > { %v3642_v40 = vadd.f32 %v3641_v17, %v3593_v58 }
 0x69f   : > { %v12733_v39 = vadd.f32 %v10690_v51, %v3642_v40 }
 0x6a1   : > { %17571 = vst [vmem:[#allocation42_spill] sm:$0xff] %v12733_v39  ;;  %v3720_v27 = vadd.f32 %v12733_v39, %v12743_v29  ;;  %v3548_v23 = vpop.f32.mrf.mxu1 }
 0x6a2   : > { %v3595_v11 = vpop.f32.mrf.mxu2 }
 0x6a3   : > { %v3644_v9 = vpop.f32.mrf.mxu3  ;;  %v3596_v35 = vadd.f32 %v3595_v11, %v12626_v47  ;;  %v10693_v11 = vld [vmem:[%s11292_s15 + $0xa0] sm:$0xff] }
 0x6a5   : > { %v3645_v44 = vadd.f32 %v3644_v9, %v3596_v35 }
 0x6a7   : > { %v12754_v6 = vadd.f32 %v10692_v54, %v3645_v44 }
 0x6a9   : > { %17573 = vst [vmem:[#allocation39_spill] sm:$0xff] %v12754_v6  ;;  %v3502_v26 = vpop.f32.mrf.mxu0 }
 0x6aa   : > { %v3597_v2 = vpop.f32.mrf.mxu2 }
 0x6ab   : > { %v3646_v41 = vpop.f32.mrf.mxu3  ;;  %v3598_v16 = vadd.f32 %v3597_v2, %v12626_v47 }
 0x6b2   : > { %v3600_v61 = vpop.f32.mrf.mxu2 }
 0x6b8   : > { %v3551_v28 = vpop.f32.mrf.mxu1 }
 0x6ba   : > { %v3602_v44 = vpop.f32.mrf.mxu2 }
 0x6be   : > { %v3649_v40 = vpop.f32.mrf.mxu3 }
 0x6ce   : > { %v3695_v46 = vpop.xlane.xlu0 %3694 }
 0x6cf   : > { %v3741_v53 = vmul.f32 %v3695_v46, %v17570_v19  ;;  %v12764_v46 = vadd.f32 %v10693_v11, %v3547_v13  ;;  %v3504_v13 = vpop.f32.mrf.mxu0 }
 0x6d1   : > { %v12721_v15 = vsub.f32 %v12631_v50, %v3741_v53  ;;  %v12724_v20 = vsub.f32 %v12634_v18, %v3741_v53  ;;  %17574 = vst [vmem:[#allocation46_spill] sm:$0xff] %v12764_v46  ;;  %v3723_v32 = vadd.f32 %v12754_v6, %v12764_v46 }
 0x6d3   : > { %v3789_v45 = vmul.f32 %v12721_v15, %v12721_v15  ;;  %v3790_v10 = vmul.f32 %v12724_v20, %v12724_v20 }
 0x6d5   : > { %v3821_v21 = vadd.f32 %v3790_v10, %v3789_v45  ;;  %v3500_v45 = vadd.f32 %v3499_v5, %v12624_v4  ;;  %v3647_v10 = vadd.f32 %v3646_v41, %v3598_v16  ;;  %v3651_v16 = vpop.f32.mrf.mxu3 }
 0x6d6   : > { %v3698_v33 = vpop.xlane.xlu1 %3697 }
 0x6d7   : > { %v3742_v38 = vmul.f32 %v3698_v33, %v17570_v19  ;;  %3822 = vadd.xlane.f32.xlu2 %v3821_v21  ;;  %v3549_v56 = vadd.f32 %v3548_v23, %v3500_v45  ;;  %v10697_v45 = vld [vmem:[%s11292_s15 + $0xc0] sm:$0xff] }
 0x6d9   : > { %v12737_v25 = vsub.f32 %v12641_v43, %v3742_v38  ;;  %v12740_v62 = vsub.f32 %v12644_v34, %v3742_v38  ;;  %v10694_v38 = vld [vmem:[%s11292_s15 + $0xb8] sm:$0xff] }
 0x6da   : > { %v12775_v2 = vadd.f32 %v10694_v38, %v3647_v10  ;;  %v9600_v34 = vld [vmem:[#allocation14 + $0x1d0] sm:$0xf0] }
 0x6db   : > { %v3791_v36 = vmul.f32 %v12737_v25, %v12737_v25  ;;  %v3792_v1 = vmul.f32 %v12740_v62, %v12740_v62 }
 0x6dc   : > { %17575 = vst [vmem:[#allocation47_spill] sm:$0xff] %v12775_v2 }
 0x6dd   : > { %v3824_v8 = vadd.f32 %v3792_v1, %v3791_v36  ;;  %v12784_v36 = vadd.f32 %v10695_v57, %v3549_v56  ;;  %v3601_v1 = vadd.f32 %v3600_v61, %v12626_v47  ;;  %v10696_v61 = vld [vmem:[%s11292_s15 + $0xc8] sm:$0xff]  ;;  %v3505_v56 = vadd.f32 %v3504_v13, %v12624_v4  ;;  %v3507_v57 = vpop.f32.mrf.mxu0 }
 0x6de   : > { %v3701_v55 = vpop.xlane.xlu2 %3700 }
 0x6df   : > { %v3743_v31 = vmul.f32 %v3701_v55, %v17570_v19  ;;  %3825 = vadd.xlane.f32.xlu0 %v3824_v8  ;;  %3721 = vadd.xlane.f32.xlu2 %v3720_v27  ;;  %17576 = vst [vmem:[#allocation44_spill] sm:$0xff] %v12784_v36  ;;  %v3503_v8 = vadd.f32 %v3502_v26, %v12624_v4  ;;  %v3553_v26 = vpop.f32.mrf.mxu1 }
 0x6e0   : > { %v3650_v27 = vadd.f32 %v3649_v40, %v3601_v1  ;;  %v3726_v41 = vadd.f32 %v12775_v2, %v12784_v36 }
 0x6e1   : > { %v12758_v59 = vsub.f32 %v12651_v48, %v3743_v31  ;;  %v12761_v17 = vsub.f32 %v12654_v42, %v3743_v31  ;;  %v3552_v23 = vadd.f32 %v3551_v28, %v3503_v8  ;;  %v10698_v8 = vld [vmem:[%s11292_s15 + $0xd8] sm:$0xff]  ;;  %v10138_v42 = vld [vmem:[#allocation14 + $0x1c4] sm:$0xf]  ;;  %v10101_v48 = vld [vmem:[#allocation14 + $0x94] sm:$0xf0] }
 0x6e2   : > { %v12796_v11 = vadd.f32 %v10696_v61, %v3650_v27 }
 0x6e3   : > { %v3793_v53 = vmul.f32 %v12758_v59, %v12758_v59  ;;  %v3794_v58 = vmul.f32 %v12761_v17, %v12761_v17  ;;  %v12805_v10 = vadd.f32 %v10697_v45, %v3552_v23  ;;  %v10699_v23 = vld [vmem:[%s11292_s15 + $0xd0] sm:$0xff] }
 0x6e4   : > { %17577 = vst [vmem:[#allocation48_spill] sm:$0xff] %v12796_v11 }
 0x6e5   : > { %v3827_v9 = vadd.f32 %v3794_v58, %v3793_v53  ;;  %17578 = vst [vmem:[#allocation49_spill] sm:$0xff] %v12805_v10  ;;  %v3729_v28 = vadd.f32 %v12796_v11, %v12805_v10 }
 0x6e6   : > { %v3704_v21 = vpop.xlane.xlu0 %3703 }
 0x6e7   : > { %v3744_v33 = vmul.f32 %v3704_v21, %v17570_v19  ;;  %3828 = vadd.xlane.f32.xlu0 %v3827_v9  ;;  %3724 = vadd.xlane.f32.xlu2 %v3723_v32  ;;  %v3603_v9 = vadd.f32 %v3602_v44, %v12626_v47  ;;  %v3605_v21 = vpop.f32.mrf.mxu2  ;;  %v3654_v44 = vpop.f32.mrf.mxu3 }
 0x6e9   : > { %v12778_v51 = vsub.f32 %v12661_v52, %v3744_v33  ;;  %v12781_v35 = vsub.f32 %v12664_v60, %v3744_v33  ;;  %v3652_v33 = vadd.f32 %v3651_v16, %v3603_v9  ;;  %v3508_v16 = vadd.f32 %v3507_v57, %v12624_v4  ;;  %v9472_v60 = vld [vmem:[#allocation14 + $0xd0] sm:$0xf0] }
 0x6eb   : > { %v3795_v5 = vmul.f32 %v12778_v51, %v12778_v51  ;;  %v3796_v30 = vmul.f32 %v12781_v35, %v12781_v35  ;;  %v12817_v27 = vadd.f32 %v10698_v8, %v3652_v33  ;;  %v10701_v8 = vld [vmem:[%s11292_s15 + $0xe0] sm:$0xff] }
 0x6ed   : > { %v3830_v55 = vadd.f32 %v3796_v30, %v3795_v5  ;;  %v3554_v5 = vadd.f32 %v3553_v26, %v3505_v56  ;;  %17579 = vst [vmem:[#allocation45_spill] sm:$0xff] %v12817_v27 }
 0x6ee   : > { %v3707_v31 = vpop.xlane.xlu1 %3706 }
 0x6ef   : > { %v3745_v54 = vmul.f32 %v3707_v31, %v17570_v19  ;;  %3727 = vadd.xlane.f32.xlu0 %v3726_v41  ;;  %3831 = vadd.xlane.f32.xlu1 %v3830_v55  ;;  %v3606_v41 = vadd.f32 %v3605_v21, %v12626_v47  ;;  %v3556_v31 = vpop.f32.mrf.mxu1 }
 0x6f0   : > { %v3557_v56 = vadd.f32 %v3556_v31, %v3508_v16 }
 0x6f1   : > { %v12799_v53 = vsub.f32 %v12671_v63, %v3745_v54  ;;  %v12802_v58 = vsub.f32 %v12674_v37, %v3745_v54  ;;  %v12827_v54 = vadd.f32 %v10699_v23, %v3554_v5  ;;  %v3655_v45 = vadd.f32 %v3654_v44, %v3606_v41  ;;  %v3656_v44 = vpop.f32.mrf.mxu3  ;;  %v9598_v37 = vld [vmem:[#allocation14 + $0x1c0] sm:$0xf] }
 0x6f2   : > { %v12848_v41 = vadd.f32 %v10701_v8, %v3557_v56 }
 0x6f3   : > { %v3797_v32 = vmul.f32 %v12799_v53, %v12799_v53  ;;  %v3798_v40 = vmul.f32 %v12802_v58, %v12802_v58  ;;  %17580 = vst [vmem:[#allocation51_spill] sm:$0xff] %v12827_v54 }
 0x6f4   : > { %17582 = vst [vmem:[#allocation69_spill] sm:$0xff] %v12848_v41 }
 0x6f5   : > { %v3833_v38 = vadd.f32 %v3798_v40, %v3797_v32  ;;  %v3732_v32 = vadd.f32 %v12817_v27, %v12827_v54  ;;  %v3607_v40 = vpop.f32.mrf.mxu2 }
 0x6f6   : > { %v3710_v1 = vpop.xlane.xlu2 %3709 }
 0x6f7   : > { %v3746_v30 = vmul.f32 %v3710_v1, %v17570_v19  ;;  %3730 = vadd.xlane.f32.xlu0 %v3729_v28  ;;  %3834 = vadd.xlane.f32.xlu1 %v3833_v38  ;;  %v3509_v28 = vpop.f32.mrf.mxu0  ;;  %v10700_v38 = vld [vmem:[%s11292_s15 + $0xe8] sm:$0xff]  ;;  %v3608_v1 = vadd.f32 %v3607_v40, %v12626_v47  ;;  %v3558_v16 = vpop.f32.mrf.mxu1 }
 0x6f8   : > { %v12838_v57 = vadd.f32 %v10700_v38, %v3655_v45  ;;  %v3510_v31 = vadd.f32 %v3509_v28, %v12624_v4  ;;  %v10702_v4 = vld [vmem:[%s11292_s15 + $0xf8] sm:$0xff]  ;;  %v10703_v28 = vld [vmem:[%s11292_s15 + $0xf0] sm:$0xff]  ;;  %s8683_s15 = sshll.u32 %s17118_s27, 4  ;;  %s8684_s15 = int_to_ptr.vmem [resolvable:$true] %s8683_s15 }
 0x6f9   : > { %v12821_v55 = vsub.f32 %v12681_v3, %v3746_v30  ;;  %v12824_v13 = vsub.f32 %v12684_v7, %v3746_v30  ;;  %v10108_v7 = vld [vmem:[#allocation14 + $0xcc] sm:$0xf0] }
 0x6fa   : > { %17581 = vst [vmem:[#allocation50_spill] sm:$0xff] %v12838_v57 }
 0x6fb   : > { %v3799_v61 = vmul.f32 %v12821_v55, %v12821_v55  ;;  %v3800_v26 = vmul.f32 %v12824_v13, %v12824_v13 }
 0x6fd   : > { %v3836_v9 = vadd.f32 %v3800_v26, %v3799_v61  ;;  %v3657_v61 = vadd.f32 %v3656_v44, %v3608_v1  ;;  %v3735_v26 = vadd.f32 %v12838_v57, %v12848_v41 }
 0x6fe   : > { %v3713_v21 = vpop.xlane.xlu0 %3712 }
 0x6ff   : > { %v3747_v33 = vmul.f32 %v3713_v21, %v17570_v19  ;;  %3837 = vadd.xlane.f32.xlu2 %v3836_v9  ;;  %3733 = vadd.xlane.f32.xlu1 %v3732_v32  ;;  %v3559_v32 = vadd.f32 %v3558_v16, %v3510_v31  ;;  %v12859_v21 = vadd.f32 %v10702_v4, %v3657_v61  ;;  %v9614_v4 = vld [vmem:[#allocation14 + $0x1e0] sm:$0xf] }
 0x701   : > { %v12842_v5 = vsub.f32 %v12691_v22, %v3747_v33  ;;  %v12845_v30 = vsub.f32 %v12694_v24, %v3747_v33  ;;  %17583 = vst [vmem:[#allocation64_spill] sm:$0xff] %v12859_v21  ;;  %v12868_v38 = vadd.f32 %v10703_v28, %v3559_v32  ;;  %v9486_v32 = vld [vmem:[#allocation14 + $0xe0] sm:$0xf] }
 0x702   : > { %v9470_v24 = vld [vmem:[#allocation14 + $0xc0] sm:$0xf] }
 0x703   : > { %v3801_v23 = vmul.f32 %v12842_v5, %v12842_v5  ;;  %v3802_v47 = vmul.f32 %v12845_v30, %v12845_v30  ;;  %17584 = vst [vmem:[#allocation66_spill] sm:$0xff] %v12868_v38  ;;  %v3738_v31 = vadd.f32 %v12859_v21, %v12868_v38 }
 0x705   : > { %v3839_v45 = vadd.f32 %v3802_v47, %v3801_v23 }
 0x706   : > { %v3716_v9 = vpop.xlane.xlu1 %3715 }
 0x707   : > { %v3748_v40 = vmul.f32 %v3716_v9, %v17570_v19  ;;  %3736 = vadd.xlane.f32.xlu1 %v3735_v26  ;;  %3840 = vadd.xlane.f32.xlu2 %v3839_v45 }
 0x709   : > { %v12862_v56 = vsub.f32 %v12701_v0, %v3748_v40  ;;  %v12865_v33 = vsub.f32 %v12704_v12, %v3748_v40  ;;  %v10112_v40 = vld [vmem:[#allocation14 + $0xec] sm:$0xf0]  ;;  %v10142_v12 = vld [vmem:[#allocation14 + $0x1e4] sm:$0xf] }
 0x70a   : > { %v9487_v28 = vor.u32 %v10112_v40, %v9486_v32 }
 0x70b   : > { %v3803_v1 = vmul.f32 %v12862_v56, %v12862_v56  ;;  %v3804_v44 = vmul.f32 %v12865_v33, %v12865_v33 }
 0x70c   : > { %4577 = vmatpush.bf16.msrb.mxu0 %v9487_v28  ;;  %v9454_v28 = vld [vmem:[#allocation14 + $0xa0] sm:$0xf] }
 0x70d   : > { %v3842_v8 = vadd.f32 %v3804_v44, %v3803_v1  ;;  %v10144_v1 = vld [vmem:[#allocation14 + $0x1ec] sm:$0xf0]  ;;  %v10110_v44 = vld [vmem:[#allocation14 + $0xe4] sm:$0xf] }
 0x70e   : > { %v3719_v23 = vpop.xlane.xlu1 %3718 }
 0x70f   : > { %v3749_v47 = vmul.f32 %v3719_v23, %v17570_v19  ;;  %3843 = vadd.xlane.f32.xlu0 %v3842_v8  ;;  %3739 = vadd.xlane.f32.xlu2 %v3738_v31  ;;  %v9488_v8 = vld [vmem:[#allocation14 + $0xf0] sm:$0xf0]  ;;  %v9615_v31 = vor.u32 %v10144_v1, %v9614_v4  ;;  %v9603_v4 = vor.u32 %v10138_v42, %v9600_v34  ;;  %v9582_v1 = vld [vmem:[#allocation14 + $0x1a0] sm:$0xf]  ;;  %v10100_v34 = vld [vmem:[#allocation14 + $0x8c] sm:$0xf0] }
 0x710   : > { %v9491_v23 = vor.u32 %v10110_v44, %v9488_v8  ;;  %v10136_v8 = vld [vmem:[#allocation14 + $0x1ac] sm:$0xf0]  ;;  %v9566_v42 = vld [vmem:[#allocation14 + $0x180] sm:$0xf] }
 0x711   : > { %v12878_v16 = vsub.f32 %v12711_v49, %v3749_v47  ;;  %v12881_v61 = vsub.f32 %v12714_v14, %v3749_v47  ;;  %v9616_v47 = vld [vmem:[#allocation14 + $0x1f0] sm:$0xf0]  ;;  %4626 = vmatpush.bf16.msrb.mxu1 %v9615_v31  ;;  %v10102_v31 = vld [vmem:[#allocation14 + $0xa4] sm:$0xf] }
 0x712   : > { %v9619_v14 = vor.u32 %v10142_v12, %v9616_v47  ;;  %4675 = vmatpush.bf16.msrb.mxu2 %v9491_v23  ;;  %v10104_v12 = vld [vmem:[#allocation14 + $0xac] sm:$0xf0]  ;;  %v10134_v23 = vld [vmem:[#allocation14 + $0x1a4] sm:$0xf]  ;;  %v9584_v47 = vld [vmem:[#allocation14 + $0x1b0] sm:$0xf0] }
 0x713   : > { %v3805_v26 = vmul.f32 %v12878_v16, %v12878_v16  ;;  %v3806_v45 = vmul.f32 %v12881_v61, %v12881_v61  ;;  %v9455_v44 = vor.u32 %v10104_v12, %v9454_v28  ;;  %v10130_v28 = vld [vmem:[#allocation14 + $0x184] sm:$0xf]  ;;  %v9568_v12 = vld [vmem:[#allocation14 + $0x190] sm:$0xf0] }
 0x714   : > { %4724 = vmatpush.bf16.msrb.mxu3 %v9619_v14  ;;  %v9456_v14 = vld [vmem:[#allocation14 + $0xb0] sm:$0xf0] }
 0x715   : > { %v3845_v9 = vadd.f32 %v3806_v45, %v3805_v26  ;;  %v9471_v26 = vor.u32 %v10108_v7, %v9470_v24  ;;  %v10140_v45 = vld [vmem:[#allocation14 + $0x1cc] sm:$0xf0]  ;;  %v9583_v7 = vor.u32 %v10136_v8, %v9582_v1  ;;  %v9459_v24 = vor.u32 %v10102_v31, %v9456_v14  ;;  %v9550_v31 = vld [vmem:[#allocation14 + $0x160] sm:$0xf] }
 0x716   : > { %v9599_v32 = vor.u32 %v10140_v45, %v9598_v37  ;;  %v9438_v37 = vld [vmem:[#allocation14 + $0x80] sm:$0xf]  ;;  %v10132_v45 = vld [vmem:[#allocation14 + $0x18c] sm:$0xf0]  ;;  %v9571_v1 = vor.u32 %v10130_v28, %v9568_v12  ;;  %v9408_v28 = vld [vmem:[#allocation14 + $0x50] sm:$0xf0] }
 0x717   : > { %3846 = vadd.xlane.f32.xlu0 %v3845_v9  ;;  %v10106_v9 = vld [vmem:[#allocation14 + $0xc4] sm:$0xf]  ;;  %4578 = vmatpush.bf16.msrb.mxu0 %v9471_v26  ;;  %v9439_v26 = vor.u32 %v10100_v34, %v9438_v37  ;;  %v10096_v8 = vld [vmem:[#allocation14 + $0x6c] sm:$0xf0]  ;;  %v9552_v34 = vld [vmem:[#allocation14 + $0x170] sm:$0xf0] }
 0x718   : > { %v9475_v40 = vor.u32 %v10106_v9, %v9472_v60  ;;  %4627 = vmatpush.bf16.msrb.mxu1 %v9599_v32  ;;  %4725 = vmatpush.bf16.msrb.mxu3 %v9603_v4  ;;  %v9587_v60 = vor.u32 %v10134_v23, %v9584_v47  ;;  %v10098_v9 = vld [vmem:[#allocation14 + $0x84] sm:$0xf]  ;;  %v9440_v32 = vld [vmem:[#allocation14 + $0x90] sm:$0xf0] }
 0x719   : > { %v9443_v4 = vor.u32 %v10098_v9, %v9440_v32  ;;  %v9424_v23 = vld [vmem:[#allocation14 + $0x70] sm:$0xf0]  ;;  %v10126_v37 = vld [vmem:[#allocation14 + $0x164] sm:$0xf]  ;;  %v9534_v9 = vld [vmem:[#allocation14 + $0x140] sm:$0xf] }
 0x71a   : > { %4676 = vmatpush.bf16.msrb.mxu2 %v9475_v40  ;;  %v9567_v40 = vor.u32 %v10132_v45, %v9566_v42  ;;  %v9555_v42 = vor.u32 %v10126_v37, %v9552_v34  ;;  %v10092_v45 = vld [vmem:[#allocation14 + $0x4c] sm:$0xf0]  ;;  %v9392_v37 = vld [vmem:[#allocation14 + $0x30] sm:$0xf0] }
 0x71b   : > { %4579 = vmatpush.bf16.msrb.mxu0 %v9455_v44  ;;  %v9422_v44 = vld [vmem:[#allocation14 + $0x60] sm:$0xf] }
 0x71c   : > { %4628 = vmatpush.bf16.msrb.mxu1 %v9583_v7  ;;  %4726 = vmatpush.bf16.msrb.mxu3 %v9587_v60  ;;  %v9423_v14 = vor.u32 %v10096_v8, %v9422_v44  ;;  %v10128_v7 = vld [vmem:[#allocation14 + $0x16c] sm:$0xf0]  ;;  %v10122_v44 = vld [vmem:[#allocation14 + $0x144] sm:$0xf]  ;;  %v9536_v8 = vld [vmem:[#allocation14 + $0x150] sm:$0xf0] }
 0x71d   : > { %v9551_v47 = vor.u32 %v10128_v7, %v9550_v31  ;;  %v9539_v31 = vor.u32 %v10122_v44, %v9536_v8  ;;  %v10088_v7 = vld [vmem:[#allocation14 + $0x2c] sm:$0xf0] }
 0x71e   : > { %4677 = vmatpush.bf16.msrb.mxu2 %v9459_v24  ;;  %v10094_v24 = vld [vmem:[#allocation14 + $0x64] sm:$0xf]  ;;  %v10116_v8 = vld [vmem:[#allocation14 + $0x10c] sm:$0xf0] }
 0x71f   : > { %4580 = vmatpush.bf16.msrb.mxu0 %v9439_v26  ;;  %v9427_v60 = vor.u32 %v10094_v24, %v9424_v23  ;;  %v9406_v26 = vld [vmem:[#allocation14 + $0x40] sm:$0xf] }
 0x720   : > { %4629 = vmatpush.bf16.msrb.mxu1 %v9567_v40  ;;  %4727 = vmatpush.bf16.msrb.mxu3 %v9571_v1  ;;  %v9407_v32 = vor.u32 %v10092_v45, %v9406_v26  ;;  %v10124_v40 = vld [vmem:[#allocation14 + $0x14c] sm:$0xf0]  ;;  %v9518_v24 = vld [vmem:[#allocation14 + $0x120] sm:$0xf]  ;;  %v10118_v45 = vld [vmem:[#allocation14 + $0x124] sm:$0xf] }
 0x721   : > { %v9535_v12 = vor.u32 %v10124_v40, %v9534_v9  ;;  %v9520_v9 = vld [vmem:[#allocation14 + $0x130] sm:$0xf0] }
 0x722   : > { %4678 = vmatpush.bf16.msrb.mxu2 %v9443_v4  ;;  %v10090_v4 = vld [vmem:[#allocation14 + $0x44] sm:$0xf] }
 0x723   : > { %4581 = vmatpush.bf16.msrb.mxu0 %v9423_v14  ;;  %v9411_v1 = vor.u32 %v10090_v4, %v9408_v28  ;;  %v9390_v14 = vld [vmem:[#allocation14 + $0x20] sm:$0xf]  ;;  %v10084_v28 = vld [vmem:[#allocation14 + $0xc] sm:$0xf0] }
 0x724   : > { %4630 = vmatpush.bf16.msrb.mxu1 %v9551_v47  ;;  %4728 = vmatpush.bf16.msrb.mxu3 %v9555_v42  ;;  %v9391_v23 = vor.u32 %v10088_v7, %v9390_v14  ;;  %v10120_v47 = vld [vmem:[#allocation14 + $0x12c] sm:$0xf0]  ;;  %v9374_v4 = vld [vmem:[#allocation14] sm:$0xf]  ;;  %v9376_v7 = vld [vmem:[#allocation14 + $0x10] sm:$0xf0] }
 0x725   : > { %v9519_v42 = vor.u32 %v10120_v47, %v9518_v24  ;;  %v9375_v44 = vor.u32 %v10084_v28, %v9374_v4  ;;  %v10114_v24 = vld [vmem:[#allocation14 + $0x104] sm:$0xf]  ;;  %v9504_v47 = vld [vmem:[#allocation14 + $0x110] sm:$0xf0] }
 0x726   : > { %4679 = vmatpush.bf16.msrb.mxu2 %v9427_v60  ;;  %v10086_v60 = vld [vmem:[#allocation14 + $0x24] sm:$0xf] }
 0x727   : > { %4582 = vmatpush.bf16.msrb.mxu0 %v9407_v32  ;;  %v9395_v26 = vor.u32 %v10086_v60, %v9392_v37  ;;  %v9523_v32 = vor.u32 %v10118_v45, %v9520_v9  ;;  %v9507_v37 = vor.u32 %v10114_v24, %v9504_v47 }
 0x728   : > { %4631 = vmatpush.bf16.msrb.mxu1 %v9535_v12  ;;  %4729 = vmatpush.bf16.msrb.mxu3 %v9539_v31  ;;  %v9502_v12 = vld [vmem:[#allocation14 + $0x100] sm:$0xf]  ;;  %v10082_v31 = vld [vmem:[#allocation14 + $0x4] sm:$0xf] }
 0x729   : > { %v9503_v14 = vor.u32 %v10116_v8, %v9502_v12  ;;  %v9379_v60 = vor.u32 %v10082_v31, %v9376_v7 }
 0x72a   : > { %4680 = vmatpush.bf16.msrb.mxu2 %v9411_v1 }
 0x72b   : > { %4583 = vmatpush.bf16.msrb.mxu0 %v9391_v23 }
 0x72c   : > { %4632 = vmatpush.bf16.msrb.mxu1 %v9519_v42  ;;  %4730 = vmatpush.bf16.msrb.mxu3 %v9523_v32 }
 0x72e   : > { %4681 = vmatpush.bf16.msrb.mxu2 %v9395_v26 }
 0x72f   : > { %4584 = vmatpush.bf16.msrb.mxu0 %v9375_v44 }
 0x730   : > { %4633 = vmatpush.bf16.msrb.mxu1 %v9503_v14  ;;  %4731 = vmatpush.bf16.msrb.mxu3 %v9507_v37 }
 0x732   : > { %4682 = vmatpush.bf16.msrb.mxu2 %v9379_v60 }
 0x74a   : > { %v3823_v34 = vpop.xlane.xlu2 %3822 }
 0x74b   : > { %v3869_v40 = vmul.f32 %v3823_v34, %v17570_v19 }
 0x74d   : > { %v3885_v1 = vadd.f32 1e-06, %v3869_v40 }
 0x74f   : > { %10510 = vrsqrt.f32 %v3885_v1  ;;  %vm3907_vm2 = vweird.f32 %v3885_v1 }
 0x752   : > { %v3722_v23 = vpop.xlane.xlu2 %3721  ;;  %v3826_v34 = vpop.xlane.xlu0 %3825 }
 0x753   : > { %v3750_v42 = vmul.f32 %v3722_v23, %v17570_v19  ;;  %v3870_v26 = vmul.f32 %v3826_v34, %v17570_v19 }
 0x755   : > { %v10511_v45 = vpop.eup %10510  ;;  %v12891_v9 = vsub.f32 %v12743_v29, %v3750_v42  ;;  %v12894_v40 = vsub.f32 %v12733_v39, %v3750_v42  ;;  %v3886_v32 = vadd.f32 1e-06, %v3870_v26 }
 0x756   : > { %v3902_v4 = vmul.f32 %v10511_v45, %v3885_v1  ;;  %vm3908_vm1 = vweird.f32 %v10511_v45 }
 0x757   : > { %10512 = vrsqrt.f32 %v3886_v32  ;;  %v3807_v28 = vmul.f32 %v12891_v9, %v12891_v9  ;;  %v3808_v12 = vmul.f32 %v12894_v40, %v12894_v40  ;;  %vm3909_vm3 = vmor %vm3907_vm2, %vm3908_vm1  ;;  %vm3917_vm5 = vweird.f32 %v3886_v32 }
 0x758   : > { %v3903_v44 = vmul.f32 %v10511_v45, %v3902_v4 }
 0x759   : > { %v3848_v8 = vadd.f32 %v3808_v12, %v3807_v28 }
 0x75a   : > { %v3904_v31 = vmul.f32 0.5, %v3903_v44  ;;  %v3725_v14 = vpop.xlane.xlu2 %3724  ;;  %v3829_v7 = vpop.xlane.xlu0 %3828  ;;  %v3691_v44 = vld [vmem:[#allocation11] sm:$0x3] }
 0x75b   : > { %v3751_v24 = vmul.f32 %v3725_v14, %v17570_v19  ;;  %v3871_v47 = vmul.f32 %v3829_v7, %v17570_v19  ;;  %3849 = vadd.xlane.f32.xlu1 %v3848_v8  ;;  %v3692_v7 = vld [vmem:[#allocation13] sm:$0x3] }
 0x75c   : > { %v3905_v60 = vsub.f32 1.5, %v3904_v31 }
 0x75d   : > { %v10513_v37 = vpop.eup %10512  ;;  %v12903_v23 = vsub.f32 %v12764_v46, %v3751_v24  ;;  %v12906_v34 = vsub.f32 %v12754_v6, %v3751_v24  ;;  %v12908_v42 = vadd.f32 1e-06, %v3871_v47  ;;  %v12920_v46 = vperm.slane %v3691_v44, 1 }
 0x75e   : > { %v3906_v26 = vmul.f32 %v10511_v45, %v3905_v60  ;;  %v3912_v4 = vmul.f32 %v10513_v37, %v3886_v32  ;;  %v12915_v60 = vperm.slane %v3691_v44, 0  ;;  %vm3918_vm4 = vweird.f32 %v10513_v37 }
 0x75f   : > { %10514 = vrsqrt.f32 %v12908_v42  ;;  %v3809_v28 = vmul.f32 %v12903_v23, %v12903_v23  ;;  %v3810_v12 = vmul.f32 %v12906_v34, %v12906_v34  ;;  %v12934_v44 = vperm.slane %v3692_v7, 1  ;;  %vm3919_vm6 = vmor %vm3917_vm5, %vm3918_vm4 }
 0x760   : > { %v3910_v8 = vsel %vm3909_vm3, %v10511_v45, %v3906_v26  ;;  %v3913_v31 = vmul.f32 %v10513_v37, %v3912_v4  ;;  %v12923_v4 = vperm.slane %v3692_v7, 0  ;;  %vm3927_vm8 = vweird.f32 %v12908_v42 }
 0x761   : > { %v3851_v14 = vadd.f32 %v3810_v12, %v3809_v28  ;;  %v4061_v1 = vmul.f32 %v3910_v8, %v12721_v15  ;;  %v4062_v29 = vmul.f32 %v3910_v8, %v12724_v20 }
 0x762   : > { %v3914_v24 = vmul.f32 0.5, %v3913_v31  ;;  %v3832_v47 = vpop.xlane.xlu1 %3831  ;;  %v3728_v6 = vpop.xlane.xlu0 %3727 }
 0x763   : > { %v3872_v39 = vmul.f32 %v3832_v47, %v17570_v19  ;;  %v3752_v18 = vmul.f32 %v3728_v6, %v17570_v19  ;;  %3852 = vadd.xlane.f32.xlu2 %v3851_v14  ;;  %v4098_v20 = vmul.f32 %v12915_v60, %v4061_v1  ;;  %v4099_v8 = vmul.f32 %v12920_v46, %v4062_v29 }
 0x764   : > { %v3915_v45 = vsub.f32 1.5, %v3914_v24 }
 0x765   : > { %v10515_v26 = vpop.eup %10514  ;;  %v12925_v28 = vadd.f32 1e-06, %v3872_v39  ;;  %v12928_v12 = vsub.f32 %v12784_v36, %v3752_v18  ;;  %v12932_v6 = vsub.f32 %v12775_v2, %v3752_v18 }
 0x766   : > { %v3916_v15 = vmul.f32 %v10513_v37, %v3915_v45  ;;  %v3922_v31 = vmul.f32 %v10515_v26, %v12908_v42  ;;  %vm3928_vm7 = vweird.f32 %v10515_v26 }
 0x767   : > { %10516 = vrsqrt.f32 %v12925_v28  ;;  %v3811_v39 = vmul.f32 %v12928_v12, %v12928_v12  ;;  %v3812_v32 = vmul.f32 %v12932_v6, %v12932_v6  ;;  %vm3929_vm9 = vmor %vm3927_vm8, %vm3928_vm7  ;;  %vm3937_vm11 = vweird.f32 %v12925_v28 }
 0x768   : > { %v3920_v14 = vsel %vm3919_vm6, %v10513_v37, %v3916_v15  ;;  %v3923_v24 = vmul.f32 %v10515_v26, %v3922_v31  ;;  %v4135_v37 = vadd.f32 %v12923_v4, %v4098_v20  ;;  %v4136_v15 = vadd.f32 %v12934_v44, %v4099_v8 }
 0x769   : > { %v4063_v18 = vmul.f32 %v3920_v14, %v12737_v25  ;;  %v4064_v7 = vmul.f32 %v3920_v14, %v12740_v62  ;;  %v3854_v2 = vadd.f32 %v3812_v32, %v3811_v39 }
 0x76a   : > { %v3924_v47 = vmul.f32 0.5, %v3923_v24  ;;  %v3835_v45 = vpop.xlane.xlu1 %3834  ;;  %v3731_v1 = vpop.xlane.xlu0 %3730 }
 0x76b   : > { %v4100_v36 = vmul.f32 %v12915_v60, %v4063_v18  ;;  %v4101_v49 = vmul.f32 %v12920_v46, %v4064_v7  ;;  %v3873_v0 = vmul.f32 %v3835_v45, %v17570_v19  ;;  %v3753_v29 = vmul.f32 %v3731_v1, %v17570_v19  ;;  %3855 = vadd.xlane.f32.xlu0 %v3854_v2 }
 0x76c   : > { %v3925_v31 = vsub.f32 1.5, %v3924_v47 }
 0x76d   : > { %v10517_v25 = vpop.eup %10516  ;;  %v4137_v62 = vadd.f32 %v12923_v4, %v4100_v36  ;;  %v4138_v39 = vadd.f32 %v12934_v44, %v4101_v49  ;;  %v12953_v14 = vadd.f32 1e-06, %v3873_v0  ;;  %v12956_v24 = vsub.f32 %v12805_v10, %v3753_v29 }
 0x76e   : > { %v3926_v32 = vmul.f32 %v10515_v26, %v3925_v31  ;;  %v3932_v18 = vmul.f32 %v10517_v25, %v12925_v28  ;;  %v12960_v20 = vsub.f32 %v12796_v11, %v3753_v29  ;;  %vm3938_vm10 = vweird.f32 %v10517_v25 }
 0x76f   : > { %10518 = vrsqrt.f32 %v12953_v14  ;;  %v12964_v2 = vpack.c.bf16 %v4137_v62, %v4135_v37  ;;  %v12966_v36 = vpack.c.bf16 %v4138_v39, %v4136_v15  ;;  %v3813_v49 = vmul.f32 %v12956_v24, %v12956_v24  ;;  %vm3939_vm12 = vmor %vm3937_vm11, %vm3938_vm10 }
 0x770   : > { %v3933_v0 = vmul.f32 %v10517_v25, %v3932_v18  ;;  %v3814_v8 = vmul.f32 %v12960_v20, %v12960_v20  ;;  %v3930_v7 = vsel %vm3929_vm9, %v10515_v26, %v3926_v32  ;;  %vm3947_vm14 = vweird.f32 %v12953_v14 }
 0x771   : > { %4585 = vmatmul.bf16.vlgmr.msrb.gmra.mxu0 %v12964_v2  ;;  %4634 = vmatmul.bf16.vlgmr.msrb.gmra.mxu1 %v12966_v36  ;;  %v4065_v15 = vmul.f32 %v3930_v7, %v12758_v59  ;;  %v4066_v18 = vmul.f32 %v3930_v7, %v12761_v17 }
 0x772   : > { %v3934_v42 = vmul.f32 0.5, %v3933_v0  ;;  %4683 = vmatmul.bf16.vlgmr.msrb.gmra.mxu2 %v12964_v2  ;;  %4732 = vmatmul.bf16.vlgmr.msrb.gmra.mxu3 %v12966_v36  ;;  %v3838_v47 = vpop.xlane.xlu2 %3837  ;;  %v3734_v45 = vpop.xlane.xlu1 %3733  ;;  %v3857_v1 = vadd.f32 %v3814_v8, %v3813_v49 }
 0x773   : > { %v3874_v29 = vmul.f32 %v3838_v47, %v17570_v19  ;;  %v3754_v37 = vmul.f32 %v3734_v45, %v17570_v19  ;;  %v4102_v45 = vmul.f32 %v12915_v60, %v4065_v15 }
 0x774   : > { %v3935_v31 = vsub.f32 1.5, %v3934_v42  ;;  %3858 = vadd.xlane.f32.xlu1 %v3857_v1 }
 0x775   : > { %v10519_v26 = vpop.eup %10518  ;;  %v12979_v62 = vadd.f32 1e-06, %v3874_v29  ;;  %v12982_v39 = vsub.f32 %v12827_v54, %v3754_v37  ;;  %v12985_v32 = vsub.f32 %v12817_v27, %v3754_v37 }
 0x776   : > { %v3936_v0 = vmul.f32 %v10517_v25, %v3935_v31  ;;  %v3942_v49 = vmul.f32 %v10519_v26, %v12953_v14  ;;  %v4103_v31 = vmul.f32 %v12920_v46, %v4066_v18  ;;  %vm3948_vm13 = vweird.f32 %v10519_v26 }
 0x777   : > { %10520 = vrsqrt.f32 %v12979_v62  ;;  %v3815_v59 = vmul.f32 %v12982_v39, %v12982_v39  ;;  %v3816_v8 = vmul.f32 %v12985_v32, %v12985_v32  ;;  %vm3949_vm15 = vmor %vm3947_vm14, %vm3948_vm13  ;;  %vm3957_vm1 = vweird.f32 %v12979_v62 }
 0x778   : > { %v3940_v42 = vsel %vm3939_vm12, %v10517_v25, %v3936_v0  ;;  %v3943_v47 = vmul.f32 %v10519_v26, %v3942_v49 }
 0x779   : > { %v4067_v17 = vmul.f32 %v3940_v42, %v12778_v51  ;;  %v4068_v7 = vmul.f32 %v3940_v42, %v12781_v35  ;;  %v3860_v28 = vadd.f32 %v3816_v8, %v3815_v59  ;;  %v4139_v51 = vadd.f32 %v12923_v4, %v4102_v45 }
 0x77a   : > { %v3944_v1 = vmul.f32 0.5, %v3943_v47  ;;  %v3737_v29 = vpop.xlane.xlu1 %3736  ;;  %v3841_v37 = vpop.xlane.xlu2 %3840 }
 0x77b   : > { %v3755_v27 = vmul.f32 %v3737_v29, %v17570_v19  ;;  %v3875_v11 = vmul.f32 %v3841_v37, %v17570_v19  ;;  %3861 = vadd.xlane.f32.xlu2 %v3860_v28  ;;  %v4104_v25 = vmul.f32 %v12915_v60, %v4067_v17  ;;  %v4105_v0 = vmul.f32 %v12920_v46, %v4068_v7 }
 0x77c   : > { %v3945_v15 = vsub.f32 1.5, %v3944_v1  ;;  %v4140_v17 = vadd.f32 %v12934_v44, %v4103_v31 }
 0x77d   : > { %v10521_v35 = vpop.eup %10520  ;;  %v13005_v49 = vsub.f32 %v12848_v41, %v3755_v27  ;;  %v13008_v59 = vsub.f32 %v12838_v57, %v3755_v27  ;;  %v13010_v18 = vadd.f32 1e-06, %v3875_v11  ;;  %v4141_v8 = vadd.f32 %v12923_v4, %v4104_v25 }
 0x77e   : > { %v3946_v42 = vmul.f32 %v10519_v26, %v3945_v15  ;;  %v3952_v47 = vmul.f32 %v10521_v35, %v12979_v62  ;;  %v4142_v7 = vadd.f32 %v12934_v44, %v4105_v0  ;;  %vm3958_vm0 = vweird.f32 %v10521_v35 }
 0x77f   : > { %10522 = vrsqrt.f32 %v13010_v18  ;;  %v13018_v45 = vpack.c.bf16 %v4141_v8, %v4139_v51  ;;  %v3817_v27 = vmul.f32 %v13005_v49, %v13005_v49  ;;  %v3818_v1 = vmul.f32 %v13008_v59, %v13008_v59  ;;  %vm3959_vm2 = vmor %vm3957_vm1, %vm3958_vm0 }
 0x780   : > { %v3953_v11 = vmul.f32 %v10521_v35, %v3952_v47  ;;  %v13023_v28 = vpack.c.bf16 %v4142_v7, %v4140_v17  ;;  %v3950_v29 = vsel %vm3949_vm15, %v10519_v26, %v3946_v42  ;;  %vm3967_vm4 = vweird.f32 %v13010_v18 }
 0x781   : > { %4590 = vmatmul.bf16.gmra.mxu0 %v13018_v45  ;;  %v3863_v25 = vadd.f32 %v3818_v1, %v3817_v27  ;;  %v4069_v51 = vmul.f32 %v3950_v29, %v12799_v53  ;;  %v4070_v42 = vmul.f32 %v3950_v29, %v12802_v58 }
 0x782   : > { %v3954_v37 = vmul.f32 0.5, %v3953_v11  ;;  %4639 = vmatmul.bf16.gmra.mxu1 %v13023_v28  ;;  %4688 = vmatmul.bf16.gmra.mxu2 %v13018_v45  ;;  %v3740_v14 = vpop.xlane.xlu2 %3739  ;;  %v3844_v31 = vpop.xlane.xlu0 %3843 }
 0x783   : > { %4737 = vmatmul.bf16.gmra.mxu3 %v13023_v28  ;;  %v3756_v0 = vmul.f32 %v3740_v14, %v17570_v19  ;;  %v3876_v15 = vmul.f32 %v3844_v31, %v17570_v19  ;;  %3864 = vadd.xlane.f32.xlu0 %v3863_v25  ;;  %v4107_v62 = vmul.f32 %v12920_v46, %v4070_v42 }
 0x784   : > { %v3955_v8 = vsub.f32 1.5, %v3954_v37  ;;  %v4106_v37 = vmul.f32 %v12915_v60, %v4069_v51 }
 0x785   : > { %v10523_v26 = vpop.eup %10522  ;;  %v13036_v47 = vsub.f32 %v12868_v38, %v3756_v0  ;;  %v13039_v17 = vsub.f32 %v12859_v21, %v3756_v0  ;;  %v3892_v7 = vadd.f32 1e-06, %v3876_v15  ;;  %v4144_v51 = vadd.f32 %v12934_v44, %v4107_v62 }
 0x786   : > { %v3956_v27 = vmul.f32 %v10521_v35, %v3955_v8  ;;  %v3962_v11 = vmul.f32 %v10523_v26, %v13010_v18  ;;  %vm3968_vm3 = vweird.f32 %v10523_v26 }
 0x787   : > { %10524 = vrsqrt.f32 %v3892_v7  ;;  %v3819_v53 = vmul.f32 %v13036_v47, %v13036_v47  ;;  %v3820_v58 = vmul.f32 %v13039_v17, %v13039_v17  ;;  %vm3969_vm5 = vmor %vm3967_vm4, %vm3968_vm3  ;;  %vm3977_vm7 = vweird.f32 %v3892_v7 }
 0x788   : > { %v3960_v1 = vsel %vm3959_vm2, %v10521_v35, %v3956_v27  ;;  %v3963_v29 = vmul.f32 %v10523_v26, %v3962_v11  ;;  %v4143_v35 = vadd.f32 %v12923_v4, %v4106_v37 }
 0x789   : > { %v4071_v14 = vmul.f32 %v3960_v1, %v12821_v55  ;;  %v4072_v31 = vmul.f32 %v3960_v1, %v12824_v13  ;;  %v3866_v25 = vadd.f32 %v3820_v58, %v3819_v53 }
 0x78a   : > { %v3964_v0 = vmul.f32 0.5, %v3963_v29 }
 0x78b   : > { %3867 = vadd.xlane.f32.xlu1 %v3866_v25  ;;  %v4108_v15 = vmul.f32 %v12915_v60, %v4071_v14  ;;  %v4109_v8 = vmul.f32 %v12920_v46, %v4072_v31 }
 0x78c   : > { %v3965_v21 = vsub.f32 1.5, %v3964_v0 }
 0x78d   : > { %v10525_v57 = vpop.eup %10524  ;;  %v4145_v27 = vadd.f32 %v12923_v4, %v4108_v15  ;;  %v4146_v55 = vadd.f32 %v12934_v44, %v4109_v8 }
 0x78e   : > { %v3966_v13 = vmul.f32 %v10523_v26, %v3965_v21  ;;  %v3972_v11 = vmul.f32 %v10525_v57, %v3892_v7  ;;  %vm3978_vm6 = vweird.f32 %v10525_v57 }
 0x78f   : > { %v13057_v42 = vpack.c.bf16 %v4145_v27, %v4143_v35  ;;  %v13059_v53 = vpack.c.bf16 %v4146_v55, %v4144_v51  ;;  %vm3979_vm8 = vmor %vm3977_vm7, %vm3978_vm6 }
 0x790   : > { %v3973_v58 = vmul.f32 %v10525_v57, %v3972_v11  ;;  %v3970_v1 = vsel %vm3969_vm5, %v10523_v26, %v3966_v13 }
 0x791   : > { %17585 = vst [vmem:[#allocation67_spill] sm:$0xff] %v13057_v42  ;;  %4595 = vmatmul.bf16.gmra.mxu0 %v13057_v42  ;;  %v4073_v37 = vmul.f32 %v3970_v1, %v12842_v5  ;;  %v4074_v14 = vmul.f32 %v3970_v1, %v12845_v30 }
 0x792   : > { %17586 = vst [vmem:[#allocation53_spill] sm:$0xff] %v13059_v53  ;;  %v3974_v29 = vmul.f32 0.5, %v3973_v58  ;;  %4644 = vmatmul.bf16.gmra.mxu1 %v13059_v53  ;;  %4693 = vmatmul.bf16.gmra.mxu2 %v13057_v42 }
 0x793   : > { %4742 = vmatmul.bf16.gmra.mxu3 %v13059_v53  ;;  %v4110_v62 = vmul.f32 %v12915_v60, %v4073_v37  ;;  %v4111_v0 = vmul.f32 %v12920_v46, %v4074_v14 }
 0x794   : > { %v3975_v21 = vsub.f32 1.5, %v3974_v29 }
 0x795   : > { %v4147_v5 = vadd.f32 %v12923_v4, %v4110_v62  ;;  %v4148_v7 = vadd.f32 %v12934_v44, %v4111_v0 }
 0x796   : > { %v3976_v31 = vmul.f32 %v10525_v57, %v3975_v21 }
 0x798   : > { %v3980_v18 = vsel %vm3979_vm8, %v10525_v57, %v3976_v31 }
 0x799   : > { %v4075_v25 = vmul.f32 %v3980_v18, %v12862_v56  ;;  %v4076_v26 = vmul.f32 %v3980_v18, %v12865_v33  ;;  %v3847_v33 = vpop.xlane.xlu0 %3846 }
 0x79a   : > { %v3877_v27 = vmul.f32 %v3847_v33, %v17570_v19 }
 0x79b   : > { %v4112_v15 = vmul.f32 %v12915_v60, %v4075_v25  ;;  %v4113_v8 = vmul.f32 %v12920_v46, %v4076_v26 }
 0x79c   : > { %v3893_v51 = vadd.f32 1e-06, %v3877_v27 }
 0x79d   : > { %v4149_v30 = vadd.f32 %v12923_v4, %v4112_v15  ;;  %v4150_v57 = vadd.f32 %v12934_v44, %v4113_v8 }
 0x79e   : > { %10526 = vrsqrt.f32 %v3893_v51  ;;  %vm3987_vm10 = vweird.f32 %v3893_v51 }
 0x79f   : > { %v13078_v35 = vpack.c.bf16 %v4149_v30, %v4147_v5  ;;  %v13080_v56 = vpack.c.bf16 %v4150_v57, %v4148_v7  ;;  %v10111_v5 = vld [vmem:[#allocation14 + $0xec] sm:$0xf]  ;;  %v9496_v30 = vld [vmem:[#allocation14 + $0xf8] sm:$0xf0] }
 0x7a0   : > { %v9499_v57 = vor.u32 %v10111_v5, %v9496_v30 }
 0x7a1   : > { %17587 = vst [vmem:[#allocation52_spill] sm:$0xff] %v13078_v35  ;;  %4600 = vmatmul.bf16.gmra.mxu0 %v13078_v35 }
 0x7a2   : > { %17588 = vst [vmem:[#allocation68_spill] sm:$0xff] %v13080_v56  ;;  %4649 = vmatmul.bf16.gmra.mxu1 %v13080_v56  ;;  %4698 = vmatmul.bf16.gmra.mxu2 %v13078_v35 }
 0x7a3   : > { %4747 = vmatmul.bf16.gmra.mxu3 %v13080_v56  ;;  %4871 = vmatpush.bf16.msra.mxu2 %v9499_v57 }
 0x7a4   : > { %v10527_v55 = vpop.eup %10526 }
 0x7a5   : > { %v3982_v13 = vmul.f32 %v10527_v55, %v3893_v51  ;;  %vm3988_vm9 = vweird.f32 %v10527_v55 }
 0x7a6   : > { %vm3989_vm11 = vmor %vm3987_vm10, %vm3988_vm9 }
 0x7a7   : > { %v3983_v11 = vmul.f32 %v10527_v55, %v3982_v13 }
 0x7a9   : > { %v3984_v21 = vmul.f32 0.5, %v3983_v11 }
 0x7ab   : > { %v3985_v37 = vsub.f32 1.5, %v3984_v21 }
 0x7ad   : > { %v3986_v26 = vmul.f32 %v10527_v55, %v3985_v37 }
 0x7af   : > { %v3990_v15 = vsel %vm3989_vm11, %v10527_v55, %v3986_v26 }
 0x7b0   : > { %v4077_v11 = vmul.f32 %v3990_v15, %v12878_v16 }
 0x7b2   : > { %v4114_v26 = vmul.f32 %v12915_v60, %v4077_v11  ;;  %v10143_v11 = vld [vmem:[#allocation14 + $0x1ec] sm:$0xf] }
 0x7ce   : > { %v3850_v58 = vpop.xlane.xlu1 %3849 }
 0x7cf   : > { %v3878_v1 = vmul.f32 %v3850_v58, %v17570_v19  ;;  %v4078_v58 = vmul.f32 %v3990_v15, %v12881_v61 }
 0x7d1   : > { %v3894_v29 = vadd.f32 1e-06, %v3878_v1  ;;  %v4115_v16 = vmul.f32 %v12920_v46, %v4078_v58  ;;  %v9624_v58 = vld [vmem:[#allocation14 + $0x1f8] sm:$0xf0] }
 0x7d3   : > { %10528 = vrsqrt.f32 %v3894_v29  ;;  %vm3997_vm13 = vweird.f32 %v3894_v29 }
 0x7d6   : > { %v3853_v14 = vpop.xlane.xlu2 %3852 }
 0x7d7   : > { %v3879_v31 = vmul.f32 %v3853_v14, %v17570_v19 }
 0x7d9   : > { %v10529_v18 = vpop.eup %10528  ;;  %v13089_v25 = vadd.f32 1e-06, %v3879_v31 }
 0x7da   : > { %v3992_v62 = vmul.f32 %v10529_v18, %v3894_v29  ;;  %vm3998_vm12 = vweird.f32 %v10529_v18 }
 0x7db   : > { %10530 = vrsqrt.f32 %v13089_v25  ;;  %vm3999_vm14 = vmor %vm3997_vm13, %vm3998_vm12  ;;  %vm4007_vm1 = vweird.f32 %v13089_v25 }
 0x7dc   : > { %v3993_v0 = vmul.f32 %v10529_v18, %v3992_v62 }
 0x7de   : > { %v3994_v8 = vmul.f32 0.5, %v3993_v0  ;;  %v3856_v7 = vpop.xlane.xlu0 %3855  ;;  %v4247_v0 = vld [vmem:[%s17297_s9] sm:$0xf] }
 0x7df   : > { %v3880_v27 = vmul.f32 %v3856_v7, %v17570_v19  ;;  %v13113_v57 = vperm.slane %v4247_v0, 0 }
 0x7e0   : > { %v3995_v33 = vsub.f32 1.5, %v3994_v8 }
 0x7e1   : > { %v10531_v13 = vpop.eup %10530  ;;  %v3896_v55 = vadd.f32 1e-06, %v3880_v27 }
 0x7e2   : > { %v3996_v1 = vmul.f32 %v10529_v18, %v3995_v33  ;;  %v4002_v51 = vmul.f32 %v10531_v13, %v13089_v25  ;;  %vm4008_vm15 = vweird.f32 %v10531_v13 }
 0x7e3   : > { %10532 = vrsqrt.f32 %v3896_v55  ;;  %vm4009_vm2 = vmor %vm4007_vm1, %vm4008_vm15  ;;  %vm4017_vm3 = vweird.f32 %v3896_v55 }
 0x7e4   : > { %v4000_v21 = vsel %vm3999_vm14, %v10529_v18, %v3996_v1  ;;  %v4003_v37 = vmul.f32 %v10531_v13, %v4002_v51  ;;  %v4151_v18 = vadd.f32 %v12923_v4, %v4114_v26  ;;  %v9494_v1 = vld [vmem:[#allocation14 + $0xe8] sm:$0xf] }
 0x7e5   : > { %v4079_v14 = vmul.f32 %v4000_v21, %v12891_v9  ;;  %v4080_v31 = vmul.f32 %v4000_v21, %v12894_v40  ;;  %v4152_v9 = vadd.f32 %v12934_v44, %v4115_v16  ;;  %v9627_v21 = vor.u32 %v10143_v11, %v9624_v58  ;;  %v9622_v16 = vld [vmem:[#allocation14 + $0x1e8] sm:$0xf] }
 0x7e6   : > { %v4004_v29 = vmul.f32 0.5, %v4003_v37  ;;  %v10113_v37 = vld [vmem:[#allocation14 + $0xf4] sm:$0xf0] }
 0x7e7   : > { %v4116_v61 = vmul.f32 %v12915_v60, %v4079_v14  ;;  %v4117_v62 = vmul.f32 %v12920_v46, %v4080_v31  ;;  %v9495_v26 = vor.u32 %v10113_v37, %v9494_v1  ;;  %4920 = vmatpush.bf16.msra.mxu3 %v9627_v21 }
 0x7e8   : > { %v4005_v33 = vsub.f32 1.5, %v4004_v29 }
 0x7e9   : > { %v4153_v15 = vadd.f32 %v12923_v4, %v4116_v61  ;;  %v4154_v40 = vadd.f32 %v12934_v44, %v4117_v62  ;;  %v10533_v8 = vpop.eup %10532  ;;  %v10145_v61 = vld [vmem:[#allocation14 + $0x1f4] sm:$0xf0]  ;;  %4773 = vmatpush.bf16.msra.mxu0 %v9495_v26 }
 0x7ea   : > { %v4012_v5 = vmul.f32 %v10533_v8, %v3896_v55  ;;  %v4006_v62 = vmul.f32 %v10531_v13, %v4005_v33  ;;  %vm4018_vm0 = vweird.f32 %v10533_v8 }
 0x7eb   : > { %v13109_v30 = vpack.c.bf16 %v4153_v15, %v4151_v18  ;;  %v13111_v7 = vpack.c.bf16 %v4154_v40, %v4152_v9  ;;  %v9623_v18 = vor.u32 %v10145_v61, %v9622_v16  ;;  %v13123_v40 = vperm.slane %v4247_v0, 1  ;;  %vm4019_vm4 = vmor %vm4017_vm3, %vm4018_vm0 }
 0x7ec   : > { %v4013_v27 = vmul.f32 %v10533_v8, %v4012_v5 }
 0x7ed   : > { %17589 = vst [vmem:[#allocation65_spill] sm:$0xff] %v13109_v30  ;;  %4605 = vmatmul.bf16.gmra.mxu0 %v13109_v30  ;;  %4654 = vmatmul.bf16.gmra.mxu1 %v13111_v7 }
 0x7ee   : > { %17590 = vst [vmem:[#allocation55_spill] sm:$0xff] %v13111_v7  ;;  %4703 = vmatmul.bf16.gmra.mxu2 %v13109_v30  ;;  %4752 = vmatmul.bf16.gmra.mxu3 %v13111_v7  ;;  %v4586_v51 = vpop.f32.mrf.mxu0  ;;  %v4014_v14 = vmul.f32 0.5, %v4013_v27  ;;  %v4635_v29 = vpop.f32.mrf.mxu1  ;;  %v4010_v27 = vsel %vm4009_vm2, %v10531_v13, %v4006_v62 }
 0x7ef   : > { %v4587_v31 = vadd.f32 %v4586_v51, %v13113_v57  ;;  %4822 = vmatpush.bf16.msra.mxu1 %v9623_v18  ;;  %v4081_v51 = vmul.f32 %v4010_v27, %v12903_v23  ;;  %v4082_v23 = vmul.f32 %v4010_v27, %v12906_v34 }
 0x7f0   : > { %v4015_v15 = vsub.f32 1.5, %v4014_v14 }
 0x7f1   : > { %v13120_v9 = vadd.f32 %v4635_v29, %v4587_v31  ;;  %v4118_v0 = vmul.f32 %v12915_v60, %v4081_v51  ;;  %v3862_v31 = vpop.xlane.xlu2 %3861  ;;  %v4119_v62 = vmul.f32 %v12920_v46, %v4082_v23  ;;  %v9608_v23 = vld [vmem:[#allocation14 + $0x1d8] sm:$0xf0] }
 0x7f2   : > { %v4016_v5 = vmul.f32 %v10533_v8, %v4015_v15  ;;  %v3882_v29 = vmul.f32 %v3862_v31, %v17570_v19 }
 0x7f3   : > { %v4155_v13 = vadd.f32 %v12923_v4, %v4118_v0 }
 0x7f4   : > { %v4020_v33 = vsel %vm4019_vm4, %v10533_v8, %v4016_v5  ;;  %v3859_v8 = vpop.xlane.xlu1 %3858  ;;  %v3898_v34 = vadd.f32 1e-06, %v3882_v29 }
 0x7f5   : > { %v4684_v11 = vpop.f32.mrf.mxu2  ;;  %v4083_v58 = vmul.f32 %v4020_v33, %v12928_v12  ;;  %v4733_v21 = vpop.f32.mrf.mxu3  ;;  %v4084_v12 = vmul.f32 %v4020_v33, %v12932_v6  ;;  %v3881_v61 = vmul.f32 %v3859_v8, %v17570_v19  ;;  %v4156_v6 = vadd.f32 %v12934_v44, %v4119_v62  ;;  %v10109_v62 = vld [vmem:[#allocation14 + $0xd4] sm:$0xf0] }
 0x7f6   : > { %v4685_v1 = vadd.f32 %v4684_v11, %v13123_v40  ;;  %v13141_v16 = vpop.f32.mrf.mxu0  ;;  %v13147_v15 = vpop.f32.mrf.mxu1  ;;  %vm4037_vm9 = vweird.f32 %v3898_v34 }
 0x7f7   : > { %v4120_v25 = vmul.f32 %v12915_v60, %v4083_v58  ;;  %v4121_v26 = vmul.f32 %v12920_v46, %v4084_v12  ;;  %v3897_v5 = vadd.f32 1e-06, %v3881_v61  ;;  %v10107_v58 = vld [vmem:[#allocation14 + $0xcc] sm:$0xf]  ;;  %v9478_v61 = vld [vmem:[#allocation14 + $0xc8] sm:$0xf] }
 0x7f8   : > { %v13128_v37 = vadd.f32 %v4733_v21, %v4685_v1  ;;  %v9480_v1 = vld [vmem:[#allocation14 + $0xd8] sm:$0xf0]  ;;  %v10139_v12 = vld [vmem:[#allocation14 + $0x1cc] sm:$0xf] }
 0x7f9   : > { %v4157_v14 = vadd.f32 %v12923_v4, %v4120_v25  ;;  %v4158_v18 = vadd.f32 %v12934_v44, %v4121_v26  ;;  %10534 = vrsqrt.f32 %v3897_v5  ;;  %v9611_v26 = vor.u32 %v10139_v12, %v9608_v23 }
 0x7fa   : > { %17591 = vst [vmem:[#allocation54_spill] sm:$0xff] %v13128_v37  ;;  %10536 = vrsqrt.f32 %v3898_v34  ;;  %vm4027_vm7 = vweird.f32 %v3897_v5 }
 0x7fb   : > { %v13134_v55 = vpack.c.bf16 %v4157_v14, %v4155_v13  ;;  %v13150_v27 = vpack.c.bf16 %v4158_v18, %v4156_v6  ;;  %v9483_v14 = vor.u32 %v10107_v58, %v9480_v1  ;;  %4921 = vmatpush.bf16.msra.mxu3 %v9611_v26  ;;  %v10141_v58 = vld [vmem:[#allocation14 + $0x1d4] sm:$0xf0] }
 0x7fd   : > { %17592 = vst [vmem:[#allocation57_spill] sm:$0xff] %v13134_v55  ;;  %4610 = vmatmul.bf16.gmra.mxu0 %v13134_v55  ;;  %4659 = vmatmul.bf16.gmra.mxu1 %v13150_v27  ;;  %v13157_v13 = vpop.f32.mrf.mxu2  ;;  %v13159_v6 = vpop.f32.mrf.mxu3 }
 0x7fe   : > { %4708 = vmatmul.bf16.gmra.mxu2 %v13134_v55  ;;  %17593 = vst [vmem:[#allocation56_spill] sm:$0xff] %v13150_v27  ;;  %4757 = vmatmul.bf16.gmra.mxu3 %v13150_v27  ;;  %v4591_v33 = vpop.f32.mrf.mxu0  ;;  %v10099_v55 = vld [vmem:[#allocation14 + $0x8c] sm:$0xf] }
 0x7ff   : > { %v4592_v11 = vadd.f32 %v4591_v33, %v13113_v57  ;;  %v4640_v51 = vpop.f32.mrf.mxu1  ;;  %v10535_v21 = vpop.eup %10534  ;;  %4872 = vmatpush.bf16.msra.mxu2 %v9483_v14  ;;  %v11074_v33 = vmov 1.4142135  }
 0x800   : > { %v10537_v0 = vpop.eup %10536  ;;  %v4022_v8 = vmul.f32 %v10535_v21, %v3897_v5  ;;  %10538 = vrcp.f32 %v11074_v33  ;;  %vm4028_vm5 = vweird.f32 %v10535_v21 }
 0x801   : > { %v13155_v25 = vadd.f32 %v4640_v51, %v4592_v11  ;;  %v4032_v31 = vmul.f32 %v10537_v0, %v3898_v34  ;;  %v9479_v11 = vor.u32 %v10109_v62, %v9478_v61  ;;  %v9606_v51 = vld [vmem:[#allocation14 + $0x1c8] sm:$0xf]  ;;  %vm4038_vm6 = vweird.f32 %v10537_v0  ;;  %vm4029_vm8 = vmor %vm4027_vm7, %vm4028_vm5 }
 0x802   : > { %v4023_v29 = vmul.f32 %v10535_v21, %v4022_v8  ;;  %v9607_v14 = vor.u32 %v10141_v58, %v9606_v51  ;;  %vm4039_vm10 = vmor %vm4037_vm9, %vm4038_vm6 }
 0x803   : > { %17594 = vst [vmem:[#allocation59_spill] sm:$0xff] %v13155_v25  ;;  %v4033_v18 = vmul.f32 %v10537_v0, %v4032_v31  ;;  %4774 = vmatpush.bf16.msra.mxu0 %v9479_v11 }
 0x804   : > { %v4024_v1 = vmul.f32 0.5, %v4023_v29  ;;  %4823 = vmatpush.bf16.msra.mxu1 %v9607_v14 }
 0x805   : > { %v4034_v38 = vmul.f32 0.5, %v4033_v18  ;;  %v4689_v41 = vpop.f32.mrf.mxu2 }
 0x806   : > { %v10539_v54 = vpop.eup %10538  ;;  %v4690_v12 = vadd.f32 %v4689_v41, %v13123_v40  ;;  %v4025_v23 = vsub.f32 1.5, %v4024_v1  ;;  %v4738_v31 = vpop.f32.mrf.mxu3 }
 0x807   : > { %v4035_v26 = vsub.f32 1.5, %v4034_v38  ;;  %v5034_v8 = vmul.f32 1.4142135, %v10539_v54  ;;  %vm5038_vm11 = vweird.f32 %v10539_v54 }
 0x808   : > { %v13162_v10 = vadd.f32 %v4738_v31, %v4690_v12  ;;  %v4026_v33 = vmul.f32 %v10535_v21, %v4025_v23  ;;  %v4589_v23 = vadd.f32 %v13141_v16, %v13113_v57  ;;  %v3868_v31 = vpop.xlane.xlu1 %3867 }
 0x809   : > { %v4036_v61 = vmul.f32 %v10537_v0, %v4035_v26  ;;  %v5035_v62 = vsub.f32 1.0, %v5034_v8  ;;  %v3865_v8 = vpop.xlane.xlu0 %3864 }
 0x80a   : > { %17595 = vst [vmem:[#allocation58_spill] sm:$0xff] %v13162_v10  ;;  %v4030_v29 = vsel %vm4029_vm8, %v10535_v21, %v4026_v33  ;;  %v13193_v33 = vpop.f32.mrf.mxu1 }
 0x80b   : > { %v4040_v18 = vsel %vm4039_vm10, %v10537_v0, %v4036_v61  ;;  %v5036_v11 = vmul.f32 %v10539_v54, %v5035_v62  ;;  %v4085_v41 = vmul.f32 %v4030_v29, %v12956_v24  ;;  %v13199_v62 = vadd.f32 %v13147_v15, %v4589_v23 }
 0x80c   : > { %v4087_v38 = vmul.f32 %v4040_v18, %v12982_v39  ;;  %v4088_v24 = vmul.f32 %v4040_v18, %v12985_v32  ;;  %v13181_v39 = vpop.f32.mrf.mxu0 }
 0x80d   : > { %v5037_v51 = vadd.f32 %v10539_v54, %v5036_v11  ;;  %v4122_v58 = vmul.f32 %v12915_v60, %v4085_v41  ;;  %17597 = vst [vmem:[#allocation60_spill] sm:$0xff] %v13199_v62  ;;  %v13202_v16 = vpop.f32.mrf.mxu2  ;;  %v3884_v11 = vmul.f32 %v3868_v31, %v17570_v19  ;;  %v9462_v31 = vld [vmem:[#allocation14 + $0xa8] sm:$0xf] }
 0x80e   : > { %v4124_v1 = vmul.f32 %v12915_v60, %v4087_v38  ;;  %v4125_v32 = vmul.f32 %v12920_v46, %v4088_v24  ;;  %v10103_v24 = vld [vmem:[#allocation14 + $0xac] sm:$0xf] }
 0x80f   : > { %v13168_v14 = vsel %vm5038_vm11, %v10539_v54, %v5037_v51  ;;  %v4159_v5 = vadd.f32 %v12923_v4, %v4122_v58  ;;  %v4086_v54 = vmul.f32 %v4030_v29, %v12960_v20  ;;  %v3883_v29 = vmul.f32 %v3865_v8, %v17570_v19  ;;  %v9464_v19 = vld [vmem:[#allocation14 + $0xb8] sm:$0xf0]  ;;  %v10135_v8 = vld [vmem:[#allocation14 + $0x1ac] sm:$0xf] }
 0x810   : > { %v4161_v34 = vadd.f32 %v12923_v4, %v4124_v1  ;;  %v13174_v21 = vmul.f32 %v13168_v14, %v13120_v9  ;;  %v13190_v26 = vmul.f32 %v13168_v14, %v13128_v37  ;;  %v4162_v41 = vadd.f32 %v12934_v44, %v4125_v32  ;;  %v9592_v32 = vld [vmem:[#allocation14 + $0x1b8] sm:$0xf0] }
 0x811   : > { %v4123_v20 = vmul.f32 %v12920_v46, %v4086_v54  ;;  %v13212_v58 = vmul.f32 %v13168_v14, %v13199_v62  ;;  %v13214_v15 = vadd.f32 1e-06, %v3883_v29  ;;  %v4687_v1 = vadd.f32 %v13157_v13, %v13123_v40  ;;  %v9400_v37 = vld [vmem:[#allocation14 + $0x38] sm:$0xf0] }
 0x812   : > { %v13176_v0 = vpack.c.bf16 %v4161_v34, %v4159_v5  ;;  %v5104_v12 = vmul.f32 %v13174_v21, %v13174_v21  ;;  %v5144_v18 = vmul.f32 %v13190_v26, %v13190_v26  ;;  %v13218_v5 = vpop.f32.mrf.mxu3  ;;  %v9467_v29 = vor.u32 %v10103_v24, %v9464_v19  ;;  %v10137_v19 = vld [vmem:[#allocation14 + $0x1b4] sm:$0xf0] }
 0x813   : > { %v4160_v51 = vadd.f32 %v12934_v44, %v4123_v20  ;;  %v10105_v20 = vld [vmem:[#allocation14 + $0xb4] sm:$0xf0]  ;;  %10540 = vrsqrt.f32 %v13214_v15  ;;  %v9595_v3 = vor.u32 %v10135_v8, %v9592_v32  ;;  %v9574_v32 = vld [vmem:[#allocation14 + $0x188] sm:$0xf]  ;;  %vm4047_vm14 = vweird.f32 %v13214_v15 }
 0x814   : > { %17596 = vst [vmem:[#allocation61_spill] sm:$0xff] %v13176_v0  ;;  %4615 = vmatmul.bf16.gmra.mxu0 %v13176_v0  ;;  %4713 = vmatmul.bf16.gmra.mxu2 %v13176_v0  ;;  %v13195_v61 = vmin.f32 %v5104_v12, 16.0  ;;  %v4596_v34 = vpop.f32.mrf.mxu0  ;;  %v13220_v54 = vmin.f32 %v5144_v18, 16.0  ;;  %v13222_v12 = vadd.f32 1e-06, %v3884_v11  ;;  %v5264_v18 = vmul.f32 %v13212_v58, %v13212_v58 }
 0x815   : > { %v13224_v23 = vpack.c.bf16 %v4162_v41, %v4160_v51  ;;  %v4597_v13 = vadd.f32 %v4596_v34, %v13113_v57  ;;  %v13233_v11 = vadd.f32 %v13159_v6, %v4687_v1  ;;  %v4645_v41 = vpop.f32.mrf.mxu1  ;;  %4873 = vmatpush.bf16.msra.mxu2 %v9467_v29  ;;  %v9463_v63 = vor.u32 %v10105_v20, %v9462_v31  ;;  %v4694_v24 = vpop.f32.mrf.mxu2  ;;  %v9446_v1 = vld [vmem:[#allocation14 + $0x88] sm:$0xf]  ;;  %v10133_v31 = vld [vmem:[#allocation14 + $0x194] sm:$0xf0] }
 0x816   : > { %v5117_v38 = vmul.f32 3.8918573e-05, %v13195_v61  ;;  %10542 = vrsqrt.f32 %v13222_v12  ;;  %v5157_v34 = vmul.f32 3.8918573e-05, %v13220_v54  ;;  %4922 = vmatpush.bf16.msra.mxu3 %v9595_v3  ;;  %v5106_v52 = vmul.f32 2.1237322e-06, %v13195_v61 }
 0x817   : > { %17598 = vst [vmem:[#allocation24_spill] sm:$0xff] %v13224_v23  ;;  %4664 = vmatmul.bf16.gmra.mxu1 %v13224_v23  ;;  %4762 = vmatmul.bf16.gmra.mxu3 %v13224_v23  ;;  %v13236_v51 = vadd.f32 %v4645_v41, %v4597_v13  ;;  %v13242_v6 = vmul.f32 %v13168_v14, %v13233_v11  ;;  %v13245_v29 = vmin.f32 %v5264_v18, 16.0  ;;  %vm4057_vm0 = vweird.f32 %v13222_v12 }
 0x818   : > { %v5118_v22 = vadd.f32 0.001143296, %v5117_v38  ;;  %17599 = vst [vmem:[#allocation70_spill] sm:$0xff] %v13233_v11  ;;  %4775 = vmatpush.bf16.msra.mxu0 %v9463_v63  ;;  %v9590_v38 = vld [vmem:[#allocation14 + $0x1a8] sm:$0xf]  ;;  %v4695_v8 = vadd.f32 %v4694_v24, %v13123_v40  ;;  %v9447_v23 = vor.u32 %v10101_v48, %v9446_v1  ;;  %v9575_v18 = vor.u32 %v10133_v31, %v9574_v32 }
 0x819   : > { %v13248_v3 = vpop.eup %10540  ;;  %v5158_v63 = vadd.f32 0.001143296, %v5157_v34  ;;  %v9591_v41 = vor.u32 %v10137_v19, %v9590_v38  ;;  %v5107_v0 = vadd.f32 0.00028619796, %v5106_v52  ;;  %v5277_v24 = vmul.f32 3.8918573e-05, %v13245_v29 }
 0x81a   : > { %v5119_v13 = vmul.f32 %v5118_v22, %v13195_v61  ;;  %v4743_v20 = vpop.f32.mrf.mxu3  ;;  %v5304_v22 = vmul.f32 %v13242_v6, %v13242_v6  ;;  %v4042_v38 = vmul.f32 %v13248_v3, %v13214_v15  ;;  %v9448_v48 = vld [vmem:[#allocation14 + $0x98] sm:$0xf0]  ;;  %v10131_v52 = vld [vmem:[#allocation14 + $0x18c] sm:$0xf]  ;;  %v5146_v32 = vmul.f32 2.1237322e-06, %v13220_v54 }
 0x81b   : > { %v13252_v50 = vadd.f32 %v4743_v20, %v4695_v8  ;;  %4824 = vmatpush.bf16.msra.mxu1 %v9591_v41  ;;  %v5159_v34 = vmul.f32 %v5158_v63, %v13220_v54  ;;  %v9576_v1 = vld [vmem:[#allocation14 + $0x198] sm:$0xf0]  ;;  %v5108_v8 = vmul.f32 %v5107_v0, %v13195_v61  ;;  %v5278_v63 = vadd.f32 0.001143296, %v5277_v24  ;;  %v10087_v11 = vld [vmem:[#allocation14 + $0x2c] sm:$0xf] }
 0x81c   : > { %v13250_v43 = vpop.eup %10542  ;;  %v5120_v27 = vadd.f32 0.014752088, %v5119_v13  ;;  %4776 = vmatpush.bf16.msra.mxu0 %v9447_v23  ;;  %v13264_v13 = vmin.f32 %v5304_v22, 16.0  ;;  %v13268_v23 = vmul.f32 %v13168_v14, %v13155_v25  ;;  %v9451_v20 = vor.u32 %v10099_v55, %v9448_v48 }
 0x81d   : > { %v4052_v19 = vmul.f32 %v13250_v43, %v13222_v12  ;;  %v9579_v41 = vor.u32 %v10131_v52, %v9576_v1  ;;  %v5160_v7 = vadd.f32 0.014752088, %v5159_v34  ;;  %v4043_v30 = vmul.f32 %v13248_v3, %v4042_v38 }
 0x81e   : > { %17600 = vst [vmem:[#allocation71_spill] sm:$0xff] %v13268_v23  ;;  %v5121_v31 = vmul.f32 %v5120_v27, %v13195_v61  ;;  %4874 = vmatpush.bf16.msra.mxu2 %v9451_v20  ;;  %v5147_v0 = vadd.f32 0.00028619796, %v5146_v32  ;;  %v5317_v22 = vmul.f32 3.8918573e-05, %v13264_v13  ;;  %v5424_v35 = vmul.f32 %v13268_v23, %v13268_v23 }
 0x81f   : > { %4825 = vmatpush.bf16.msra.mxu1 %v9575_v18  ;;  %v4053_v56 = vmul.f32 %v13250_v43, %v4052_v19  ;;  %4923 = vmatpush.bf16.msra.mxu3 %v9579_v41  ;;  %v5109_v53 = vadd.f32 0.0036580483, %v5108_v8  ;;  %v5279_v27 = vmul.f32 %v5278_v63, %v13245_v29  ;;  %v5161_v55 = vmul.f32 %v5160_v7, %v13220_v54 }
 0x820   : > { %v5122_v18 = vadd.f32 0.112945676, %v5121_v31  ;;  %v4044_v24 = vmul.f32 0.5, %v4043_v30  ;;  %v5266_v38 = vmul.f32 2.1237322e-06, %v13245_v29  ;;  %v5148_v19 = vmul.f32 %v5147_v0, %v13220_v54 }
 0x821   : > { %v4054_v34 = vmul.f32 0.5, %v4053_v56  ;;  %v5318_v48 = vadd.f32 0.001143296, %v5317_v22  ;;  %v13280_v52 = vmin.f32 %v5424_v35, 16.0  ;;  %v5110_v1 = vmul.f32 %v5109_v53, %v13195_v61 }
 0x822   : > { %v5123_v32 = vmul.f32 %v5122_v18, %v13195_v61  ;;  %v5280_v20 = vadd.f32 0.014752088, %v5279_v27  ;;  %v5162_v8 = vadd.f32 0.112945676, %v5161_v55  ;;  %v4045_v31 = vsub.f32 1.5, %v4044_v24 }
 0x823   : > { %v4055_v41 = vsub.f32 1.5, %v4054_v34  ;;  %v5267_v63 = vadd.f32 0.00028619796, %v5266_v38  ;;  %v5149_v42 = vadd.f32 0.0036580483, %v5148_v19  ;;  %v5319_v30 = vmul.f32 %v5318_v48, %v13264_v13 }
 0x824   : > { %v5437_v56 = vmul.f32 3.8918573e-05, %v13280_v52  ;;  %v5111_v7 = vadd.f32 0.05243302, %v5110_v1  ;;  %v5124_v25 = vadd.f32 0.4994258, %v5123_v32  ;;  %v5281_v0 = vmul.f32 %v5280_v20, %v13245_v29 }
 0x825   : > { %vm4048_vm12 = vweird.f32 %v13248_v3  ;;  %v5163_v53 = vmul.f32 %v5162_v8, %v13220_v54  ;;  %v4046_v35 = vmul.f32 %v13248_v3, %v4045_v31  ;;  %v4056_v22 = vmul.f32 %v13250_v43, %v4055_v41 }
 0x826   : > { %vm4058_vm13 = vweird.f32 %v13250_v43  ;;  %v5268_v18 = vmul.f32 %v5267_v63, %v13245_v29  ;;  %v5150_v27 = vmul.f32 %v5149_v42, %v13220_v54  ;;  %vm4049_vm15 = vmor %vm4047_vm14, %vm4048_vm12  ;;  %v5320_v55 = vadd.f32 0.014752088, %v5319_v30 }
 0x827   : > { %v5438_v24 = vadd.f32 0.001143296, %v5437_v56  ;;  %v5112_v34 = vmul.f32 %v5111_v7, %v13195_v61  ;;  %v5125_v38 = vmul.f32 %v5124_v25, %v13195_v61  ;;  %vm4059_vm1 = vmor %vm4057_vm0, %vm4058_vm13  ;;  %v5164_v19 = vadd.f32 0.4994258, %v5163_v53  ;;  %v13306_v25 = vpop.f32.mrf.mxu0 }
 0x828   : > { %v5282_v48 = vadd.f32 0.112945676, %v5281_v0  ;;  %v4050_v1 = vsel %vm4049_vm15, %v13248_v3, %v4046_v35  ;;  %v4060_v32 = vsel %vm4059_vm1, %v13250_v43, %v4056_v22  ;;  %v5151_v20 = vadd.f32 0.05243302, %v5150_v27 }
 0x829   : > { %v5269_v15 = vadd.f32 0.0036580483, %v5268_v18  ;;  %v5321_v42 = vmul.f32 %v5320_v55, %v13264_v13  ;;  %v5439_v8 = vmul.f32 %v5438_v24, %v13280_v52  ;;  %v13302_v31 = vadd.f32 1.0, %v5125_v38  ;;  %v13323_v38 = vpop.f32.mrf.mxu1 }
 0x82a   : > { %v4089_v12 = vmul.f32 %v4050_v1, %v13005_v49  ;;  %v4091_v41 = vmul.f32 %v4060_v32, %v13036_v47  ;;  %v5113_v63 = vadd.f32 0.18741608, %v5112_v34  ;;  %v5165_v30 = vmul.f32 %v5164_v19, %v13220_v54 }
 0x82b   : > { %v5283_v3 = vmul.f32 %v5282_v48, %v13245_v29  ;;  %v5306_v43 = vmul.f32 2.1237322e-06, %v13264_v13  ;;  %v5152_v56 = vmul.f32 %v5151_v20, %v13220_v54  ;;  %v5270_v7 = vmul.f32 %v5269_v15, %v13245_v29 }
 0x82c   : > { %v5322_v0 = vadd.f32 0.112945676, %v5321_v42  ;;  %v5440_v53 = vadd.f32 0.014752088, %v5439_v8  ;;  %10544 = vrcp.f32 %v13302_v31  ;;  %v4090_v49 = vmul.f32 %v4050_v1, %v13008_v59 }
 0x82d   : > { %v4126_v47 = vmul.f32 %v12915_v60, %v4089_v12  ;;  %v4128_v35 = vmul.f32 %v12915_v60, %v4091_v41  ;;  %v5114_v22 = vmul.f32 %v5113_v63, %v13195_v61  ;;  %v13318_v18 = vadd.f32 1.0, %v5165_v30 }
 0x82e   : > { %v5284_v27 = vadd.f32 0.4994258, %v5283_v3  ;;  %v4092_v55 = vmul.f32 %v4060_v32, %v13039_v17  ;;  %v5307_v24 = vadd.f32 0.00028619796, %v5306_v43  ;;  %v4594_v34 = vadd.f32 %v13181_v39, %v13113_v57 }
 0x82f   : > { %v5271_v19 = vadd.f32 0.05243302, %v5270_v7  ;;  %v5323_v59 = vmul.f32 %v5322_v0, %v13264_v13  ;;  %v5441_v48 = vmul.f32 %v5440_v53, %v13280_v52  ;;  %v13329_v60 = vmul.f32 %v13168_v14, %v13162_v10  ;;  %v4601_v63 = vpop.f32.mrf.mxu0 }
 0x830   : > { %v5153_v61 = vadd.f32 0.18741608, %v5152_v56  ;;  %v4163_v1 = vadd.f32 %v12923_v4, %v4126_v47  ;;  %v4165_v17 = vadd.f32 %v12923_v4, %v4128_v35  ;;  %v4127_v32 = vmul.f32 %v12920_v46, %v4090_v49 }
 0x831   : > { %17601 = vst [vmem:[#allocation72_spill] sm:$0xff] %v13329_v60  ;;  %v13334_v20 = vadd.f32 1.1283791, %v5114_v22  ;;  %10546 = vrcp.f32 %v13318_v18  ;;  %v5285_v39 = vmul.f32 %v5284_v27, %v13245_v29  ;;  %v4129_v15 = vmul.f32 %v12920_v46, %v4092_v55  ;;  %v10097_v27 = vld [vmem:[#allocation14 + $0x74] sm:$0xf0] }
 0x832   : > { %v13339_v42 = vpop.eup %10544  ;;  %v5138_v8 = vand.u32 2147483648, %v13302_v31  ;;  %v5308_v12 = vmul.f32 %v5307_v24, %v13264_v13  ;;  %v13344_v41 = vadd.f32 %v13193_v33, %v4594_v34  ;;  %v13346_v4 = vpack.c.bf16 %v4165_v17, %v4163_v1 }
 0x833   : > { %v5324_v30 = vadd.f32 0.4994258, %v5323_v59  ;;  %v5442_v3 = vadd.f32 0.112945676, %v5441_v48  ;;  %v5464_v43 = vmul.f32 %v13329_v60, %v13329_v60  ;;  %v4692_v46 = vadd.f32 %v13202_v16, %v13123_v40 }
 0x834   : > { %17602 = vst [vmem:[#allocation73_spill] sm:$0xff] %v13344_v41  ;;  %v5154_v56 = vmul.f32 %v5153_v61, %v13220_v54  ;;  %v5272_v7 = vmul.f32 %v5271_v19, %v13245_v29  ;;  %4620 = vmatmul.bf16.gmra.mxu0 %v13346_v4  ;;  %v4164_v33 = vadd.f32 %v12934_v44, %v4127_v32  ;;  %v13362_v47 = vadd.f32 1.0, %v5285_v39  ;;  %v13388_v32 = vpop.f32.mrf.mxu2  ;;  %v4650_v39 = vpop.f32.mrf.mxu1 }
 0x835   : > { %17603 = vst [vmem:[#allocation74_spill] sm:$0xff] %v13346_v4  ;;  %v4166_v0 = vadd.f32 %v12934_v44, %v4129_v15  ;;  %v13359_v53 = vmul.f32 %v13339_v42, %v13302_v31  ;;  %4718 = vmatmul.bf16.gmra.mxu2 %v13346_v4  ;;  %v4602_v16 = vadd.f32 %v4601_v63, %v13113_v57  ;;  %v5309_v54 = vadd.f32 0.0036580483, %v5308_v12  ;;  %v9430_v44 = vld [vmem:[#allocation14 + $0x68] sm:$0xf] }
 0x836   : > { %v13368_v35 = vmul.f32 %v13168_v14, %v13344_v41  ;;  %v5325_v24 = vmul.f32 %v5324_v30, %v13264_v13  ;;  %v5443_v34 = vmul.f32 %v5442_v3, %v13280_v52  ;;  %v13376_v19 = vmin.f32 %v5464_v43, 16.0  ;;  %v9558_v12 = vld [vmem:[#allocation14 + $0x168] sm:$0xf]  ;;  %v10093_v4 = vld [vmem:[#allocation14 + $0x54] sm:$0xf0] }
 0x837   : > { %v13370_v22 = vpack.c.bf16 %v4166_v0, %v4164_v33  ;;  %v13372_v55 = vpop.eup %10546  ;;  %v13379_v59 = vadd.f32 %v13218_v5, %v4692_v46  ;;  %v13382_v48 = vmul.f32 0.5, %v13120_v9  ;;  %v13384_v61 = vor.u32 1.1754944e-38, %v5138_v8  ;;  %v10129_v8 = vld [vmem:[#allocation14 + $0x174] sm:$0xf0]  ;;  %v10095_v46 = vld [vmem:[#allocation14 + $0x6c] sm:$0xf] }
 0x838   : > { %17604 = vst [vmem:[#allocation75_spill] sm:$0xff] %v13368_v35  ;;  %v13386_v1 = vadd.f32 1.1283791, %v5154_v56  ;;  %v5273_v17 = vadd.f32 0.18741608, %v5272_v7  ;;  %v5129_v15 = vsub.f32 1.0, %v13359_v53  ;;  %10548 = vrcp.f32 %v13362_v47 }
 0x839   : > { %17605 = vst [vmem:[#allocation76_spill] sm:$0xff] %v13370_v22  ;;  %4669 = vmatmul.bf16.gmra.mxu1 %v13370_v22  ;;  %4767 = vmatmul.bf16.gmra.mxu3 %v13370_v22  ;;  %v13394_v5 = vadd.f32 %v4650_v39, %v4602_v16  ;;  %v9431_v9 = vor.u32 %v10097_v27, %v9430_v44  ;;  %v5426_v3 = vmul.f32 2.1237322e-06, %v13280_v52  ;;  %v9432_v56 = vld [vmem:[#allocation14 + $0x78] sm:$0xf0]  ;;  %v13402_v7 = vadd.f32 1.0, %v5325_v24  ;;  %v13409_v16 = vpop.f32.mrf.mxu3 }
 0x83a   : > { %17606 = vst [vmem:[#allocation77_spill] sm:$0xff] %v13379_v59  ;;  %v5168_v63 = vmul.f32 %v13372_v55, %v13318_v18  ;;  %v5310_v30 = vmul.f32 %v5309_v54, %v13264_v13  ;;  %v5584_v43 = vmul.f32 %v13368_v35, %v13368_v35  ;;  %v5444_v33 = vadd.f32 0.4994258, %v5443_v34  ;;  %v10127_v44 = vld [vmem:[#allocation14 + $0x16c] sm:$0xf] }
 0x83b   : > { %17607 = vst [vmem:[#allocation78_spill] sm:$0xff] %v13382_v48  ;;  %v5477_v0 = vmul.f32 3.8918573e-05, %v13376_v19  ;;  %v13407_v53 = vmul.f32 %v13168_v14, %v13379_v59  ;;  %4777 = vmatpush.bf16.msra.mxu0 %v9431_v9  ;;  %v9559_v54 = vor.u32 %v10129_v8, %v9558_v12  ;;  %v9560_v27 = vld [vmem:[#allocation14 + $0x178] sm:$0xf0]  ;;  %v5274_v49 = vmul.f32 %v5273_v17, %v13245_v29 }
 0x83c   : > { %17608 = vst [vmem:[#allocation79_spill] sm:$0xff] %v13394_v5  ;;  %v9414_v39 = vld [vmem:[#allocation14 + $0x48] sm:$0xf]  ;;  %v9435_v22 = vor.u32 %v10095_v46, %v9432_v56  ;;  %v10125_v5 = vld [vmem:[#allocation14 + $0x154] sm:$0xf0]  ;;  %v5169_v34 = vsub.f32 1.0, %v5168_v63  ;;  %v9563_v29 = vor.u32 %v10127_v44, %v9560_v27  ;;  %v5130_v46 = vmul.f32 %v13339_v42, %v5129_v15 }
 0x83d   : > { %17609 = vst [vmem:[#allocation80_spill] sm:$0xff] %v13407_v53  ;;  %v9542_v24 = vld [vmem:[#allocation14 + $0x148] sm:$0xf]  ;;  %v5176_v35 = vand.u32 2147483647, %v13318_v18  ;;  %v13413_v41 = vmin.f32 %v5584_v43, 16.0  ;;  %4826 = vmatpush.bf16.msra.mxu1 %v9559_v54  ;;  %v5624_v59 = vmul.f32 %v13407_v53, %v13407_v53  ;;  %vm5132_vm2 = vweird.f32 %v13302_v31 }
 0x83e   : > { %v5311_v60 = vadd.f32 0.05243302, %v5310_v30  ;;  %v13415_v9 = vpop.eup %10548  ;;  %v5178_v12 = vand.u32 2147483648, %v13318_v18  ;;  %v5427_v8 = vadd.f32 0.00028619796, %v5426_v3  ;;  %4875 = vmatpush.bf16.msra.mxu2 %v9435_v22  ;;  %v9415_v63 = vor.u32 %v10093_v4, %v9414_v39  ;;  %4924 = vmatpush.bf16.msra.mxu3 %v9563_v29 }
 0x83f   : > { %v10091_v17 = vld [vmem:[#allocation14 + $0x4c] sm:$0xf]  ;;  %v9543_v30 = vor.u32 %v10125_v5, %v9542_v24  ;;  %v9416_v43 = vld [vmem:[#allocation14 + $0x58] sm:$0xf0]  ;;  %v13422_v10 = vadd.f32 1.1283791, %v5274_v49  ;;  %10550 = vrcp.f32 %v13402_v7  ;;  %v5445_v3 = vmul.f32 %v5444_v33, %v13280_v52  ;;  %v4699_v49 = vpop.f32.mrf.mxu2 }
 0x840   : > { %v10123_v56 = vld [vmem:[#allocation14 + $0x14c] sm:$0xf]  ;;  %v9544_v54 = vld [vmem:[#allocation14 + $0x158] sm:$0xf0]  ;;  %v5478_v48 = vadd.f32 0.001143296, %v5477_v0  ;;  %v5170_v22 = vmul.f32 %v13372_v55, %v5169_v34  ;;  %v13429_v15 = vmul.f32 %v13415_v9, %v13362_v47  ;;  %v5312_v4 = vmul.f32 %v5311_v60, %v13264_v13  ;;  %4778 = vmatpush.bf16.msra.mxu0 %v9415_v63 }
 0x841   : > { %v5597_v5 = vmul.f32 3.8918573e-05, %v13413_v41  ;;  %4827 = vmatpush.bf16.msra.mxu1 %v9543_v30  ;;  %v9398_v44 = vld [vmem:[#allocation14 + $0x28] sm:$0xf]  ;;  %v10089_v27 = vld [vmem:[#allocation14 + $0x34] sm:$0xf0]  ;;  %vm5133_vm3 = vweird.f32 %v13339_v42  ;;  %v9419_v24 = vor.u32 %v10091_v17, %v9416_v43  ;;  %v9547_v34 = vor.u32 %v10123_v56, %v9544_v54  ;;  %v4748_v54 = vpop.f32.mrf.mxu3 }
 0x842   : > { %v17610_v33 = vand.u32 2147483647, %v13302_v31  ;;  %v13440_v39 = vmin.f32 %v5624_v59, 16.0  ;;  %v9526_v60 = vld [vmem:[#allocation14 + $0x128] sm:$0xf]  ;;  %v5131_v63 = vadd.f32 %v13339_v42, %v5130_v46  ;;  %vm5173_vm5 = vweird.f32 %v13372_v55  ;;  %vm13461_vm7 = vmor %vm5132_vm2, %vm5133_vm3 }
 0x843   : > { %v10121_v29 = vld [vmem:[#allocation14 + $0x134] sm:$0xf0]  ;;  %vm13444_vm6 = vcmp.eq.f32.partialorder %v5176_v35, 8.507059e+37  ;;  %v5179_v53 = vor.u32 1.1754944e-38, %v5178_v12  ;;  %v13449_v23 = vadd.f32 1.0, %v5445_v3  ;;  %v5479_v59 = vmul.f32 %v5478_v48, %v13376_v19  ;;  %4876 = vmatpush.bf16.msra.mxu2 %v9419_v24  ;;  %4925 = vmatpush.bf16.msra.mxu3 %v9547_v34 }
 0x844   : > { %vm13436_vm4 = vcmp.eq.f32.partialorder %v17610_v33, 8.507059e+37  ;;  %v5428_v33 = vmul.f32 %v5427_v8, %v13280_v52  ;;  %v4700_v17 = vadd.f32 %v4699_v49, %v13123_v40  ;;  %v9399_v46 = vor.u32 %v10089_v27, %v9398_v44  ;;  %v9528_v44 = vld [vmem:[#allocation14 + $0x138] sm:$0xf0]  ;;  %v9382_v31 = vld [vmem:[#allocation14 + $0x8] sm:$0xf] }
 0x845   : > { %v5171_v43 = vadd.f32 %v13372_v55, %v5170_v22  ;;  %v5289_v35 = vsub.f32 1.0, %v13429_v15  ;;  %v5313_v56 = vadd.f32 0.18741608, %v5312_v4  ;;  %v9527_v12 = vor.u32 %v10121_v29, %v9526_v60  ;;  %v13455_v62 = vpop.eup %10550  ;;  %v10119_v15 = vld [vmem:[#allocation14 + $0x12c] sm:$0xf] }
 0x846   : > { %v5598_v8 = vadd.f32 0.001143296, %v5597_v5  ;;  %v5637_v3 = vmul.f32 3.8918573e-05, %v13440_v39  ;;  %v13466_v49 = vadd.f32 %v4748_v54, %v4700_v17  ;;  %4779 = vmatpush.bf16.msra.mxu0 %v9399_v46  ;;  %v9403_v22 = vor.u32 %v10087_v11, %v9400_v37  ;;  %v10085_v27 = vld [vmem:[#allocation14 + $0x14] sm:$0xf0] }
 0x847   : > { %v5116_v4 = vmul.f32 %v13334_v20, %v13174_v21  ;;  %vm5172_vm8 = vweird.f32 %v13318_v18  ;;  %4828 = vmatpush.bf16.msra.mxu1 %v9527_v12  ;;  %v5135_v5 = vsel %vm13461_vm7, %v13339_v42, %v5131_v63  ;;  %v5429_v37 = vadd.f32 0.0036580483, %v5428_v33  ;;  %v9510_v11 = vld [vmem:[#allocation14 + $0x108] sm:$0xf]  ;;  %v10117_v60 = vld [vmem:[#allocation14 + $0x114] sm:$0xf0] }
 0x848   : > { %vm13476_vm9 = vmor %vm5172_vm8, %vm5173_vm5  ;;  %10552 = vrcp.f32 %v13449_v23  ;;  %v5480_v21 = vadd.f32 0.014752088, %v5479_v59  ;;  %4877 = vmatpush.bf16.msra.mxu2 %v9403_v22  ;;  %v5156_v18 = vmul.f32 %v13386_v1, %v13190_v26  ;;  %v13488_v42 = vmul.f32 %v13422_v10, %v13212_v58  ;;  %v10083_v29 = vld [vmem:[#allocation14 + $0xc] sm:$0xf]  ;;  %v9384_v63 = vld [vmem:[#allocation14 + $0x18] sm:$0xf0] }
 0x849   : > { %v5175_v20 = vsel %vm13476_vm9, %v13372_v55, %v5171_v43  ;;  %v5328_v34 = vmul.f32 %v13455_v62, %v13402_v7  ;;  %v5599_v33 = vmul.f32 %v5598_v8, %v13413_v41  ;;  %v5638_v59 = vadd.f32 0.001143296, %v5637_v3  ;;  %v10115_v58 = vld [vmem:[#allocation14 + $0x10c] sm:$0xf]  ;;  %v9512_v1 = vld [vmem:[#allocation14 + $0x118] sm:$0xf0] }
 0x84a   : > { %v9531_v17 = vor.u32 %v10119_v15, %v9528_v44  ;;  %v9383_v46 = vor.u32 %v10085_v27, %v9382_v31  ;;  %v5140_v26 = vsel %vm13436_vm4, %v13384_v61, %v5135_v5  ;;  %v5290_v55 = vmul.f32 %v13415_v9, %v5289_v35 }
 0x84b   : > { %vm5292_vm10 = vweird.f32 %v13362_v47  ;;  %v5466_v10 = vmul.f32 2.1237322e-06, %v13376_v19  ;;  %v5180_v43 = vsel %vm13444_vm6, %v5179_v53, %v5175_v20  ;;  %v5296_v54 = vand.u32 2147483647, %v13362_v47 }
 0x84c   : > { %4926 = vmatpush.bf16.msra.mxu3 %v9531_v17  ;;  %4780 = vmatpush.bf16.msra.mxu0 %v9383_v46  ;;  %v9511_v12 = vor.u32 %v10117_v60, %v9510_v11  ;;  %v9387_v48 = vor.u32 %v10083_v29, %v9384_v63  ;;  %v5298_v0 = vand.u32 2147483648, %v13362_v47  ;;  %v5314_v61 = vmul.f32 %v5313_v56, %v13264_v13 }
 0x84d   : > { %v5329_v35 = vsub.f32 1.0, %v5328_v34  ;;  %v5586_v8 = vmul.f32 2.1237322e-06, %v13413_v41  ;;  %v5481_v22 = vmul.f32 %v5480_v21, %v13376_v19  ;;  %v5600_v15 = vadd.f32 0.014752088, %v5599_v33 }
 0x84e   : > { %v13505_v3 = vpop.eup %10552  ;;  %v5639_v53 = vmul.f32 %v5638_v59, %v13440_v39  ;;  %4829 = vmatpush.bf16.msra.mxu1 %v9511_v12  ;;  %4878 = vmatpush.bf16.msra.mxu2 %v9387_v48  ;;  %v9515_v30 = vor.u32 %v10115_v58, %v9512_v1  ;;  %v13509_v44 = vmul.f32 %v5140_v26, %v5116_v4  ;;  %v5467_v13 = vadd.f32 0.00028619796, %v5466_v10 }
 0x84f   : > { %v13511_v31 = vmul.f32 %v5180_v43, %v5156_v18  ;;  %v5430_v27 = vmul.f32 %v5429_v37, %v13280_v52  ;;  %4781 = vmatmul.bf16.vlgmr.msra.gmra.mxu0 %v12964_v2  ;;  %v5291_v56 = vadd.f32 %v13415_v9, %v5290_v55  ;;  %vm5293_vm11 = vweird.f32 %v13415_v9 }
 0x850   : > { %vm13517_vm12 = vcmp.eq.f32.partialorder %v5296_v54, 8.507059e+37  ;;  %v13523_v24 = vmul.f32 %v13168_v14, %v13236_v51  ;;  %4927 = vmatpush.bf16.msra.mxu3 %v9515_v30  ;;  %v5299_v4 = vor.u32 1.1754944e-38, %v5298_v0  ;;  %v5330_v21 = vmul.f32 %v13455_v62, %v5329_v35  ;;  %vm13537_vm13 = vmor %vm5292_vm10, %vm5293_vm11 }
 0x851   : > { %v5448_v37 = vmul.f32 %v13505_v3, %v13449_v23  ;;  %v5587_v11 = vadd.f32 0.00028619796, %v5586_v8  ;;  %4830 = vmatmul.bf16.vlgmr.msra.gmra.mxu1 %v12966_v36  ;;  %4879 = vmatmul.bf16.vlgmr.msra.gmra.mxu2 %v12964_v2  ;;  %v5315_v18 = vadd.f32 1.1283791, %v5314_v61  ;;  %v5482_v20 = vadd.f32 0.112945676, %v5481_v22 }
 0x852   : > { %v5601_v34 = vmul.f32 %v5600_v15, %v13413_v41  ;;  %v5640_v60 = vadd.f32 0.014752088, %v5639_v53  ;;  %v9628_v29 = vclamps-f32 %v13509_v44, 1.0  ;;  %v9629_v63 = vclamps-f32 %v13511_v31, 1.0 }
 0x853   : > { %v5431_v59 = vadd.f32 0.05243302, %v5430_v27  ;;  %v5468_v2 = vmul.f32 %v5467_v13, %v13376_v19  ;;  %4928 = vmatmul.bf16.vlgmr.msra.gmra.mxu3 %v12966_v36  ;;  %v5295_v17 = vsel %vm13537_vm13, %v13415_v9, %v5291_v56  ;;  %vm5333_vm14 = vweird.f32 %v13455_v62 }
 0x854   : > { %v5338_v46 = vand.u32 2147483648, %v13402_v7  ;;  %v5744_v47 = vmul.f32 %v13523_v24, %v13523_v24  ;;  %v5331_v26 = vadd.f32 %v13455_v62, %v5330_v21  ;;  %v5449_v55 = vsub.f32 1.0, %v5448_v37 }
 0x855   : > { %v5588_v10 = vmul.f32 %v5587_v11, %v13413_v41  ;;  %v5626_v58 = vmul.f32 2.1237322e-06, %v13440_v39  ;;  %v5316_v36 = vmul.f32 %v5315_v18, %v13242_v6  ;;  %v5483_v1 = vmul.f32 %v5482_v20, %v13376_v19 }
 0x856   : > { %v5602_v43 = vadd.f32 0.112945676, %v5601_v34  ;;  %v5641_v9 = vmul.f32 %v5640_v60, %v13440_v39  ;;  %vm5332_vm15 = vweird.f32 %v13402_v7  ;;  %v5336_v54 = vand.u32 2147483647, %v13402_v7 }
 0x857   : > { %v5432_v12 = vmul.f32 %v5431_v59, %v13280_v52  ;;  %v5469_v48 = vadd.f32 0.0036580483, %v5468_v2  ;;  %v5300_v0 = vsel %vm13517_vm12, %v5299_v4, %v5295_v17  ;;  %vm13563_vm0 = vmor %vm5332_vm15, %vm5333_vm14  ;;  %v5339_v6 = vor.u32 1.1754944e-38, %v5338_v46 }
 0x858   : > { %v13567_v35 = vmin.f32 %v5744_v47, 16.0  ;;  %v4599_v8 = vadd.f32 %v13306_v25, %v13113_v57  ;;  %v5335_v7 = vsel %vm13563_vm0, %v13455_v62, %v5331_v26  ;;  %v5450_v22 = vmul.f32 %v13505_v3, %v5449_v55 }
 0x859   : > { %v5589_v15 = vadd.f32 0.0036580483, %v5588_v10  ;;  %v5627_v53 = vadd.f32 0.00028619796, %v5626_v58  ;;  %v5484_v30 = vadd.f32 0.4994258, %v5483_v1  ;;  %v5603_v27 = vmul.f32 %v5602_v43, %v13413_v41 }
 0x85a   : > { %v5642_v13 = vadd.f32 0.112945676, %v5641_v9  ;;  %v4697_v56 = vadd.f32 %v13388_v32, %v13123_v40  ;;  %v5301_v5 = vmul.f32 %v5300_v0, %v13488_v42  ;;  %vm5337_vm1 = vcmp.eq.f32.partialorder %v5336_v54, 8.507059e+37 }
 0x85b   : > { %v5433_v4 = vadd.f32 0.18741608, %v5432_v12  ;;  %v5470_v25 = vmul.f32 %v5469_v48, %v13376_v19  ;;  %v5340_v21 = vsel %vm5337_vm1, %v5339_v6, %v5335_v7  ;;  %v5757_v62 = vmul.f32 3.8918573e-05, %v13567_v35 }
 0x85c   : > { %v13583_v37 = vmul.f32 %v13168_v14, %v13252_v50  ;;  %v13586_v11 = vadd.f32 %v13323_v38, %v4599_v8  ;;  %v5451_v18 = vadd.f32 %v13505_v3, %v5450_v22  ;;  %vm5453_vm2 = vweird.f32 %v13505_v3 }
 0x85d   : > { %v5590_v32 = vmul.f32 %v5589_v15, %v13413_v41  ;;  %v5628_v42 = vmul.f32 %v5627_v53, %v13440_v39  ;;  %v5485_v20 = vmul.f32 %v5484_v30, %v13376_v19  ;;  %v5604_v34 = vadd.f32 0.4994258, %v5603_v27  ;;  %v17627_v53 = vld [vmem:[#allocation60_spill] sm:$0xff] }
 0x85e   : > { %v5643_v60 = vmul.f32 %v5642_v13, %v13440_v39  ;;  %v13595_v33 = vadd.f32 %v13409_v16, %v4697_v56  ;;  %v5434_v59 = vmul.f32 %v5433_v4, %v13280_v52  ;;  %vm5452_vm3 = vweird.f32 %v13449_v23  ;;  %v17628_v13 = vld [vmem:[#allocation71_spill] sm:$0xff] }
 0x85f   : > { %v5458_v38 = vand.u32 2147483648, %v13449_v23  ;;  %v5471_v2 = vadd.f32 0.05243302, %v5470_v25  ;;  %4786 = vmatmul.bf16.gmra.mxu0 %v13018_v45  ;;  %vm13601_vm4 = vmor %vm5452_vm3, %vm5453_vm2  ;;  %v5456_v46 = vand.u32 2147483647, %v13449_v23  ;;  %v5784_v16 = vmul.f32 %v13583_v37, %v13583_v37 }
 0x860   : > { %v5758_v47 = vadd.f32 0.001143296, %v5757_v62  ;;  %v13610_v52 = vmul.f32 %v13168_v14, %v13586_v11  ;;  %v5341_v26 = vmul.f32 %v5340_v21, %v5316_v36  ;;  %v5455_v55 = vsel %vm13601_vm4, %v13505_v3, %v5451_v18  ;;  %v13646_v18 = vpop.f32.mrf.mxu0 }
 0x861   : > { %v5591_v10 = vadd.f32 0.05243302, %v5590_v32  ;;  %v5629_v58 = vadd.f32 0.0036580483, %v5628_v42  ;;  %4835 = vmatmul.bf16.gmra.mxu1 %v13023_v28  ;;  %4884 = vmatmul.bf16.gmra.mxu2 %v13018_v45  ;;  %v13617_v23 = vadd.f32 1.0, %v5485_v20  ;;  %v5605_v1 = vmul.f32 %v5604_v34, %v13413_v41 }
 0x862   : > { %v5644_v43 = vadd.f32 0.4994258, %v5643_v60  ;;  %v13622_v9 = vmul.f32 %v13168_v14, %v13595_v33  ;;  %v9632_v36 = vclamps-f32 %v5301_v5, 1.0  ;;  %v5435_v54 = vadd.f32 1.1283791, %v5434_v59 }
 0x863   : > { %v5459_v12 = vor.u32 1.1754944e-38, %v5458_v38  ;;  %v5472_v3 = vmul.f32 %v5471_v2, %v13376_v19  ;;  %4933 = vmatmul.bf16.gmra.mxu3 %v13023_v28  ;;  %vm5457_vm5 = vcmp.eq.f32.partialorder %v5456_v46, 8.507059e+37  ;;  %v5759_v48 = vmul.f32 %v5758_v47, %v13567_v35  ;;  %v17629_v38 = vld [vmem:[#allocation54_spill] sm:$0xff] }
 0x864   : > { %v13627_v45 = vmin.f32 %v5784_v16, 16.0  ;;  %v5904_v0 = vmul.f32 %v13610_v52, %v13610_v52  ;;  %v9633_v61 = vclamps-f32 %v5341_v26, 1.0  ;;  %v5592_v8 = vmul.f32 %v5591_v10, %v13413_v41  ;;  %v17630_v46 = vld [vmem:[#allocation70_spill] sm:$0xff]  ;;  %v17631_v16 = vld [vmem:[#allocation59_spill] sm:$0xff] }
 0x865   : > { %v5460_v6 = vsel %vm5457_vm5, %v5459_v12, %v5455_v55  ;;  %v5630_v7 = vmul.f32 %v5629_v58, %v13440_v39  ;;  %10554 = vrcp.f32 %v13617_v23  ;;  %v13634_v22 = vadd.f32 1.0, %v5605_v1  ;;  %v17632_v1 = vld [vmem:[#allocation78_spill] sm:$0xff] }
 0x866   : > { %v5645_v28 = vmul.f32 %v5644_v43, %v13440_v39  ;;  %v5944_v15 = vmul.f32 %v13622_v9, %v13622_v9  ;;  %v4973_v30 = vmul.f32 0.5, %v17627_v53  ;;  %v7668_v27 = vadd.f32 1.0, %v9632_v36 }
 0x867   : > { %v5436_v56 = vmul.f32 %v5435_v54, %v17628_v13  ;;  %v5473_v5 = vadd.f32 0.18741608, %v5472_v3  ;;  %v7664_v4 = vadd.f32 1.0, %v9628_v29  ;;  %v5760_v25 = vadd.f32 0.014752088, %v5759_v48  ;;  %v13655_v29 = vpop.f32.mrf.mxu1 }
 0x868   : > { %v5797_v21 = vmul.f32 3.8918573e-05, %v13627_v45  ;;  %v13644_v62 = vmin.f32 %v5904_v0, 16.0  ;;  %v7665_v32 = vadd.f32 1.0, %v9629_v63  ;;  %v7669_v42 = vadd.f32 1.0, %v9633_v61 }
 0x869   : > { %v5461_v20 = vmul.f32 %v5460_v6, %v5436_v56  ;;  %v5631_v34 = vadd.f32 0.05243302, %v5630_v7  ;;  %v5593_v60 = vadd.f32 0.18741608, %v5592_v8  ;;  %10556 = vrcp.f32 %v13634_v22  ;;  %v17635_v7 = vld [vmem:[#allocation73_spill] sm:$0xff] }
 0x86a   : > { %v13651_v59 = vadd.f32 1.0, %v5645_v28  ;;  %v13653_v44 = vmin.f32 %v5944_v15, 16.0  ;;  %v4970_v2 = vmul.f32 0.5, %v17629_v38  ;;  %v7732_v17 = vmul.f32 %v7668_v27, %v4973_v30  ;;  %v17636_v15 = vld [vmem:[#allocation67_spill] sm:$0xff]  ;;  %v4606_v56 = vpop.f32.mrf.mxu0 }
 0x86b   : > { %v4974_v47 = vmul.f32 0.5, %v17630_v46  ;;  %v4977_v31 = vmul.f32 0.5, %v17631_v16  ;;  %v13660_v63 = vpop.eup %10554  ;;  %v5474_v26 = vmul.f32 %v5473_v5, %v13376_v19  ;;  %v5761_v55 = vmul.f32 %v5760_v25, %v13567_v35  ;;  %v17634_v19 = vld [vmem:[#allocation58_spill] sm:$0xff]  ;;  %v17637_v25 = vld [vmem:[#allocation77_spill] sm:$0xff] }
 0x86c   : > { %v5798_v10 = vadd.f32 0.001143296, %v5797_v21  ;;  %v5917_v58 = vmul.f32 3.8918573e-05, %v13644_v62  ;;  %v7728_v43 = vmul.f32 %v7664_v4, %v17632_v1  ;;  %v7729_v36 = vmul.f32 %v7665_v32, %v4970_v2  ;;  %v17638_v32 = vld [vmem:[#allocation53_spill] sm:$0xff] }
 0x86d   : > { %v7733_v54 = vmul.f32 %v7669_v42, %v4974_v47  ;;  %v9636_v12 = vclamps-f32 %v5461_v20, 1.0  ;;  %v5594_v3 = vmul.f32 %v5593_v60, %v13413_v41  ;;  %v5632_v48 = vmul.f32 %v5631_v34, %v13440_v39 }
 0x86e   : > { %10558 = vrcp.f32 %v13651_v59  ;;  %v5957_v0 = vmul.f32 3.8918573e-05, %v13653_v44  ;;  %v13670_v61 = vpack.c.bf16 %v7732_v17, %v7728_v43  ;;  %v13673_v6 = vmul.f32 0.5, %v17634_v19 }
 0x86f   : > { %v5488_v8 = vmul.f32 %v13660_v63, %v13617_v23  ;;  %v13678_v28 = vmul.f32 0.5, %v17635_v7  ;;  %4791 = vmatmul.bf16.gmra.mxu0 %v17636_v15  ;;  %v13681_v41 = vpop.eup %10556  ;;  %v5475_v53 = vadd.f32 1.1283791, %v5474_v26  ;;  %v5762_v30 = vadd.f32 0.112945676, %v5761_v55  ;;  %v4655_v2 = vpop.f32.mrf.mxu1  ;;  %v17641_v55 = vld [vmem:[#allocation72_spill] sm:$0xff] }
 0x870   : > { %17633 = vst [vmem:[#allocation60_spill] sm:$0xff] %v13670_v61  ;;  %v5799_v27 = vmul.f32 %v5798_v10, %v13627_v45  ;;  %v5918_v13 = vadd.f32 0.001143296, %v5917_v58  ;;  %v7672_v5 = vadd.f32 1.0, %v9636_v12  ;;  %v5498_v4 = vand.u32 2147483648, %v13617_v23 }
 0x871   : > { %v13686_v21 = vmul.f32 0.5, %v17637_v25  ;;  %4840 = vmatmul.bf16.gmra.mxu1 %v17638_v32  ;;  %4889 = vmatmul.bf16.gmra.mxu2 %v17636_v15  ;;  %v4607_v42 = vadd.f32 %v4606_v56, %v13113_v57  ;;  %v13691_v20 = vpack.c.bf16 %v7733_v54, %v7729_v36  ;;  %v5595_v34 = vadd.f32 1.1283791, %v5594_v3 }
 0x872   : > { %v5633_v60 = vadd.f32 0.18741608, %v5632_v48  ;;  %v5958_v38 = vadd.f32 0.001143296, %v5957_v0  ;;  %v5489_v17 = vsub.f32 1.0, %v5488_v8  ;;  %v5608_v46 = vmul.f32 %v13681_v41, %v13634_v22  ;;  %v17643_v48 = vld [vmem:[#allocation75_spill] sm:$0xff] }
 0x873   : > { %17639 = vst [vmem:[#allocation71_spill] sm:$0xff] %v13691_v20  ;;  %v5746_v47 = vmul.f32 2.1237322e-06, %v13567_v35  ;;  %4938 = vmatmul.bf16.gmra.mxu3 %v17638_v32  ;;  %v13697_v16 = vadd.f32 %v4655_v2, %v4607_v42  ;;  %v13702_v10 = vmul.f32 %v5475_v53, %v17641_v55  ;;  %v5763_v58 = vmul.f32 %v5762_v30, %v13567_v35 }
 0x874   : > { %v13699_v26 = vpop.eup %10558  ;;  %v5800_v1 = vadd.f32 0.014752088, %v5799_v27  ;;  %v5919_v43 = vmul.f32 %v5918_v13, %v13644_v62  ;;  %v13706_v36 = vmul.f32 %v7672_v5, %v4977_v31  ;;  %vm5492_vm6 = vweird.f32 %v13617_v23 }
 0x875   : > { %17640 = vst [vmem:[#allocation54_spill] sm:$0xff] %v13697_v16  ;;  %v5496_v54 = vand.u32 2147483647, %v13617_v23  ;;  %v5499_v12 = vor.u32 1.1754944e-38, %v5498_v4  ;;  %v5786_v3 = vmul.f32 2.1237322e-06, %v13627_v45  ;;  %vm5493_vm7 = vweird.f32 %v13660_v63 }
 0x876   : > { %17642 = vst [vmem:[#allocation70_spill] sm:$0xff] %v13706_v36  ;;  %v13713_v0 = vmul.f32 %v5595_v34, %v17643_v48  ;;  %v5634_v19 = vmul.f32 %v5633_v60, %v13440_v39  ;;  %v5959_v8 = vmul.f32 %v5958_v38, %v13653_v44  ;;  %v5490_v7 = vmul.f32 %v13660_v63, %v5489_v17  ;;  %v17646_v34 = vld [vmem:[#allocation79_spill] sm:$0xff]  ;;  %vm13752_vm11 = vmor %vm5492_vm6, %vm5493_vm7 }
 0x877   : > { %v5609_v31 = vsub.f32 1.0, %v5608_v46  ;;  %v5648_v15 = vmul.f32 %v13699_v26, %v13651_v59  ;;  %v5747_v53 = vadd.f32 0.00028619796, %v5746_v47  ;;  %v5764_v30 = vadd.f32 0.4994258, %v5763_v58 }
 0x878   : > { %v5801_v27 = vmul.f32 %v5800_v1, %v13627_v45  ;;  %v5906_v13 = vmul.f32 2.1237322e-06, %v13644_v62  ;;  %v5920_v56 = vadd.f32 0.014752088, %v5919_v43  ;;  %vm13722_vm8 = vcmp.eq.f32.partialorder %v5496_v54, 8.507059e+37 }
 0x879   : > { %vm5612_vm9 = vweird.f32 %v13634_v22  ;;  %v5616_v39 = vand.u32 2147483647, %v13634_v22  ;;  %v5618_v4 = vand.u32 2147483648, %v13634_v22  ;;  %v5787_v25 = vadd.f32 0.00028619796, %v5786_v3 }
 0x87a   : > { %v5635_v32 = vadd.f32 1.1283791, %v5634_v19  ;;  %v5960_v42 = vadd.f32 0.014752088, %v5959_v8  ;;  %v13731_v60 = vmul.f32 %v13168_v14, %v17646_v34  ;;  %v4604_v38 = vadd.f32 %v13646_v18, %v13113_v57 }
 0x87b   : > { %v5491_v2 = vadd.f32 %v13660_v63, %v5490_v7  ;;  %v5610_v17 = vmul.f32 %v13681_v41, %v5609_v31  ;;  %v5649_v46 = vsub.f32 1.0, %v5648_v15  ;;  %v5748_v47 = vmul.f32 %v5747_v53, %v13567_v35 }
 0x87c   : > { %v5765_v55 = vmul.f32 %v5764_v30, %v13567_v35  ;;  %v5802_v58 = vadd.f32 0.112945676, %v5801_v27  ;;  %v5907_v1 = vadd.f32 0.00028619796, %v5906_v13  ;;  %v5921_v43 = vmul.f32 %v5920_v56, %v13644_v62  ;;  %v17651_v30 = vld [vmem:[#allocation52_spill] sm:$0xff] }
 0x87d   : > { %vm13740_vm10 = vcmp.eq.f32.partialorder %v5616_v39, 8.507059e+37  ;;  %v5619_v3 = vor.u32 1.1754944e-38, %v5618_v4  ;;  %v13745_v18 = vmul.f32 0.5, %v13236_v51  ;;  %v5788_v48 = vmul.f32 %v5787_v25, %v13627_v45 }
 0x87e   : > { %vm5613_vm12 = vweird.f32 %v13681_v41  ;;  %v5961_v8 = vmul.f32 %v5960_v42, %v13653_v44  ;;  %v6064_v7 = vmul.f32 %v13731_v60, %v13731_v60  ;;  %v13761_v51 = vadd.f32 %v13655_v29, %v4604_v38  ;;  %v17652_v29 = vld [vmem:[#allocation80_spill] sm:$0xff]  ;;  %v4701_v38 = vpop.f32.mrf.mxu2 }
 0x87f   : > { %v5495_v31 = vsel %vm13752_vm11, %v13660_v63, %v5491_v2  ;;  %v5611_v23 = vadd.f32 %v13681_v41, %v5610_v17  ;;  %v5650_v15 = vmul.f32 %v13699_v26, %v5649_v46  ;;  %v5749_v53 = vadd.f32 0.0036580483, %v5748_v47  ;;  %4796 = vmatmul.bf16.gmra.mxu0 %v17651_v30  ;;  %v17653_v2 = vld [vmem:[#allocation68_spill] sm:$0xff]  ;;  %v13783_v17 = vpop.f32.mrf.mxu0  ;;  %vm13791_vm13 = vmor %vm5612_vm9, %vm5613_vm12 }
 0x880   : > { %v13769_v27 = vadd.f32 1.0, %v5765_v55  ;;  %v5803_v13 = vmul.f32 %v5802_v58, %v13627_v45  ;;  %v5908_v56 = vmul.f32 %v5907_v1, %v13644_v62  ;;  %v5922_v39 = vadd.f32 0.112945676, %v5921_v43 }
 0x881   : > { %v13774_v4 = vmul.f32 %v5635_v32, %v17652_v29  ;;  %v5656_v25 = vand.u32 2147483647, %v13651_v59  ;;  %v5789_v63 = vadd.f32 0.0036580483, %v5788_v48  ;;  %v13779_v42 = vmul.f32 %v13168_v14, %v13466_v49  ;;  %4845 = vmatmul.bf16.gmra.mxu1 %v17653_v2  ;;  %4894 = vmatmul.bf16.gmra.mxu2 %v17651_v30 }
 0x882   : > { %v5500_v46 = vsel %vm13722_vm8, %v5499_v12, %v5495_v31  ;;  %v5962_v47 = vadd.f32 0.112945676, %v5961_v8  ;;  %v13795_v55 = vmin.f32 %v6064_v7, 16.0  ;;  %v13799_v58 = vmul.f32 %v13168_v14, %v13761_v51 }
 0x883   : > { %v5615_v5 = vsel %vm13791_vm13, %v13681_v41, %v5611_v23  ;;  %v5651_v12 = vadd.f32 %v13699_v26, %v5650_v15  ;;  %vm5653_vm14 = vweird.f32 %v13699_v26  ;;  %v5750_v22 = vmul.f32 %v5749_v53, %v13567_v35  ;;  %4943 = vmatmul.bf16.gmra.mxu3 %v17653_v2 }
 0x884   : > { %10560 = vrcp.f32 %v13769_v27  ;;  %v5804_v1 = vadd.f32 0.4994258, %v5803_v13  ;;  %v5909_v43 = vadd.f32 0.0036580483, %v5908_v56  ;;  %v5923_v48 = vmul.f32 %v5922_v39, %v13644_v62  ;;  %v4750_v13 = vpop.f32.mrf.mxu3  ;;  %v13833_v56 = vpop.f32.mrf.mxu1 }
 0x885   : > { %vm5652_vm15 = vweird.f32 %v13651_v59  ;;  %v5658_v19 = vand.u32 2147483648, %v13651_v59  ;;  %v5790_v41 = vmul.f32 %v5789_v63, %v13627_v45  ;;  %v6104_v8 = vmul.f32 %v13779_v42, %v13779_v42 }
 0x886   : > { %v5620_v7 = vsel %vm13740_vm10, %v5619_v3, %v5615_v5  ;;  %vm13817_vm0 = vmor %vm5652_vm15, %vm5653_vm14  ;;  %v5963_v23 = vmul.f32 %v5962_v47, %v13653_v44  ;;  %v6077_v15 = vmul.f32 3.8918573e-05, %v13795_v55  ;;  %v6224_v53 = vmul.f32 %v13799_v58, %v13799_v58 }
 0x887   : > { %v5501_v59 = vmul.f32 %v5500_v46, %v13702_v10  ;;  %v5655_v30 = vsel %vm13817_vm0, %v13699_v26, %v5651_v12  ;;  %vm13829_vm1 = vcmp.eq.f32.partialorder %v5656_v25, 8.507059e+37  ;;  %v5751_v3 = vadd.f32 0.05243302, %v5750_v22  ;;  %v13841_v25 = vpop.f32.mrf.mxu2 }
 0x888   : > { %v5805_v39 = vmul.f32 %v5804_v1, %v13627_v45  ;;  %v5910_v29 = vmul.f32 %v5909_v43, %v13644_v62  ;;  %v5924_v63 = vadd.f32 0.4994258, %v5923_v48  ;;  %v4702_v2 = vadd.f32 %v4701_v38, %v13123_v40 }
 0x889   : > { %v5621_v10 = vmul.f32 %v5620_v7, %v13713_v0  ;;  %v5659_v46 = vor.u32 1.1754944e-38, %v5658_v19  ;;  %v5791_v32 = vadd.f32 0.05243302, %v5790_v41  ;;  %v13839_v26 = vmin.f32 %v6104_v8, 16.0  ;;  %v4611_v19 = vpop.f32.mrf.mxu0 }
 0x88a   : > { %v13843_v47 = vpop.eup %10560  ;;  %v13846_v5 = vmul.f32 0.5, %v13252_v50  ;;  %v5964_v12 = vadd.f32 0.4994258, %v5963_v23  ;;  %v6078_v22 = vadd.f32 0.001143296, %v6077_v15  ;;  %v13848_v1 = vmin.f32 %v6224_v53, 16.0 }
 0x88b   : > { %v9637_v43 = vclamps-f32 %v5501_v59, 1.0  ;;  %v5660_v38 = vsel %vm13829_vm1, %v5659_v46, %v5655_v30  ;;  %v5752_v0 = vmul.f32 %v5751_v3, %v13567_v35  ;;  %v5946_v48 = vmul.f32 2.1237322e-06, %v13653_v44 }
 0x88c   : > { %17660 = vst [vmem:[#allocation59_spill] sm:$0xff] %v13846_v5  ;;  %v13854_v41 = vadd.f32 1.0, %v5805_v39  ;;  %v5911_v8 = vadd.f32 0.05243302, %v5910_v29  ;;  %v5925_v7 = vmul.f32 %v5924_v63, %v13644_v62  ;;  %v13857_v50 = vadd.f32 %v4750_v13, %v4702_v2  ;;  %v17661_v2 = vld [vmem:[#allocation65_spill] sm:$0xff] }
 0x88d   : > { %v9640_v31 = vclamps-f32 %v5621_v10, 1.0  ;;  %v5768_v23 = vmul.f32 %v13843_v47, %v13769_v27  ;;  %v5792_v15 = vmul.f32 %v5791_v32, %v13627_v45  ;;  %v6117_v53 = vmul.f32 3.8918573e-05, %v13839_v26  ;;  %v13869_v10 = vpop.f32.mrf.mxu3 }
 0x88e   : > { %v5965_v59 = vmul.f32 %v5964_v12, %v13653_v44  ;;  %v6079_v30 = vmul.f32 %v6078_v22, %v13795_v55  ;;  %v6237_v54 = vmul.f32 3.8918573e-05, %v13848_v1  ;;  %v4612_v3 = vadd.f32 %v4611_v19, %v13113_v57 }
 0x88f   : > { %v7673_v39 = vadd.f32 1.0, %v9637_v43  ;;  %v5661_v13 = vmul.f32 %v5660_v38, %v13774_v4  ;;  %v5753_v29 = vadd.f32 0.18741608, %v5752_v0  ;;  %v5947_v63 = vadd.f32 0.00028619796, %v5946_v48  ;;  %4801 = vmatmul.bf16.gmra.mxu0 %v17661_v2  ;;  %v17663_v38 = vld [vmem:[#allocation55_spill] sm:$0xff]  ;;  %v4660_v0 = vpop.f32.mrf.mxu1 }
 0x890   : > { %10562 = vrcp.f32 %v13854_v41  ;;  %v5912_v46 = vmul.f32 %v5911_v8, %v13644_v62  ;;  %v13873_v32 = vadd.f32 1.0, %v5925_v7  ;;  %v13877_v12 = vmul.f32 %v13168_v14, %v13857_v50 }
 0x891   : > { %v7676_v22 = vadd.f32 1.0, %v9640_v31  ;;  %v5769_v43 = vsub.f32 1.0, %v5768_v23  ;;  %v5793_v19 = vadd.f32 0.18741608, %v5792_v15  ;;  %v6118_v4 = vadd.f32 0.001143296, %v6117_v53  ;;  %4850 = vmatmul.bf16.gmra.mxu1 %v17663_v38  ;;  %4899 = vmatmul.bf16.gmra.mxu2 %v17661_v2  ;;  %v13891_v23 = vpop.f32.mrf.mxu2 }
 0x892   : > { %17662 = vst [vmem:[#allocation78_spill] sm:$0xff] %v13877_v12  ;;  %v13881_v48 = vadd.f32 1.0, %v5965_v59  ;;  %v6080_v36 = vadd.f32 0.014752088, %v6079_v30  ;;  %v6238_v20 = vadd.f32 0.001143296, %v6237_v54  ;;  %v13883_v8 = vadd.f32 %v4660_v0, %v4612_v3 }
 0x893   : > { %v9641_v7 = vclamps-f32 %v5661_v13, 1.0  ;;  %v5754_v61 = vmul.f32 %v5753_v29, %v13567_v35  ;;  %v13887_v5 = vmul.f32 0.5, %v13586_v11  ;;  %v5948_v31 = vmul.f32 %v5947_v63, %v13653_v44  ;;  %4948 = vmatmul.bf16.gmra.mxu3 %v17663_v38 }
 0x894   : > { %v13894_v15 = vmul.f32 %v7673_v39, %v13673_v6  ;;  %v5913_v53 = vadd.f32 0.18741608, %v5912_v46  ;;  %10564 = vrcp.f32 %v13873_v32  ;;  %v6264_v59 = vmul.f32 %v13877_v12, %v13877_v12 }
 0x895   : > { %17664 = vst [vmem:[#allocation58_spill] sm:$0xff] %v13887_v5  ;;  %v13900_v35 = vmul.f32 %v7676_v22, %v13678_v28  ;;  %v5770_v11 = vmul.f32 %v13843_v47, %v5769_v43  ;;  %v5794_v30 = vmul.f32 %v5793_v19, %v13627_v45  ;;  %v6119_v54 = vmul.f32 %v6118_v4, %v13839_v26 }
 0x896   : > { %17665 = vst [vmem:[#allocation73_spill] sm:$0xff] %v13894_v15  ;;  %v13905_v3 = vpop.eup %10562  ;;  %10566 = vrcp.f32 %v13881_v48  ;;  %v6066_v6 = vmul.f32 2.1237322e-06, %v13795_v55  ;;  %v6081_v39 = vmul.f32 %v6080_v36, %v13795_v55  ;;  %v6239_v13 = vmul.f32 %v6238_v20, %v13848_v1 }
 0x897   : > { %17666 = vst [vmem:[#allocation67_spill] sm:$0xff] %v13900_v35  ;;  %v13911_v29 = vadd.f32 1.0, %v9641_v7  ;;  %v5755_v28 = vadd.f32 1.1283791, %v5754_v61  ;;  %v13914_v63 = vmul.f32 0.5, %v13595_v33  ;;  %v5778_v46 = vand.u32 2147483648, %v13769_v27  ;;  %v13924_v61 = vpop.f32.mrf.mxu3 }
 0x898   : > { %v5949_v2 = vadd.f32 0.0036580483, %v5948_v31  ;;  %v5776_v45 = vand.u32 2147483647, %v13769_v27  ;;  %v5914_v22 = vmul.f32 %v5913_v53, %v13644_v62  ;;  %v13919_v43 = vmin.f32 %v6264_v59, 16.0 }
 0x899   : > { %17667 = vst [vmem:[#allocation77_spill] sm:$0xff] %v13914_v63  ;;  %vm5773_vm2 = vweird.f32 %v13843_v47  ;;  %v5795_v36 = vadd.f32 1.1283791, %v5794_v30  ;;  %v5808_v20 = vmul.f32 %v13905_v3, %v13854_v41  ;;  %v6120_v19 = vadd.f32 0.014752088, %v6119_v54 }
 0x89a   : > { %v13926_v33 = vpop.eup %10564  ;;  %v5771_v4 = vadd.f32 %v13843_v47, %v5770_v11  ;;  %v6067_v38 = vadd.f32 0.00028619796, %v6066_v6  ;;  %v6082_v0 = vadd.f32 0.112945676, %v6081_v39  ;;  %v6240_v7 = vadd.f32 0.014752088, %v6239_v13 }
 0x89b   : > { %v5756_v62 = vmul.f32 %v5755_v28, %v13523_v24  ;;  %vm5772_vm3 = vweird.f32 %v13769_v27  ;;  %v5818_v31 = vand.u32 2147483648, %v13854_v41  ;;  %v5950_v53 = vmul.f32 %v5949_v2, %v13653_v44  ;;  %v4709_v28 = vpop.f32.mrf.mxu2  ;;  %v17673_v24 = vld [vmem:[#allocation56_spill] sm:$0xff] }
 0x89c   : > { %v13933_v59 = vpop.eup %10566  ;;  %vm13935_vm4 = vcmp.eq.f32.partialorder %v5776_v45, 8.507059e+37  ;;  %v5779_v54 = vor.u32 1.1754944e-38, %v5778_v46  ;;  %v5915_v15 = vadd.f32 1.1283791, %v5914_v22  ;;  %v6277_v11 = vmul.f32 3.8918573e-05, %v13919_v43  ;;  %vm13942_vm5 = vmor %vm5772_vm3, %vm5773_vm2 }
 0x89d   : > { %v13947_v27 = vmul.f32 %v5795_v36, %v13583_v37  ;;  %v5809_v6 = vsub.f32 1.0, %v5808_v20  ;;  %v5928_v39 = vmul.f32 %v13926_v33, %v13873_v32  ;;  %v6121_v13 = vmul.f32 %v6120_v19, %v13839_v26  ;;  %v17672_v19 = vld [vmem:[#allocation57_spill] sm:$0xff] }
 0x89e   : > { %v5775_v2 = vsel %vm13942_vm5, %v13843_v47, %v5771_v4  ;;  %v6068_v45 = vmul.f32 %v6067_v38, %v13795_v55  ;;  %v6083_v46 = vmul.f32 %v6082_v0, %v13795_v55  ;;  %v6241_v22 = vmul.f32 %v6240_v7, %v13848_v1 }
 0x89f   : > { %v5816_v37 = vand.u32 2147483647, %v13854_v41  ;;  %v13959_v36 = vor.u32 1.1754944e-38, %v5818_v31  ;;  %v5951_v20 = vadd.f32 0.05243302, %v5950_v53  ;;  %v5968_v35 = vmul.f32 %v13933_v59, %v13881_v48  ;;  %4806 = vmatmul.bf16.gmra.mxu0 %v17672_v19 }
 0x8a0   : > { %vm5812_vm6 = vweird.f32 %v13854_v41  ;;  %vm5813_vm7 = vweird.f32 %v13905_v3  ;;  %v13967_v47 = vmul.f32 %v5915_v15, %v13610_v52  ;;  %v6278_v4 = vadd.f32 0.001143296, %v6277_v11 }
 0x8a1   : > { %v4710_v38 = vadd.f32 %v4709_v28, %v13123_v40  ;;  %v5780_v0 = vsel %vm13935_vm4, %v5779_v54, %v5775_v2  ;;  %v5929_v7 = vsub.f32 1.0, %v5928_v39  ;;  %v6106_v31 = vmul.f32 2.1237322e-06, %v13839_v26  ;;  %4855 = vmatmul.bf16.gmra.mxu1 %v17673_v24  ;;  %4904 = vmatmul.bf16.gmra.mxu2 %v17672_v19  ;;  %v4758_v54 = vpop.f32.mrf.mxu3  ;;  %vm14012_vm11 = vmor %vm5812_vm6, %vm5813_vm7 }
 0x8a2   : > { %v6122_v53 = vadd.f32 0.112945676, %v6121_v13  ;;  %v5810_v12 = vmul.f32 %v13905_v3, %v5809_v6  ;;  %v6069_v63 = vadd.f32 0.0036580483, %v6068_v45  ;;  %v6084_v5 = vadd.f32 0.4994258, %v6083_v46 }
 0x8a3   : > { %v6242_v52 = vadd.f32 0.112945676, %v6241_v22  ;;  %v5936_v15 = vand.u32 2147483647, %v13873_v32  ;;  %v5952_v11 = vmul.f32 %v5951_v20, %v13653_v44  ;;  %v5969_v28 = vsub.f32 1.0, %v5968_v35  ;;  %4953 = vmatmul.bf16.gmra.mxu3 %v17673_v24 }
 0x8a4   : > { %v6226_v30 = vmul.f32 2.1237322e-06, %v13848_v1  ;;  %v5938_v39 = vand.u32 2147483648, %v13873_v32  ;;  %v6279_v13 = vmul.f32 %v6278_v4, %v13919_v43  ;;  %v13984_v6 = vmul.f32 %v13168_v14, %v13697_v16 }
 0x8a5   : > { %v13986_v2 = vadd.f32 %v4758_v54, %v4710_v38  ;;  %v5930_v45 = vmul.f32 %v13926_v33, %v5929_v7  ;;  %vm5932_vm8 = vweird.f32 %v13873_v32  ;;  %v6107_v35 = vadd.f32 0.00028619796, %v6106_v31 }
 0x8a6   : > { %v6123_v46 = vmul.f32 %v6122_v53, %v13839_v26  ;;  %v5811_v22 = vadd.f32 %v13905_v3, %v5810_v12  ;;  %vm13992_vm9 = vcmp.eq.f32.partialorder %v5816_v37, 8.507059e+37  ;;  %v6070_v19 = vmul.f32 %v6069_v63, %v13795_v55 }
 0x8a7   : > { %v6085_v4 = vmul.f32 %v6084_v5, %v13795_v55  ;;  %v6243_v38 = vmul.f32 %v6242_v52, %v13848_v1  ;;  %v13999_v24 = vmul.f32 %v5780_v0, %v5756_v62  ;;  %v5953_v7 = vadd.f32 0.18741608, %v5952_v11 }
 0x8a8   : > { %v5970_v54 = vmul.f32 %v13933_v59, %v5969_v28  ;;  %v6227_v31 = vadd.f32 0.00028619796, %v6226_v30  ;;  %vm14002_vm10 = vcmp.eq.f32.partialorder %v5936_v15, 8.507059e+37  ;;  %v5939_v12 = vor.u32 1.1754944e-38, %v5938_v39 }
 0x8a9   : > { %v6280_v37 = vadd.f32 0.014752088, %v6279_v13  ;;  %v6384_v16 = vmul.f32 %v13984_v6, %v13984_v6  ;;  %v5931_v63 = vadd.f32 %v13926_v33, %v5930_v45  ;;  %vm5933_vm12 = vweird.f32 %v13926_v33 }
 0x8aa   : > { %v6108_v62 = vmul.f32 %v6107_v35, %v13839_v26  ;;  %v6124_v0 = vadd.f32 0.4994258, %v6123_v46  ;;  %v5815_v52 = vsel %vm14012_vm11, %v13905_v3, %v5811_v22  ;;  %v6071_v15 = vadd.f32 0.05243302, %v6070_v19  ;;  %vm14030_vm14 = vmor %vm5932_vm8, %vm5933_vm12 }
 0x8ab   : > { %v14022_v11 = vadd.f32 1.0, %v6085_v4  ;;  %v6244_v28 = vadd.f32 0.4994258, %v6243_v38  ;;  %v5954_v41 = vmul.f32 %v5953_v7, %v13653_v44  ;;  %v5971_v30 = vadd.f32 %v13933_v59, %v5970_v54 }
 0x8ac   : > { %vm5973_vm13 = vweird.f32 %v13933_v59  ;;  %v6228_v39 = vmul.f32 %v6227_v31, %v13848_v1  ;;  %vm5972_vm15 = vweird.f32 %v13881_v48  ;;  %v5978_v3 = vand.u32 2147483648, %v13881_v48  ;;  %v17684_v31 = vld [vmem:[#allocation61_spill] sm:$0xff] }
 0x8ad   : > { %v6281_v45 = vmul.f32 %v6280_v37, %v13919_v43  ;;  %v14037_v35 = vmin.f32 %v6384_v16, 16.0  ;;  %v5935_v44 = vsel %vm14030_vm14, %v13926_v33, %v5931_v63  ;;  %v5976_v46 = vand.u32 2147483647, %v13881_v48  ;;  %vm14044_vm0 = vmor %vm5972_vm15, %vm5973_vm13 }
 0x8ae   : > { %v6109_v22 = vadd.f32 0.0036580483, %v6108_v62  ;;  %v6125_v32 = vmul.f32 %v6124_v0, %v13839_v26  ;;  %v6072_v4 = vmul.f32 %v6071_v15, %v13795_v55  ;;  %10568 = vrcp.f32 %v14022_v11  ;;  %v17685_v0 = vld [vmem:[#allocation24_spill] sm:$0xff] }
 0x8af   : > { %v6245_v16 = vmul.f32 %v6244_v28, %v13848_v1  ;;  %v4705_v38 = vadd.f32 %v13841_v25, %v13123_v40  ;;  %v5820_v48 = vsel %vm13992_vm9, %v13959_v36, %v5815_v52  ;;  %v5955_v33 = vadd.f32 1.1283791, %v5954_v41  ;;  %4811 = vmatmul.bf16.gmra.mxu0 %v17684_v31 }
 0x8b0   : > { %v5975_v7 = vsel %vm14044_vm0, %v13933_v59, %v5971_v30  ;;  %v6229_v54 = vadd.f32 0.0036580483, %v6228_v39  ;;  %v5979_v37 = vor.u32 1.1754944e-38, %v5978_v3  ;;  %v6282_v5 = vadd.f32 0.112945676, %v6281_v45 }
 0x8b1   : > { %v6397_v63 = vmul.f32 3.8918573e-05, %v14037_v35  ;;  %v4609_v62 = vadd.f32 %v13783_v17, %v13113_v57  ;;  %v5940_v25 = vsel %vm14002_vm10, %v5939_v12, %v5935_v44  ;;  %vm5977_vm1 = vcmp.eq.f32.partialorder %v5976_v46, 8.507059e+37  ;;  %4860 = vmatmul.bf16.gmra.mxu1 %v17685_v0  ;;  %4909 = vmatmul.bf16.gmra.mxu2 %v17684_v31 }
 0x8b2   : > { %v6110_v36 = vmul.f32 %v6109_v22, %v13839_v26  ;;  %v14066_v20 = vadd.f32 1.0, %v6125_v32  ;;  %v5980_v59 = vsel %vm5977_vm1, %v5979_v37, %v5975_v7  ;;  %v6073_v52 = vadd.f32 0.18741608, %v6072_v4 }
 0x8b3   : > { %v14070_v15 = vadd.f32 1.0, %v6245_v16  ;;  %v14073_v28 = vadd.f32 %v13869_v10, %v4705_v38  ;;  %v9644_v17 = vclamps-f32 %v13999_v24, 1.0  ;;  %v5821_v53 = vmul.f32 %v5820_v48, %v13947_v27  ;;  %4958 = vmatmul.bf16.gmra.mxu3 %v17685_v0  ;;  %v14088_v24 = vpop.f32.mrf.mxu0 }
 0x8b4   : > { %v5956_v12 = vmul.f32 %v5955_v33, %v13622_v9  ;;  %v6230_v41 = vmul.f32 %v6229_v54, %v13848_v1  ;;  %v14080_v30 = vpop.eup %10568  ;;  %v6283_v39 = vmul.f32 %v6282_v5, %v13919_v43  ;;  %v6398_v13 = vadd.f32 0.001143296, %v6397_v63  ;;  %v14119_v63 = vpop.f32.mrf.mxu1 }
 0x8b5   : > { %v14084_v3 = vadd.f32 %v13833_v56, %v4609_v62  ;;  %v4707_v10 = vadd.f32 %v13891_v23, %v13123_v40  ;;  %v5941_v27 = vmul.f32 %v5940_v25, %v13967_v47  ;;  %v6111_v45 = vadd.f32 0.05243302, %v6110_v36 }
 0x8b6   : > { %v5981_v9 = vmul.f32 %v5980_v59, %v5956_v12  ;;  %10570 = vrcp.f32 %v14066_v20  ;;  %v6074_v44 = vmul.f32 %v6073_v52, %v13795_v55  ;;  %v6266_v46 = vmul.f32 2.1237322e-06, %v13919_v43 }
 0x8b7   : > { %10572 = vrcp.f32 %v14070_v15  ;;  %v14097_v56 = vmul.f32 %v13168_v14, %v14073_v28  ;;  %v7680_v22 = vadd.f32 1.0, %v9644_v17  ;;  %v9645_v23 = vclamps-f32 %v5821_v53, 1.0 }
 0x8b8   : > { %v6088_v32 = vmul.f32 %v14080_v30, %v14022_v11  ;;  %v6231_v47 = vadd.f32 0.05243302, %v6230_v41  ;;  %v6284_v19 = vadd.f32 0.4994258, %v6283_v39  ;;  %v6399_v4 = vmul.f32 %v6398_v13, %v14037_v35 }
 0x8b9   : > { %v14104_v55 = vmul.f32 %v13168_v14, %v14084_v3  ;;  %v14107_v16 = vadd.f32 %v13924_v61, %v4707_v10  ;;  %v14111_v38 = vmul.f32 %v13911_v29, %v13686_v21  ;;  %v9648_v48 = vclamps-f32 %v5941_v27, 1.0 }
 0x8ba   : > { %v14114_v33 = vmul.f32 0.5, %v17646_v34  ;;  %v6112_v7 = vmul.f32 %v6111_v45, %v13839_v26  ;;  %v9649_v54 = vclamps-f32 %v5981_v9, 1.0  ;;  %v6075_v31 = vadd.f32 1.1283791, %v6074_v44  ;;  %v9750_v9 = vld [vmem:[#allocation16 + $0x70] sm:$0xf] }
 0x8bb   : > { %17686 = vst [vmem:[#allocation53_spill] sm:$0xff] %v14111_v38  ;;  %v6267_v37 = vadd.f32 0.00028619796, %v6266_v46  ;;  %v6424_v5 = vmul.f32 %v14097_v56, %v14097_v56  ;;  %v14124_v62 = vmul.f32 %v7680_v22, %v13745_v18  ;;  %v14126_v21 = vadd.f32 1.0, %v9645_v23  ;;  %v4616_v27 = vpop.f32.mrf.mxu0  ;;  %v10161_v45 = vld [vmem:[#allocation16 + $0x74] sm:$0xf0] }
 0x8bc   : > { %v14121_v61 = vpop.eup %10570  ;;  %v6089_v29 = vsub.f32 1.0, %v6088_v32  ;;  %v6232_v34 = vmul.f32 %v6231_v47, %v13848_v1  ;;  %v6285_v36 = vmul.f32 %v6284_v19, %v13919_v43  ;;  %v6400_v0 = vadd.f32 0.014752088, %v6399_v4  ;;  %v17688_v22 = vld [vmem:[#allocation74_spill] sm:$0xff] }
 0x8bd   : > { %17687 = vst [vmem:[#allocation72_spill] sm:$0xff] %v14124_v62  ;;  %v14129_v25 = vpop.eup %10572  ;;  %v6544_v59 = vmul.f32 %v14104_v55, %v14104_v55  ;;  %v14136_v52 = vmul.f32 %v13168_v14, %v14107_v16  ;;  %v14138_v17 = vadd.f32 1.0, %v9648_v48  ;;  %v14141_v18 = vmul.f32 0.5, %v13466_v49 }
 0x8be   : > { %v6113_v53 = vadd.f32 0.18741608, %v6112_v7  ;;  %v14144_v12 = vmul.f32 0.5, %v13761_v51  ;;  %v14146_v41 = vadd.f32 1.0, %v9649_v54  ;;  %v14149_v39 = vmul.f32 %v6075_v31, %v13731_v60  ;;  %v17689_v54 = vld [vmem:[#allocation76_spill] sm:$0xff] }
 0x8bf   : > { %v6268_v13 = vmul.f32 %v6267_v37, %v13919_v43  ;;  %v14152_v10 = vmin.f32 %v6424_v5, 16.0  ;;  %v6090_v44 = vmul.f32 %v14080_v30, %v6089_v29  ;;  %v6128_v49 = vmul.f32 %v14121_v61, %v14066_v20  ;;  %4816 = vmatmul.bf16.gmra.mxu0 %v17688_v22 }
 0x8c0   : > { %v6233_v46 = vadd.f32 0.18741608, %v6232_v34  ;;  %v6248_v51 = vmul.f32 %v14129_v25, %v14070_v15  ;;  %v14160_v60 = vadd.f32 1.0, %v6285_v36  ;;  %v6401_v23 = vmul.f32 %v6400_v0, %v14037_v35  ;;  %v14177_v0 = vpop.f32.mrf.mxu2 }
 0x8c1   : > { %v14163_v32 = vmin.f32 %v6544_v59, 16.0  ;;  %v6584_v47 = vmul.f32 %v14136_v52, %v14136_v52  ;;  %v6096_v19 = vand.u32 2147483647, %v14022_v11  ;;  %v6114_v4 = vmul.f32 %v6113_v53, %v13839_v26  ;;  %4865 = vmatmul.bf16.gmra.mxu1 %v17689_v54  ;;  %4914 = vmatmul.bf16.gmra.mxu2 %v17688_v22 }
 0x8c2   : > { %v4617_v48 = vadd.f32 %v4616_v27, %v13113_v57  ;;  %v9751_v7 = vor.u32 %v10161_v45, %v9750_v9  ;;  %vm6093_vm2 = vweird.f32 %v14080_v30  ;;  %v6098_v31 = vand.u32 2147483648, %v14022_v11 }
 0x8c3   : > { %v6269_v37 = vadd.f32 0.0036580483, %v6268_v13  ;;  %v6437_v5 = vmul.f32 3.8918573e-05, %v14152_v10  ;;  %v6091_v29 = vadd.f32 %v14080_v30, %v6090_v44  ;;  %v6129_v34 = vsub.f32 1.0, %v6128_v49  ;;  %4963 = vmatmul.bf16.gmra.mxu3 %v17689_v54  ;;  %v4665_v13 = vpop.f32.mrf.mxu1 }
 0x8c4   : > { %v6234_v36 = vmul.f32 %v6233_v46, %v13848_v1  ;;  %v6249_v26 = vsub.f32 1.0, %v6248_v51  ;;  %8214 = vmatpush.bf16.msrb.mxu0 %v9751_v7  ;;  %10574 = vrcp.f32 %v14160_v60  ;;  %v6402_v59 = vadd.f32 0.112945676, %v6401_v23 }
 0x8c5   : > { %v6557_v53 = vmul.f32 3.8918573e-05, %v14163_v32  ;;  %v14182_v27 = vmin.f32 %v6584_v47, 16.0  ;;  %vm6092_vm3 = vweird.f32 %v14022_v11  ;;  %vm14185_vm4 = vcmp.eq.f32.partialorder %v6096_v19, 8.507059e+37 }
 0x8c6   : > { %v6115_v1 = vadd.f32 1.1283791, %v6114_v4  ;;  %v14189_v45 = vadd.f32 %v4665_v13, %v4617_v48  ;;  %v6099_v44 = vor.u32 1.1754944e-38, %v6098_v31  ;;  %v14192_v49 = vmul.f32 0.5, %v13857_v50  ;;  %vm14197_vm5 = vmor %vm6092_vm3, %vm6093_vm2 }
 0x8c7   : > { %v6270_v46 = vmul.f32 %v6269_v37, %v13919_v43  ;;  %v6438_v51 = vadd.f32 0.001143296, %v6437_v5  ;;  %v6130_v11 = vmul.f32 %v14121_v61, %v6129_v34  ;;  %v6136_v23 = vand.u32 2147483647, %v14066_v20  ;;  %v14215_v37 = vpop.f32.mrf.mxu3  ;;  %v9814_v5 = vld [vmem:[#allocation16 + $0xf0] sm:$0xf] }
 0x8c8   : > { %v6235_v47 = vadd.f32 1.1283791, %v6234_v36  ;;  %v6250_v19 = vmul.f32 %v14129_v25, %v6249_v26  ;;  %v6095_v50 = vsel %vm14197_vm5, %v14080_v30, %v6091_v29  ;;  %v6403_v4 = vmul.f32 %v6402_v59, %v14037_v35  ;;  %v10177_v34 = vld [vmem:[#allocation16 + $0xf4] sm:$0xf0] }
 0x8c9   : > { %v6558_v48 = vadd.f32 0.001143296, %v6557_v53  ;;  %v6597_v7 = vmul.f32 3.8918573e-05, %v14182_v27  ;;  %v14210_v54 = vmul.f32 %v6115_v1, %v13779_v42  ;;  %vm6132_vm6 = vweird.f32 %v14066_v20 }
 0x8ca   : > { %v6138_v31 = vand.u32 2147483648, %v14066_v20  ;;  %vm6252_vm7 = vweird.f32 %v14070_v15  ;;  %v14217_v36 = vpop.eup %10574  ;;  %vm6133_vm8 = vweird.f32 %v14121_v61  ;;  %v6256_v30 = vand.u32 2147483647, %v14070_v15 }
 0x8cb   : > { %v6271_v29 = vadd.f32 0.05243302, %v6270_v46  ;;  %v6439_v42 = vmul.f32 %v6438_v51, %v14152_v10  ;;  %v6100_v26 = vsel %vm14185_vm4, %v6099_v44, %v6095_v50  ;;  %v6131_v59 = vadd.f32 %v14121_v61, %v6130_v11  ;;  %vm14230_vm10 = vmor %vm6132_vm6, %vm6133_vm8 }
 0x8cc   : > { %v6251_v53 = vadd.f32 %v14129_v25, %v6250_v19  ;;  %vm6253_vm9 = vweird.f32 %v14129_v25  ;;  %v6404_v13 = vadd.f32 0.4994258, %v6403_v4  ;;  %v6559_v1 = vmul.f32 %v6558_v48, %v14163_v32  ;;  %v4714_v19 = vpop.f32.mrf.mxu2 }
 0x8cd   : > { %v6598_v22 = vadd.f32 0.001143296, %v6597_v7  ;;  %v9815_v62 = vor.u32 %v10177_v34, %v9814_v5  ;;  %v6258_v9 = vand.u32 2147483648, %v14070_v15  ;;  %v6288_v44 = vmul.f32 %v14217_v36, %v14160_v60  ;;  %vm14245_vm12 = vmor %vm6252_vm7, %vm6253_vm9 }
 0x8ce   : > { %v6386_v51 = vmul.f32 2.1237322e-06, %v14037_v35  ;;  %v6426_v11 = vmul.f32 2.1237322e-06, %v14152_v10  ;;  %vm14239_vm11 = vcmp.eq.f32.partialorder %v6136_v23, 8.507059e+37  ;;  %v6139_v4 = vor.u32 1.1754944e-38, %v6138_v31 }
 0x8cf   : > { %v6272_v48 = vmul.f32 %v6271_v29, %v13919_v43  ;;  %v6440_v7 = vadd.f32 0.014752088, %v6439_v42  ;;  %8263 = vmatpush.bf16.msrb.mxu1 %v9815_v62  ;;  %v6101_v5 = vmul.f32 %v6100_v26, %v14149_v39  ;;  %v6135_v23 = vsel %vm14230_vm10, %v14121_v61, %v6131_v59 }
 0x8d0   : > { %v6255_v31 = vsel %vm14245_vm12, %v14129_v25, %v6251_v53  ;;  %vm14257_vm13 = vcmp.eq.f32.partialorder %v6256_v30, 8.507059e+37  ;;  %v6405_v34 = vmul.f32 %v6404_v13, %v14037_v35  ;;  %v6560_v38 = vadd.f32 0.014752088, %v6559_v1  ;;  %v9742_v53 = vld [vmem:[#allocation16 + $0x60] sm:$0xf] }
 0x8d1   : > { %v6599_v29 = vmul.f32 %v6598_v22, %v14182_v27  ;;  %v4715_v62 = vadd.f32 %v4714_v19, %v13123_v40  ;;  %v6259_v39 = vor.u32 1.1754944e-38, %v6258_v9  ;;  %v6289_v42 = vsub.f32 1.0, %v6288_v44  ;;  %v10159_v13 = vld [vmem:[#allocation16 + $0x64] sm:$0xf0] }
 0x8d2   : > { %v6387_v26 = vadd.f32 0.00028619796, %v6386_v51  ;;  %v6427_v46 = vadd.f32 0.00028619796, %v6426_v11  ;;  %v6236_v61 = vmul.f32 %v6235_v47, %v13799_v58  ;;  %v6273_v59 = vadd.f32 0.18741608, %v6272_v48  ;;  %v4763_v51 = vpop.f32.mrf.mxu3 }
 0x8d3   : > { %v6441_v25 = vmul.f32 %v6440_v7, %v14152_v10  ;;  %v14268_v30 = vmul.f32 %v13168_v14, %v13883_v8  ;;  %v9652_v1 = vclamps-f32 %v6101_v5, 1.0  ;;  %v6140_v22 = vsel %vm14239_vm11, %v6139_v4, %v6135_v23 }
 0x8d4   : > { %v6260_v9 = vsel %vm14257_vm13, %v6259_v39, %v6255_v31  ;;  %v6546_v44 = vmul.f32 2.1237322e-06, %v14163_v32  ;;  %v14275_v58 = vadd.f32 1.0, %v6405_v34  ;;  %v6561_v47 = vmul.f32 %v6560_v38, %v14163_v32 }
 0x8d5   : > { %v6600_v11 = vadd.f32 0.014752088, %v6599_v29  ;;  %v14278_v19 = vadd.f32 %v4763_v51, %v4715_v62  ;;  %v6290_v20 = vmul.f32 %v14217_v36, %v6289_v42  ;;  %v6388_v48 = vmul.f32 %v6387_v26, %v14037_v35  ;;  %v17702_v62 = vld [vmem:[#allocation59_spill] sm:$0xff]  ;;  %v9806_v42 = vld [vmem:[#allocation16 + $0xe0] sm:$0xf] }
 0x8d6   : > { %v6428_v50 = vmul.f32 %v6427_v46, %v14152_v10  ;;  %v9743_v4 = vor.u32 %v10159_v13, %v9742_v53  ;;  %v14284_v7 = vmul.f32 %v6140_v22, %v14210_v54  ;;  %v6274_v5 = vmul.f32 %v6273_v59, %v13919_v43  ;;  %v10175_v26 = vld [vmem:[#allocation16 + $0xe4] sm:$0xf0] }
 0x8d7   : > { %v6442_v23 = vadd.f32 0.112945676, %v6441_v25  ;;  %v6704_v31 = vmul.f32 %v14268_v30, %v14268_v30  ;;  %v7688_v38 = vadd.f32 1.0, %v9652_v1  ;;  %v14289_v15 = vmul.f32 %v6260_v9, %v6236_v61 }
 0x8d8   : > { %v6298_v34 = vand.u32 2147483648, %v14160_v60  ;;  %v6547_v29 = vadd.f32 0.00028619796, %v6546_v44  ;;  %8215 = vmatpush.bf16.msrb.mxu0 %v9743_v4  ;;  %v14294_v39 = vmul.f32 %v14126_v21, %v17702_v62  ;;  %10576 = vrcp.f32 %v14275_v58 }
 0x8d9   : > { %v6562_v54 = vadd.f32 0.112945676, %v6561_v47  ;;  %v6601_v43 = vmul.f32 %v6600_v11, %v14182_v27  ;;  %v6291_v46 = vadd.f32 %v14217_v36, %v6290_v20  ;;  %vm6293_vm14 = vweird.f32 %v14217_v36 }
 0x8da   : > { %17703 = vst [vmem:[#allocation75_spill] sm:$0xff] %v14294_v39  ;;  %v6389_v61 = vadd.f32 0.0036580483, %v6388_v48  ;;  %v6429_v59 = vadd.f32 0.0036580483, %v6428_v50  ;;  %v9653_v25 = vclamps-f32 %v14284_v7, 1.0  ;;  %v6443_v13 = vmul.f32 %v6442_v23, %v14152_v10  ;;  %v14313_v48 = vpop.f32.mrf.mxu0  ;;  %v14343_v39 = vpop.f32.mrf.mxu1 }
 0x8db   : > { %v6275_v53 = vadd.f32 1.1283791, %v6274_v5  ;;  %v14302_v21 = vmin.f32 %v6704_v31, 16.0  ;;  %v9656_v1 = vclamps-f32 %v14289_v15, 1.0  ;;  %vm6292_vm15 = vweird.f32 %v14160_v60 }
 0x8dc   : > { %v6296_v22 = vand.u32 2147483647, %v14160_v60  ;;  %v9807_v9 = vor.u32 %v10175_v26, %v9806_v42  ;;  %vm14307_vm0 = vmor %vm6292_vm15, %vm6293_vm14  ;;  %v6299_v51 = vor.u32 1.1754944e-38, %v6298_v34  ;;  %v6548_v47 = vmul.f32 %v6547_v29, %v14163_v32  ;;  %v17706_v29 = vld [vmem:[#allocation58_spill] sm:$0xff] }
 0x8dd   : > { %v6563_v11 = vmul.f32 %v6562_v54, %v14163_v32  ;;  %v6602_v20 = vadd.f32 0.112945676, %v6601_v43  ;;  %v6295_v50 = vsel %vm14307_vm0, %v14217_v36, %v6291_v46  ;;  %v6390_v4 = vmul.f32 %v6389_v61, %v14037_v35  ;;  %v9734_v36 = vld [vmem:[#allocation16 + $0x50] sm:$0xf]  ;;  %v17708_v54 = vld [vmem:[#allocation77_spill] sm:$0xff] }
 0x8de   : > { %v6430_v60 = vmul.f32 %v6429_v59, %v14152_v10  ;;  %v6586_v7 = vmul.f32 2.1237322e-06, %v14182_v27  ;;  %8264 = vmatpush.bf16.msrb.mxu1 %v9807_v9  ;;  %v14321_v5 = vpop.eup %10576  ;;  %v6444_v23 = vadd.f32 0.4994258, %v6443_v13  ;;  %v6717_v31 = vmul.f32 3.8918573e-05, %v14302_v21 }
 0x8df   : > { %v14326_v15 = vmul.f32 %v13168_v14, %v13986_v2  ;;  %v4614_v34 = vadd.f32 %v14088_v24, %v13113_v57  ;;  %v14332_v62 = vmul.f32 %v14138_v17, %v17706_v29  ;;  %v14336_v43 = vmul.f32 %v14146_v41, %v17708_v54  ;;  %v17711_v26 = vld [vmem:[#allocation78_spill] sm:$0xff]  ;;  %v10157_v61 = vld [vmem:[#allocation16 + $0x54] sm:$0xf0] }
 0x8e0   : > { %v14339_v42 = vmul.f32 %v7688_v38, %v14114_v33  ;;  %v6276_v46 = vmul.f32 %v6275_v53, %v17711_v26  ;;  %v9798_v59 = vld [vmem:[#allocation16 + $0xd0] sm:$0xf]  ;;  %v10173_v13 = vld [vmem:[#allocation16 + $0xd4] sm:$0xf0]  ;;  %vm6297_vm1 = vcmp.eq.f32.partialorder %v6296_v22, 8.507059e+37  ;;  %v6603_v44 = vmul.f32 %v6602_v20, %v14182_v27 }
 0x8e1   : > { %17707 = vst [vmem:[#allocation79_spill] sm:$0xff] %v14332_v62  ;;  %v6549_v9 = vadd.f32 0.0036580483, %v6548_v47  ;;  %v6564_v24 = vadd.f32 0.4994258, %v6563_v11  ;;  %v6300_v17 = vsel %vm6297_vm1, %v6299_v51, %v6295_v50  ;;  %v6408_v41 = vmul.f32 %v14321_v5, %v14275_v58 }
 0x8e2   : > { %17709 = vst [vmem:[#allocation52_spill] sm:$0xff] %v14336_v43  ;;  %v6391_v29 = vadd.f32 0.05243302, %v6390_v4  ;;  %v6431_v54 = vadd.f32 0.05243302, %v6430_v60  ;;  %v6744_v33 = vmul.f32 %v14326_v15, %v14326_v15  ;;  %v14350_v38 = vadd.f32 %v14119_v63, %v4614_v34 }
 0x8e3   : > { %17710 = vst [vmem:[#allocation80_spill] sm:$0xff] %v14339_v42  ;;  %v9735_v53 = vor.u32 %v10157_v61, %v9734_v36  ;;  %v9799_v22 = vor.u32 %v10173_v13, %v9798_v59  ;;  %v7689_v47 = vadd.f32 1.0, %v9653_v25  ;;  %v6445_v11 = vmul.f32 %v6444_v23, %v14152_v10  ;;  %v17712_v42 = vld [vmem:[#allocation54_spill] sm:$0xff] }
 0x8e4   : > { %v6587_v20 = vadd.f32 0.00028619796, %v6586_v7  ;;  %v6718_v26 = vadd.f32 0.001143296, %v6717_v31  ;;  %v14354_v51 = vmul.f32 0.5, %v17712_v42  ;;  %v6550_v50 = vmul.f32 %v6549_v9, %v14163_v32  ;;  %v4621_v42 = vpop.f32.mrf.mxu0 }
 0x8e5   : > { %v6565_v4 = vmul.f32 %v6564_v24, %v14163_v32  ;;  %v6604_v60 = vadd.f32 0.4994258, %v6603_v44  ;;  %8216 = vmatpush.bf16.msrb.mxu0 %v9735_v53  ;;  %8265 = vmatpush.bf16.msrb.mxu1 %v9799_v22  ;;  %v14358_v43 = vadd.f32 1.0, %v9656_v1  ;;  %v6301_v63 = vmul.f32 %v6300_v17, %v6276_v46  ;;  %v4670_v53 = vpop.f32.mrf.mxu1 }
 0x8e6   : > { %v6392_v34 = vmul.f32 %v6391_v29, %v14037_v35  ;;  %v6409_v25 = vsub.f32 1.0, %v6408_v41  ;;  %v6432_v23 = vmul.f32 %v6431_v54, %v14152_v10  ;;  %v14362_v7 = vmin.f32 %v6744_v33, 16.0 }
 0x8e7   : > { %v14366_v31 = vmul.f32 %v13168_v14, %v14350_v38  ;;  %v4712_v36 = vadd.f32 %v14177_v0, %v13123_v40  ;;  %v14371_v61 = vmul.f32 %v7689_v47, %v14141_v18  ;;  %v14373_v1 = vadd.f32 1.0, %v6445_v11 }
 0x8e8   : > { %v6588_v46 = vmul.f32 %v6587_v20, %v14182_v27  ;;  %v6719_v59 = vmul.f32 %v6718_v26, %v14302_v21  ;;  %v14378_v13 = vmul.f32 0.5, %v14073_v28  ;;  %v6551_v9 = vadd.f32 0.05243302, %v6550_v50 }
 0x8e9   : > { %17713 = vst [vmem:[#allocation68_spill] sm:$0xff] %v14366_v31  ;;  %v14380_v24 = vadd.f32 1.0, %v6565_v4  ;;  %v6605_v44 = vmul.f32 %v6604_v60, %v14182_v27  ;;  %v9657_v17 = vclamps-f32 %v6301_v63, 1.0  ;;  %v6393_v0 = vadd.f32 0.18741608, %v6392_v34 }
 0x8ea   : > { %17714 = vst [vmem:[#allocation65_spill] sm:$0xff] %v14371_v61  ;;  %v6410_v29 = vmul.f32 %v14321_v5, %v6409_v25  ;;  %v4622_v18 = vadd.f32 %v4621_v42, %v13113_v57  ;;  %v6433_v41 = vadd.f32 0.18741608, %v6432_v23  ;;  %v6757_v54 = vmul.f32 3.8918573e-05, %v14362_v7 }
 0x8eb   : > { %v6864_v33 = vmul.f32 %v14366_v31, %v14366_v31  ;;  %v14389_v28 = vadd.f32 %v14215_v37, %v4712_v36  ;;  %10578 = vrcp.f32 %v14373_v1  ;;  %v6589_v22 = vadd.f32 0.0036580483, %v6588_v46  ;;  %v9718_v61 = vld [vmem:[#allocation16 + $0x30] sm:$0xf] }
 0x8ec   : > { %v6720_v47 = vadd.f32 0.014752088, %v6719_v59  ;;  %v14392_v11 = vadd.f32 %v4670_v53, %v4622_v18  ;;  %v6552_v20 = vmul.f32 %v6551_v9, %v14163_v32  ;;  %10580 = vrcp.f32 %v14380_v24 }
 0x8ed   : > { %v14396_v26 = vadd.f32 1.0, %v6605_v44  ;;  %v6706_v50 = vmul.f32 2.1237322e-06, %v14302_v21  ;;  %v6394_v4 = vmul.f32 %v6393_v0, %v14037_v35  ;;  %v6411_v37 = vadd.f32 %v14321_v5, %v6410_v29 }
 0x8ee   : > { %17715 = vst [vmem:[#allocation55_spill] sm:$0xff] %v14392_v11  ;;  %vm6413_vm2 = vweird.f32 %v14321_v5  ;;  %v6418_v60 = vand.u32 2147483648, %v14275_v58  ;;  %v6434_v63 = vmul.f32 %v6433_v41, %v14152_v10  ;;  %v6758_v34 = vadd.f32 0.001143296, %v6757_v54 }
 0x8ef   : > { %v14404_v25 = vmin.f32 %v6864_v33, 16.0  ;;  %v14408_v23 = vmul.f32 %v13168_v14, %v14389_v28  ;;  %vm6412_vm3 = vweird.f32 %v14275_v58  ;;  %v6416_v36 = vand.u32 2147483647, %v14275_v58 }
 0x8f0   : > { %v6590_v35 = vmul.f32 %v6589_v22, %v14182_v27  ;;  %v6721_v42 = vmul.f32 %v6720_v47, %v14302_v21  ;;  %vm14414_vm4 = vmor %vm6412_vm3, %vm6413_vm2  ;;  %v14419_v10 = vmul.f32 0.5, %v14084_v3  ;;  %v6553_v59 = vadd.f32 0.18741608, %v6552_v20  ;;  %v14436_v22 = vpop.f32.mrf.mxu2 }
 0x8f1   : > { %17716 = vst [vmem:[#allocation57_spill] sm:$0xff] %v14408_v23  ;;  %10582 = vrcp.f32 %v14396_v26  ;;  %v6707_v9 = vadd.f32 0.00028619796, %v6706_v50  ;;  %v14422_v44 = vpop.eup %10578  ;;  %v6395_v0 = vadd.f32 1.1283791, %v6394_v4  ;;  %v6415_v58 = vsel %vm14414_vm4, %v14321_v5, %v6411_v37 }
 0x8f2   : > { %v6419_v29 = vor.u32 1.1754944e-38, %v6418_v60  ;;  %v14428_v18 = vmul.f32 0.5, %v14107_v16  ;;  %v14430_v41 = vpop.eup %10580  ;;  %v6435_v54 = vadd.f32 1.1283791, %v6434_v63  ;;  %v6759_v3 = vmul.f32 %v6758_v34, %v14362_v7  ;;  %v9726_v60 = vld [vmem:[#allocation16 + $0x40] sm:$0xf] }
 0x8f3   : > { %v6877_v33 = vmul.f32 3.8918573e-05, %v14404_v25  ;;  %v6904_v53 = vmul.f32 %v14408_v23, %v14408_v23  ;;  %v14438_v47 = vadd.f32 1.0, %v9657_v17  ;;  %vm6417_vm5 = vcmp.eq.f32.partialorder %v6416_v36, 8.507059e+37 }
 0x8f4   : > { %v6591_v5 = vadd.f32 0.05243302, %v6590_v35  ;;  %v6722_v20 = vadd.f32 0.112945676, %v6721_v42  ;;  %v6420_v50 = vsel %vm6417_vm5, %v6419_v29, %v6415_v58  ;;  %v6554_v16 = vmul.f32 %v6553_v59, %v14163_v32  ;;  %v10155_v35 = vld [vmem:[#allocation16 + $0x44] sm:$0xf0]  ;;  %v14466_v29 = vpop.f32.mrf.mxu3 }
 0x8f5   : > { %v14442_v4 = vmul.f32 0.5, %v13883_v8  ;;  %v6708_v37 = vmul.f32 %v6707_v9, %v14302_v21  ;;  %v14447_v63 = vmul.f32 %v14358_v43, %v14144_v12  ;;  %v6396_v34 = vmul.f32 %v6395_v0, %v13984_v6  ;;  %v9790_v32 = vld [vmem:[#allocation16 + $0xc0] sm:$0xf]  ;;  %v10171_v42 = vld [vmem:[#allocation16 + $0xc4] sm:$0xf0] }
 0x8f6   : > { %v6448_v17 = vmul.f32 %v14422_v44, %v14373_v1  ;;  %v6568_v36 = vmul.f32 %v14430_v41, %v14380_v24  ;;  %v14457_v46 = vmul.f32 %v6435_v54, %v14097_v56  ;;  %v6760_v59 = vadd.f32 0.014752088, %v6759_v3 }
 0x8f7   : > { %17719 = vst [vmem:[#allocation56_spill] sm:$0xff] %v14442_v4  ;;  %v14454_v8 = vpop.eup %10582  ;;  %v6878_v9 = vadd.f32 0.001143296, %v6877_v33  ;;  %v14459_v12 = vmin.f32 %v6904_v53, 16.0  ;;  %v14461_v43 = vmul.f32 %v6420_v50, %v6396_v34  ;;  %v6458_v6 = vand.u32 2147483648, %v14373_v1 }
 0x8f8   : > { %17720 = vst [vmem:[#allocation61_spill] sm:$0xff] %v14447_v63  ;;  %v6592_v0 = vmul.f32 %v6591_v5, %v14182_v27  ;;  %v6723_v58 = vmul.f32 %v6722_v20, %v14302_v21  ;;  %v10153_v63 = vld [vmem:[#allocation16 + $0x34] sm:$0xf0]  ;;  %v6555_v62 = vadd.f32 1.1283791, %v6554_v16  ;;  %v9727_v56 = vor.u32 %v10155_v35, %v9726_v60 }
 0x8f9   : > { %v6709_v23 = vadd.f32 0.0036580483, %v6708_v37  ;;  %v9791_v54 = vor.u32 %v10171_v42, %v9790_v32  ;;  %v6449_v3 = vsub.f32 1.0, %v6448_v17  ;;  %v6456_v33 = vand.u32 2147483647, %v14373_v1 }
 0x8fa   : > { %v6569_v53 = vsub.f32 1.0, %v6568_v36  ;;  %v6608_v50 = vmul.f32 %v14454_v8, %v14396_v26  ;;  %vm6452_vm6 = vweird.f32 %v14373_v1  ;;  %v6761_v5 = vmul.f32 %v6760_v59, %v14362_v7  ;;  %8217 = vmatpush.bf16.msrb.mxu0 %v9727_v56  ;;  %v9782_v37 = vld [vmem:[#allocation16 + $0xb0] sm:$0xf]  ;;  %v10169_v60 = vld [vmem:[#allocation16 + $0xb4] sm:$0xf0]  ;;  %v4719_v56 = vpop.f32.mrf.mxu2 }
 0x8fb   : > { %v6879_v20 = vmul.f32 %v6878_v9, %v14404_v25  ;;  %v6917_v34 = vmul.f32 3.8918573e-05, %v14459_v12  ;;  %8266 = vmatpush.bf16.msrb.mxu1 %v9791_v54  ;;  %v9719_v16 = vor.u32 %v10153_v63, %v9718_v61  ;;  %v14476_v35 = vor.u32 1.1754944e-38, %v6458_v6 }
 0x8fc   : > { %v6593_v36 = vadd.f32 0.18741608, %v6592_v0  ;;  %v6724_v32 = vadd.f32 0.4994258, %v6723_v58  ;;  %v6576_v42 = vand.u32 2147483647, %v14380_v24  ;;  %v6710_v4 = vmul.f32 %v6709_v23, %v14302_v21 }
 0x8fd   : > { %v6746_v59 = vmul.f32 2.1237322e-06, %v14362_v7  ;;  %v14483_v9 = vmul.f32 %v13168_v14, %v14189_v45  ;;  %v6450_v61 = vmul.f32 %v14422_v44, %v6449_v3  ;;  %v6570_v63 = vmul.f32 %v14430_v41, %v6569_v53 }
 0x8fe   : > { %v6609_v54 = vsub.f32 1.0, %v6608_v50  ;;  %v9783_v6 = vor.u32 %v10169_v60, %v9782_v37  ;;  %v14488_v0 = vmul.f32 %v6555_v62, %v14104_v55  ;;  %v6762_v58 = vadd.f32 0.112945676, %v6761_v5  ;;  %8218 = vmatpush.bf16.msrb.mxu0 %v9719_v16  ;;  %v4768_v37 = vpop.f32.mrf.mxu3 }
 0x8ff   : > { %v6880_v17 = vadd.f32 0.014752088, %v6879_v20  ;;  %v6918_v11 = vadd.f32 0.001143296, %v6917_v34  ;;  %vm6453_vm7 = vweird.f32 %v14422_v44  ;;  %v6578_v23 = vand.u32 2147483648, %v14380_v24 }
 0x900   : > { %v6725_v31 = vmul.f32 %v6724_v32, %v14302_v21  ;;  %8267 = vmatpush.bf16.msrb.mxu1 %v9783_v6  ;;  %v4720_v3 = vadd.f32 %v4719_v56, %v13123_v40  ;;  %vm14494_vm8 = vcmp.eq.f32.partialorder %v6456_v33, 8.507059e+37  ;;  %vm6573_vm9 = vweird.f32 %v14430_v41  ;;  %vm14514_vm10 = vmor %vm6452_vm6, %vm6453_vm7  ;;  %v10167_v56 = vld [vmem:[#allocation16 + $0xa4] sm:$0xf0] }
 0x901   : > { %v6711_v55 = vadd.f32 0.05243302, %v6710_v4  ;;  %v6747_v62 = vadd.f32 0.00028619796, %v6746_v59  ;;  %v7024_v50 = vmul.f32 %v14483_v9, %v14483_v9  ;;  %v6451_v5 = vadd.f32 %v14422_v44, %v6450_v61  ;;  %v9774_v59 = vld [vmem:[#allocation16 + $0xa0] sm:$0xf] }
 0x902   : > { %v6571_v20 = vadd.f32 %v14430_v41, %v6570_v63  ;;  %v6610_v34 = vmul.f32 %v14454_v8, %v6609_v54  ;;  %v6866_v16 = vmul.f32 2.1237322e-06, %v14404_v25  ;;  %v6763_v33 = vmul.f32 %v6762_v58, %v14362_v7  ;;  %v10151_v63 = vld [vmem:[#allocation16 + $0x24] sm:$0xf0] }
 0x903   : > { %v6881_v60 = vmul.f32 %v6880_v17, %v14404_v25  ;;  %v6919_v32 = vmul.f32 %v6918_v11, %v14459_v12  ;;  %v14508_v4 = vadd.f32 %v4768_v37, %v4720_v3  ;;  %vm6572_vm11 = vweird.f32 %v14380_v24  ;;  %v9710_v11 = vld [vmem:[#allocation16 + $0x20] sm:$0xf] }
 0x904   : > { %vm14519_vm12 = vcmp.eq.f32.partialorder %v6576_v42, 8.507059e+37  ;;  %v6594_v17 = vmul.f32 %v6593_v36, %v14182_v27  ;;  %v14524_v61 = vadd.f32 1.0, %v6725_v31  ;;  %vm14528_vm13 = vmor %vm6572_vm11, %vm6573_vm9  ;;  %v6579_v54 = vor.u32 1.1754944e-38, %v6578_v23 }
 0x905   : > { %v6712_v6 = vmul.f32 %v6711_v55, %v14302_v21  ;;  %v6748_v24 = vmul.f32 %v6747_v62, %v14362_v7  ;;  %v14534_v42 = vmin.f32 %v7024_v50, 16.0  ;;  %v6455_v27 = vsel %vm14514_vm10, %v14422_v44, %v6451_v5 }
 0x906   : > { %v6575_v31 = vsel %vm14528_vm13, %v14430_v41, %v6571_v20  ;;  %v6611_v36 = vadd.f32 %v14454_v8, %v6610_v34  ;;  %vm6613_vm14 = vweird.f32 %v14454_v8  ;;  %v6764_v58 = vadd.f32 0.4994258, %v6763_v33 }
 0x907   : > { %v6882_v23 = vadd.f32 0.112945676, %v6881_v60  ;;  %v6920_v3 = vadd.f32 0.014752088, %v6919_v32  ;;  %v9711_v55 = vor.u32 %v10151_v63, %v9710_v11  ;;  %v6595_v37 = vadd.f32 1.1283791, %v6594_v17 }
 0x908   : > { %v6618_v62 = vand.u32 2147483648, %v14396_v26  ;;  %10584 = vrcp.f32 %v14524_v61  ;;  %v6867_v50 = vadd.f32 0.00028619796, %v6866_v16  ;;  %vm6612_vm15 = vweird.f32 %v14396_v26 }
 0x909   : > { %v6616_v44 = vand.u32 2147483647, %v14396_v26  ;;  %v6749_v5 = vadd.f32 0.0036580483, %v6748_v24  ;;  %v7037_v41 = vmul.f32 3.8918573e-05, %v14534_v42  ;;  %8219 = vmatpush.bf16.msrb.mxu0 %v9711_v55  ;;  %v6460_v20 = vsel %vm14494_vm8, %v14476_v35, %v6455_v27  ;;  %vm14556_vm0 = vmor %vm6612_vm15, %vm6613_vm14 }
 0x90a   : > { %v6580_v34 = vsel %vm14519_vm12, %v6579_v54, %v6575_v31  ;;  %v6713_v16 = vadd.f32 0.18741608, %v6712_v6  ;;  %v14562_v26 = vmul.f32 %v13168_v14, %v14278_v19  ;;  %v6615_v60 = vsel %vm14556_vm0, %v14454_v8, %v6611_v36  ;;  %v9702_v6 = vld [vmem:[#allocation16 + $0x10] sm:$0xf]  ;;  %v10149_v24 = vld [vmem:[#allocation16 + $0x14] sm:$0xf0] }
 0x90b   : > { %v6765_v35 = vmul.f32 %v6764_v58, %v14362_v7  ;;  %v6883_v53 = vmul.f32 %v6882_v23, %v14404_v25  ;;  %v6921_v32 = vmul.f32 %v6920_v3, %v14459_v12  ;;  %v17731_v17 = vclamps-f32 %v14461_v43, 1.0 }
 0x90c   : > { %v6619_v63 = vor.u32 1.1754944e-38, %v6618_v62  ;;  %v6868_v1 = vmul.f32 %v6867_v50, %v14404_v25  ;;  %v4619_v54 = vadd.f32 %v14313_v48, %v13113_v57  ;;  %v6461_v8 = vmul.f32 %v6460_v20, %v14457_v46  ;;  %v10165_v20 = vld [vmem:[#allocation16 + $0x94] sm:$0xf0] }
 0x90d   : > { %v7696_v11 = vadd.f32 1.0, %v17731_v17  ;;  %vm6617_vm1 = vcmp.eq.f32.partialorder %v6616_v44, 8.507059e+37  ;;  %v6750_v27 = vmul.f32 %v6749_v5, %v14362_v7  ;;  %v7038_v31 = vadd.f32 0.001143296, %v7037_v41 }
 0x90e   : > { %v14577_v36 = vpop.eup %10584  ;;  %v6581_v58 = vmul.f32 %v6580_v34, %v14488_v0  ;;  %v6620_v43 = vsel %vm6617_vm1, %v6619_v63, %v6615_v60  ;;  %v7064_v23 = vmul.f32 %v14562_v26, %v14562_v26  ;;  %v9775_v3 = vor.u32 %v10167_v56, %v9774_v59  ;;  %v9766_v0 = vld [vmem:[#allocation16 + $0x90] sm:$0xf] }
 0x90f   : > { %v14582_v55 = vadd.f32 1.0, %v6765_v35  ;;  %v6884_v48 = vadd.f32 0.4994258, %v6883_v53  ;;  %v6922_v62 = vadd.f32 0.112945676, %v6921_v32  ;;  %v9703_v50 = vor.u32 %v10149_v24, %v9702_v6 }
 0x910   : > { %v6596_v46 = vmul.f32 %v6595_v37, %v14136_v52  ;;  %v6714_v44 = vmul.f32 %v6713_v16, %v14302_v21  ;;  %v6869_v5 = vadd.f32 0.0036580483, %v6868_v1  ;;  %v14587_v41 = vadd.f32 %v14343_v39, %v4619_v54  ;;  %8268 = vmatpush.bf16.msrb.mxu1 %v9775_v3 }
 0x911   : > { %v9661_v34 = vclamps-f32 %v6461_v8, 1.0  ;;  %v6728_v33 = vmul.f32 %v14577_v36, %v14524_v61  ;;  %v6751_v60 = vadd.f32 0.05243302, %v6750_v27  ;;  %v7039_v35 = vmul.f32 %v7038_v31, %v14534_v42  ;;  %8220 = vmatpush.bf16.msrb.mxu0 %v9703_v50  ;;  %v9694_v50 = vld [vmem:[#allocation16] sm:$0xf] }
 0x912   : > { %v9664_v53 = vclamps-f32 %v6581_v58, 1.0  ;;  %v14592_v32 = vmul.f32 %v6620_v43, %v6596_v46  ;;  %v6906_v52 = vmul.f32 2.1237322e-06, %v14459_v12  ;;  %v14595_v21 = vmin.f32 %v7064_v23, 16.0  ;;  %v10147_v46 = vld [vmem:[#allocation16 + $0x4] sm:$0xf0] }
 0x913   : > { %10586 = vrcp.f32 %v14582_v55  ;;  %v6885_v39 = vmul.f32 %v6884_v48, %v14404_v25  ;;  %v6923_v37 = vmul.f32 %v6922_v62, %v14459_v12  ;;  %v9767_v16 = vor.u32 %v10165_v20, %v9766_v0 }
 0x914   : > { %v6715_v59 = vadd.f32 1.1283791, %v6714_v44  ;;  %v14601_v56 = vmul.f32 0.5, %v13986_v2  ;;  %v6870_v17 = vmul.f32 %v6869_v5, %v14404_v25  ;;  %v14606_v63 = vmul.f32 %v13168_v14, %v14587_v41 }
 0x915   : > { %v6729_v1 = vsub.f32 1.0, %v6728_v33  ;;  %v6752_v54 = vmul.f32 %v6751_v60, %v14362_v7  ;;  %v7040_v6 = vadd.f32 0.014752088, %v7039_v35  ;;  %v4717_v24 = vadd.f32 %v14436_v22, %v13123_v40  ;;  %8269 = vmatpush.bf16.msrb.mxu1 %v9767_v16  ;;  %v9758_v33 = vld [vmem:[#allocation16 + $0x80] sm:$0xf] }
 0x916   : > { %v7697_v8 = vadd.f32 1.0, %v9661_v34  ;;  %v14612_v27 = vmul.f32 0.5, %v14350_v38  ;;  %v6907_v2 = vadd.f32 0.00028619796, %v6906_v52  ;;  %v7077_v31 = vmul.f32 3.8918573e-05, %v14595_v21 }
 0x917   : > { %v7700_v58 = vadd.f32 1.0, %v9664_v53  ;;  %v9665_v43 = vclamps-f32 %v14592_v32, 1.0  ;;  %v14616_v23 = vadd.f32 1.0, %v6885_v39  ;;  %v6924_v3 = vadd.f32 0.4994258, %v6923_v37 }
 0x918   : > { %v14620_v48 = vmul.f32 %v14438_v47, %v14192_v49  ;;  %v14623_v22 = vmul.f32 %v7696_v11, %v14354_v51  ;;  %v6871_v62 = vadd.f32 0.05243302, %v6870_v17  ;;  %v7184_v38 = vmul.f32 %v14606_v63, %v14606_v63  ;;  %v10163_v60 = vld [vmem:[#allocation16 + $0x84] sm:$0xf0] }
 0x919   : > { %v14627_v44 = vpop.eup %10586  ;;  %v6730_v5 = vmul.f32 %v14577_v36, %v6729_v1  ;;  %v6753_v0 = vadd.f32 0.18741608, %v6752_v54  ;;  %v7041_v20 = vmul.f32 %v7040_v6, %v14534_v42  ;;  %v14632_v34 = vadd.f32 %v14466_v29, %v4717_v24 }
 0x91a   : > { %v14635_v49 = vmul.f32 %v7697_v8, %v14378_v13  ;;  %v6716_v51 = vmul.f32 %v6715_v59, %v14268_v30  ;;  %v6908_v47 = vmul.f32 %v6907_v2, %v14459_v12  ;;  %v7078_v11 = vadd.f32 0.001143296, %v7077_v31 }
 0x91b   : > { %10588 = vrcp.f32 %v14616_v23  ;;  %v6925_v35 = vmul.f32 %v6924_v3, %v14459_v12  ;;  %v7026_v53 = vmul.f32 2.1237322e-06, %v14534_v42  ;;  %v9695_v32 = vor.u32 %v10147_v46, %v9694_v50 }
 0x91c   : > { %vm6733_vm2 = vweird.f32 %v14577_v36  ;;  %v6768_v13 = vmul.f32 %v14627_v44, %v14582_v55  ;;  %v6872_v29 = vmul.f32 %v6871_v62, %v14404_v25  ;;  %v14646_v30 = vmin.f32 %v7184_v38, 16.0  ;;  %v17734_v38 = vld [vmem:[#allocation60_spill] sm:$0xff] }
 0x91d   : > { %v6731_v52 = vadd.f32 %v14577_v36, %v6730_v5  ;;  %v7042_v39 = vadd.f32 0.112945676, %v7041_v20  ;;  %v14651_v37 = vmul.f32 %v13168_v14, %v14632_v34  ;;  %8221 = vmatpush.bf16.msrb.mxu0 %v9695_v32  ;;  %v9759_v16 = vor.u32 %v10163_v60, %v9758_v33 }
 0x91e   : > { %v6738_v59 = vand.u32 2147483648, %v14524_v61  ;;  %v6754_v17 = vmul.f32 %v6753_v0, %v14362_v7  ;;  %v6909_v1 = vadd.f32 0.0036580483, %v6908_v47  ;;  %v7079_v54 = vmul.f32 %v7078_v11, %v14595_v21  ;;  %v17735_v11 = vld [vmem:[#allocation71_spill] sm:$0xff] }
 0x91f   : > { %vm6732_vm3 = vweird.f32 %v14524_v61  ;;  %v6736_v6 = vand.u32 2147483647, %v14524_v61  ;;  %v14658_v24 = vadd.f32 1.0, %v6925_v35  ;;  %v7027_v8 = vadd.f32 0.00028619796, %v7026_v53  ;;  %8270 = vmatpush.bf16.msrb.mxu1 %v9759_v16 }
 0x920   : > { %v7701_v2 = vadd.f32 1.0, %v9665_v43  ;;  %vm14662_vm4 = vmor %vm6732_vm3, %vm6733_vm2  ;;  %v6769_v3 = vsub.f32 1.0, %v6768_v13  ;;  %v14667_v7 = vmul.f32 0.5, %v14389_v28  ;;  %v7197_v62 = vmul.f32 3.8918573e-05, %v14646_v30  ;;  %8222 = vmatmul.bf16.vlgmr.msrb.gmra.mxu0 %v17734_v38 }
 0x921   : > { %v14671_v61 = vpop.eup %10588  ;;  %v6735_v43 = vsel %vm14662_vm4, %v14577_v36, %v6731_v52  ;;  %v6873_v50 = vadd.f32 0.18741608, %v6872_v29  ;;  %v7043_v46 = vmul.f32 %v7042_v39, %v14534_v42  ;;  %v7224_v5 = vmul.f32 %v14651_v37, %v14651_v37 }
 0x922   : > { %v6739_v0 = vor.u32 1.1754944e-38, %v6738_v59  ;;  %v6755_v20 = vadd.f32 1.1283791, %v6754_v17  ;;  %v6910_v28 = vmul.f32 %v6909_v1, %v14459_v12  ;;  %v7080_v47 = vadd.f32 0.014752088, %v7079_v54  ;;  %8271 = vmatmul.bf16.vlgmr.msrb.gmra.mxu1 %v17735_v11 }
 0x923   : > { %v14682_v33 = vmul.f32 %v7700_v58, %v14419_v10  ;;  %vm6737_vm5 = vcmp.eq.f32.partialorder %v6736_v6, 8.507059e+37  ;;  %10590 = vrcp.f32 %v14658_v24  ;;  %v7028_v36 = vmul.f32 %v7027_v8, %v14534_v42 }
 0x924   : > { %v6740_v60 = vsel %vm6737_vm5, %v6739_v0, %v6735_v43  ;;  %v6770_v35 = vmul.f32 %v14627_v44, %v6769_v3  ;;  %v6888_v53 = vmul.f32 %v14671_v61, %v14616_v23  ;;  %v7198_v32 = vadd.f32 0.001143296, %v7197_v62 }
 0x925   : > { %v14690_v13 = vmul.f32 %v7701_v2, %v14428_v18  ;;  %v6874_v29 = vmul.f32 %v6873_v50, %v14404_v25  ;;  %v7044_v52 = vadd.f32 0.4994258, %v7043_v46  ;;  %v14693_v10 = vmin.f32 %v7224_v5, 16.0 }
 0x926   : > { %v6756_v58 = vmul.f32 %v6755_v20, %v14326_v15  ;;  %v6911_v39 = vadd.f32 0.05243302, %v6910_v28  ;;  %v7066_v16 = vmul.f32 2.1237322e-06, %v14595_v21  ;;  %v7081_v59 = vmul.f32 %v7080_v47, %v14595_v21 }
 0x927   : > { %v6741_v17 = vmul.f32 %v6740_v60, %v6716_v51  ;;  %v6776_v1 = vand.u32 2147483647, %v14582_v55  ;;  %v6778_v54 = vand.u32 2147483648, %v14582_v55  ;;  %v7029_v6 = vadd.f32 0.0036580483, %v7028_v36  ;;  %v17738_v36 = vld [vmem:[#allocation68_spill] sm:$0xff] }
 0x928   : > { %v6771_v18 = vadd.f32 %v14627_v44, %v6770_v35  ;;  %vm6773_vm6 = vweird.f32 %v14627_v44  ;;  %v6889_v25 = vsub.f32 1.0, %v6888_v53  ;;  %v7199_v8 = vmul.f32 %v7198_v32, %v14646_v30 }
 0x929   : > { %v14703_v2 = vpop.eup %10590  ;;  %v6875_v15 = vadd.f32 1.1283791, %v6874_v29  ;;  %v14706_v31 = vmul.f32 0.5, %v14189_v45  ;;  %v7045_v51 = vmul.f32 %v7044_v52, %v14534_v42  ;;  %v7237_v3 = vmul.f32 3.8918573e-05, %v14693_v10 }
 0x92a   : > { %vm6772_vm7 = vweird.f32 %v14582_v55  ;;  %v6912_v62 = vmul.f32 %v6911_v39, %v14459_v12  ;;  %v7067_v43 = vadd.f32 0.00028619796, %v7066_v16  ;;  %v7082_v50 = vadd.f32 0.112945676, %v7081_v59 }
 0x92b   : > { %v9668_v46 = vclamps-f32 %v6741_v17, 1.0  ;;  %vm14712_vm8 = vmor %vm6772_vm7, %vm6773_vm6  ;;  %vm6777_vm9 = vcmp.eq.f32.partialorder %v6776_v1, 8.507059e+37  ;;  %v6779_v0 = vor.u32 1.1754944e-38, %v6778_v54  ;;  %v7030_v45 = vmul.f32 %v7029_v6, %v14534_v42  ;;  %v17739_v6 = vld [vmem:[#allocation55_spill] sm:$0xff] }
 0x92c   : > { %v6775_v20 = vsel %vm14712_vm8, %v14627_v44, %v6771_v18  ;;  %v6890_v28 = vmul.f32 %v14671_v61, %v6889_v25  ;;  %v6928_v55 = vmul.f32 %v14703_v2, %v14658_v24  ;;  %v7200_v47 = vadd.f32 0.014752088, %v7199_v8  ;;  %v9878_v25 = vld [vmem:[#allocation16 + $0x170] sm:$0xf]  ;;  %v10193_v8 = vld [vmem:[#allocation16 + $0x174] sm:$0xf0] }
 0x92d   : > { %v14724_v60 = vmul.f32 %v6875_v15, %v17738_v36  ;;  %v6896_v35 = vand.u32 2147483647, %v14616_v23  ;;  %v14727_v53 = vadd.f32 1.0, %v7045_v51  ;;  %v7238_v32 = vadd.f32 0.001143296, %v7237_v3 }
 0x92e   : > { %vm6892_vm10 = vweird.f32 %v14616_v23  ;;  %v6913_v29 = vadd.f32 0.18741608, %v6912_v62  ;;  %v7068_v52 = vmul.f32 %v7067_v43, %v14595_v21  ;;  %v7083_v44 = vmul.f32 %v7082_v50, %v14595_v21 }
 0x92f   : > { %v6780_v39 = vsel %vm6777_vm9, %v6779_v0, %v6775_v20  ;;  %vm6893_vm11 = vweird.f32 %v14671_v61  ;;  %v6898_v16 = vand.u32 2147483648, %v14616_v23  ;;  %v7031_v59 = vadd.f32 0.05243302, %v7030_v45 }
 0x930   : > { %v6891_v17 = vadd.f32 %v14671_v61, %v6890_v28  ;;  %v6929_v1 = vsub.f32 1.0, %v6928_v55  ;;  %v7201_v54 = vmul.f32 %v7200_v47, %v14646_v30  ;;  %v14738_v18 = vmul.f32 %v13168_v14, %v17739_v6  ;;  %vm14751_vm13 = vmor %vm6892_vm10, %vm6893_vm11  ;;  %v17744_v47 = vld [vmem:[#allocation56_spill] sm:$0xff] }
 0x931   : > { %v7704_v15 = vadd.f32 1.0, %v9668_v46  ;;  %vm14740_vm12 = vcmp.eq.f32.partialorder %v6896_v35, 8.507059e+37  ;;  %10592 = vrcp.f32 %v14727_v53  ;;  %v7239_v3 = vmul.f32 %v7238_v32, %v14693_v10 }
 0x932   : > { %v6781_v62 = vmul.f32 %v6780_v39, %v6756_v58  ;;  %v6914_v43 = vmul.f32 %v6913_v29, %v14459_v12  ;;  %v7069_v50 = vadd.f32 0.0036580483, %v7068_v52  ;;  %v7084_v5 = vadd.f32 0.4994258, %v7083_v44 }
 0x933   : > { %v6899_v46 = vor.u32 1.1754944e-38, %v6898_v16  ;;  %v7032_v45 = vmul.f32 %v7031_v59, %v14534_v42  ;;  %v14758_v20 = vmul.f32 %v13168_v14, %v14508_v4  ;;  %v9879_v58 = vor.u32 %v10193_v8, %v9878_v25  ;;  %v4623_v16 = vpop.f32.mrf.mxu0 }
 0x934   : > { %v6895_v12 = vsel %vm14751_vm13, %v14671_v61, %v6891_v17  ;;  %v6930_v28 = vmul.f32 %v14703_v2, %v6929_v1  ;;  %v7202_v55 = vadd.f32 0.112945676, %v7201_v54  ;;  %v7344_v23 = vmul.f32 %v14738_v18, %v14738_v18 }
 0x935   : > { %v14767_v36 = vmul.f32 %v7704_v15, %v17744_v47  ;;  %v14770_v35 = vmul.f32 0.5, %v14278_v19  ;;  %v7186_v32 = vmul.f32 2.1237322e-06, %v14646_v30  ;;  %v7240_v29 = vadd.f32 0.014752088, %v7239_v3  ;;  %8312 = vmatpush.bf16.msrb.mxu2 %v9879_v58 }
 0x936   : > { %v9669_v52 = vclamps-f32 %v6781_v62, 1.0  ;;  %v6915_v44 = vadd.f32 1.1283791, %v6914_v43  ;;  %v7070_v61 = vmul.f32 %v7069_v50, %v14595_v21  ;;  %v7085_v39 = vmul.f32 %v7084_v5, %v14595_v21 }
 0x937   : > { %17745 = vst [vmem:[#allocation24_spill] sm:$0xff] %v14767_v36  ;;  %v14775_v59 = vpop.eup %10592  ;;  %v6900_v17 = vsel %vm14740_vm12, %v6899_v46, %v6895_v12  ;;  %vm6932_vm14 = vweird.f32 %v14658_v24  ;;  %v7033_v19 = vadd.f32 0.18741608, %v7032_v45  ;;  %v7384_v1 = vmul.f32 %v14758_v20, %v14758_v20 }
 0x938   : > { %v6931_v54 = vadd.f32 %v14703_v2, %v6930_v28  ;;  %vm6933_vm15 = vweird.f32 %v14703_v2  ;;  %v7203_v25 = vmul.f32 %v7202_v55, %v14646_v30  ;;  %v14785_v8 = vmin.f32 %v7344_v23, 16.0 }
 0x939   : > { %v6938_v15 = vand.u32 2147483648, %v14658_v24  ;;  %v7187_v3 = vadd.f32 0.00028619796, %v7186_v32  ;;  %v7241_v51 = vmul.f32 %v7240_v29, %v14693_v10  ;;  %v4624_v62 = vadd.f32 %v4623_v16, %v13113_v57  ;;  %vm14798_vm0 = vmor %vm6932_vm14, %vm6933_vm15  ;;  %v9942_v16 = vld [vmem:[#allocation16 + $0x1f0] sm:$0xf] }
 0x93a   : > { %v6936_v43 = vand.u32 2147483647, %v14658_v24  ;;  %v7048_v50 = vmul.f32 %v14775_v59, %v14727_v53  ;;  %v7071_v5 = vadd.f32 0.05243302, %v7070_v61  ;;  %v14793_v0 = vadd.f32 1.0, %v7085_v39 }
 0x93b   : > { %v7705_v46 = vadd.f32 1.0, %v9669_v52  ;;  %v6901_v45 = vmul.f32 %v6900_v17, %v14724_v60  ;;  %v7226_v12 = vmul.f32 2.1237322e-06, %v14693_v10  ;;  %v14803_v57 = vmin.f32 %v7384_v1, 16.0  ;;  %v4672_v60 = vpop.f32.mrf.mxu1 }
 0x93c   : > { %v6935_v28 = vsel %vm14798_vm0, %v14703_v2, %v6931_v54  ;;  %v7034_v55 = vmul.f32 %v7033_v19, %v14534_v42  ;;  %v7204_v23 = vadd.f32 0.4994258, %v7203_v25  ;;  %v7357_v47 = vmul.f32 3.8918573e-05, %v14785_v8  ;;  %v10209_v2 = vld [vmem:[#allocation16 + $0x1f4] sm:$0xf0] }
 0x93d   : > { %v6939_v32 = vor.u32 1.1754944e-38, %v6938_v15  ;;  %v7188_v24 = vmul.f32 %v7187_v3, %v14646_v30  ;;  %v7242_v29 = vadd.f32 0.112945676, %v7241_v51  ;;  %v14811_v52 = vadd.f32 %v4672_v60, %v4624_v62  ;;  %v17748_v54 = vld [vmem:[#allocation57_spill] sm:$0xff] }
 0x93e   : > { %vm6937_vm1 = vcmp.eq.f32.partialorder %v6936_v43, 8.507059e+37  ;;  %v7049_v61 = vsub.f32 1.0, %v7048_v50  ;;  %v7072_v39 = vmul.f32 %v7071_v5, %v14595_v21  ;;  %10594 = vrcp.f32 %v14793_v0 }
 0x93f   : > { %v9672_v17 = vclamps-f32 %v6901_v45, 1.0  ;;  %v6940_v42 = vsel %vm6937_vm1, %v6939_v32, %v6935_v28  ;;  %v7227_v19 = vadd.f32 0.00028619796, %v7226_v12  ;;  %v7397_v1 = vmul.f32 3.8918573e-05, %v14803_v57 }
 0x940   : > { %v6916_v25 = vmul.f32 %v6915_v44, %v17748_v54  ;;  %v7035_v15 = vadd.f32 1.1283791, %v7034_v55  ;;  %v7205_v3 = vmul.f32 %v7204_v23, %v14646_v30  ;;  %v7358_v51 = vadd.f32 0.001143296, %v7357_v47 }
 0x941   : > { %v7189_v62 = vadd.f32 0.0036580483, %v7188_v24  ;;  %v7243_v43 = vmul.f32 %v7242_v29, %v14693_v10  ;;  %v14821_v50 = vmul.f32 %v13168_v14, %v14811_v52  ;;  %v9943_v5 = vor.u32 %v10209_v2, %v9942_v16 }
 0x942   : > { %v14824_v45 = vmul.f32 %v7705_v46, %v14601_v56  ;;  %v6941_v58 = vmul.f32 %v6940_v42, %v6916_v25  ;;  %v7050_v12 = vmul.f32 %v14775_v59, %v7049_v61  ;;  %v7073_v28 = vadd.f32 0.18741608, %v7072_v39  ;;  %v17750_v25 = vld [vmem:[#allocation70_spill] sm:$0xff] }
 0x943   : > { %v7708_v44 = vadd.f32 1.0, %v9672_v17  ;;  %v14828_v55 = vmul.f32 0.5, %v14587_v41  ;;  %v7228_v23 = vmul.f32 %v7227_v19, %v14693_v10  ;;  %v7398_v47 = vadd.f32 0.001143296, %v7397_v1  ;;  %8361 = vmatpush.bf16.msrb.mxu3 %v9943_v5 }
 0x944   : > { %17749 = vst [vmem:[#allocation74_spill] sm:$0xff] %v14824_v45  ;;  %v14831_v60 = vpop.eup %10594  ;;  %v7036_v32 = vmul.f32 %v7035_v15, %v14483_v9  ;;  %vm7052_vm2 = vweird.f32 %v14727_v53  ;;  %v14835_v56 = vadd.f32 1.0, %v7205_v3  ;;  %v7359_v46 = vmul.f32 %v7358_v51, %v14785_v8  ;;  %v17751_v15 = vld [vmem:[#allocation67_spill] sm:$0xff]  ;;  %v17774_v45 = vld [vmem:[#allocation80_spill] sm:$0xff] }
 0x945   : > { %v7056_v24 = vand.u32 2147483647, %v14727_v53  ;;  %v7190_v29 = vmul.f32 %v7189_v62, %v14646_v30  ;;  %v7244_v41 = vadd.f32 0.4994258, %v7243_v43  ;;  %v7504_v61 = vmul.f32 %v14821_v50, %v14821_v50 }
 0x946   : > { %v9673_v39 = vclamps-f32 %v6941_v58, 1.0  ;;  %v7051_v16 = vadd.f32 %v14775_v59, %v7050_v12  ;;  %vm7053_vm3 = vweird.f32 %v14775_v59  ;;  %v7074_v9 = vmul.f32 %v7073_v28, %v14595_v21 }
 0x947   : > { %v7058_v2 = vand.u32 2147483648, %v14727_v53  ;;  %v7088_v17 = vmul.f32 %v14831_v60, %v14793_v0  ;;  %v7229_v42 = vadd.f32 0.0036580483, %v7228_v23  ;;  %v7399_v19 = vmul.f32 %v7398_v47, %v14803_v57  ;;  %vm14860_vm4 = vmor %vm7052_vm2, %vm7053_vm3  ;;  %v10704_v47 = vld [vmem:[%s17297_s9] sm:$0xf] }
 0x948   : > { %10596 = vrcp.f32 %v14835_v56  ;;  %v7346_v1 = vmul.f32 2.1237322e-06, %v14785_v8  ;;  %v7360_v54 = vadd.f32 0.014752088, %v7359_v46  ;;  %v14853_v3 = vpack.c.bf16 %v17751_v15, %v17750_v25 }
 0x949   : > { %v14856_v51 = vmul.f32 %v7708_v44, %v14612_v27  ;;  %v7191_v62 = vadd.f32 0.05243302, %v7190_v29  ;;  %v7245_v43 = vmul.f32 %v7244_v41, %v14693_v10  ;;  %v14865_v5 = vmin.f32 %v7504_v61, 16.0  ;;  %v4721_v27 = vpop.f32.mrf.mxu2  ;;  %v4782_v61 = vpop.f32.mrf.mxu0 }
 0x94a   : > { %17752 = vst [vmem:[#allocation76_spill] sm:$0xff] %v14853_v3  ;;  %v7709_v58 = vadd.f32 1.0, %v9673_v39  ;;  %v7055_v12 = vsel %vm14860_vm4, %v14775_v59, %v7051_v16  ;;  %vm7057_vm5 = vcmp.eq.f32.partialorder %v7056_v24, 8.507059e+37  ;;  %v7075_v28 = vadd.f32 1.1283791, %v7074_v9  ;;  %8227 = vmatmul.bf16.gmra.mxu0 %v14853_v3 }
 0x94b   : > { %17753 = vst [vmem:[#allocation59_spill] sm:$0xff] %v14856_v51  ;;  %v7059_v53 = vor.u32 1.1754944e-38, %v7058_v2  ;;  %v7089_v44 = vsub.f32 1.0, %v7088_v17  ;;  %v7400_v23 = vadd.f32 0.014752088, %v7399_v19  ;;  %v14874_v46 = vperm.slane %v10704_v47, 2 }
 0x94c   : > { %v14877_v29 = vmul.f32 0.5, %v14632_v34  ;;  %v7230_v41 = vmul.f32 %v7229_v42, %v14693_v10  ;;  %v7347_v59 = vadd.f32 0.00028619796, %v7346_v1  ;;  %v7361_v24 = vmul.f32 %v7360_v54, %v14785_v8  ;;  %v17775_v51 = vld [vmem:[#allocation61_spill] sm:$0xff] }
 0x94d   : > { %v7060_v39 = vsel %vm7057_vm5, %v7059_v53, %v7055_v12  ;;  %v7192_v16 = vmul.f32 %v7191_v62, %v14646_v30  ;;  %v14882_v9 = vadd.f32 1.0, %v7245_v43  ;;  %v7517_v2 = vmul.f32 3.8918573e-05, %v14865_v5  ;;  %v4831_v53 = vpop.f32.mrf.mxu1 }
 0x94e   : > { %v14885_v17 = vpop.eup %10596  ;;  %v14888_v19 = vmul.f32 %v7709_v58, %v14667_v7  ;;  %v14891_v34 = vmul.f32 %v7075_v28, %v14562_v26  ;;  %v14894_v42 = vmul.f32 0.5, %v17739_v6  ;;  %v4722_v1 = vadd.f32 %v4721_v27, %v13123_v40  ;;  %v4770_v26 = vpop.f32.mrf.mxu3 }
 0x94f   : > { %v7090_v54 = vmul.f32 %v14831_v60, %v7089_v44  ;;  %v7096_v25 = vand.u32 2147483647, %v14793_v0  ;;  %v7401_v15 = vmul.f32 %v7400_v23, %v14803_v57  ;;  %v4783_v21 = vadd.f32 %v4782_v61, %v14874_v46  ;;  %v17758_v44 = vld [vmem:[#allocation53_spill] sm:$0xff] }
 0x950   : > { %17756 = vst [vmem:[#allocation58_spill] sm:$0xff] %v14888_v19  ;;  %v7061_v62 = vmul.f32 %v7060_v39, %v7036_v32  ;;  %v7231_v43 = vadd.f32 0.05243302, %v7230_v41  ;;  %v7348_v7 = vmul.f32 %v7347_v59, %v14785_v8  ;;  %v7362_v58 = vadd.f32 0.112945676, %v7361_v24  ;;  %v17757_v32 = vld [vmem:[#allocation73_spill] sm:$0xff] }
 0x951   : > { %v7193_v12 = vadd.f32 0.18741608, %v7192_v16  ;;  %v7208_v6 = vmul.f32 %v14885_v17, %v14835_v56  ;;  %10598 = vrcp.f32 %v14882_v9  ;;  %v7518_v40 = vadd.f32 0.001143296, %v7517_v2 }
 0x952   : > { %vm7093_vm6 = vweird.f32 %v14831_v60  ;;  %v7098_v28 = vand.u32 2147483648, %v14793_v0  ;;  %v14907_v27 = vadd.f32 %v4770_v26, %v4722_v1  ;;  %v14911_v23 = vpack.c.bf16 %v17758_v44, %v17757_v32  ;;  %v4880_v1 = vpop.f32.mrf.mxu2 }
 0x953   : > { %v7091_v41 = vadd.f32 %v14831_v60, %v7090_v54  ;;  %v7402_v59 = vadd.f32 0.112945676, %v7401_v15  ;;  %v14914_v24 = vadd.f32 %v4831_v53, %v4783_v21  ;;  %v14916_v61 = vperm.slane %v10704_v47, 3  ;;  %v17765_v53 = vld [vmem:[#allocation79_spill] sm:$0xff] }
 0x954   : > { %17759 = vst [vmem:[#allocation77_spill] sm:$0xff] %v14911_v23  ;;  %vm7092_vm7 = vweird.f32 %v14793_v0  ;;  %v7232_v39 = vmul.f32 %v7231_v43, %v14693_v10  ;;  %v7349_v16 = vadd.f32 0.0036580483, %v7348_v7  ;;  %v7363_v2 = vmul.f32 %v7362_v58, %v14785_v8  ;;  %8276 = vmatmul.bf16.gmra.mxu1 %v14911_v23 }
 0x955   : > { %v9676_v26 = vclamps-f32 %v7061_v62, 1.0  ;;  %v7194_v32 = vmul.f32 %v7193_v12, %v14646_v30  ;;  %v7209_v44 = vsub.f32 1.0, %v7208_v6  ;;  %v7519_v54 = vmul.f32 %v7518_v40, %v14865_v5  ;;  %vm14926_vm8 = vmor %vm7092_vm7, %vm7093_vm6 }
 0x956   : > { %vm14930_vm9 = vcmp.eq.f32.partialorder %v7096_v25, 8.507059e+37  ;;  %v7099_v15 = vor.u32 1.1754944e-38, %v7098_v28  ;;  %v7386_v21 = vmul.f32 2.1237322e-06, %v14803_v57  ;;  %v14937_v62 = vmul.f32 %v13168_v14, %v14907_v27  ;;  %v17764_v28 = vld [vmem:[#allocation72_spill] sm:$0xff] }
 0x957   : > { %v14939_v30 = vpop.eup %10598  ;;  %v7095_v43 = vsel %vm14926_vm8, %v14831_v60, %v7091_v41  ;;  %v7403_v7 = vmul.f32 %v7402_v59, %v14803_v57  ;;  %v14947_v25 = vmul.f32 %v13168_v14, %v14914_v24  ;;  %v4881_v58 = vadd.f32 %v4880_v1, %v14916_v61 }
 0x958   : > { %v7233_v12 = vadd.f32 0.18741608, %v7232_v39  ;;  %v7350_v6 = vmul.f32 %v7349_v16, %v14785_v8  ;;  %v7364_v40 = vadd.f32 0.4994258, %v7363_v2  ;;  %v14953_v23 = vpack.c.bf16 %v17765_v53, %v17764_v28  ;;  %v4929_v2 = vpop.f32.mrf.mxu3 }
 0x959   : > { %v14955_v3 = vadd.f32 1.0, %v9676_v26  ;;  %v7195_v47 = vadd.f32 1.1283791, %v7194_v32  ;;  %v7210_v60 = vmul.f32 %v14885_v17, %v7209_v44  ;;  %v7520_v41 = vadd.f32 0.014752088, %v7519_v54 }
 0x95a   : > { %17766 = vst [vmem:[#allocation78_spill] sm:$0xff] %v14953_v23  ;;  %v7100_v59 = vsel %vm14930_vm9, %v7099_v15, %v7095_v43  ;;  %v7248_v1 = vmul.f32 %v14939_v30, %v14882_v9  ;;  %v7387_v39 = vadd.f32 0.00028619796, %v7386_v21  ;;  %v7544_v16 = vmul.f32 %v14937_v62, %v14937_v62  ;;  %8232 = vmatmul.bf16.gmra.mxu0 %v14953_v23 }
 0x95b   : > { %v7216_v26 = vand.u32 2147483647, %v14835_v56  ;;  %v7404_v28 = vadd.f32 0.4994258, %v7403_v7  ;;  %v5184_v32 = vmul.f32 %v14947_v25, %v14947_v25  ;;  %v14968_v44 = vadd.f32 %v4929_v2, %v4881_v58 }
 0x95c   : > { %v7218_v54 = vand.u32 2147483648, %v14835_v56  ;;  %v7234_v0 = vmul.f32 %v7233_v12, %v14693_v10  ;;  %v7351_v15 = vadd.f32 0.05243302, %v7350_v6  ;;  %v7365_v21 = vmul.f32 %v7364_v40, %v14785_v8 }
 0x95d   : > { %v7101_v43 = vmul.f32 %v7100_v59, %v14891_v34  ;;  %v7211_v53 = vadd.f32 %v14885_v17, %v7210_v60  ;;  %vm7213_vm10 = vweird.f32 %v14885_v17  ;;  %v7521_v7 = vmul.f32 %v7520_v41, %v14865_v5 }
 0x95e   : > { %v7196_v23 = vmul.f32 %v7195_v47, %v14606_v63  ;;  %v7249_v11 = vsub.f32 1.0, %v7248_v1  ;;  %v7388_v58 = vmul.f32 %v7387_v39, %v14803_v57  ;;  %v14979_v2 = vmin.f32 %v7544_v16, 16.0 }
 0x95f   : > { %vm7212_vm11 = vweird.f32 %v14835_v56  ;;  %v7405_v10 = vmul.f32 %v7404_v28, %v14803_v57  ;;  %v14983_v12 = vmin.f32 %v5184_v32, 16.0  ;;  %v14987_v34 = vmul.f32 %v13168_v14, %v14968_v44  ;;  %v17771_v28 = vld [vmem:[#allocation75_spill] sm:$0xff]  ;;  %v17772_v32 = vld [vmem:[#allocation52_spill] sm:$0xff] }
 0x960   : > { %vm14989_vm12 = vmor %vm7212_vm11, %vm7213_vm10  ;;  %vm14993_vm13 = vcmp.eq.f32.partialorder %v7216_v26, 8.507059e+37  ;;  %v7219_v40 = vor.u32 1.1754944e-38, %v7218_v54  ;;  %v7352_v47 = vmul.f32 %v7351_v15, %v14785_v8  ;;  %v14998_v56 = vadd.f32 1.0, %v7365_v21 }
 0x961   : > { %v9677_v60 = vclamps-f32 %v7101_v43, 1.0  ;;  %v7215_v41 = vsel %vm14989_vm12, %v14885_v17, %v7211_v53  ;;  %v7235_v59 = vadd.f32 1.1283791, %v7234_v0  ;;  %v7522_v1 = vadd.f32 0.112945676, %v7521_v7  ;;  %v4784_v0 = vpop.f32.mrf.mxu0 }
 0x962   : > { %v7250_v39 = vmul.f32 %v14939_v30, %v7249_v11  ;;  %v7389_v16 = vadd.f32 0.0036580483, %v7388_v58  ;;  %v7557_v26 = vmul.f32 3.8918573e-05, %v14979_v2  ;;  %v15007_v38 = vpack.c.bf16 %v17772_v32, %v17771_v28 }
 0x963   : > { %v15009_v54 = vadd.f32 1.0, %v7405_v10  ;;  %v7506_v15 = vmul.f32 2.1237322e-06, %v14865_v5  ;;  %v5197_v21 = vmul.f32 3.8918573e-05, %v14983_v12  ;;  %v5224_v17 = vmul.f32 %v14987_v34, %v14987_v34 }
 0x964   : > { %17773 = vst [vmem:[#allocation54_spill] sm:$0xff] %v15007_v38  ;;  %vm7252_vm14 = vweird.f32 %v14882_v9  ;;  %v7256_v11 = vand.u32 2147483647, %v14882_v9  ;;  %v7353_v43 = vadd.f32 0.18741608, %v7352_v47  ;;  %10600 = vrcp.f32 %v14998_v56  ;;  %8281 = vmatmul.bf16.gmra.mxu1 %v15007_v38 }
 0x965   : > { %v7220_v53 = vsel %vm14993_vm13, %v7219_v40, %v7215_v41  ;;  %vm7253_vm15 = vweird.f32 %v14939_v30  ;;  %v7258_v7 = vand.u32 2147483648, %v14882_v9  ;;  %v7523_v58 = vmul.f32 %v7522_v1, %v14865_v5 }
 0x966   : > { %v7251_v10 = vadd.f32 %v14939_v30, %v7250_v39  ;;  %v7390_v6 = vmul.f32 %v7389_v16, %v14803_v57  ;;  %v7558_v28 = vadd.f32 0.001143296, %v7557_v26  ;;  %v4785_v47 = vadd.f32 %v4784_v0, %v14874_v46  ;;  %vm15044_vm0 = vmor %vm7252_vm14, %vm7253_vm15  ;;  %v4882_v0 = vpop.f32.mrf.mxu2 }
 0x967   : > { %10602 = vrcp.f32 %v15009_v54  ;;  %v7507_v32 = vadd.f32 0.00028619796, %v7506_v15  ;;  %v5198_v38 = vadd.f32 0.001143296, %v5197_v21  ;;  %v15028_v19 = vmin.f32 %v5224_v17, 16.0 }
 0x968   : > { %v7713_v63 = vadd.f32 1.0, %v9677_v60  ;;  %v7221_v40 = vmul.f32 %v7220_v53, %v7196_v23  ;;  %v7354_v41 = vmul.f32 %v7353_v43, %v14785_v8  ;;  %v15033_v1 = vpack.c.bf16 %v17775_v51, %v17774_v45  ;;  %v4833_v45 = vpop.f32.mrf.mxu1 }
 0x969   : > { %v15037_v39 = vmul.f32 %v14955_v3, %v14706_v31  ;;  %v7236_v16 = vmul.f32 %v7235_v59, %v14651_v37  ;;  %v15049_v8 = vmul.f32 0.5, %v14508_v4  ;;  %v7524_v23 = vadd.f32 0.4994258, %v7523_v58 }
 0x96a   : > { %17776 = vst [vmem:[#allocation68_spill] sm:$0xff] %v15033_v1  ;;  %v15051_v51 = vpop.eup %10600  ;;  %v7255_v31 = vsel %vm15044_vm0, %v14939_v30, %v7251_v10  ;;  %v7391_v37 = vadd.f32 0.05243302, %v7390_v6  ;;  %v7559_v3 = vmul.f32 %v7558_v28, %v14979_v2  ;;  %v15057_v60 = vadd.f32 %v4833_v45, %v4785_v47  ;;  %8237 = vmatmul.bf16.gmra.mxu0 %v15033_v1 }
 0x96b   : > { %17777 = vst [vmem:[#allocation55_spill] sm:$0xff] %v15037_v39  ;;  %v7259_v9 = vor.u32 1.1754944e-38, %v7258_v7  ;;  %v7508_v59 = vmul.f32 %v7507_v32, %v14865_v5  ;;  %v5199_v4 = vmul.f32 %v5198_v38, %v14983_v12  ;;  %v5237_v15 = vmul.f32 3.8918573e-05, %v15028_v19 }
 0x96c   : > { %v15064_v21 = vmul.f32 %v7713_v63, %v14770_v35  ;;  %v9680_v17 = vclamps-f32 %v7221_v40, 1.0  ;;  %vm7257_vm1 = vcmp.eq.f32.partialorder %v7256_v11, 8.507059e+37  ;;  %v7355_v30 = vadd.f32 1.1283791, %v7354_v41 }
 0x96d   : > { %v15066_v43 = vpop.eup %10602  ;;  %v7260_v53 = vsel %vm7257_vm1, %v7259_v9, %v7255_v31  ;;  %v7368_v58 = vmul.f32 %v15051_v51, %v14998_v56  ;;  %v7525_v7 = vmul.f32 %v7524_v23, %v14865_v5  ;;  %v7546_v10 = vmul.f32 2.1237322e-06, %v14979_v2 }
 0x96e   : > { %17780 = vst [vmem:[#allocation56_spill] sm:$0xff] %v15064_v21  ;;  %v7392_v38 = vmul.f32 %v7391_v37, %v14803_v57  ;;  %v15074_v6 = vmul.f32 0.5, %v14811_v52  ;;  %v7560_v35 = vadd.f32 0.014752088, %v7559_v3  ;;  %v15078_v11 = vmul.f32 %v13168_v14, %v15057_v60 }
 0x96f   : > { %v7509_v28 = vadd.f32 0.0036580483, %v7508_v59  ;;  %v5200_v47 = vadd.f32 0.014752088, %v5199_v4  ;;  %v5238_v32 = vadd.f32 0.001143296, %v5237_v15  ;;  %v4883_v63 = vadd.f32 %v4882_v0, %v14916_v61  ;;  %v4931_v4 = vpop.f32.mrf.mxu3 }
 0x970   : > { %v7716_v40 = vadd.f32 1.0, %v9680_v17  ;;  %v7261_v41 = vmul.f32 %v7260_v53, %v7236_v16  ;;  %v15082_v26 = vmul.f32 %v7355_v30, %v14738_v18  ;;  %v7408_v23 = vmul.f32 %v15066_v43, %v15009_v54  ;;  %v17781_v16 = vld [vmem:[#allocation65_spill] sm:$0xff] }
 0x971   : > { %v7369_v52 = vsub.f32 1.0, %v7368_v58  ;;  %v15086_v45 = vadd.f32 1.0, %v7525_v7  ;;  %v7547_v31 = vadd.f32 0.00028619796, %v7546_v10  ;;  %v5186_v37 = vmul.f32 2.1237322e-06, %v14983_v12 }
 0x972   : > { %v7393_v3 = vadd.f32 0.18741608, %v7392_v38  ;;  %v7561_v9 = vmul.f32 %v7560_v35, %v14979_v2  ;;  %v5344_v59 = vmul.f32 %v15078_v11, %v15078_v11  ;;  %v15094_v18 = vpack.c.bf16 %v14620_v48, %v17781_v16 }
 0x973   : > { %vm7372_vm2 = vweird.f32 %v14998_v56  ;;  %v7510_v15 = vmul.f32 %v7509_v28, %v14865_v5  ;;  %v5201_v17 = vmul.f32 %v5200_v47, %v14983_v12  ;;  %v5239_v30 = vmul.f32 %v5238_v32, %v15028_v19 }
 0x974   : > { %17782 = vst [vmem:[#allocation57_spill] sm:$0xff] %v15094_v18  ;;  %v15100_v0 = vadd.f32 %v4931_v4, %v4883_v63  ;;  %v9681_v53 = vclamps-f32 %v7261_v41, 1.0  ;;  %v7376_v58 = vand.u32 2147483647, %v14998_v56  ;;  %v7378_v7 = vand.u32 2147483648, %v14998_v56  ;;  %8286 = vmatmul.bf16.gmra.mxu1 %v15094_v18 }
 0x975   : > { %v7409_v10 = vsub.f32 1.0, %v7408_v23  ;;  %v7370_v48 = vmul.f32 %v15051_v51, %v7369_v52  ;;  %10604 = vrcp.f32 %v15086_v45  ;;  %v7548_v38 = vmul.f32 %v7547_v31, %v14979_v2 }
 0x976   : > { %v5187_v35 = vadd.f32 0.00028619796, %v5186_v37  ;;  %v15109_v28 = vmul.f32 %v7716_v40, %v14828_v55  ;;  %v7394_v47 = vmul.f32 %v7393_v3, %v14803_v57  ;;  %v7562_v32 = vadd.f32 0.112945676, %v7561_v9 }
 0x977   : > { %v15112_v63 = vmin.f32 %v5344_v59, 16.0  ;;  %v7511_v41 = vadd.f32 0.05243302, %v7510_v15  ;;  %v5202_v4 = vadd.f32 0.112945676, %v5201_v17  ;;  %v15116_v16 = vmul.f32 %v13168_v14, %v15100_v0  ;;  %v4787_v17 = vpop.f32.mrf.mxu0 }
 0x978   : > { %17783 = vst [vmem:[#allocation70_spill] sm:$0xff] %v15109_v28  ;;  %v5240_v23 = vadd.f32 0.014752088, %v5239_v30  ;;  %v7717_v52 = vadd.f32 1.0, %v9681_v53  ;;  %vm15118_vm3 = vcmp.eq.f32.partialorder %v7376_v58, 8.507059e+37  ;;  %v7379_v31 = vor.u32 1.1754944e-38, %v7378_v7 }
 0x979   : > { %v7410_v55 = vmul.f32 %v15066_v43, %v7409_v10  ;;  %v7371_v57 = vadd.f32 %v15051_v51, %v7370_v48  ;;  %vm7373_vm4 = vweird.f32 %v15051_v51  ;;  %v7549_v40 = vadd.f32 0.0036580483, %v7548_v38 }
 0x97a   : > { %v5188_v37 = vmul.f32 %v5187_v35, %v14983_v12  ;;  %v7395_v3 = vadd.f32 1.1283791, %v7394_v47  ;;  %v15127_v9 = vmul.f32 0.5, %v14907_v27  ;;  %v7563_v59 = vmul.f32 %v7562_v32, %v14979_v2  ;;  %vm15140_vm5 = vmor %vm7372_vm2, %vm7373_vm4  ;;  %v10191_v27 = vld [vmem:[#allocation16 + $0x164] sm:$0xf0] }
 0x97b   : > { %v5357_v15 = vmul.f32 3.8918573e-05, %v15112_v63  ;;  %v15131_v30 = vpop.eup %10604  ;;  %v7512_v53 = vmul.f32 %v7511_v41, %v14865_v5  ;;  %v5203_v58 = vmul.f32 %v5202_v4, %v14983_v12  ;;  %v5241_v7 = vmul.f32 %v5240_v23, %v15028_v19 }
 0x97c   : > { %v5384_v10 = vmul.f32 %v15116_v16, %v15116_v16  ;;  %v7411_v48 = vadd.f32 %v15066_v43, %v7410_v55  ;;  %vm7412_vm6 = vweird.f32 %v15009_v54  ;;  %vm7413_vm7 = vweird.f32 %v15066_v43 }
 0x97d   : > { %v7416_v38 = vand.u32 2147483647, %v15009_v54  ;;  %v7375_v35 = vsel %vm15140_vm5, %v15051_v51, %v7371_v57  ;;  %v7550_v47 = vmul.f32 %v7549_v40, %v14979_v2  ;;  %v5189_v32 = vadd.f32 0.0036580483, %v5188_v37  ;;  %vm15159_vm8 = vmor %vm7412_vm6, %vm7413_vm7 }
 0x97e   : > { %v4788_v56 = vadd.f32 %v4787_v17, %v14874_v46  ;;  %v7418_v41 = vand.u32 2147483648, %v15009_v54  ;;  %v7528_v4 = vmul.f32 %v15131_v30, %v15086_v45  ;;  %v7564_v23 = vadd.f32 0.4994258, %v7563_v59 }
 0x97f   : > { %v5358_v55 = vadd.f32 0.001143296, %v5357_v15  ;;  %v15157_v1 = vmul.f32 %v7717_v52, %v14877_v29  ;;  %v5204_v51 = vadd.f32 0.4994258, %v5203_v58  ;;  %v5242_v57 = vadd.f32 0.112945676, %v5241_v7  ;;  %v4836_v52 = vpop.f32.mrf.mxu1 }
 0x980   : > { %v15163_v40 = vmin.f32 %v5384_v10, 16.0  ;;  %v7380_v37 = vsel %vm15118_vm3, %v7379_v31, %v7375_v35  ;;  %v7415_v54 = vsel %vm15159_vm8, %v15066_v43, %v7411_v48  ;;  %vm15170_vm9 = vcmp.eq.f32.partialorder %v7416_v38, 8.507059e+37  ;;  %v9870_v43 = vld [vmem:[#allocation16 + $0x160] sm:$0xf]  ;;  %v4885_v35 = vpop.f32.mrf.mxu2 }
 0x981   : > { %17788 = vst [vmem:[#allocation67_spill] sm:$0xff] %v15157_v1  ;;  %v7513_v29 = vadd.f32 0.18741608, %v7512_v53  ;;  %v7551_v15 = vadd.f32 0.05243302, %v7550_v47  ;;  %v5190_v17 = vmul.f32 %v5189_v32, %v14983_v12  ;;  %v15176_v7 = vadd.f32 %v4836_v52, %v4788_v56 }
 0x982   : > { %v5226_v58 = vmul.f32 2.1237322e-06, %v15028_v19  ;;  %v7419_v10 = vor.u32 1.1754944e-38, %v7418_v41  ;;  %v7529_v18 = vsub.f32 1.0, %v7528_v4  ;;  %v7565_v31 = vmul.f32 %v7564_v23, %v14979_v2 }
 0x983   : > { %v5359_v21 = vmul.f32 %v5358_v55, %v15112_v63  ;;  %v5205_v48 = vmul.f32 %v5204_v51, %v14983_v12  ;;  %v5243_v53 = vmul.f32 %v5242_v57, %v15028_v19  ;;  %v5397_v38 = vmul.f32 3.8918573e-05, %v15163_v40 }
 0x984   : > { %v9871_v47 = vor.u32 %v10191_v27, %v9870_v43  ;;  %v7381_v32 = vmul.f32 %v7380_v37, %v15082_v26  ;;  %v7396_v56 = vmul.f32 %v7395_v3, %v14758_v20  ;;  %v7420_v41 = vsel %vm15170_vm9, %v7419_v10, %v7415_v54 }
 0x985   : > { %v7514_v4 = vmul.f32 %v7513_v29, %v14865_v5  ;;  %v7552_v23 = vmul.f32 %v7551_v15, %v14979_v2  ;;  %v5191_v55 = vadd.f32 0.05243302, %v5190_v17  ;;  %v5227_v52 = vadd.f32 0.00028619796, %v5226_v58 }
 0x986   : > { %v15191_v51 = vmul.f32 %v13168_v14, %v15176_v7  ;;  %8313 = vmatpush.bf16.msrb.mxu2 %v9871_v47  ;;  %v7530_v57 = vmul.f32 %v15131_v30, %v7529_v18  ;;  %v15194_v43 = vadd.f32 1.0, %v7565_v31  ;;  %v5360_v26 = vadd.f32 0.014752088, %v5359_v21  ;;  %v4934_v31 = vpop.f32.mrf.mxu3 }
 0x987   : > { %v4886_v20 = vadd.f32 %v4885_v35, %v14916_v61  ;;  %v15198_v3 = vmul.f32 0.5, %v14914_v24  ;;  %v15200_v5 = vadd.f32 1.0, %v5205_v48  ;;  %v5244_v37 = vadd.f32 0.4994258, %v5243_v53  ;;  %v4789_v48 = vpop.f32.mrf.mxu0 }
 0x988   : > { %v5398_v54 = vadd.f32 0.001143296, %v5397_v38  ;;  %v9684_v59 = vclamps-f32 %v7381_v32, 1.0  ;;  %v7421_v29 = vmul.f32 %v7420_v41, %v7396_v56  ;;  %v7515_v15 = vadd.f32 1.1283791, %v7514_v4 }
 0x989   : > { %v7538_v17 = vand.u32 2147483648, %v15086_v45  ;;  %vm7533_vm10 = vweird.f32 %v15131_v30  ;;  %v7553_v58 = vadd.f32 0.18741608, %v7552_v23  ;;  %v5192_v10 = vmul.f32 %v5191_v55, %v14983_v12 }
 0x98a   : > { %v5504_v18 = vmul.f32 %v15191_v51, %v15191_v51  ;;  %v7531_v24 = vadd.f32 %v15131_v30, %v7530_v57  ;;  %10606 = vrcp.f32 %v15194_v43  ;;  %v5361_v21 = vmul.f32 %v5360_v26, %v15112_v63 }
 0x98b   : > { %v15210_v27 = vadd.f32 %v4934_v31, %v4886_v20  ;;  %10608 = vrcp.f32 %v15200_v5  ;;  %v5228_v53 = vmul.f32 %v5227_v52, %v15028_v19  ;;  %v5245_v38 = vmul.f32 %v5244_v37, %v15028_v19 }
 0x98c   : > { %v5399_v35 = vmul.f32 %v5398_v54, %v15163_v40  ;;  %v7720_v47 = vadd.f32 1.0, %v9684_v59  ;;  %v7516_v32 = vmul.f32 %v7515_v15, %v14821_v50  ;;  %vm7532_vm11 = vweird.f32 %v15086_v45 }
 0x98d   : > { %v7536_v56 = vand.u32 2147483647, %v15086_v45  ;;  %v9685_v41 = vclamps-f32 %v7421_v29, 1.0  ;;  %vm15221_vm12 = vmor %vm7532_vm11, %vm7533_vm10  ;;  %v7554_v23 = vmul.f32 %v7553_v58, %v14979_v2  ;;  %v15226_v55 = vmin.f32 %v5504_v18, 16.0  ;;  %v4838_v58 = vpop.f32.mrf.mxu1 }
 0x98e   : > { %v4790_v52 = vadd.f32 %v4789_v48, %v14874_v46  ;;  %v7535_v50 = vsel %vm15221_vm12, %v15131_v30, %v7531_v24  ;;  %v5193_v57 = vadd.f32 0.18741608, %v5192_v10  ;;  %v5362_v26 = vadd.f32 0.112945676, %v5361_v21 }
 0x98f   : > { %v15234_v45 = vmul.f32 %v13168_v14, %v15210_v27  ;;  %v7539_v20 = vor.u32 1.1754944e-38, %v7538_v17  ;;  %v5229_v37 = vadd.f32 0.0036580483, %v5228_v53  ;;  %v15236_v54 = vadd.f32 1.0, %v5245_v38 }
 0x990   : > { %v5400_v59 = vadd.f32 0.014752088, %v5399_v35  ;;  %v15238_v2 = vpop.eup %10606  ;;  %v15241_v29 = vmul.f32 %v7720_v47, %v14894_v42  ;;  %vm7537_vm13 = vcmp.eq.f32.partialorder %v7536_v56, 8.507059e+37  ;;  %v15244_v15 = vmul.f32 0.5, %v14968_v44 }
 0x991   : > { %v5346_v30 = vmul.f32 2.1237322e-06, %v15112_v63  ;;  %v15247_v10 = vpop.eup %10608  ;;  %v7721_v18 = vadd.f32 1.0, %v9685_v41  ;;  %v7540_v17 = vsel %vm7537_vm13, %v7539_v20, %v7535_v50  ;;  %v5517_v31 = vmul.f32 3.8918573e-05, %v15226_v55 }
 0x992   : > { %17795 = vst [vmem:[#allocation73_spill] sm:$0xff] %v15241_v29  ;;  %v15250_v24 = vadd.f32 %v4838_v58, %v4790_v52  ;;  %v7555_v21 = vadd.f32 1.1283791, %v7554_v23  ;;  %v5194_v48 = vmul.f32 %v5193_v57, %v14983_v12  ;;  %v5363_v42 = vmul.f32 %v5362_v26, %v15112_v63 }
 0x993   : > { %v5544_v44 = vmul.f32 %v15234_v45, %v15234_v45  ;;  %v7578_v53 = vand.u32 2147483648, %v15194_v43  ;;  %v5230_v38 = vmul.f32 %v5229_v37, %v15028_v19  ;;  %10610 = vrcp.f32 %v15236_v54 }
 0x994   : > { %17796 = vst [vmem:[#allocation53_spill] sm:$0xff] %v15250_v24  ;;  %v5401_v35 = vmul.f32 %v5400_v59, %v15163_v40  ;;  %v15260_v47 = vmul.f32 %v7540_v17, %v7516_v32  ;;  %v7568_v56 = vmul.f32 %v15238_v2, %v15194_v43  ;;  %v5208_v12 = vmul.f32 %v15247_v10, %v15200_v5 }
 0x995   : > { %v5347_v41 = vadd.f32 0.00028619796, %v5346_v30  ;;  %v15267_v4 = vmul.f32 %v7721_v18, %v15049_v8  ;;  %v7576_v23 = vand.u32 2147483647, %v15194_v43  ;;  %v5518_v52 = vadd.f32 0.001143296, %v5517_v31 }
 0x996   : > { %v15272_v50 = vmul.f32 %v13168_v14, %v15250_v24  ;;  %v15275_v32 = vmul.f32 %v7555_v21, %v14937_v62  ;;  %v5195_v57 = vadd.f32 1.1283791, %v5194_v48  ;;  %v5364_v26 = vadd.f32 0.4994258, %v5363_v42  ;;  %v10207_v42 = vld [vmem:[#allocation16 + $0x1e4] sm:$0xf0] }
 0x997   : > { %17797 = vst [vmem:[#allocation72_spill] sm:$0xff] %v15267_v4  ;;  %v15277_v20 = vmin.f32 %v5544_v44, 16.0  ;;  %v15279_v37 = vor.u32 1.1754944e-38, %v7578_v53  ;;  %v5231_v59 = vadd.f32 0.05243302, %v5230_v38  ;;  %v15282_v8 = vmul.f32 0.5, %v15057_v60  ;;  %v4887_v44 = vpop.f32.mrf.mxu2 }
 0x998   : > { %v5402_v30 = vadd.f32 0.112945676, %v5401_v35  ;;  %v9688_v58 = vclamps-f32 %v15260_v47, 1.0  ;;  %v7569_v18 = vsub.f32 1.0, %v7568_v56  ;;  %v5209_v17 = vsub.f32 1.0, %v5208_v12 }
 0x999   : > { %v5348_v31 = vmul.f32 %v5347_v41, %v15112_v63  ;;  %v15286_v4 = vpop.eup %10610  ;;  %vm7572_vm14 = vweird.f32 %v15194_v43  ;;  %v5386_v62 = vmul.f32 2.1237322e-06, %v15163_v40  ;;  %v5519_v21 = vmul.f32 %v5518_v52, %v15226_v55  ;;  %v9934_v60 = vld [vmem:[#allocation16 + $0x1e0] sm:$0xf] }
 0x99a   : > { %v5664_v48 = vmul.f32 %v15272_v50, %v15272_v50  ;;  %v15294_v53 = vmul.f32 %v5195_v57, %v14947_v25  ;;  %v5365_v38 = vmul.f32 %v5364_v26, %v15112_v63  ;;  %v5557_v35 = vmul.f32 3.8918573e-05, %v15277_v20  ;;  %v4936_v26 = vpop.f32.mrf.mxu3 }
 0x99b   : > { %v9935_v47 = vor.u32 %v10207_v42, %v9934_v60  ;;  %vm5212_vm15 = vweird.f32 %v15200_v5  ;;  %v5216_v56 = vand.u32 2147483647, %v15200_v5  ;;  %v5403_v12 = vmul.f32 %v5402_v30, %v15163_v40 }
 0x99c   : > { %v4888_v41 = vadd.f32 %v4887_v44, %v14916_v61  ;;  %v7570_v52 = vmul.f32 %v15238_v2, %v7569_v18  ;;  %v5210_v29 = vmul.f32 %v15247_v10, %v5209_v17  ;;  %v5248_v25 = vmul.f32 %v15286_v4, %v15236_v54 }
 0x99d   : > { %v5349_v57 = vadd.f32 0.0036580483, %v5348_v31  ;;  %8362 = vmatpush.bf16.msrb.mxu3 %v9935_v47  ;;  %v5387_v1 = vadd.f32 0.00028619796, %v5386_v62  ;;  %v5520_v60 = vadd.f32 0.014752088, %v5519_v21  ;;  %v5232_v17 = vmul.f32 %v5231_v59, %v15028_v19 }
 0x99e   : > { %v15306_v42 = vmin.f32 %v5664_v48, 16.0  ;;  %v15308_v28 = vadd.f32 %v4936_v26, %v4888_v41  ;;  %vm15310_vm0 = vcmp.eq.f32.partialorder %v7576_v23, 8.507059e+37  ;;  %v5218_v18 = vand.u32 2147483648, %v15200_v5 }
 0x99f   : > { %v15316_v44 = vadd.f32 1.0, %v5365_v38  ;;  %v5558_v39 = vadd.f32 0.001143296, %v5557_v35  ;;  %vm7573_vm1 = vweird.f32 %v15238_v2  ;;  %vm5213_vm2 = vweird.f32 %v15247_v10 }
 0x9a0   : > { %17798 = vst [vmem:[#allocation79_spill] sm:$0xff] %v15308_v28  ;;  %v5404_v31 = vadd.f32 0.4994258, %v5403_v12  ;;  %v15322_v62 = vmul.f32 %v13168_v14, %v15308_v28  ;;  %v7571_v23 = vadd.f32 %v15238_v2, %v7570_v52  ;;  %v5211_v21 = vadd.f32 %v15247_v10, %v5210_v29  ;;  %vm15334_vm3 = vmor %vm7572_vm14, %vm7573_vm1 }
 0x9a1   : > { %v5249_v48 = vsub.f32 1.0, %v5248_v25  ;;  %v5350_v47 = vmul.f32 %v5349_v57, %v15112_v63  ;;  %v5388_v59 = vmul.f32 %v5387_v1, %v15163_v40  ;;  %v5521_v38 = vmul.f32 %v5520_v60, %v15226_v55  ;;  %vm15345_vm4 = vmor %vm5212_vm15, %vm5213_vm2 }
 0x9a2   : > { %17801 = vst [vmem:[#allocation75_spill] sm:$0xff] %v15322_v62  ;;  %v5677_v35 = vmul.f32 3.8918573e-05, %v15306_v42  ;;  %v5704_v12 = vmul.f32 %v15322_v62, %v15322_v62  ;;  %v7724_v41 = vadd.f32 1.0, %v9688_v58  ;;  %10612 = vrcp.f32 %v15316_v44 }
 0x9a3   : > { %v5506_v29 = vmul.f32 2.1237322e-06, %v15226_v55  ;;  %v5559_v1 = vmul.f32 %v5558_v39, %v15277_v20  ;;  %vm15349_vm5 = vcmp.eq.f32.partialorder %v5216_v56, 8.507059e+37  ;;  %v5233_v58 = vadd.f32 0.18741608, %v5232_v17 }
 0x9a4   : > { %v5405_v25 = vmul.f32 %v5404_v31, %v15163_v40  ;;  %v15354_v57 = vmin.f32 %v5704_v12, 16.0  ;;  %v7575_v39 = vsel %vm15334_vm3, %v15238_v2, %v7571_v23  ;;  %v5215_v5 = vsel %vm15345_vm4, %v15247_v10, %v5211_v21 }
 0x9a5   : > { %v5219_v60 = vor.u32 1.1754944e-38, %v5218_v18  ;;  %v5351_v36 = vadd.f32 0.05243302, %v5350_v47  ;;  %v5250_v56 = vmul.f32 %v15286_v4, %v5249_v48  ;;  %v5389_v28 = vadd.f32 0.0036580483, %v5388_v59 }
 0x9a6   : > { %v5522_v24 = vadd.f32 0.112945676, %v5521_v38  ;;  %v5678_v62 = vadd.f32 0.001143296, %v5677_v35  ;;  %v15364_v17 = vmul.f32 %v7724_v41, %v15074_v6  ;;  %v5507_v31 = vadd.f32 0.00028619796, %v5506_v29 }
 0x9a7   : > { %v5560_v12 = vadd.f32 0.014752088, %v5559_v1  ;;  %v15368_v26 = vpack.c.bf16 %v14682_v33, %v14623_v22  ;;  %v7580_v2 = vsel %vm15310_vm0, %v15279_v37, %v7575_v39  ;;  %v5234_v10 = vmul.f32 %v5233_v58, %v15028_v19 }
 0x9a8   : > { %v15374_v18 = vadd.f32 1.0, %v5405_v25  ;;  %v5717_v23 = vmul.f32 3.8918573e-05, %v15354_v57  ;;  %v15377_v21 = vpop.eup %10612  ;;  %v5220_v6 = vsel %vm15349_vm5, %v5219_v60, %v5215_v5  ;;  %vm5252_vm6 = vweird.f32 %v15236_v54 }
 0x9a9   : > { %17808 = vst [vmem:[#allocation52_spill] sm:$0xff] %v15368_v26  ;;  %vm5253_vm7 = vweird.f32 %v15286_v4  ;;  %v5352_v22 = vmul.f32 %v5351_v36, %v15112_v63  ;;  %8242 = vmatmul.bf16.gmra.mxu0 %v15368_v26  ;;  %v5251_v33 = vadd.f32 %v15286_v4, %v5250_v56  ;;  %v5390_v19 = vmul.f32 %v5389_v28, %v15163_v40  ;;  %v17856_v26 = vld [vmem:[#allocation59_spill] sm:$0xff] }
 0x9aa   : > { %v5523_v37 = vmul.f32 %v5522_v24, %v15226_v55  ;;  %v5679_v30 = vmul.f32 %v5678_v62, %v15306_v42  ;;  %v7581_v48 = vmul.f32 %v7580_v2, %v15275_v32  ;;  %v5258_v47 = vand.u32 2147483648, %v15236_v54  ;;  %vm15402_vm8 = vmor %vm5252_vm6, %vm5253_vm7 }
 0x9ab   : > { %v5508_v59 = vmul.f32 %v5507_v31, %v15226_v55  ;;  %v5561_v38 = vmul.f32 %v5560_v12, %v15277_v20  ;;  %v5256_v36 = vand.u32 2147483647, %v15236_v54  ;;  %v5368_v35 = vmul.f32 %v15377_v21, %v15316_v44  ;;  %v4792_v12 = vpop.f32.mrf.mxu0 }
 0x9ac   : > { %10614 = vrcp.f32 %v15374_v18  ;;  %v5718_v28 = vadd.f32 0.001143296, %v5717_v23  ;;  %v5221_v24 = vmul.f32 %v5220_v6, %v15294_v53  ;;  %v5235_v41 = vadd.f32 1.1283791, %v5234_v10 }
 0x9ad   : > { %v5353_v62 = vadd.f32 0.18741608, %v5352_v22  ;;  %v15408_v29 = vpack.c.bf16 %v14690_v13, %v14635_v49  ;;  %v5255_v1 = vsel %vm15402_vm8, %v15286_v4, %v5251_v33  ;;  %v5391_v52 = vadd.f32 0.05243302, %v5390_v19  ;;  %v4841_v19 = vpop.f32.mrf.mxu1 }
 0x9ae   : > { %v5524_v53 = vadd.f32 0.4994258, %v5523_v37  ;;  %v5680_v43 = vadd.f32 0.014752088, %v5679_v30  ;;  %v9689_v58 = vclamps-f32 %v7581_v48, 1.0  ;;  %v5259_v25 = vor.u32 1.1754944e-38, %v5258_v47 }
 0x9af   : > { %17811 = vst [vmem:[#allocation80_spill] sm:$0xff] %v15408_v29  ;;  %v5509_v39 = vadd.f32 0.0036580483, %v5508_v59  ;;  %v5562_v54 = vadd.f32 0.112945676, %v5561_v38  ;;  %8291 = vmatmul.bf16.gmra.mxu1 %v15408_v29  ;;  %vm5257_vm9 = vcmp.eq.f32.partialorder %v5256_v36, 8.507059e+37  ;;  %v5719_v49 = vmul.f32 %v5718_v28, %v15354_v57 }
 0x9b0   : > { %v5369_v5 = vsub.f32 1.0, %v5368_v35  ;;  %v15415_v60 = vmul.f32 0.5, %v15100_v0  ;;  %v9630_v13 = vclamps-f32 %v5221_v24, 1.0  ;;  %v5236_v56 = vmul.f32 %v5235_v41, %v14987_v34 }
 0x9b1   : > { %v5260_v4 = vsel %vm5257_vm9, %v5259_v25, %v5255_v1  ;;  %v5354_v31 = vmul.f32 %v5353_v62, %v15112_v63  ;;  %v5392_v10 = vmul.f32 %v5391_v52, %v15163_v40  ;;  %v5525_v23 = vmul.f32 %v5524_v53, %v15226_v55 }
 0x9b2   : > { %v15420_v2 = vpop.eup %10614  ;;  %v5681_v6 = vmul.f32 %v5680_v43, %v15306_v42  ;;  %v4793_v0 = vadd.f32 %v4792_v12, %v14874_v46  ;;  %v15426_v22 = vadd.f32 1.0, %v9689_v58  ;;  %v15429_v33 = vmul.f32 0.5, %v15176_v7 }
 0x9b3   : > { %v5510_v34 = vmul.f32 %v5509_v39, %v15226_v55  ;;  %v5563_v63 = vmul.f32 %v5562_v54, %v15277_v20  ;;  %v5370_v37 = vmul.f32 %v15377_v21, %v5369_v5  ;;  %v5546_v30 = vmul.f32 2.1237322e-06, %v15277_v20 }
 0x9b4   : > { %v5720_v48 = vadd.f32 0.014752088, %v5719_v49  ;;  %v15435_v47 = vadd.f32 %v4841_v19, %v4793_v0  ;;  %v5261_v59 = vmul.f32 %v5260_v4, %v5236_v56  ;;  %v5355_v38 = vadd.f32 1.1283791, %v5354_v31 }
 0x9b5   : > { %v5376_v36 = vand.u32 2147483647, %v15316_v44  ;;  %v5408_v7 = vmul.f32 %v15420_v2, %v15374_v18  ;;  %v15440_v35 = vadd.f32 1.0, %v9630_v13  ;;  %v5393_v28 = vadd.f32 0.18741608, %v5392_v10 }
 0x9b6   : > { %v15442_v24 = vadd.f32 1.0, %v5525_v23  ;;  %v5682_v41 = vadd.f32 0.112945676, %v5681_v6  ;;  %v5511_v32 = vadd.f32 0.05243302, %v5510_v34  ;;  %v15447_v52 = vmul.f32 %v13168_v14, %v15435_v47 }
 0x9b7   : > { %v5564_v62 = vadd.f32 0.4994258, %v5563_v63  ;;  %v5666_v1 = vmul.f32 2.1237322e-06, %v15306_v42  ;;  %v5371_v53 = vadd.f32 %v15377_v21, %v5370_v37  ;;  %vm5373_vm10 = vweird.f32 %v15377_v21 }
 0x9b8   : > { %v5547_v43 = vadd.f32 0.00028619796, %v5546_v30  ;;  %v5721_v58 = vmul.f32 %v5720_v48, %v15354_v57  ;;  %v9631_v25 = vclamps-f32 %v5261_v59, 1.0  ;;  %v5378_v39 = vand.u32 2147483648, %v15316_v44 }
 0x9b9   : > { %v5409_v54 = vsub.f32 1.0, %v5408_v7  ;;  %v5824_v5 = vmul.f32 %v15447_v52, %v15447_v52  ;;  %vm5372_vm11 = vweird.f32 %v15316_v44  ;;  %v5394_v49 = vmul.f32 %v5393_v28, %v15163_v40 }
 0x9ba   : > { %10616 = vrcp.f32 %v15442_v24  ;;  %v5683_v13 = vmul.f32 %v5682_v41, %v15306_v42  ;;  %vm15459_vm12 = vmor %vm5372_vm11, %vm5373_vm10  ;;  %vm15463_vm13 = vcmp.eq.f32.partialorder %v5376_v36, 8.507059e+37  ;;  %v5512_v31 = vmul.f32 %v5511_v32, %v15226_v55  ;;  %v4890_v41 = vpop.f32.mrf.mxu2 }
 0x9bb   : > { %v5565_v12 = vmul.f32 %v5564_v62, %v15277_v20  ;;  %v5667_v10 = vadd.f32 0.00028619796, %v5666_v1  ;;  %v5375_v40 = vsel %vm15459_vm12, %v15377_v21, %v5371_v53  ;;  %v5418_v44 = vand.u32 2147483648, %v15374_v18 }
 0x9bc   : > { %v5548_v23 = vmul.f32 %v5547_v43, %v15277_v20  ;;  %v5722_v6 = vadd.f32 0.112945676, %v5721_v58  ;;  %v7667_v0 = vadd.f32 1.0, %v9631_v25  ;;  %v5379_v34 = vor.u32 1.1754944e-38, %v5378_v39  ;;  %v4939_v58 = vpop.f32.mrf.mxu3  ;;  %v9862_v25 = vld [vmem:[#allocation16 + $0x150] sm:$0xf] }
 0x9bd   : > { %v5410_v63 = vmul.f32 %v15420_v2, %v5409_v54  ;;  %v15475_v19 = vmin.f32 %v5824_v5, 16.0  ;;  %v5356_v37 = vmul.f32 %v5355_v38, %v15078_v11  ;;  %v5395_v30 = vadd.f32 1.1283791, %v5394_v49  ;;  %v10189_v39 = vld [vmem:[#allocation16 + $0x154] sm:$0xf0]  ;;  %v4794_v54 = vpop.f32.mrf.mxu0 }
 0x9be   : > { %v5416_v48 = vand.u32 2147483647, %v15374_v18  ;;  %v5684_v59 = vadd.f32 0.4994258, %v5683_v13  ;;  %v5380_v21 = vsel %vm15463_vm13, %v5379_v34, %v5375_v40  ;;  %v5513_v36 = vadd.f32 0.18741608, %v5512_v31 }
 0x9bf   : > { %v15481_v7 = vadd.f32 1.0, %v5565_v12  ;;  %v5668_v28 = vmul.f32 %v5667_v10, %v15306_v42  ;;  %v5419_v62 = vor.u32 1.1754944e-38, %v5418_v44  ;;  %v5549_v1 = vadd.f32 0.0036580483, %v5548_v23  ;;  %v4843_v10 = vpop.f32.mrf.mxu1 }
 0x9c0   : > { %v15484_v32 = vpop.eup %10616  ;;  %v5723_v53 = vmul.f32 %v5722_v6, %v15354_v57  ;;  %v4891_v11 = vadd.f32 %v4890_v41, %v14916_v61  ;;  %v5411_v38 = vadd.f32 %v15420_v2, %v5410_v63  ;;  %vm5412_vm14 = vweird.f32 %v15374_v18 }
 0x9c1   : > { %vm5413_vm15 = vweird.f32 %v15420_v2  ;;  %v5837_v43 = vmul.f32 3.8918573e-05, %v15475_v19  ;;  %v5685_v5 = vmul.f32 %v5684_v59, %v15306_v42  ;;  %v9863_v13 = vor.u32 %v10189_v39, %v9862_v25 }
 0x9c2   : > { %v15493_v49 = vadd.f32 %v4939_v58, %v4891_v11  ;;  %v4795_v56 = vadd.f32 %v4794_v54, %v14874_v46  ;;  %v5381_v4 = vmul.f32 %v5380_v21, %v5356_v37  ;;  %v5528_v31 = vmul.f32 %v15484_v32, %v15442_v24  ;;  %vm15503_vm0 = vmor %vm5412_vm14, %vm5413_vm15  ;;  %v9854_v21 = vld [vmem:[#allocation16 + $0x140] sm:$0xf]  ;;  %v9926_v58 = vld [vmem:[#allocation16 + $0x1d0] sm:$0xf] }
 0x9c3   : > { %10618 = vrcp.f32 %v15481_v7  ;;  %v5669_v12 = vadd.f32 0.0036580483, %v5668_v28  ;;  %v5706_v44 = vmul.f32 2.1237322e-06, %v15354_v57  ;;  %v5724_v23 = vadd.f32 0.4994258, %v5723_v53  ;;  %8314 = vmatpush.bf16.msrb.mxu2 %v9863_v13 }
 0x9c4   : > { %v15510_v6 = vmul.f32 %v13168_v14, %v15493_v49  ;;  %v15512_v34 = vadd.f32 %v4843_v10, %v4795_v56  ;;  %v15516_v63 = vmul.f32 %v15426_v22, %v15127_v9  ;;  %v15520_v18 = vmul.f32 %v15440_v35, %v15198_v3  ;;  %v10187_v28 = vld [vmem:[#allocation16 + $0x144] sm:$0xf0] }
 0x9c5   : > { %v5415_v37 = vsel %vm15503_vm0, %v15420_v2, %v5411_v38  ;;  %v5838_v59 = vadd.f32 0.001143296, %v5837_v43  ;;  %v5550_v41 = vmul.f32 %v5549_v1, %v15277_v20  ;;  %v15526_v53 = vadd.f32 1.0, %v5685_v5  ;;  %v10205_v43 = vld [vmem:[#allocation16 + $0x1d4] sm:$0xf0]  ;;  %v4892_v5 = vpop.f32.mrf.mxu2 }
 0x9c6   : > { %v5864_v11 = vmul.f32 %v15510_v6, %v15510_v6  ;;  %v9855_v9 = vor.u32 %v10187_v28, %v9854_v21  ;;  %v9634_v22 = vclamps-f32 %v5381_v4, 1.0  ;;  %vm5417_vm1 = vcmp.eq.f32.partialorder %v5416_v48, 8.507059e+37 }
 0x9c7   : > { %v5514_v3 = vmul.f32 %v5513_v36, %v15226_v55  ;;  %v5529_v35 = vsub.f32 1.0, %v5528_v31  ;;  %v15532_v25 = vmul.f32 %v7667_v0, %v15244_v15  ;;  %v5420_v2 = vsel %vm5417_vm1, %v5419_v62, %v5415_v37 }
 0x9c8   : > { %v5670_v38 = vmul.f32 %v5669_v12, %v15306_v42  ;;  %v15537_v1 = vmul.f32 %v13168_v14, %v15512_v34  ;;  %8315 = vmatpush.bf16.msrb.mxu2 %v9855_v9  ;;  %v5707_v54 = vadd.f32 0.00028619796, %v5706_v44  ;;  %v5725_v48 = vmul.f32 %v5724_v23, %v15354_v57 }
 0x9c9   : > { %v15539_v39 = vpop.eup %10618  ;;  %v5839_v55 = vmul.f32 %v5838_v59, %v15475_v19  ;;  %v9927_v36 = vor.u32 %v10205_v43, %v9926_v58  ;;  %v5396_v15 = vmul.f32 %v5395_v30, %v15116_v16  ;;  %v5551_v0 = vadd.f32 0.05243302, %v5550_v41 }
 0x9ca   : > { %10620 = vrcp.f32 %v15526_v53  ;;  %v15545_v62 = vmin.f32 %v5864_v11, 16.0  ;;  %v7670_v13 = vadd.f32 1.0, %v9634_v22  ;;  %v5515_v56 = vadd.f32 1.1283791, %v5514_v3 }
 0x9cb   : > { %v5530_v4 = vmul.f32 %v15484_v32, %v5529_v35  ;;  %v15549_v31 = vmul.f32 0.5, %v15210_v27  ;;  %8363 = vmatpush.bf16.msrb.mxu3 %v9927_v36  ;;  %v5421_v12 = vmul.f32 %v5420_v2, %v5396_v15  ;;  %v5568_v10 = vmul.f32 %v15539_v39, %v15481_v7  ;;  %v4941_v2 = vpop.f32.mrf.mxu3 }
 0x9cc   : > { %v5671_v40 = vadd.f32 0.05243302, %v5670_v38  ;;  %v5984_v16 = vmul.f32 %v15537_v1, %v15537_v1  ;;  %v5708_v30 = vmul.f32 %v5707_v54, %v15354_v57  ;;  %v15556_v44 = vadd.f32 1.0, %v5725_v48 }
 0x9cd   : > { %v5840_v23 = vadd.f32 0.014752088, %v5839_v55  ;;  %v4893_v37 = vadd.f32 %v4892_v5, %v14916_v61  ;;  %v5536_v59 = vand.u32 2147483647, %v15442_v24  ;;  %v5538_v27 = vand.u32 2147483648, %v15442_v24 }
 0x9ce   : > { %v5552_v21 = vmul.f32 %v5551_v0, %v15277_v20  ;;  %v5877_v28 = vmul.f32 3.8918573e-05, %v15545_v62  ;;  %v7734_v41 = vmul.f32 %v7670_v13, %v15282_v8  ;;  %v5531_v11 = vadd.f32 %v15484_v32, %v5530_v4  ;;  %v9846_v4 = vld [vmem:[#allocation16 + $0x130] sm:$0xf] }
 0x9cf   : > { %vm5532_vm2 = vweird.f32 %v15442_v24  ;;  %vm5533_vm3 = vweird.f32 %v15484_v32  ;;  %v9635_v22 = vclamps-f32 %v5421_v12, 1.0  ;;  %v5569_v3 = vsub.f32 1.0, %v5568_v10  ;;  %v10185_v12 = vld [vmem:[#allocation16 + $0x134] sm:$0xf0] }
 0x9d0   : > { %v15567_v9 = vpop.eup %10620  ;;  %v5672_v35 = vmul.f32 %v5671_v40, %v15306_v42  ;;  %v15570_v58 = vmin.f32 %v5984_v16, 16.0  ;;  %v5709_v38 = vadd.f32 0.0036580483, %v5708_v30  ;;  %10622 = vrcp.f32 %v15556_v44  ;;  %vm15576_vm4 = vmor %vm5532_vm2, %vm5533_vm3 }
 0x9d1   : > { %v5841_v8 = vmul.f32 %v5840_v23, %v15475_v19  ;;  %v15574_v43 = vadd.f32 %v4941_v2, %v4893_v37  ;;  %vm15580_vm5 = vcmp.eq.f32.partialorder %v5536_v59, 8.507059e+37  ;;  %v5539_v48 = vor.u32 1.1754944e-38, %v5538_v27 }
 0x9d2   : > { %v5553_v55 = vadd.f32 0.18741608, %v5552_v21  ;;  %v5878_v36 = vadd.f32 0.001143296, %v5877_v28  ;;  %v5516_v15 = vmul.f32 %v5515_v56, %v15191_v51  ;;  %v5535_v0 = vsel %vm15576_vm4, %v15484_v32, %v5531_v11 }
 0x9d3   : > { %v5688_v5 = vmul.f32 %v15567_v9, %v15526_v53  ;;  %v5826_v13 = vmul.f32 2.1237322e-06, %v15475_v19  ;;  %v15592_v10 = vpack.c.bf16 %v7734_v41, %v15520_v18  ;;  %v5570_v40 = vmul.f32 %v15539_v39, %v5569_v3 }
 0x9d4   : > { %v5673_v16 = vadd.f32 0.18741608, %v5672_v35  ;;  %v5997_v30 = vmul.f32 3.8918573e-05, %v15570_v58  ;;  %v7671_v51 = vadd.f32 1.0, %v9635_v22  ;;  %v5710_v56 = vmul.f32 %v5709_v38, %v15354_v57 }
 0x9d5   : > { %17822 = vst [vmem:[#allocation61_spill] sm:$0xff] %v15592_v10  ;;  %v5842_v23 = vadd.f32 0.112945676, %v5841_v8  ;;  %v15599_v32 = vmul.f32 %v13168_v14, %v15574_v43  ;;  %v5540_v37 = vsel %vm15580_vm5, %v5539_v48, %v5535_v0  ;;  %v5554_v59 = vmul.f32 %v5553_v55, %v15277_v20 }
 0x9d6   : > { %v5879_v18 = vmul.f32 %v5878_v36, %v15545_v62  ;;  %v9847_v27 = vor.u32 %v10185_v12, %v9846_v4  ;;  %v15605_v21 = vpop.eup %10622  ;;  %v5576_v28 = vand.u32 2147483647, %v15481_v7  ;;  %v5578_v41 = vand.u32 2147483648, %v15481_v7 }
 0x9d7   : > { %v5689_v11 = vsub.f32 1.0, %v5688_v5  ;;  %v5827_v22 = vadd.f32 0.00028619796, %v5826_v13  ;;  %v5571_v3 = vadd.f32 %v15539_v39, %v5570_v40  ;;  %vm5573_vm6 = vweird.f32 %v15539_v39 }
 0x9d8   : > { %v5674_v35 = vmul.f32 %v5673_v16, %v15306_v42  ;;  %v5998_v2 = vadd.f32 0.001143296, %v5997_v30  ;;  %8316 = vmatpush.bf16.msrb.mxu2 %v9847_v27  ;;  %v15613_v20 = vmul.f32 %v7671_v51, %v15415_v60  ;;  %v5711_v38 = vadd.f32 0.05243302, %v5710_v56  ;;  %v4797_v42 = vpop.f32.mrf.mxu0 }
 0x9d9   : > { %v5843_v8 = vmul.f32 %v5842_v23, %v15475_v19  ;;  %v6024_v24 = vmul.f32 %v15599_v32, %v15599_v32  ;;  %v15618_v54 = vmul.f32 %v5540_v37, %v5516_v15  ;;  %vm5572_vm7 = vweird.f32 %v15481_v7 }
 0x9da   : > { %v5728_v48 = vmul.f32 %v15605_v21, %v15556_v44  ;;  %v5880_v55 = vadd.f32 0.014752088, %v5879_v18  ;;  %v5555_v36 = vadd.f32 1.1283791, %v5554_v59  ;;  %vm15623_vm8 = vmor %vm5572_vm7, %vm5573_vm6  ;;  %vm15627_vm9 = vcmp.eq.f32.partialorder %v5576_v28, 8.507059e+37 }
 0x9db   : > { %v5690_v5 = vmul.f32 %v15567_v9, %v5689_v11  ;;  %v5828_v15 = vmul.f32 %v5827_v22, %v15475_v19  ;;  %v5575_v7 = vsel %vm15623_vm8, %v15539_v39, %v5571_v3  ;;  %v5579_v13 = vor.u32 1.1754944e-38, %v5578_v41  ;;  %v4846_v22 = vpop.f32.mrf.mxu1  ;;  %v9918_v3 = vld [vmem:[#allocation16 + $0x1c0] sm:$0xf] }
 0x9dc   : > { %v5675_v4 = vadd.f32 1.1283791, %v5674_v35  ;;  %v5999_v12 = vmul.f32 %v5998_v2, %v15570_v58  ;;  %v5712_v40 = vmul.f32 %v5711_v38, %v15354_v57  ;;  %v5844_v16 = vadd.f32 0.4994258, %v5843_v8  ;;  %v10203_v35 = vld [vmem:[#allocation16 + $0x1c4] sm:$0xf0] }
 0x9dd   : > { %v15638_v30 = vmin.f32 %v6024_v24, 16.0  ;;  %v4798_v51 = vadd.f32 %v4797_v42, %v14874_v46  ;;  %v5696_v56 = vand.u32 2147483647, %v15526_v53  ;;  %v5729_v23 = vsub.f32 1.0, %v5728_v48  ;;  %v4895_v48 = vpop.f32.mrf.mxu2 }
 0x9de   : > { %v5866_v37 = vmul.f32 2.1237322e-06, %v15545_v62  ;;  %v5881_v59 = vmul.f32 %v5880_v55, %v15545_v62  ;;  %v5691_v39 = vadd.f32 %v15567_v9, %v5690_v5  ;;  %vm5693_vm10 = vweird.f32 %v15567_v9 }
 0x9df   : > { %v5698_v18 = vand.u32 2147483648, %v15526_v53  ;;  %v5829_v27 = vadd.f32 0.0036580483, %v5828_v15  ;;  %v5556_v28 = vmul.f32 %v5555_v36, %v15234_v45  ;;  %v5580_v41 = vsel %vm15627_vm9, %v5579_v13, %v5575_v7 }
 0x9e0   : > { %vm5692_vm11 = vweird.f32 %v15526_v53  ;;  %v6000_v11 = vadd.f32 0.014752088, %v5999_v12  ;;  %v5713_v2 = vadd.f32 0.18741608, %v5712_v40  ;;  %v5845_v38 = vmul.f32 %v5844_v16, %v15475_v19 }
 0x9e1   : > { %v6037_v8 = vmul.f32 3.8918573e-05, %v15638_v30  ;;  %v15653_v24 = vadd.f32 %v4846_v22, %v4798_v51  ;;  %v5676_v55 = vmul.f32 %v5675_v4, %v15272_v50  ;;  %vm15658_vm12 = vmor %vm5692_vm11, %vm5693_vm10  ;;  %v5730_v53 = vmul.f32 %v15605_v21, %v5729_v23 }
 0x9e2   : > { %v5867_v42 = vadd.f32 0.00028619796, %v5866_v37  ;;  %v5882_v36 = vadd.f32 0.112945676, %v5881_v59  ;;  %v5695_v0 = vsel %vm15658_vm12, %v15567_v9, %v5691_v39  ;;  %vm15666_vm13 = vcmp.eq.f32.partialorder %v5696_v56, 8.507059e+37 }
 0x9e3   : > { %v5699_v5 = vor.u32 1.1754944e-38, %v5698_v18  ;;  %v9919_v50 = vor.u32 %v10203_v35, %v9918_v3  ;;  %v5830_v15 = vmul.f32 %v5829_v27, %v15475_v19  ;;  %v5986_v7 = vmul.f32 2.1237322e-06, %v15570_v58  ;;  %v9838_v37 = vld [vmem:[#allocation16 + $0x120] sm:$0xf]  ;;  %v4944_v27 = vpop.f32.mrf.mxu3 }
 0x9e4   : > { %v6001_v13 = vmul.f32 %v6000_v11, %v15570_v58  ;;  %v4896_v4 = vadd.f32 %v4895_v48, %v14916_v61  ;;  %v5714_v12 = vmul.f32 %v5713_v2, %v15354_v57  ;;  %v15675_v40 = vadd.f32 1.0, %v5845_v38  ;;  %v10183_v59 = vld [vmem:[#allocation16 + $0x124] sm:$0xf0] }
 0x9e5   : > { %v6038_v16 = vadd.f32 0.001143296, %v6037_v8  ;;  %v15679_v9 = vmul.f32 %v13168_v14, %v15653_v24  ;;  %8364 = vmatpush.bf16.msrb.mxu3 %v9919_v50  ;;  %v5731_v51 = vadd.f32 %v15605_v21, %v5730_v53  ;;  %vm5733_vm14 = vweird.f32 %v15605_v21 }
 0x9e6   : > { %v5868_v56 = vmul.f32 %v5867_v42, %v15545_v62  ;;  %v5883_v23 = vmul.f32 %v5882_v36, %v15545_v62  ;;  %v5700_v57 = vsel %vm15666_vm13, %v5699_v5, %v5695_v0  ;;  %vm5732_vm15 = vweird.f32 %v15556_v44 }
 0x9e7   : > { %v5736_v39 = vand.u32 2147483647, %v15556_v44  ;;  %v5738_v18 = vand.u32 2147483648, %v15556_v44  ;;  %v5831_v11 = vadd.f32 0.05243302, %v5830_v15  ;;  %v15690_v35 = vadd.f32 %v4944_v27, %v4896_v4  ;;  %vm15692_vm0 = vmor %vm5732_vm15, %vm5733_vm14 }
 0x9e8   : > { %v5987_v22 = vadd.f32 0.00028619796, %v5986_v7  ;;  %v6002_v3 = vadd.f32 0.112945676, %v6001_v13  ;;  %10624 = vrcp.f32 %v15675_v40  ;;  %v6039_v38 = vmul.f32 %v6038_v16, %v15638_v30 }
 0x9e9   : > { %v6144_v8 = vmul.f32 %v15679_v9, %v15679_v9  ;;  %v9839_v48 = vor.u32 %v10183_v59, %v9838_v37  ;;  %v5715_v45 = vadd.f32 1.1283791, %v5714_v12  ;;  %v5735_v44 = vsel %vm15692_vm0, %v15605_v21, %v5731_v51  ;;  %v17835_v59 = vld [vmem:[#allocation53_spill] sm:$0xff] }
 0x9ea   : > { %v5869_v53 = vadd.f32 0.0036580483, %v5868_v56  ;;  %v5884_v42 = vadd.f32 0.4994258, %v5883_v23  ;;  %v9638_v36 = vclamps-f32 %v15618_v54, 1.0  ;;  %v5581_v0 = vmul.f32 %v5580_v41, %v5556_v28  ;;  %v4799_v54 = vpop.f32.mrf.mxu0  ;;  %v17834_v41 = vld [vmem:[#allocation75_spill] sm:$0xff] }
 0x9eb   : > { %v5739_v60 = vor.u32 1.1754944e-38, %v5738_v18  ;;  %v15706_v5 = vmul.f32 %v13168_v14, %v15690_v35  ;;  %8317 = vmatpush.bf16.msrb.mxu2 %v9839_v48  ;;  %v5701_v50 = vmul.f32 %v5700_v57, %v5676_v55  ;;  %vm5737_vm1 = vcmp.eq.f32.partialorder %v5736_v39, 8.507059e+37 }
 0x9ec   : > { %v5832_v15 = vmul.f32 %v5831_v11, %v15475_v19  ;;  %v6003_v7 = vmul.f32 %v6002_v3, %v15570_v58  ;;  %v5988_v21 = vmul.f32 %v5987_v22, %v15570_v58  ;;  %v6040_v4 = vadd.f32 0.014752088, %v6039_v38 }
 0x9ed   : > { %v5740_v13 = vsel %vm5737_vm1, %v5739_v60, %v5735_v44  ;;  %v15711_v12 = vmin.f32 %v6144_v8, 16.0  ;;  %v15715_v28 = vpack.c.bf16 %v15613_v20, %v15532_v25  ;;  %v5716_v16 = vmul.f32 %v5715_v45, %v17834_v41  ;;  %v4848_v60 = vpop.f32.mrf.mxu1 }
 0x9ee   : > { %v5870_v55 = vmul.f32 %v5869_v53, %v15545_v62  ;;  %v5885_v51 = vmul.f32 %v5884_v42, %v15545_v62  ;;  %v15720_v56 = vpop.eup %10624  ;;  %v7674_v23 = vadd.f32 1.0, %v9638_v36  ;;  %v9639_v37 = vclamps-f32 %v5581_v0, 1.0  ;;  %v17836_v53 = vld [vmem:[#allocation79_spill] sm:$0xff] }
 0x9ef   : > { %17833 = vst [vmem:[#allocation65_spill] sm:$0xff] %v15715_v28  ;;  %v4983_v57 = vmul.f32 0.5, %v17835_v59  ;;  %v6184_v39 = vmul.f32 %v15706_v5, %v15706_v5  ;;  %v9642_v18 = vclamps-f32 %v5701_v50, 1.0  ;;  %v5741_v27 = vmul.f32 %v5740_v13, %v5716_v16 }
 0x9f0   : > { %v6004_v11 = vadd.f32 0.4994258, %v6003_v7  ;;  %v4800_v25 = vadd.f32 %v4799_v54, %v14874_v46  ;;  %v5833_v20 = vadd.f32 0.18741608, %v5832_v15  ;;  %v5989_v22 = vadd.f32 0.0036580483, %v5988_v21 }
 0x9f1   : > { %v6041_v3 = vmul.f32 %v6040_v4, %v15638_v30  ;;  %v6157_v2 = vmul.f32 3.8918573e-05, %v15711_v12  ;;  %v5848_v38 = vmul.f32 %v15720_v56, %v15675_v40  ;;  %v5871_v8 = vadd.f32 0.05243302, %v5870_v55  ;;  %v9910_v21 = vld [vmem:[#allocation16 + $0x1b0] sm:$0xf] }
 0x9f2   : > { %v15730_v48 = vadd.f32 1.0, %v5885_v51  ;;  %v6026_v45 = vmul.f32 2.1237322e-06, %v15638_v30  ;;  %v7675_v44 = vadd.f32 1.0, %v9639_v37  ;;  %v4984_v42 = vmul.f32 0.5, %v17836_v53 }
 0x9f3   : > { %v15735_v36 = vmul.f32 0.5, %v15435_v47  ;;  %v15737_v0 = vmin.f32 %v6184_v39, 16.0  ;;  %v7678_v50 = vadd.f32 1.0, %v9642_v18  ;;  %v9643_v15 = vclamps-f32 %v5741_v27, 1.0  ;;  %v10201_v4 = vld [vmem:[#allocation16 + $0x1b4] sm:$0xf0] }
 0x9f4   : > { %v6005_v7 = vmul.f32 %v6004_v11, %v15570_v58  ;;  %v15740_v13 = vadd.f32 %v4848_v60, %v4800_v25  ;;  %v5834_v54 = vmul.f32 %v5833_v20, %v15475_v19  ;;  %v5990_v41 = vmul.f32 %v5989_v22, %v15570_v58  ;;  %v9830_v51 = vld [vmem:[#allocation16 + $0x110] sm:$0xf]  ;;  %v10181_v39 = vld [vmem:[#allocation16 + $0x114] sm:$0xf0]  ;;  %v9902_v25 = vld [vmem:[#allocation16 + $0x1a0] sm:$0xf] }
 0x9f5   : > { %v6042_v16 = vadd.f32 0.112945676, %v6041_v3  ;;  %v6158_v55 = vadd.f32 0.001143296, %v6157_v2  ;;  %v5849_v47 = vsub.f32 1.0, %v5848_v38  ;;  %v5872_v37 = vmul.f32 %v5871_v8, %v15545_v62 }
 0x9f6   : > { %10626 = vrcp.f32 %v15730_v48  ;;  %v6027_v59 = vadd.f32 0.00028619796, %v6026_v45  ;;  %v15747_v18 = vmul.f32 %v7674_v23, %v15429_v33  ;;  %v15750_v27 = vmul.f32 %v7675_v44, %v15549_v31  ;;  %v10199_v20 = vld [vmem:[#allocation16 + $0x1a4] sm:$0xf0] }
 0x9f7   : > { %v6197_v19 = vmul.f32 3.8918573e-05, %v15737_v0  ;;  %v9911_v11 = vor.u32 %v10201_v4, %v9910_v21  ;;  %v15753_v22 = vmul.f32 %v7678_v50, %v4983_v57  ;;  %v7679_v3 = vadd.f32 1.0, %v9643_v15 }
 0x9f8   : > { %v15755_v2 = vadd.f32 1.0, %v6005_v7  ;;  %v15759_v38 = vmul.f32 %v13168_v14, %v15740_v13  ;;  %v5835_v8 = vadd.f32 1.1283791, %v5834_v54  ;;  %v6043_v33 = vmul.f32 %v6042_v16, %v15638_v30  ;;  %v9822_v16 = vld [vmem:[#allocation16 + $0x100] sm:$0xf] }
 0x9f9   : > { %v6159_v31 = vmul.f32 %v6158_v55, %v15711_v12  ;;  %8365 = vmatpush.bf16.msrb.mxu3 %v9911_v11  ;;  %v9831_v23 = vor.u32 %v10181_v39, %v9830_v51  ;;  %v5873_v45 = vadd.f32 0.18741608, %v5872_v37  ;;  %v5991_v44 = vadd.f32 0.05243302, %v5990_v41  ;;  %v4897_v37 = vpop.f32.mrf.mxu2  ;;  %v9894_v11 = vld [vmem:[#allocation16 + $0x190] sm:$0xf] }
 0x9fa   : > { %v6028_v53 = vmul.f32 %v6027_v59, %v15638_v30  ;;  %v9903_v57 = vor.u32 %v10199_v20, %v9902_v25  ;;  %v5850_v60 = vmul.f32 %v15720_v56, %v5849_v47  ;;  %v15766_v50 = vmul.f32 0.5, %v15493_v49  ;;  %v4802_v59 = vpop.f32.mrf.mxu0  ;;  %v10197_v25 = vld [vmem:[#allocation16 + $0x194] sm:$0xf0] }
 0x9fb   : > { %v6146_v15 = vmul.f32 2.1237322e-06, %v15711_v12  ;;  %v6198_v7 = vadd.f32 0.001143296, %v6197_v19  ;;  %8318 = vmatpush.bf16.msrb.mxu2 %v9831_v23  ;;  %v15772_v4 = vmul.f32 0.5, %v15512_v34  ;;  %10628 = vrcp.f32 %v15755_v2 }
 0x9fc   : > { %v15769_v21 = vpop.eup %10626  ;;  %v15776_v54 = vmul.f32 0.5, %v15574_v43  ;;  %v6304_v41 = vmul.f32 %v15759_v38, %v15759_v38  ;;  %v15780_v49 = vmul.f32 %v7679_v3, %v4984_v42  ;;  %v15783_v55 = vmul.f32 %v5835_v8, %v15447_v52  ;;  %v10179_v34 = vld [vmem:[#allocation16 + $0x104] sm:$0xf0] }
 0x9fd   : > { %v6044_v51 = vadd.f32 0.4994258, %v6043_v33  ;;  %v6160_v47 = vadd.f32 0.014752088, %v6159_v31  ;;  %8366 = vmatpush.bf16.msrb.mxu3 %v9903_v57  ;;  %vm5853_vm2 = vweird.f32 %v15720_v56  ;;  %v5874_v43 = vmul.f32 %v5873_v45, %v15545_v62 }
 0x9fe   : > { %v5992_v39 = vmul.f32 %v5991_v44, %v15570_v58  ;;  %v6029_v19 = vadd.f32 0.0036580483, %v6028_v53  ;;  %v5851_v42 = vadd.f32 %v15720_v56, %v5850_v60  ;;  %v5888_v52 = vmul.f32 %v15769_v21, %v15730_v48  ;;  %v4946_v44 = vpop.f32.mrf.mxu3 }
 0x9ff   : > { %v6147_v20 = vadd.f32 0.00028619796, %v6146_v15  ;;  %v6199_v3 = vmul.f32 %v6198_v7, %v15737_v0  ;;  %v15792_v8 = vmin.f32 %v6304_v41, 16.0  ;;  %v4898_v33 = vadd.f32 %v4897_v37, %v14916_v61 }
 0xa00   : > { %v9823_v31 = vor.u32 %v10179_v34, %v9822_v16  ;;  %v4803_v62 = vadd.f32 %v4802_v59, %v14874_v46  ;;  %vm5852_vm3 = vweird.f32 %v15675_v40  ;;  %v6045_v23 = vmul.f32 %v6044_v51, %v15638_v30  ;;  %v4851_v51 = vpop.f32.mrf.mxu1 }
 0xa01   : > { %v6161_v45 = vmul.f32 %v6160_v47, %v15711_v12  ;;  %v9895_v53 = vor.u32 %v10197_v25, %v9894_v11  ;;  %v15799_v57 = vpop.eup %10628  ;;  %vm15803_vm4 = vmor %vm5852_vm3, %vm5853_vm2  ;;  %v5856_v15 = vand.u32 2147483647, %v15675_v40  ;;  %v5858_v7 = vand.u32 2147483648, %v15675_v40 }
 0xa02   : > { %v5993_v41 = vadd.f32 0.18741608, %v5992_v39  ;;  %v15809_v16 = vadd.f32 %v4946_v44, %v4898_v33  ;;  %8319 = vmatpush.bf16.msrb.mxu2 %v9823_v31  ;;  %v5855_v47 = vsel %vm15803_vm4, %v15720_v56, %v5851_v42  ;;  %v5875_v37 = vadd.f32 1.1283791, %v5874_v43 }
 0xa03   : > { %v6030_v34 = vmul.f32 %v6029_v19, %v15638_v30  ;;  %v15815_v59 = vadd.f32 %v4851_v51, %v4803_v62  ;;  %8367 = vmatpush.bf16.msrb.mxu3 %v9895_v53  ;;  %v5889_v11 = vsub.f32 1.0, %v5888_v52  ;;  %v6148_v25 = vmul.f32 %v6147_v20, %v15711_v12 }
 0xa04   : > { %v6200_v29 = vadd.f32 0.014752088, %v6199_v3  ;;  %v6317_v40 = vmul.f32 3.8918573e-05, %v15792_v8  ;;  %v6008_v39 = vmul.f32 %v15799_v57, %v15755_v2  ;;  %v15821_v33 = vadd.f32 1.0, %v6045_v23 }
 0xa05   : > { %v6162_v31 = vadd.f32 0.112945676, %v6161_v45  ;;  %v15825_v56 = vmul.f32 %v13168_v14, %v15809_v16  ;;  %8320 = vmatmul.bf16.vlgmr.msrb.gmra.mxu2 %v15592_v10  ;;  %vm5857_vm5 = vcmp.eq.f32.partialorder %v5856_v15, 8.507059e+37  ;;  %v5859_v43 = vor.u32 1.1754944e-38, %v5858_v7  ;;  %v9886_v23 = vld [vmem:[#allocation16 + $0x180] sm:$0xf] }
 0xa06   : > { %v5994_v19 = vmul.f32 %v5993_v41, %v15570_v58  ;;  %v15830_v42 = vmul.f32 0.5, %v15653_v24  ;;  %v15833_v52 = vmul.f32 %v5875_v37, %v15510_v6  ;;  %v6031_v20 = vadd.f32 0.05243302, %v6030_v34  ;;  %v10195_v45 = vld [vmem:[#allocation16 + $0x184] sm:$0xf0]  ;;  %v17855_v10 = vld [vmem:[#allocation24_spill] sm:$0xff] }
 0xa07   : > { %v6344_v3 = vmul.f32 %v15825_v56, %v15825_v56  ;;  %v15839_v62 = vmul.f32 %v13168_v14, %v15815_v59  ;;  %v5860_v44 = vsel %vm5857_vm5, %v5859_v43, %v5855_v47  ;;  %v6149_v53 = vadd.f32 0.0036580483, %v6148_v25  ;;  %v4900_v25 = vpop.f32.mrf.mxu2 }
 0xa08   : > { %v6201_v58 = vmul.f32 %v6200_v29, %v15737_v0  ;;  %v6318_v60 = vadd.f32 0.001143296, %v6317_v40  ;;  %v5890_v24 = vmul.f32 %v15769_v21, %v5889_v11  ;;  %v6009_v15 = vsub.f32 1.0, %v6008_v39 }
 0xa09   : > { %10630 = vrcp.f32 %v15821_v33  ;;  %v6163_v6 = vmul.f32 %v6162_v31, %v15711_v12  ;;  %v5896_v7 = vand.u32 2147483647, %v15730_v48  ;;  %v5898_v41 = vand.u32 2147483648, %v15730_v48 }
 0xa0a   : > { %v15847_v51 = vmin.f32 %v6344_v3, 16.0  ;;  %v9887_v37 = vor.u32 %v10195_v45, %v9886_v23  ;;  %v5861_v47 = vmul.f32 %v5860_v44, %v15783_v55  ;;  %v5995_v34 = vadd.f32 1.1283791, %v5994_v19 }
 0xa0b   : > { %v6032_v29 = vmul.f32 %v6031_v20, %v15638_v30  ;;  %v6464_v11 = vmul.f32 %v15839_v62, %v15839_v62  ;;  %vm5892_vm6 = vweird.f32 %v15730_v48  ;;  %v6150_v40 = vmul.f32 %v6149_v53, %v15711_v12 }
 0xa0c   : > { %v6202_v39 = vadd.f32 0.112945676, %v6201_v58  ;;  %v6319_v31 = vmul.f32 %v6318_v60, %v15792_v8  ;;  %8368 = vmatpush.bf16.msrb.mxu3 %v9887_v37  ;;  %v5891_v43 = vadd.f32 %v15769_v21, %v5890_v24  ;;  %vm5893_vm7 = vweird.f32 %v15769_v21 }
 0xa0d   : > { %v6010_v55 = vmul.f32 %v15799_v57, %v6009_v15  ;;  %v6164_v19 = vadd.f32 0.4994258, %v6163_v6  ;;  %vm15859_vm8 = vcmp.eq.f32.partialorder %v5896_v7, 8.507059e+37  ;;  %v5899_v3 = vor.u32 1.1754944e-38, %v5898_v41  ;;  %vm15873_vm9 = vmor %vm5892_vm6, %vm5893_vm7 }
 0xa0e   : > { %v6357_v23 = vmul.f32 3.8918573e-05, %v15847_v51  ;;  %v4901_v45 = vadd.f32 %v4900_v25, %v14916_v61  ;;  %v9646_v53 = vclamps-f32 %v5861_v47, 1.0  ;;  %v5996_v58 = vmul.f32 %v5995_v34, %v15537_v1  ;;  %v4949_v34 = vpop.f32.mrf.mxu3 }
 0xa0f   : > { %v15865_v44 = vpop.eup %10630  ;;  %v6033_v60 = vadd.f32 0.18741608, %v6032_v29  ;;  %v15868_v24 = vmin.f32 %v6464_v11, 16.0  ;;  %8369 = vmatmul.bf16.vlgmr.msrb.gmra.mxu3 %v15715_v28  ;;  %vm6013_vm10 = vweird.f32 %v15799_v57  ;;  %v6151_v6 = vadd.f32 0.05243302, %v6150_v40 }
 0xa10   : > { %v6203_v7 = vmul.f32 %v6202_v39, %v15737_v0  ;;  %v6320_v41 = vadd.f32 0.014752088, %v6319_v31  ;;  %v5895_v1 = vsel %vm15873_vm9, %v15769_v21, %v5891_v43  ;;  %v6011_v37 = vadd.f32 %v15799_v57, %v6010_v55 }
 0xa11   : > { %v6165_v47 = vmul.f32 %v6164_v19, %v15711_v12  ;;  %v6186_v48 = vmul.f32 2.1237322e-06, %v15737_v0  ;;  %v6018_v29 = vand.u32 2147483648, %v15755_v2  ;;  %v6048_v11 = vmul.f32 %v15865_v44, %v15821_v33 }
 0xa12   : > { %v6358_v25 = vadd.f32 0.001143296, %v6357_v23  ;;  %v15888_v40 = vadd.f32 %v4949_v34, %v4901_v45  ;;  %vm6012_vm11 = vweird.f32 %v15755_v2  ;;  %v6016_v39 = vand.u32 2147483647, %v15755_v2 }
 0xa13   : > { %v6034_v21 = vmul.f32 %v6033_v60, %v15638_v30  ;;  %v6477_v31 = vmul.f32 3.8918573e-05, %v15868_v24  ;;  %v7682_v43 = vadd.f32 1.0, %v9646_v53  ;;  %v5900_v55 = vsel %vm15859_vm8, %v5899_v3, %v5895_v1  ;;  %vm15898_vm12 = vmor %vm6012_vm11, %vm6013_vm10 }
 0xa14   : > { %v6204_v23 = vadd.f32 0.4994258, %v6203_v7  ;;  %v6321_v45 = vmul.f32 %v6320_v41, %v15792_v8  ;;  %v6015_v2 = vsel %vm15898_vm12, %v15799_v57, %v6011_v37  ;;  %v6152_v30 = vmul.f32 %v6151_v6, %v15711_v12 }
 0xa15   : > { %v15907_v60 = vadd.f32 1.0, %v6165_v47  ;;  %v6187_v53 = vadd.f32 0.00028619796, %v6186_v48  ;;  %v6019_v20 = vor.u32 1.1754944e-38, %v6018_v29  ;;  %v6049_v3 = vsub.f32 1.0, %v6048_v11 }
 0xa16   : > { %v6359_v15 = vmul.f32 %v6358_v25, %v15847_v51  ;;  %v15912_v1 = vmul.f32 %v13168_v14, %v15888_v40  ;;  %v5901_v7 = vmul.f32 %v5900_v55, %v15833_v52  ;;  %vm6017_vm13 = vcmp.eq.f32.partialorder %v6016_v39, 8.507059e+37 }
 0xa17   : > { %v6035_v41 = vadd.f32 1.1283791, %v6034_v21  ;;  %v6478_v34 = vadd.f32 0.001143296, %v6477_v31  ;;  %v6020_v19 = vsel %vm6017_vm13, %v6019_v20, %v6015_v2  ;;  %v6205_v57 = vmul.f32 %v6204_v23, %v15737_v0 }
 0xa18   : > { %v6322_v6 = vadd.f32 0.112945676, %v6321_v45  ;;  %v6504_v37 = vmul.f32 %v15912_v1, %v15912_v1  ;;  %v6153_v47 = vadd.f32 0.18741608, %v6152_v30  ;;  %10632 = vrcp.f32 %v15907_v60 }
 0xa19   : > { %v6188_v48 = vmul.f32 %v6187_v53, %v15737_v0  ;;  %v6306_v29 = vmul.f32 2.1237322e-06, %v15792_v8  ;;  %v15922_v11 = vmul.f32 %v7682_v43, %v15735_v36  ;;  %v6050_v52 = vmul.f32 %v15865_v44, %v6049_v3 }
 0xa1a   : > { %v6360_v25 = vadd.f32 0.014752088, %v6359_v15  ;;  %v15925_v39 = vmin.f32 %v6504_v37, 16.0  ;;  %v6021_v21 = vmul.f32 %v6020_v19, %v5996_v58  ;;  %v6036_v31 = vmul.f32 %v6035_v41, %v15599_v32 }
 0xa1b   : > { %v15929_v55 = vmul.f32 0.5, %v15690_v35  ;;  %v6479_v23 = vmul.f32 %v6478_v34, %v15868_v24  ;;  %v9647_v45 = vclamps-f32 %v5901_v7, 1.0  ;;  %v6056_v2 = vand.u32 2147483647, %v15821_v33 }
 0xa1c   : > { %v15933_v30 = vadd.f32 1.0, %v6205_v57  ;;  %v6323_v36 = vmul.f32 %v6322_v6, %v15792_v8  ;;  %v6154_v43 = vmul.f32 %v6153_v47, %v15711_v12  ;;  %v6189_v53 = vadd.f32 0.0036580483, %v6188_v48  ;;  %v4804_v12 = vpop.f32.mrf.mxu0 }
 0xa1d   : > { %v6307_v20 = vadd.f32 0.00028619796, %v6306_v29  ;;  %v6517_v58 = vmul.f32 3.8918573e-05, %v15925_v39  ;;  %v6051_v32 = vadd.f32 %v15865_v44, %v6050_v52  ;;  %vm6052_vm14 = vweird.f32 %v15821_v33 }
 0xa1e   : > { %vm6053_vm15 = vweird.f32 %v15865_v44  ;;  %v6361_v35 = vmul.f32 %v6360_v25, %v15847_v51  ;;  %v15942_v3 = vpop.eup %10632  ;;  %v9650_v15 = vclamps-f32 %v6021_v21, 1.0  ;;  %v6058_v7 = vand.u32 2147483648, %v15821_v33 }
 0xa1f   : > { %v6480_v41 = vadd.f32 0.014752088, %v6479_v23  ;;  %v6518_v34 = vadd.f32 0.001143296, %v6517_v58  ;;  %v7683_v19 = vadd.f32 1.0, %v9647_v45  ;;  %10634 = vrcp.f32 %v15933_v30  ;;  %vm15947_vm0 = vmor %vm6052_vm14, %vm6053_vm15  ;;  %v4902_v58 = vpop.f32.mrf.mxu2 }
 0xa20   : > { %v6324_v57 = vadd.f32 0.4994258, %v6323_v36  ;;  %v6346_v6 = vmul.f32 2.1237322e-06, %v15847_v51  ;;  %vm15951_vm1 = vcmp.eq.f32.partialorder %v6056_v2, 8.507059e+37  ;;  %v6190_v33 = vmul.f32 %v6189_v53, %v15737_v0 }
 0xa21   : > { %v6155_v48 = vadd.f32 1.1283791, %v6154_v43  ;;  %v6308_v29 = vmul.f32 %v6307_v20, %v15792_v8  ;;  %v6055_v52 = vsel %vm15947_vm0, %v15865_v44, %v6051_v32  ;;  %v6168_v25 = vmul.f32 %v15942_v3, %v15907_v60 }
 0xa22   : > { %v6362_v21 = vadd.f32 0.112945676, %v6361_v35  ;;  %v4805_v23 = vadd.f32 %v4804_v12, %v14874_v46  ;;  %v7686_v45 = vadd.f32 1.0, %v9650_v15  ;;  %v6059_v2 = vor.u32 1.1754944e-38, %v6058_v7  ;;  %v4853_v12 = vpop.f32.mrf.mxu1 }
 0xa23   : > { %v6481_v36 = vmul.f32 %v6480_v41, %v15868_v24  ;;  %v6519_v43 = vmul.f32 %v6518_v34, %v15925_v39  ;;  %v15966_v53 = vmul.f32 %v7683_v19, %v15766_v50  ;;  %v15969_v20 = vmul.f32 0.5, %v15740_v13 }
 0xa24   : > { %v6325_v44 = vmul.f32 %v6324_v57, %v15792_v8  ;;  %v6347_v32 = vadd.f32 0.00028619796, %v6346_v6  ;;  %v6060_v35 = vsel %vm15951_vm1, %v6059_v2, %v6055_v52  ;;  %v15975_v15 = vmul.f32 %v6155_v48, %v15679_v9  ;;  %v4807_v2 = vpop.f32.mrf.mxu0 }
 0xa25   : > { %17849 = vst [vmem:[#allocation75_spill] sm:$0xff] %v15966_v53  ;;  %v6191_v7 = vadd.f32 0.05243302, %v6190_v33  ;;  %v6309_v41 = vadd.f32 0.0036580483, %v6308_v29  ;;  %v15977_v34 = vpop.eup %10634  ;;  %v6169_v37 = vsub.f32 1.0, %v6168_v25  ;;  %v6363_v50 = vmul.f32 %v6362_v21, %v15847_v51 }
 0xa26   : > { %v15980_v19 = vadd.f32 %v4853_v12, %v4805_v23  ;;  %v4903_v13 = vadd.f32 %v4902_v58, %v14916_v61  ;;  %v15984_v57 = vmul.f32 %v7686_v45, %v15772_v4  ;;  %v6466_v6 = vmul.f32 2.1237322e-06, %v15868_v24  ;;  %v4951_v45 = vpop.f32.mrf.mxu3 }
 0xa27   : > { %v6482_v47 = vadd.f32 0.112945676, %v6481_v36  ;;  %v6520_v9 = vadd.f32 0.014752088, %v6519_v43  ;;  %v6061_v48 = vmul.f32 %v6060_v35, %v6036_v31  ;;  %vm6172_vm2 = vweird.f32 %v15907_v60 }
 0xa28   : > { %v6176_v33 = vand.u32 2147483647, %v15907_v60  ;;  %v15989_v29 = vadd.f32 1.0, %v6325_v44  ;;  %v6348_v52 = vmul.f32 %v6347_v32, %v15847_v51  ;;  %v6178_v25 = vand.u32 2147483648, %v15907_v60 }
 0xa29   : > { %v6192_v21 = vmul.f32 %v6191_v7, %v15737_v0  ;;  %v6208_v4 = vmul.f32 %v15977_v34, %v15933_v30  ;;  %v6310_v23 = vmul.f32 %v6309_v41, %v15792_v8  ;;  %v6170_v31 = vmul.f32 %v15942_v3, %v6169_v37 }
 0xa2a   : > { %v6364_v36 = vadd.f32 0.4994258, %v6363_v50  ;;  %v16000_v43 = vmul.f32 %v13168_v14, %v15980_v19  ;;  %v16002_v58 = vadd.f32 %v4951_v45, %v4903_v13  ;;  %v6467_v44 = vadd.f32 0.00028619796, %v6466_v6 }
 0xa2b   : > { %v6483_v32 = vmul.f32 %v6482_v47, %v15868_v24  ;;  %v6521_v35 = vmul.f32 %v6520_v9, %v15925_v39  ;;  %v16008_v7 = vpack.c.bf16 %v15753_v22, %v15747_v18  ;;  %v9651_v41 = vclamps-f32 %v6061_v48, 1.0 }
 0xa2c   : > { %10636 = vrcp.f32 %v15989_v29  ;;  %v6349_v12 = vadd.f32 0.0036580483, %v6348_v52  ;;  %v4808_v37 = vadd.f32 %v4807_v2, %v14874_v46  ;;  %vm6173_vm3 = vweird.f32 %v15942_v3 }
 0xa2d   : > { %17850 = vst [vmem:[#allocation53_spill] sm:$0xff] %v16008_v7  ;;  %vm16013_vm4 = vcmp.eq.f32.partialorder %v6176_v33, 8.507059e+37  ;;  %v6193_v13 = vadd.f32 0.18741608, %v6192_v21  ;;  %v6209_v6 = vsub.f32 1.0, %v6208_v4  ;;  %8325 = vmatmul.bf16.gmra.mxu2 %v16008_v7  ;;  %v6171_v47 = vadd.f32 %v15942_v3, %v6170_v31  ;;  %v4856_v21 = vpop.f32.mrf.mxu1  ;;  %vm16034_vm5 = vmor %vm6172_vm2, %vm6173_vm3 }
 0xa2e   : > { %v6365_v18 = vmul.f32 %v6364_v36, %v15847_v51  ;;  %v6624_v22 = vmul.f32 %v16000_v43, %v16000_v43  ;;  %v16024_v9 = vmul.f32 %v13168_v14, %v16002_v58  ;;  %v6311_v48 = vadd.f32 0.05243302, %v6310_v23 }
 0xa2f   : > { %v6468_v33 = vmul.f32 %v6467_v44, %v15868_v24  ;;  %v6484_v52 = vadd.f32 0.4994258, %v6483_v32  ;;  %v6522_v45 = vadd.f32 0.112945676, %v6521_v35  ;;  %v7687_v4 = vadd.f32 1.0, %v9651_v41 }
 0xa30   : > { %v6179_v2 = vor.u32 1.1754944e-38, %v6178_v25  ;;  %v6350_v7 = vmul.f32 %v6349_v12, %v15847_v51  ;;  %v16028_v31 = vadd.f32 %v4856_v21, %v4808_v37  ;;  %v6194_v23 = vmul.f32 %v6193_v13, %v15737_v0 }
 0xa31   : > { %v6210_v44 = vmul.f32 %v15977_v34, %v6209_v6  ;;  %vm6212_vm6 = vweird.f32 %v15933_v30  ;;  %v16042_v25 = vmul.f32 0.5, %v15809_v16  ;;  %v6175_v35 = vsel %vm16034_vm5, %v15942_v3, %v6171_v47 }
 0xa32   : > { %v16044_v32 = vpop.eup %10636  ;;  %v16049_v60 = vadd.f32 1.0, %v6365_v18  ;;  %v16051_v41 = vmin.f32 %v6624_v22, 16.0  ;;  %v6664_v0 = vmul.f32 %v16024_v9, %v16024_v9  ;;  %v6312_v12 = vmul.f32 %v6311_v48, %v15792_v8 }
 0xa33   : > { %v6469_v37 = vadd.f32 0.0036580483, %v6468_v33  ;;  %v6485_v13 = vmul.f32 %v6484_v52, %v15868_v24  ;;  %v6523_v16 = vmul.f32 %v6522_v45, %v15925_v39  ;;  %v6216_v6 = vand.u32 2147483647, %v15933_v30 }
 0xa34   : > { %v6218_v21 = vand.u32 2147483648, %v15933_v30  ;;  %v6351_v36 = vadd.f32 0.05243302, %v6350_v7  ;;  %v16062_v3 = vmul.f32 %v13168_v14, %v16028_v31  ;;  %v6180_v47 = vsel %vm16013_vm4, %v6179_v2, %v6175_v35 }
 0xa35   : > { %v6211_v18 = vadd.f32 %v15977_v34, %v6210_v44  ;;  %vm6213_vm7 = vweird.f32 %v15977_v34  ;;  %v6328_v22 = vmul.f32 %v16044_v32, %v15989_v29  ;;  %10638 = vrcp.f32 %v16049_v60 }
 0xa36   : > { %v6506_v48 = vmul.f32 2.1237322e-06, %v15925_v39  ;;  %v6637_v7 = vmul.f32 3.8918573e-05, %v16051_v41  ;;  %v16073_v33 = vmin.f32 %v6664_v0, 16.0  ;;  %v6470_v45 = vmul.f32 %v6469_v37, %v15868_v24  ;;  %vm16093_vm8 = vmor %vm6212_vm6, %vm6213_vm7 }
 0xa37   : > { %v6313_v52 = vadd.f32 0.18741608, %v6312_v12  ;;  %v16076_v50 = vadd.f32 1.0, %v6485_v13  ;;  %v6524_v2 = vadd.f32 0.4994258, %v6523_v16  ;;  %v6181_v44 = vmul.f32 %v6180_v47, %v15975_v15 }
 0xa38   : > { %v6352_v35 = vmul.f32 %v6351_v36, %v15847_v51  ;;  %v6784_v28 = vmul.f32 %v16062_v3, %v16062_v3  ;;  %v16084_v53 = vpack.c.bf16 %v17856_v26, %v17855_v10  ;;  %v16087_v0 = vmul.f32 %v7687_v4, %v15776_v54 }
 0xa39   : > { %v6195_v12 = vadd.f32 1.1283791, %v6194_v23  ;;  %vm16097_vm9 = vcmp.eq.f32.partialorder %v6216_v6, 8.507059e+37  ;;  %v6329_v13 = vsub.f32 1.0, %v6328_v22  ;;  %v6215_v26 = vsel %vm16093_vm8, %v15977_v34, %v6211_v18 }
 0xa3a   : > { %17857 = vst [vmem:[#allocation79_spill] sm:$0xff] %v16084_v53  ;;  %v6507_v10 = vadd.f32 0.00028619796, %v6506_v48  ;;  %v6638_v54 = vadd.f32 0.001143296, %v6637_v7  ;;  %8247 = vmatmul.bf16.gmra.mxu0 %v16084_v53  ;;  %v6219_v30 = vor.u32 1.1754944e-38, %v6218_v21  ;;  %10640 = vrcp.f32 %v16076_v50 }
 0xa3b   : > { %v6677_v4 = vmul.f32 3.8918573e-05, %v16073_v33  ;;  %v6471_v23 = vadd.f32 0.05243302, %v6470_v45  ;;  %v6525_v16 = vmul.f32 %v6524_v2, %v15925_v39  ;;  %v16108_v6 = vpop.eup %10638  ;;  %v9654_v36 = vclamps-f32 %v6181_v44, 1.0  ;;  %v17862_v48 = vld [vmem:[#allocation74_spill] sm:$0xff] }
 0xa3c   : > { %v6314_v47 = vmul.f32 %v6313_v52, %v15792_v8  ;;  %v6353_v22 = vadd.f32 0.18741608, %v6352_v35  ;;  %v16111_v37 = vmin.f32 %v6784_v28, 16.0  ;;  %v6196_v34 = vmul.f32 %v6195_v12, %v15706_v5  ;;  %v17863_v7 = vld [vmem:[#allocation58_spill] sm:$0xff] }
 0xa3d   : > { %v6220_v18 = vsel %vm16097_vm9, %v6219_v30, %v6215_v26  ;;  %v16117_v21 = vmul.f32 0.5, %v15815_v59  ;;  %v16121_v45 = vpack.c.bf16 %v17863_v7, %v17862_v48  ;;  %v6330_v2 = vmul.f32 %v16044_v32, %v6329_v13 }
 0xa3e   : > { %v6508_v44 = vmul.f32 %v6507_v10, %v15925_v39  ;;  %v6639_v8 = vmul.f32 %v6638_v54, %v16051_v41  ;;  %v6678_v28 = vadd.f32 0.001143296, %v6677_v4  ;;  %v6368_v5 = vmul.f32 %v16108_v6, %v16049_v60 }
 0xa3f   : > { %17864 = vst [vmem:[#allocation24_spill] sm:$0xff] %v16121_v45  ;;  %v6472_v52 = vmul.f32 %v6471_v23, %v15868_v24  ;;  %v16129_v35 = vadd.f32 1.0, %v6525_v16  ;;  %v6626_v59 = vmul.f32 2.1237322e-06, %v16051_v41  ;;  %8296 = vmatmul.bf16.gmra.mxu1 %v16121_v45  ;;  %v16133_v12 = vadd.f32 1.0, %v9654_v36 }
 0xa40   : > { %v6315_v15 = vadd.f32 1.1283791, %v6314_v47  ;;  %v6354_v13 = vmul.f32 %v6353_v22, %v15847_v51  ;;  %v6797_v26 = vmul.f32 3.8918573e-05, %v16111_v37  ;;  %v16137_v10 = vpop.eup %10640  ;;  %v16139_v54 = vmul.f32 %v6220_v18, %v6196_v34 }
 0xa41   : > { %vm6333_vm10 = vweird.f32 %v16044_v32  ;;  %v6336_v4 = vand.u32 2147483647, %v15989_v29  ;;  %v6338_v30 = vand.u32 2147483648, %v15989_v29  ;;  %v6331_v23 = vadd.f32 %v16044_v32, %v6330_v2 }
 0xa42   : > { %v6509_v16 = vadd.f32 0.0036580483, %v6508_v44  ;;  %v6640_v36 = vadd.f32 0.014752088, %v6639_v8  ;;  %v6679_v47 = vmul.f32 %v6678_v28, %v16073_v33  ;;  %v6369_v48 = vsub.f32 1.0, %v6368_v5 }
 0xa43   : > { %v6473_v51 = vadd.f32 0.18741608, %v6472_v52  ;;  %10642 = vrcp.f32 %v16129_v35  ;;  %v6627_v22 = vadd.f32 0.00028619796, %v6626_v59  ;;  %vm6332_vm11 = vweird.f32 %v15989_v29 }
 0xa44   : > { %v6355_v34 = vadd.f32 1.1283791, %v6354_v13  ;;  %v6488_v18 = vmul.f32 %v16137_v10, %v16076_v50  ;;  %v6798_v7 = vadd.f32 0.001143296, %v6797_v26  ;;  %v6316_v45 = vmul.f32 %v6315_v15, %v15759_v38  ;;  %vm16153_vm12 = vmor %vm6332_vm11, %vm6333_vm10 }
 0xa45   : > { %vm16157_vm13 = vcmp.eq.f32.partialorder %v6336_v4, 8.507059e+37  ;;  %v6339_v8 = vor.u32 1.1754944e-38, %v6338_v30  ;;  %v6666_v29 = vmul.f32 2.1237322e-06, %v16073_v33  ;;  %v6335_v28 = vsel %vm16153_vm12, %v16044_v32, %v6331_v23  ;;  %v4905_v32 = vpop.f32.mrf.mxu2  ;;  %v17869_v23 = vld [vmem:[#allocation55_spill] sm:$0xff] }
 0xa46   : > { %v6510_v5 = vmul.f32 %v6509_v16, %v15925_v39  ;;  %v6641_v38 = vmul.f32 %v6640_v36, %v16051_v41  ;;  %v6680_v52 = vadd.f32 0.014752088, %v6679_v47  ;;  %v6370_v15 = vmul.f32 %v16108_v6, %v6369_v48  ;;  %v17870_v16 = vld [vmem:[#allocation70_spill] sm:$0xff] }
 0xa47   : > { %v6474_v13 = vmul.f32 %v6473_v51, %v15868_v24  ;;  %v6628_v26 = vmul.f32 %v6627_v22, %v16051_v41  ;;  %v16172_v4 = vmul.f32 %v6355_v34, %v15825_v56  ;;  %v6489_v30 = vsub.f32 1.0, %v6488_v18 }
 0xa48   : > { %v6799_v2 = vmul.f32 %v6798_v7, %v16111_v37  ;;  %v16177_v53 = vpack.c.bf16 %v17870_v16, %v17869_v23  ;;  %v6340_v47 = vsel %vm16157_vm13, %v6339_v8, %v6335_v28  ;;  %v6376_v24 = vand.u32 2147483647, %v16049_v60  ;;  %v4954_v7 = vpop.f32.mrf.mxu3 }
 0xa49   : > { %v16179_v36 = vpop.eup %10642  ;;  %v6667_v48 = vadd.f32 0.00028619796, %v6666_v29  ;;  %v4906_v51 = vadd.f32 %v4905_v32, %v14916_v61  ;;  %v6378_v56 = vand.u32 2147483648, %v16049_v60  ;;  %v6511_v22 = vadd.f32 0.05243302, %v6510_v5  ;;  %v17874_v32 = vld [vmem:[#allocation56_spill] sm:$0xff] }
 0xa4a   : > { %17871 = vst [vmem:[#allocation59_spill] sm:$0xff] %v16177_v53  ;;  %v6642_v34 = vadd.f32 0.112945676, %v6641_v38  ;;  %v6681_v18 = vmul.f32 %v6680_v52, %v16073_v33  ;;  %8252 = vmatmul.bf16.gmra.mxu0 %v16177_v53  ;;  %v6371_v23 = vadd.f32 %v16108_v6, %v6370_v15  ;;  %vm6373_vm14 = vweird.f32 %v16108_v6 }
 0xa4b   : > { %v6629_v44 = vadd.f32 0.0036580483, %v6628_v26  ;;  %v16190_v8 = vadd.f32 %v4954_v7, %v4906_v51  ;;  %vm6372_vm15 = vweird.f32 %v16049_v60  ;;  %v6490_v29 = vmul.f32 %v16137_v10, %v6489_v30  ;;  %v17875_v26 = vld [vmem:[#allocation67_spill] sm:$0xff] }
 0xa4c   : > { %v6528_v28 = vmul.f32 %v16179_v36, %v16129_v35  ;;  %v6800_v5 = vadd.f32 0.014752088, %v6799_v2  ;;  %v16196_v38 = vmul.f32 %v6340_v47, %v6316_v45  ;;  %vm16198_vm0 = vcmp.eq.f32.partialorder %v6376_v24, 8.507059e+37  ;;  %vm16207_vm1 = vmor %vm6372_vm15, %vm6373_vm14 }
 0xa4d   : > { %v6668_v15 = vmul.f32 %v6667_v48, %v16073_v33  ;;  %v16205_v16 = vpack.c.bf16 %v17875_v26, %v17874_v32  ;;  %v6512_v30 = vmul.f32 %v6511_v22, %v15925_v39  ;;  %v6643_v2 = vmul.f32 %v6642_v34, %v16051_v41 }
 0xa4e   : > { %v6682_v45 = vadd.f32 0.112945676, %v6681_v18  ;;  %v16215_v47 = vmul.f32 %v13168_v14, %v16190_v8  ;;  %v6375_v24 = vsel %vm16207_vm1, %v16108_v6, %v6371_v23  ;;  %v6379_v48 = vor.u32 1.1754944e-38, %v6378_v56 }
 0xa4f   : > { %17876 = vst [vmem:[#allocation74_spill] sm:$0xff] %v16205_v16  ;;  %vm6493_vm2 = vweird.f32 %v16137_v10  ;;  %v6630_v51 = vmul.f32 %v6629_v44, %v16051_v41  ;;  %8301 = vmatmul.bf16.gmra.mxu1 %v16205_v16  ;;  %v6491_v22 = vadd.f32 %v16137_v10, %v6490_v29  ;;  %v6529_v7 = vsub.f32 1.0, %v6528_v28 }
 0xa50   : > { %v6801_v34 = vmul.f32 %v6800_v5, %v16111_v37  ;;  %v6824_v18 = vmul.f32 %v16215_v47, %v16215_v47  ;;  %vm6492_vm3 = vweird.f32 %v16076_v50  ;;  %v6496_v32 = vand.u32 2147483647, %v16076_v50 }
 0xa51   : > { %v6498_v6 = vand.u32 2147483648, %v16076_v50  ;;  %v6669_v56 = vadd.f32 0.0036580483, %v6668_v15  ;;  %v6513_v23 = vadd.f32 0.18741608, %v6512_v30  ;;  %v6683_v44 = vmul.f32 %v6682_v45, %v16073_v33  ;;  %vm16238_vm4 = vmor %vm6492_vm3, %vm6493_vm2 }
 0xa52   : > { %v6644_v26 = vadd.f32 0.4994258, %v6643_v2  ;;  %v16231_v60 = vmin.f32 %v6824_v18, 16.0  ;;  %v9658_v29 = vclamps-f32 %v16196_v38, 1.0  ;;  %v6380_v28 = vsel %vm16198_vm0, %v6379_v48, %v6375_v24 }
 0xa53   : > { %v6475_v5 = vadd.f32 1.1283791, %v6474_v13  ;;  %v6631_v50 = vadd.f32 0.05243302, %v6630_v51  ;;  %v6495_v15 = vsel %vm16238_vm4, %v16137_v10, %v6491_v22  ;;  %v6530_v30 = vmul.f32 %v16179_v36, %v6529_v7 }
 0xa54   : > { %v6802_v2 = vadd.f32 0.112945676, %v6801_v34  ;;  %v6837_v38 = vmul.f32 3.8918573e-05, %v16231_v60  ;;  %vm6497_vm5 = vcmp.eq.f32.partialorder %v6496_v32, 8.507059e+37  ;;  %v6499_v52 = vor.u32 1.1754944e-38, %v6498_v6 }
 0xa55   : > { %v6670_v13 = vmul.f32 %v6669_v56, %v16073_v33  ;;  %v6786_v45 = vmul.f32 2.1237322e-06, %v16111_v37  ;;  %v6514_v24 = vmul.f32 %v6513_v23, %v15925_v39  ;;  %v6645_v48 = vmul.f32 %v6644_v26, %v16051_v41  ;;  %v17881_v6 = vld [vmem:[#allocation73_spill] sm:$0xff] }
 0xa56   : > { %v6684_v51 = vadd.f32 0.4994258, %v6683_v44  ;;  %v6838_v18 = vadd.f32 0.001143296, %v6837_v38  ;;  %v6381_v59 = vmul.f32 %v6380_v28, %v16172_v4  ;;  %v6500_v10 = vsel %vm6497_vm5, %v6499_v52, %v6495_v15 }
 0xa57   : > { %v6538_v22 = vand.u32 2147483648, %v16129_v35  ;;  %v6632_v7 = vmul.f32 %v6631_v50, %v16051_v41  ;;  %v6531_v34 = vadd.f32 %v16179_v36, %v6530_v30  ;;  %vm6533_vm6 = vweird.f32 %v16179_v36 }
 0xa58   : > { %v6803_v32 = vmul.f32 %v6802_v2, %v16111_v37  ;;  %v16259_v39 = vpack.c.bf16 %v15364_v17, %v17881_v6  ;;  %v6476_v56 = vmul.f32 %v6475_v5, %v15839_v62  ;;  %v6671_v23 = vadd.f32 0.05243302, %v6670_v13 }
 0xa59   : > { %v6787_v26 = vadd.f32 0.00028619796, %v6786_v45  ;;  %v6839_v4 = vmul.f32 %v6838_v18, %v16231_v60  ;;  %vm6532_vm7 = vweird.f32 %v16129_v35  ;;  %v6536_v44 = vand.u32 2147483647, %v16129_v35 }
 0xa5a   : > { %17882 = vst [vmem:[#allocation58_spill] sm:$0xff] %v16259_v39  ;;  %v16265_v28 = vadd.f32 1.0, %v6645_v48  ;;  %v6685_v50 = vmul.f32 %v6684_v51, %v16073_v33  ;;  %8257 = vmatmul.bf16.gmra.mxu0 %v16259_v39  ;;  %v9659_v15 = vclamps-f32 %v6381_v59, 1.0  ;;  %v6501_v30 = vmul.f32 %v6500_v10, %v6476_v56  ;;  %vm16271_vm8 = vmor %vm6532_vm7, %vm6533_vm6  ;;  %v17885_v48 = vld [vmem:[#allocation72_spill] sm:$0xff] }
 0xa5b   : > { %v6515_v17 = vadd.f32 1.1283791, %v6514_v24  ;;  %v6840_v5 = vadd.f32 0.014752088, %v6839_v4  ;;  %v6535_v35 = vsel %vm16271_vm8, %v16179_v36, %v6531_v34  ;;  %v6539_v2 = vor.u32 1.1754944e-38, %v6538_v22 }
 0xa5c   : > { %v6633_v38 = vadd.f32 0.18741608, %v6632_v7  ;;  %v6804_v52 = vadd.f32 0.4994258, %v6803_v32  ;;  %v6672_v13 = vmul.f32 %v6671_v23, %v16073_v33  ;;  %v6788_v45 = vmul.f32 %v6787_v26, %v16111_v37  ;;  %v4809_v23 = vpop.f32.mrf.mxu0 }
 0xa5d   : > { %v6841_v24 = vmul.f32 %v6840_v5, %v16231_v60  ;;  %v16283_v51 = vpack.c.bf16 %v15516_v63, %v17885_v48  ;;  %vm6537_vm9 = vcmp.eq.f32.partialorder %v6536_v44, 8.507059e+37  ;;  %10644 = vrcp.f32 %v16265_v28  ;;  %v4956_v48 = vpop.f32.mrf.mxu3 }
 0xa5e   : > { %v16286_v18 = vadd.f32 1.0, %v6685_v50  ;;  %v16290_v36 = vpack.c.bf16 %v15780_v49, %v15750_v27  ;;  %v16294_v59 = vmul.f32 %v16133_v12, %v15830_v42  ;;  %v17888_v10 = vclamps-f32 %v16139_v54, 1.0 }
 0xa5f   : > { %17886 = vst [vmem:[#allocation55_spill] sm:$0xff] %v16283_v51  ;;  %v7694_v7 = vadd.f32 1.0, %v9658_v29  ;;  %v6540_v34 = vsel %vm6537_vm9, %v6539_v2, %v6535_v35  ;;  %8306 = vmatmul.bf16.gmra.mxu1 %v16283_v51  ;;  %v9662_v63 = vclamps-f32 %v6501_v30, 1.0  ;;  %v6516_v32 = vmul.f32 %v6515_v17, %v15912_v1  ;;  %v4858_v1 = vpop.f32.mrf.mxu1 }
 0xa60   : > { %17887 = vst [vmem:[#allocation70_spill] sm:$0xff] %v16290_v36  ;;  %v7691_v22 = vadd.f32 1.0, %v17888_v10  ;;  %v6805_v6 = vmul.f32 %v6804_v52, %v16111_v37  ;;  %v6842_v56 = vadd.f32 0.112945676, %v6841_v24  ;;  %8374 = vmatmul.bf16.gmra.mxu3 %v16290_v36  ;;  %v6634_v27 = vmul.f32 %v6633_v38, %v16051_v41  ;;  %v4907_v52 = vpop.f32.mrf.mxu2 }
 0xa61   : > { %v6673_v49 = vadd.f32 0.18741608, %v6672_v13  ;;  %v6789_v42 = vadd.f32 0.0036580483, %v6788_v45  ;;  %v4810_v12 = vadd.f32 %v4809_v23, %v14874_v46  ;;  %v7695_v54 = vadd.f32 1.0, %v9659_v15 }
 0xa62   : > { %v16305_v29 = vmul.f32 0.5, %v15888_v40  ;;  %v6541_v26 = vmul.f32 %v6540_v34, %v6516_v32  ;;  %10646 = vrcp.f32 %v16286_v18  ;;  %v16309_v4 = vmul.f32 %v7691_v22, %v15929_v55 }
 0xa63   : > { %v16312_v44 = vmul.f32 %v7694_v7, %v15969_v20  ;;  %v16315_v41 = vmul.f32 0.5, %v15980_v19  ;;  %v16317_v50 = vadd.f32 %v4858_v1, %v4810_v12  ;;  %v16319_v30 = vpop.eup %10644  ;;  %v7698_v15 = vadd.f32 1.0, %v9662_v63 }
 0xa64   : > { %v16322_v40 = vmul.f32 0.5, %v16002_v58  ;;  %v16324_v17 = vadd.f32 1.0, %v6805_v6  ;;  %v6843_v62 = vmul.f32 %v6842_v56, %v16231_v60  ;;  %v6635_v55 = vadd.f32 1.1283791, %v6634_v27  ;;  %v4812_v22 = vpop.f32.mrf.mxu0  ;;  %v10160_v56 = vld [vmem:[#allocation16 + $0x74] sm:$0xf] }
 0xa65   : > { %v6674_v5 = vmul.f32 %v6673_v49, %v16073_v33  ;;  %v6790_v20 = vmul.f32 %v6789_v42, %v16111_v37  ;;  %v16331_v19 = vmul.f32 %v13168_v14, %v16317_v50  ;;  %v16334_v35 = vmul.f32 %v7695_v54, %v16042_v25 }
 0xa66   : > { %v9663_v2 = vclamps-f32 %v6541_v26, 1.0  ;;  %v6656_v58 = vand.u32 2147483647, %v16265_v28  ;;  %v16338_v38 = vmul.f32 0.5, %v16028_v31  ;;  %v6648_v13 = vmul.f32 %v16319_v30, %v16265_v28  ;;  %v9816_v26 = vld [vmem:[#allocation16 + $0xf8] sm:$0xf0] }
 0xa67   : > { %v6658_v33 = vand.u32 2147483648, %v16265_v28  ;;  %v6944_v45 = vmul.f32 %v16331_v19, %v16331_v19  ;;  %v4908_v24 = vadd.f32 %v4907_v52, %v14916_v61  ;;  %10648 = vrcp.f32 %v16324_v17 }
 0xa68   : > { %v16346_v25 = vpop.eup %10646  ;;  %v6826_v10 = vmul.f32 2.1237322e-06, %v16231_v60  ;;  %v6844_v31 = vadd.f32 0.4994258, %v6843_v62  ;;  %v16352_v7 = vpack.c.bf16 %v15984_v57, %v15922_v11  ;;  %v16355_v34 = vmul.f32 %v7698_v15, %v16117_v21  ;;  %v9752_v11 = vld [vmem:[#allocation16 + $0x78] sm:$0xf0] }
 0xa69   : > { %v16358_v63 = vmul.f32 %v6635_v55, %v16000_v43  ;;  %v6675_v32 = vadd.f32 1.1283791, %v6674_v5  ;;  %v6791_v6 = vadd.f32 0.05243302, %v6790_v20  ;;  %v7699_v23 = vadd.f32 1.0, %v9663_v2  ;;  %v4861_v5 = vpop.f32.mrf.mxu1 }
 0xa6a   : > { %17889 = vst [vmem:[#allocation56_spill] sm:$0xff] %v16352_v7  ;;  %v16360_v27 = vmin.f32 %v6944_v45, 16.0  ;;  %v16362_v49 = vadd.f32 %v4956_v48, %v4908_v24  ;;  %v4813_v42 = vadd.f32 %v4812_v22, %v14874_v46  ;;  %8330 = vmatmul.bf16.gmra.mxu2 %v16352_v7  ;;  %v10176_v57 = vld [vmem:[#allocation16 + $0xf4] sm:$0xf]  ;;  %v6649_v12 = vsub.f32 1.0, %v6648_v13  ;;  %v4910_v22 = vpop.f32.mrf.mxu2 }
 0xa6b   : > { %v16366_v21 = vor.u32 1.1754944e-38, %v6658_v33  ;;  %v6688_v43 = vmul.f32 %v16346_v25, %v16286_v18  ;;  %v9755_v54 = vor.u32 %v10160_v56, %v9752_v11  ;;  %v6827_v1 = vadd.f32 0.00028619796, %v6826_v10  ;;  %v10158_v33 = vld [vmem:[#allocation16 + $0x64] sm:$0xf] }
 0xa6c   : > { %v6845_v15 = vmul.f32 %v6844_v31, %v16231_v60  ;;  %v6957_v62 = vmul.f32 3.8918573e-05, %v16360_v27  ;;  %v16374_v55 = vmul.f32 %v13168_v14, %v16362_v49  ;;  %vm6652_vm10 = vweird.f32 %v16265_v28  ;;  %v9744_v45 = vld [vmem:[#allocation16 + $0x68] sm:$0xf0] }
 0xa6d   : > { %v16378_v20 = vmul.f32 %v6675_v32, %v16024_v9  ;;  %v6792_v2 = vmul.f32 %v6791_v6, %v16111_v37  ;;  %v16381_v52 = vadd.f32 %v4861_v5, %v4813_v42  ;;  %8410 = vmatpush.bf16.msra.mxu0 %v9755_v54  ;;  %v9819_v13 = vor.u32 %v10176_v57, %v9816_v26  ;;  %v16383_v24 = vpop.eup %10648  ;;  %v17890_v9 = vld [vmem:[#allocation75_spill] sm:$0xff]  ;;  %v9808_v11 = vld [vmem:[#allocation16 + $0xe8] sm:$0xf0] }
 0xa6e   : > { %v16386_v48 = vmul.f32 %v7699_v23, %v16305_v29  ;;  %v6958_v10 = vadd.f32 0.001143296, %v6957_v62  ;;  %v6984_v31 = vmul.f32 %v16374_v55, %v16374_v55  ;;  %v16392_v32 = vpack.c.bf16 %v16087_v0, %v17890_v9  ;;  %v10174_v23 = vld [vmem:[#allocation16 + $0xe4] sm:$0xf] }
 0xa6f   : > { %v6650_v6 = vmul.f32 %v16319_v30, %v6649_v12  ;;  %v16397_v56 = vmul.f32 %v13168_v14, %v16381_v52  ;;  %8459 = vmatpush.bf16.msra.mxu1 %v9819_v13  ;;  %v4911_v42 = vadd.f32 %v4910_v22, %v14916_v61  ;;  %v9747_v29 = vor.u32 %v10158_v33, %v9744_v45  ;;  %v4959_v13 = vpop.f32.mrf.mxu3 }
 0xa70   : > { %17891 = vst [vmem:[#allocation67_spill] sm:$0xff] %v16392_v32  ;;  %v6689_v57 = vsub.f32 1.0, %v6688_v43  ;;  %v6828_v54 = vmul.f32 %v6827_v1, %v16231_v60  ;;  %v16401_v26 = vadd.f32 1.0, %v6845_v15  ;;  %v6959_v0 = vmul.f32 %v6958_v10, %v16360_v27  ;;  %8379 = vmatmul.bf16.gmra.mxu3 %v16392_v32 }
 0xa71   : > { %vm6653_vm11 = vweird.f32 %v16319_v30  ;;  %v6808_v12 = vmul.f32 %v16383_v24, %v16324_v17  ;;  %v16408_v62 = vmin.f32 %v6984_v31, 16.0  ;;  %v7104_v5 = vmul.f32 %v16397_v56, %v16397_v56  ;;  %8411 = vmatpush.bf16.msra.mxu0 %v9747_v29 }
 0xa72   : > { %vm16414_vm12 = vcmp.eq.f32.partialorder %v6656_v58, 8.507059e+37  ;;  %v6793_v1 = vadd.f32 0.18741608, %v6792_v2  ;;  %v6960_v15 = vadd.f32 0.014752088, %v6959_v0  ;;  %v16418_v33 = vadd.f32 %v4959_v13, %v4911_v42  ;;  %vm16434_vm14 = vmor %vm6652_vm10, %vm6653_vm11 }
 0xa73   : > { %v9811_v45 = vor.u32 %v10174_v23, %v9808_v11  ;;  %v6651_v10 = vadd.f32 %v16319_v30, %v6650_v6  ;;  %v6696_v31 = vand.u32 2147483647, %v16286_v18  ;;  %v6997_v22 = vmul.f32 3.8918573e-05, %v16408_v62 }
 0xa74   : > { %v16423_v9 = vmin.f32 %v7104_v5, 16.0  ;;  %v6690_v29 = vmul.f32 %v16346_v25, %v6689_v57  ;;  %v6829_v51 = vadd.f32 0.0036580483, %v6828_v54  ;;  %10650 = vrcp.f32 %v16401_v26 }
 0xa75   : > { %v6961_v58 = vmul.f32 %v6960_v15, %v16360_v27  ;;  %8460 = vmatpush.bf16.msra.mxu1 %v9811_v45  ;;  %vm6692_vm13 = vweird.f32 %v16286_v18  ;;  %v6698_v2 = vand.u32 2147483648, %v16286_v18  ;;  %v6809_v42 = vsub.f32 1.0, %v6808_v12 }
 0xa76   : > { %v6998_v6 = vadd.f32 0.001143296, %v6997_v22  ;;  %v6794_v11 = vmul.f32 %v6793_v1, %v16111_v37  ;;  %v7117_v54 = vmul.f32 3.8918573e-05, %v16423_v9  ;;  %v16442_v0 = vmul.f32 %v13168_v14, %v16418_v33 }
 0xa77   : > { %v6962_v57 = vadd.f32 0.112945676, %v6961_v58  ;;  %v6655_v12 = vsel %vm16434_vm14, %v16319_v30, %v6651_v10  ;;  %vm16447_vm15 = vcmp.eq.f32.partialorder %v6696_v31, 8.507059e+37  ;;  %v16452_v28 = vmul.f32 0.5, %v16190_v8 }
 0xa78   : > { %v6999_v37 = vmul.f32 %v6998_v6, %v16408_v62  ;;  %v6691_v13 = vadd.f32 %v16346_v25, %v6690_v29  ;;  %vm6693_vm0 = vweird.f32 %v16346_v25  ;;  %v6830_v1 = vmul.f32 %v6829_v51, %v16231_v60 }
 0xa79   : > { %v7118_v15 = vadd.f32 0.001143296, %v7117_v54  ;;  %v6699_v45 = vor.u32 1.1754944e-38, %v6698_v2  ;;  %v6810_v22 = vmul.f32 %v16383_v24, %v6809_v42  ;;  %v6946_v30 = vmul.f32 2.1237322e-06, %v16360_v27  ;;  %vm16471_vm1 = vmor %vm6692_vm13, %vm6693_vm0 }
 0xa7a   : > { %v7000_v10 = vadd.f32 0.014752088, %v6999_v37  ;;  %v16460_v31 = vpop.eup %10650  ;;  %v6795_v58 = vadd.f32 1.1283791, %v6794_v11  ;;  %v6963_v8 = vmul.f32 %v6962_v57, %v16360_v27  ;;  %v7144_v29 = vmul.f32 %v16442_v0, %v16442_v0  ;;  %v4814_v57 = vpop.f32.mrf.mxu0 }
 0xa7b   : > { %v7119_v6 = vmul.f32 %v7118_v15, %v16423_v9  ;;  %v6660_v51 = vsel %vm16414_vm12, %v16366_v21, %v6655_v12  ;;  %v6818_v42 = vand.u32 2147483648, %v16324_v17  ;;  %v6986_v23 = vmul.f32 2.1237322e-06, %v16408_v62 }
 0xa7c   : > { %v7001_v11 = vmul.f32 %v7000_v10, %v16408_v62  ;;  %v6695_v54 = vsel %vm16471_vm1, %v16346_v25, %v6691_v13  ;;  %vm6813_vm2 = vweird.f32 %v16383_v24  ;;  %v6831_v21 = vadd.f32 0.05243302, %v6830_v1 }
 0xa7d   : > { %v7120_v43 = vadd.f32 0.014752088, %v7119_v6  ;;  %v6811_v18 = vadd.f32 %v16383_v24, %v6810_v22  ;;  %v6848_v12 = vmul.f32 %v16460_v31, %v16401_v26  ;;  %v6947_v37 = vadd.f32 0.00028619796, %v6946_v30 }
 0xa7e   : > { %v7106_v15 = vmul.f32 2.1237322e-06, %v16423_v9  ;;  %v6964_v39 = vadd.f32 0.4994258, %v6963_v8  ;;  %v7002_v32 = vadd.f32 0.112945676, %v7001_v11  ;;  %v4815_v16 = vadd.f32 %v4814_v57, %v14874_v46 }
 0xa7f   : > { %v16486_v10 = vmin.f32 %v7144_v29, 16.0  ;;  %v6661_v25 = vmul.f32 %v6660_v51, %v16358_v63  ;;  %vm6812_vm3 = vweird.f32 %v16324_v17  ;;  %v6987_v13 = vadd.f32 0.00028619796, %v6986_v23 }
 0xa80   : > { %v7121_v1 = vmul.f32 %v7120_v43, %v16423_v9  ;;  %v6700_v22 = vsel %vm16447_vm15, %v6699_v45, %v6695_v54  ;;  %vm16496_vm4 = vmor %vm6812_vm3, %vm6813_vm2  ;;  %v6816_v8 = vand.u32 2147483647, %v16324_v17  ;;  %v6819_v6 = vor.u32 1.1754944e-38, %v6818_v42  ;;  %v4863_v45 = vpop.f32.mrf.mxu1 }
 0xa81   : > { %v6832_v29 = vmul.f32 %v6831_v21, %v16231_v60  ;;  %v6815_v63 = vsel %vm16496_vm4, %v16383_v24, %v6811_v18  ;;  %v6849_v51 = vsub.f32 1.0, %v6848_v12  ;;  %v6948_v2 = vmul.f32 %v6947_v37, %v16360_v27 }
 0xa82   : > { %v7107_v5 = vadd.f32 0.00028619796, %v7106_v15  ;;  %v6965_v23 = vmul.f32 %v6964_v39, %v16360_v27  ;;  %v7003_v11 = vmul.f32 %v7002_v32, %v16408_v62  ;;  %v7157_v57 = vmul.f32 3.8918573e-05, %v16486_v10 }
 0xa83   : > { %v16509_v54 = vadd.f32 %v4863_v45, %v4815_v16  ;;  %v9666_v17 = vclamps-f32 %v6661_v25, 1.0  ;;  %v6701_v42 = vmul.f32 %v6700_v22, %v16378_v20  ;;  %v6988_v21 = vmul.f32 %v6987_v13, %v16408_v62 }
 0xa84   : > { %v7122_v43 = vadd.f32 0.112945676, %v7121_v1  ;;  %v6796_v24 = vmul.f32 %v6795_v58, %v16062_v3  ;;  %vm6817_vm5 = vcmp.eq.f32.partialorder %v6816_v8, 8.507059e+37  ;;  %v6833_v18 = vadd.f32 0.18741608, %v6832_v29 }
 0xa85   : > { %v7158_v12 = vadd.f32 0.001143296, %v7157_v57  ;;  %v6820_v37 = vsel %vm6817_vm5, %v6819_v6, %v6815_v63  ;;  %v6850_v39 = vmul.f32 %v16460_v31, %v6849_v51  ;;  %v6949_v15 = vadd.f32 0.0036580483, %v6948_v2  ;;  %v10156_v6 = vld [vmem:[#allocation16 + $0x54] sm:$0xf] }
 0xa86   : > { %v7108_v32 = vmul.f32 %v7107_v5, %v16423_v9  ;;  %v16516_v30 = vadd.f32 1.0, %v6965_v23  ;;  %v7004_v16 = vadd.f32 0.4994258, %v7003_v11  ;;  %v16521_v20 = vmul.f32 %v13168_v14, %v16509_v54  ;;  %v9736_v29 = vld [vmem:[#allocation16 + $0x58] sm:$0xf0]  ;;  %v4912_v11 = vpop.f32.mrf.mxu2 }
 0xa87   : > { %v7159_v25 = vmul.f32 %v7158_v12, %v16486_v10  ;;  %v7702_v13 = vadd.f32 1.0, %v9666_v17  ;;  %v9667_v3 = vclamps-f32 %v6701_v42, 1.0  ;;  %v6989_v58 = vadd.f32 0.0036580483, %v6988_v21  ;;  %v10172_v63 = vld [vmem:[#allocation16 + $0xd4] sm:$0xf] }
 0xa88   : > { %v7123_v1 = vmul.f32 %v7122_v43, %v16423_v9  ;;  %v16524_v22 = vmul.f32 %v6820_v37, %v6796_v24  ;;  %v6834_v8 = vmul.f32 %v6833_v18, %v16231_v60  ;;  %vm6852_vm6 = vweird.f32 %v16401_v26  ;;  %v9800_v23 = vld [vmem:[#allocation16 + $0xd8] sm:$0xf0] }
 0xa89   : > { %vm6853_vm7 = vweird.f32 %v16460_v31  ;;  %v6851_v51 = vadd.f32 %v16460_v31, %v6850_v39  ;;  %v6950_v2 = vmul.f32 %v6949_v15, %v16360_v27  ;;  %v7109_v5 = vadd.f32 0.0036580483, %v7108_v32 }
 0xa8a   : > { %v7146_v45 = vmul.f32 2.1237322e-06, %v16486_v10  ;;  %10652 = vrcp.f32 %v16516_v30  ;;  %v7005_v60 = vmul.f32 %v7004_v16, %v16408_v62  ;;  %v7160_v57 = vadd.f32 0.014752088, %v7159_v25  ;;  %vm16545_vm8 = vmor %vm6852_vm6, %vm6853_vm7 }
 0xa8b   : > { %v7264_v17 = vmul.f32 %v16521_v20, %v16521_v20  ;;  %v6858_v42 = vand.u32 2147483648, %v16401_v26  ;;  %v6990_v21 = vmul.f32 %v6989_v58, %v16408_v62  ;;  %v7124_v43 = vadd.f32 0.4994258, %v7123_v1  ;;  %v4961_v1 = vpop.f32.mrf.mxu3 }
 0xa8c   : > { %v9739_v24 = vor.u32 %v10156_v6, %v9736_v29  ;;  %v6856_v18 = vand.u32 2147483647, %v16401_v26  ;;  %v7161_v12 = vmul.f32 %v7160_v57, %v16486_v10  ;;  %v9803_v37 = vor.u32 %v10172_v63, %v9800_v23 }
 0xa8d   : > { %v4913_v39 = vadd.f32 %v4912_v11, %v14916_v61  ;;  %v6835_v15 = vadd.f32 1.1283791, %v6834_v8  ;;  %v6951_v16 = vadd.f32 0.05243302, %v6950_v2  ;;  %v7110_v25 = vmul.f32 %v7109_v5, %v16423_v9 }
 0xa8e   : > { %v16550_v58 = vmin.f32 %v7264_v17, 16.0  ;;  %8412 = vmatpush.bf16.msra.mxu0 %v9739_v24  ;;  %v6855_v6 = vsel %vm16545_vm8, %v16460_v31, %v6851_v51  ;;  %v16555_v8 = vadd.f32 1.0, %v7005_v60  ;;  %v7147_v29 = vadd.f32 0.00028619796, %v7146_v45  ;;  %8461 = vmatpush.bf16.msra.mxu1 %v9803_v37 }
 0xa8f   : > { %v16557_v26 = vadd.f32 %v4961_v1, %v4913_v39  ;;  %v16560_v63 = vmul.f32 %v7702_v13, %v16315_v41  ;;  %v6859_v2 = vor.u32 1.1754944e-38, %v6858_v42  ;;  %v6991_v23 = vadd.f32 0.05243302, %v6990_v21 }
 0xa90   : > { %v7125_v5 = vmul.f32 %v7124_v43, %v16423_v9  ;;  %v16563_v11 = vpop.eup %10652  ;;  %v7703_v57 = vadd.f32 1.0, %v9667_v3  ;;  %v9670_v17 = vclamps-f32 %v16524_v22, 1.0  ;;  %vm6857_vm9 = vcmp.eq.f32.partialorder %v6856_v18, 8.507059e+37 }
 0xa91   : > { %v7162_v31 = vadd.f32 0.112945676, %v7161_v12  ;;  %v6860_v51 = vsel %vm6857_vm9, %v6859_v2, %v6855_v6  ;;  %v6952_v45 = vmul.f32 %v6951_v16, %v16360_v27  ;;  %v7111_v60 = vadd.f32 0.05243302, %v7110_v25 }
 0xa92   : > { %v7277_v24 = vmul.f32 3.8918573e-05, %v16550_v58  ;;  %v6836_v41 = vmul.f32 %v6835_v15, %v16215_v47  ;;  %10654 = vrcp.f32 %v16555_v8  ;;  %v7148_v13 = vmul.f32 %v7147_v29, %v16486_v10  ;;  %v4817_v29 = vpop.f32.mrf.mxu0 }
 0xa93   : > { %v16573_v42 = vmul.f32 %v13168_v14, %v16557_v26  ;;  %v6968_v3 = vmul.f32 %v16563_v11, %v16516_v30  ;;  %v6992_v22 = vmul.f32 %v6991_v23, %v16408_v62  ;;  %v16578_v21 = vadd.f32 1.0, %v7125_v5 }
 0xa94   : > { %v7278_v43 = vadd.f32 0.001143296, %v7277_v24  ;;  %v16581_v18 = vmul.f32 %v7703_v57, %v16322_v40  ;;  %v6861_v47 = vmul.f32 %v6860_v51, %v6836_v41  ;;  %v7163_v12 = vmul.f32 %v7162_v31, %v16486_v10 }
 0xa95   : > { %v7266_v37 = vmul.f32 2.1237322e-06, %v16550_v58  ;;  %v16586_v39 = vmul.f32 0.5, %v16317_v50  ;;  %v6953_v15 = vadd.f32 0.18741608, %v6952_v45  ;;  %v7112_v32 = vmul.f32 %v7111_v60, %v16423_v9 }
 0xa96   : > { %v7279_v16 = vmul.f32 %v7278_v43, %v16550_v58  ;;  %v16590_v25 = vadd.f32 1.0, %v9670_v17  ;;  %v16593_v1 = vmul.f32 0.5, %v16362_v49  ;;  %v7149_v40 = vadd.f32 0.0036580483, %v7148_v13 }
 0xa97   : > { %v7304_v6 = vmul.f32 %v16573_v42, %v16573_v42  ;;  %v6969_v2 = vsub.f32 1.0, %v6968_v3  ;;  %v6993_v23 = vadd.f32 0.18741608, %v6992_v22  ;;  %10656 = vrcp.f32 %v16578_v21 }
 0xa98   : > { %v7280_v50 = vadd.f32 0.014752088, %v7279_v16  ;;  %v16598_v5 = vpop.eup %10654  ;;  %v9671_v57 = vclamps-f32 %v6861_v47, 1.0  ;;  %v16601_v31 = vmul.f32 0.5, %v16381_v52  ;;  %v7164_v17 = vadd.f32 0.4994258, %v7163_v12 }
 0xa99   : > { %v7267_v51 = vadd.f32 0.00028619796, %v7266_v37  ;;  %v6954_v49 = vmul.f32 %v6953_v15, %v16360_v27  ;;  %v7113_v45 = vadd.f32 0.18741608, %v7112_v32  ;;  %v16605_v60 = vmul.f32 0.5, %v16418_v33  ;;  %v4866_v32 = vpop.f32.mrf.mxu1 }
 0xa9a   : > { %v4818_v24 = vadd.f32 %v4817_v29, %v14874_v46  ;;  %v6978_v41 = vand.u32 2147483648, %v16516_v30  ;;  %v7150_v13 = vmul.f32 %v7149_v40, %v16486_v10  ;;  %v7281_v3 = vmul.f32 %v7280_v50, %v16550_v58  ;;  %v10154_v16 = vld [vmem:[#allocation16 + $0x44] sm:$0xf] }
 0xa9b   : > { %17904 = vst [vmem:[#allocation73_spill] sm:$0xff] %v16605_v60  ;;  %v16611_v22 = vmin.f32 %v7304_v6, 16.0  ;;  %v6970_v52 = vmul.f32 %v16563_v11, %v6969_v2  ;;  %v6976_v43 = vand.u32 2147483647, %v16516_v30  ;;  %v6994_v27 = vmul.f32 %v6993_v23, %v16408_v62  ;;  %v9728_v23 = vld [vmem:[#allocation16 + $0x48] sm:$0xf0] }
 0xa9c   : > { %v7008_v33 = vmul.f32 %v16598_v5, %v16555_v8  ;;  %v16618_v47 = vadd.f32 1.0, %v9671_v57  ;;  %v7165_v12 = vmul.f32 %v7164_v17, %v16486_v10  ;;  %v7268_v37 = vmul.f32 %v7267_v51, %v16550_v58 }
 0xa9d   : > { %v7317_v15 = vmul.f32 3.8918573e-05, %v16611_v22  ;;  %v16623_v40 = vpop.eup %10656  ;;  %v6955_v6 = vadd.f32 1.1283791, %v6954_v49  ;;  %v7114_v29 = vmul.f32 %v7113_v45, %v16423_v9  ;;  %v7282_v2 = vadd.f32 0.112945676, %v7281_v3 }
 0xa9e   : > { %v16626_v62 = vadd.f32 %v4866_v32, %v4818_v24  ;;  %vm6972_vm10 = vweird.f32 %v16516_v30  ;;  %v6979_v50 = vor.u32 1.1754944e-38, %v6978_v41  ;;  %v7151_v57 = vadd.f32 0.05243302, %v7150_v13  ;;  %v10170_v9 = vld [vmem:[#allocation16 + $0xc4] sm:$0xf] }
 0xa9f   : > { %v7318_v17 = vadd.f32 0.001143296, %v7317_v15  ;;  %v6971_v51 = vadd.f32 %v16563_v11, %v6970_v52  ;;  %vm6973_vm11 = vweird.f32 %v16563_v11  ;;  %vm16631_vm12 = vcmp.eq.f32.partialorder %v6976_v43, 8.507059e+37  ;;  %v9792_v13 = vld [vmem:[#allocation16 + $0xc8] sm:$0xf0] }
 0xaa0   : > { %17905 = vst [vmem:[#allocation72_spill] sm:$0xff] %v16626_v62  ;;  %v6995_v49 = vadd.f32 1.1283791, %v6994_v27  ;;  %v7009_v53 = vsub.f32 1.0, %v7008_v33  ;;  %v7128_v45 = vmul.f32 %v16623_v40, %v16578_v21  ;;  %v16637_v24 = vadd.f32 1.0, %v7165_v12  ;;  %vm16649_vm13 = vmor %vm6972_vm10, %vm6973_vm11 }
 0xaa1   : > { %v7269_v3 = vadd.f32 0.0036580483, %v7268_v37  ;;  %v7319_v41 = vmul.f32 %v7318_v17, %v16611_v22  ;;  %v16640_v15 = vadd.f32 1.1283791, %v7114_v29  ;;  %v7283_v52 = vmul.f32 %v7282_v2, %v16550_v58 }
 0xaa2   : > { %v16645_v43 = vmul.f32 %v13168_v14, %v16626_v62  ;;  %v9731_v27 = vor.u32 %v10154_v16, %v9728_v23  ;;  %v7016_v12 = vand.u32 2147483647, %v16555_v8  ;;  %v7018_v37 = vand.u32 2147483648, %v16555_v8 }
 0xaa3   : > { %v7152_v32 = vmul.f32 %v7151_v57, %v16486_v10  ;;  %v7320_v29 = vadd.f32 0.014752088, %v7319_v41  ;;  %v6975_v2 = vsel %vm16649_vm13, %v16563_v11, %v6971_v51  ;;  %v7010_v17 = vmul.f32 %v16598_v5, %v7009_v53  ;;  %v10152_v11 = vld [vmem:[#allocation16 + $0x34] sm:$0xf] }
 0xaa4   : > { %17908 = vst [vmem:[#allocation75_spill] sm:$0xff] %v16645_v43  ;;  %v7424_v30 = vmul.f32 %v16645_v43, %v16645_v43  ;;  %8413 = vmatpush.bf16.msra.mxu0 %v9731_v27  ;;  %v9795_v16 = vor.u32 %v10170_v9, %v9792_v13  ;;  %v7129_v23 = vsub.f32 1.0, %v7128_v45  ;;  %10658 = vrcp.f32 %v16637_v24  ;;  %v9720_v13 = vld [vmem:[#allocation16 + $0x38] sm:$0xf0] }
 0xaa5   : > { %v7270_v36 = vmul.f32 %v7269_v3, %v16550_v58  ;;  %v7321_v62 = vmul.f32 %v7320_v29, %v16611_v22  ;;  %v7284_v57 = vadd.f32 0.4994258, %v7283_v52  ;;  %v7306_v41 = vmul.f32 2.1237322e-06, %v16611_v22  ;;  %v10168_v52 = vld [vmem:[#allocation16 + $0xb4] sm:$0xf] }
 0xaa6   : > { %v16666_v60 = vmin.f32 %v7424_v30, 16.0  ;;  %8462 = vmatpush.bf16.msra.mxu1 %v9795_v16  ;;  %v16670_v53 = vpack.c.bf16 %v16312_v44, %v16294_v59  ;;  %v6956_v51 = vmul.f32 %v6955_v6, %v16331_v19  ;;  %v16674_v9 = vmul.f32 %v6995_v49, %v16374_v55  ;;  %v9784_v59 = vld [vmem:[#allocation16 + $0xb8] sm:$0xf0]  ;;  %v4915_v44 = vpop.f32.mrf.mxu2  ;;  %v4819_v30 = vpop.f32.mrf.mxu0 }
 0xaa7   : > { %v7019_v45 = vor.u32 1.1754944e-38, %v7018_v37  ;;  %v16677_v3 = vmul.f32 0.5, %v16509_v54  ;;  %vm7012_vm14 = vweird.f32 %v16555_v8  ;;  %vm7013_vm15 = vweird.f32 %v16598_v5 }
 0xaa8   : > { %17911 = vst [vmem:[#allocation81_spill] sm:$0xff] %v16670_v53  ;;  %v7153_v27 = vadd.f32 0.18741608, %v7152_v32  ;;  %v7322_v33 = vadd.f32 0.112945676, %v7321_v62  ;;  %8335 = vmatmul.bf16.gmra.mxu2 %v16670_v53  ;;  %v6980_v19 = vsel %vm16631_vm12, %v6979_v50, %v6975_v2  ;;  %v7011_v55 = vadd.f32 %v16598_v5, %v7010_v17  ;;  %vm16702_vm1 = vmor %vm7012_vm14, %vm7013_vm15 }
 0xaa9   : > { %vm16685_vm0 = vcmp.eq.f32.partialorder %v7016_v12, 8.507059e+37  ;;  %v7130_v6 = vmul.f32 %v16623_v40, %v7129_v23  ;;  %v7437_v49 = vmul.f32 3.8918573e-05, %v16666_v60  ;;  %v7271_v37 = vadd.f32 0.05243302, %v7270_v36  ;;  %v4964_v36 = vpop.f32.mrf.mxu3 }
 0xaaa   : > { %v7285_v62 = vmul.f32 %v7284_v57, %v16550_v58  ;;  %v7307_v32 = vadd.f32 0.00028619796, %v7306_v41  ;;  %v7323_v29 = vmul.f32 %v7322_v33, %v16611_v22  ;;  %v16693_v16 = vpop.eup %10658  ;;  %v9723_v50 = vor.u32 %v10152_v11, %v9720_v13  ;;  %v10166_v57 = vld [vmem:[#allocation16 + $0xa4] sm:$0xf] }
 0xaab   : > { %v7438_v7 = vadd.f32 0.001143296, %v7437_v49  ;;  %v9787_v2 = vor.u32 %v10168_v52, %v9784_v59  ;;  %v4916_v12 = vadd.f32 %v4915_v44, %v14916_v61  ;;  %v6981_v17 = vmul.f32 %v6980_v19, %v6956_v51 }
 0xaac   : > { %v7136_v53 = vand.u32 2147483647, %v16578_v21  ;;  %v7154_v23 = vmul.f32 %v7153_v27, %v16486_v10  ;;  %v7324_v43 = vadd.f32 0.4994258, %v7323_v29  ;;  %v7138_v41 = vand.u32 2147483648, %v16578_v21  ;;  %8414 = vmatpush.bf16.msra.mxu0 %v9723_v50 }
 0xaad   : > { %v7439_v11 = vmul.f32 %v7438_v7, %v16666_v60  ;;  %8463 = vmatpush.bf16.msra.mxu1 %v9787_v2  ;;  %v16708_v51 = vadd.f32 %v4964_v36, %v4916_v12  ;;  %v4820_v10 = vadd.f32 %v4819_v30, %v14874_v46  ;;  %v7015_v13 = vsel %vm16702_vm1, %v16598_v5, %v7011_v55  ;;  %v4868_v55 = vpop.f32.mrf.mxu1  ;;  %v10150_v7 = vld [vmem:[#allocation16 + $0x24] sm:$0xf] }
 0xaae   : > { %vm7132_vm2 = vweird.f32 %v16578_v21  ;;  %vm7133_vm3 = vweird.f32 %v16623_v40  ;;  %v7272_v8 = vmul.f32 %v7271_v37, %v16550_v58  ;;  %v7131_v52 = vadd.f32 %v16623_v40, %v7130_v6 }
 0xaaf   : > { %v7168_v27 = vmul.f32 %v16693_v16, %v16637_v24  ;;  %v16720_v33 = vadd.f32 1.0, %v7285_v62  ;;  %v7308_v59 = vmul.f32 %v7307_v32, %v16611_v22  ;;  %vm16723_vm4 = vcmp.eq.f32.partialorder %v7136_v53, 8.507059e+37  ;;  %vm16740_vm5 = vmor %vm7132_vm2, %vm7133_vm3 }
 0xab0   : > { %v7325_v5 = vmul.f32 %v7324_v43, %v16611_v22  ;;  %v7440_v44 = vadd.f32 0.014752088, %v7439_v11  ;;  %v16730_v19 = vmul.f32 %v13168_v14, %v16708_v51  ;;  %v9674_v6 = vclamps-f32 %v6981_v17, 1.0 }
 0xab1   : > { %v7139_v49 = vor.u32 1.1754944e-38, %v7138_v41  ;;  %v7155_v37 = vadd.f32 1.1283791, %v7154_v23  ;;  %v16732_v29 = vadd.f32 %v4868_v55, %v4820_v10  ;;  %v7020_v62 = vsel %vm16685_vm0, %v7019_v45, %v7015_v13  ;;  %v9776_v41 = vld [vmem:[#allocation16 + $0xa8] sm:$0xf0] }
 0xab2   : > { %v7273_v53 = vadd.f32 0.18741608, %v7272_v8  ;;  %v7464_v32 = vmul.f32 %v16730_v19, %v16730_v19  ;;  %v16748_v30 = vpack.c.bf16 %v16334_v35, %v16309_v4  ;;  %v7135_v45 = vsel %vm16740_vm5, %v16623_v40, %v7131_v52  ;;  %v9712_v4 = vld [vmem:[#allocation16 + $0x28] sm:$0xf0]  ;;  %v10148_v52 = vld [vmem:[#allocation16 + $0x14] sm:$0xf] }
 0xab3   : > { %v7169_v54 = vsub.f32 1.0, %v7168_v27  ;;  %10660 = vrcp.f32 %v16720_v33  ;;  %v7309_v21 = vadd.f32 0.0036580483, %v7308_v59  ;;  %v16754_v50 = vadd.f32 1.0, %v7325_v5 }
 0xab4   : > { %v7426_v2 = vmul.f32 2.1237322e-06, %v16666_v60  ;;  %v7441_v12 = vmul.f32 %v7440_v44, %v16666_v60  ;;  %v16758_v17 = vmin.f32 %v7464_v32, 16.0  ;;  %8384 = vmatmul.bf16.gmra.mxu3 %v16748_v30  ;;  %v16761_v35 = vadd.f32 1.0, %v9674_v6 }
 0xab5   : > { %v7116_v40 = vmul.f32 %v16640_v15, %v16397_v56  ;;  %v16766_v23 = vmul.f32 0.5, %v16557_v26  ;;  %v16770_v36 = vmul.f32 %v13168_v14, %v16732_v29  ;;  %v7021_v11 = vmul.f32 %v7020_v62, %v16674_v9  ;;  %v9704_v56 = vld [vmem:[#allocation16 + $0x18] sm:$0xf0] }
 0xab6   : > { %v7140_v10 = vsel %vm16723_vm4, %v7139_v49, %v7135_v45  ;;  %v7176_v13 = vand.u32 2147483647, %v16637_v24  ;;  %v7274_v8 = vmul.f32 %v7273_v53, %v16550_v58  ;;  %v7310_v26 = vmul.f32 %v7309_v21, %v16611_v22  ;;  %v10164_v45 = vld [vmem:[#allocation16 + $0x94] sm:$0xf] }
 0xab7   : > { %v7477_v15 = vmul.f32 3.8918573e-05, %v16758_v17  ;;  %v7584_v27 = vmul.f32 %v16770_v36, %v16770_v36  ;;  %v9715_v59 = vor.u32 %v10150_v7, %v9712_v4  ;;  %v7170_v5 = vmul.f32 %v16693_v16, %v7169_v54  ;;  %v9768_v54 = vld [vmem:[#allocation16 + $0x98] sm:$0xf0] }
 0xab8   : > { %10662 = vrcp.f32 %v16754_v50  ;;  %v7427_v9 = vadd.f32 0.00028619796, %v7426_v2  ;;  %v7442_v46 = vadd.f32 0.112945676, %v7441_v12  ;;  %v9779_v6 = vor.u32 %v10166_v57, %v9776_v41 }
 0xab9   : > { %v16783_v44 = vpop.eup %10660  ;;  %v7478_v55 = vadd.f32 0.001143296, %v7477_v15  ;;  %v16785_v58 = vmin.f32 %v7584_v27, 16.0  ;;  %8415 = vmatpush.bf16.msra.mxu0 %v9715_v59  ;;  %v9707_v49 = vor.u32 %v10148_v52, %v9704_v56  ;;  %v16789_v62 = vmul.f32 %v16590_v25, %v16338_v38  ;;  %v4917_v52 = vpop.f32.mrf.mxu2 }
 0xaba   : > { %v9675_v43 = vclamps-f32 %v7021_v11, 1.0  ;;  %v7156_v53 = vmul.f32 %v7155_v37, %v16442_v0  ;;  %v7178_v32 = vand.u32 2147483648, %v16637_v24  ;;  %v16793_v21 = vmul.f32 %v7140_v10, %v7116_v40  ;;  %8464 = vmatpush.bf16.msra.mxu1 %v9779_v6 }
 0xabb   : > { %v7275_v7 = vadd.f32 1.1283791, %v7274_v8  ;;  %v7311_v2 = vadd.f32 0.05243302, %v7310_v26  ;;  %v7479_v12 = vmul.f32 %v7478_v55, %v16758_v17  ;;  %v7171_v4 = vadd.f32 %v16693_v16, %v7170_v5 }
 0xabc   : > { %vm7173_vm6 = vweird.f32 %v16693_v16  ;;  %v7288_v38 = vmul.f32 %v16783_v44, %v16720_v33  ;;  %v7428_v0 = vmul.f32 %v7427_v9, %v16666_v60  ;;  %v7443_v25 = vmul.f32 %v7442_v46, %v16666_v60 }
 0xabd   : > { %v7480_v37 = vadd.f32 0.014752088, %v7479_v12  ;;  %v7597_v40 = vmul.f32 3.8918573e-05, %v16785_v58  ;;  %8416 = vmatpush.bf16.msra.mxu0 %v9707_v49  ;;  %v9771_v57 = vor.u32 %v10164_v45, %v9768_v54  ;;  %vm7172_vm7 = vweird.f32 %v16637_v24  ;;  %v4966_v54 = vpop.f32.mrf.mxu3 }
 0xabe   : > { %v16803_v41 = vpop.eup %10662  ;;  %vm16806_vm8 = vcmp.eq.f32.partialorder %v7176_v13, 8.507059e+37  ;;  %v7179_v10 = vor.u32 1.1754944e-38, %v7178_v32  ;;  %v7586_v8 = vmul.f32 2.1237322e-06, %v16785_v58  ;;  %v16811_v56 = vadd.f32 1.0, %v9675_v43  ;;  %vm16816_vm9 = vmor %vm7172_vm7, %vm7173_vm6 }
 0xabf   : > { %v9678_v26 = vclamps-f32 %v16793_v21, 1.0  ;;  %v16821_v24 = vmul.f32 %v7275_v7, %v16521_v20  ;;  %v7312_v13 = vmul.f32 %v7311_v2, %v16611_v22  ;;  %8465 = vmatpush.bf16.msra.mxu1 %v9771_v57  ;;  %v7175_v27 = vsel %vm16816_vm9, %v16693_v16, %v7171_v4 }
 0xac0   : > { %v7289_v59 = vsub.f32 1.0, %v7288_v38  ;;  %v7429_v5 = vadd.f32 0.0036580483, %v7428_v0  ;;  %v7481_v9 = vmul.f32 %v7480_v37, %v16758_v17  ;;  %v7298_v46 = vand.u32 2147483648, %v16720_v33 }
 0xac1   : > { %v7444_v55 = vadd.f32 0.4994258, %v7443_v25  ;;  %v7598_v6 = vadd.f32 0.001143296, %v7597_v40  ;;  %v4918_v49 = vadd.f32 %v4917_v52, %v14916_v61  ;;  %v7296_v20 = vand.u32 2147483647, %v16720_v33 }
 0xac2   : > { %v7328_v43 = vmul.f32 %v16803_v41, %v16754_v50  ;;  %v7482_v32 = vadd.f32 0.112945676, %v7481_v9  ;;  %v7587_v45 = vadd.f32 0.00028619796, %v7586_v8  ;;  %v7180_v16 = vsel %vm16806_vm8, %v7179_v10, %v7175_v27  ;;  %v10146_v25 = vld [vmem:[#allocation16 + $0x4] sm:$0xf] }
 0xac3   : > { %vm7292_vm10 = vweird.f32 %v16720_v33  ;;  %v7313_v7 = vadd.f32 0.18741608, %v7312_v13  ;;  %v7599_v2 = vmul.f32 %v7598_v6, %v16785_v58  ;;  %v16837_v12 = vadd.f32 %v4966_v54, %v4918_v49  ;;  %v9696_v10 = vld [vmem:[#allocation16 + $0x8] sm:$0xf0]  ;;  %v10162_v9 = vld [vmem:[#allocation16 + $0x84] sm:$0xf] }
 0xac4   : > { %v7290_v61 = vmul.f32 %v16783_v44, %v7289_v59  ;;  %v7430_v4 = vmul.f32 %v7429_v5, %v16666_v60  ;;  %v7466_v38 = vmul.f32 2.1237322e-06, %v16758_v17  ;;  %v7483_v0 = vmul.f32 %v7482_v32, %v16758_v17 }
 0xac5   : > { %v7299_v37 = vor.u32 1.1754944e-38, %v7298_v46  ;;  %v7445_v40 = vmul.f32 %v7444_v55, %v16666_v60  ;;  %v7600_v57 = vadd.f32 0.014752088, %v7599_v2  ;;  %v16846_v11 = vmul.f32 %v13168_v14, %v16837_v12 }
 0xac6   : > { %v16848_v8 = vmul.f32 %v7180_v16, %v7156_v53  ;;  %vm7293_vm11 = vweird.f32 %v16783_v44  ;;  %v7329_v52 = vsub.f32 1.0, %v7328_v43  ;;  %v7588_v15 = vmul.f32 %v7587_v45, %v16785_v58  ;;  %v9760_v53 = vld [vmem:[#allocation16 + $0x88] sm:$0xf0] }
 0xac7   : > { %vm16852_vm12 = vcmp.eq.f32.partialorder %v7296_v20, 8.507059e+37  ;;  %v7314_v27 = vmul.f32 %v7313_v7, %v16611_v22  ;;  %v7484_v59 = vadd.f32 0.4994258, %v7483_v0  ;;  %v7601_v5 = vmul.f32 %v7600_v57, %v16785_v58  ;;  %vm16877_vm13 = vmor %vm7292_vm10, %vm7293_vm11 }
 0xac8   : > { %v7624_v14 = vmul.f32 %v16846_v11, %v16846_v11  ;;  %v7291_v46 = vadd.f32 %v16783_v44, %v7290_v61  ;;  %v7431_v55 = vadd.f32 0.05243302, %v7430_v4  ;;  %v7467_v6 = vadd.f32 0.00028619796, %v7466_v38 }
 0xac9   : > { %v9699_v49 = vor.u32 %v10146_v25, %v9696_v10  ;;  %v16861_v43 = vadd.f32 1.0, %v7445_v40  ;;  %v7485_v20 = vmul.f32 %v7484_v59, %v16758_v17  ;;  %v7602_v32 = vadd.f32 0.112945676, %v7601_v5 }
 0xaca   : > { %v16864_v45 = vmin.f32 %v7624_v14, 16.0  ;;  %v9679_v22 = vclamps-f32 %v16848_v8, 1.0  ;;  %v7330_v54 = vmul.f32 %v16803_v41, %v7329_v52  ;;  %v7589_v16 = vadd.f32 0.0036580483, %v7588_v15  ;;  %v17928_v15 = vld [vmem:[#allocation60_spill] sm:$0xff] }
 0xacb   : > { %8417 = vmatpush.bf16.msra.mxu0 %v9699_v49  ;;  %v9763_v7 = vor.u32 %v10162_v9, %v9760_v53  ;;  %v16868_v2 = vadd.f32 1.1283791, %v7314_v27  ;;  %v7338_v61 = vand.u32 2147483648, %v16754_v50  ;;  %v7603_v4 = vmul.f32 %v7602_v32, %v16785_v58  ;;  %v10192_v27 = vld [vmem:[#allocation16 + $0x174] sm:$0xf] }
 0xacc   : > { %v7626_v38 = vmul.f32 2.1237322e-06, %v16864_v45  ;;  %v7432_v25 = vmul.f32 %v7431_v55, %v16666_v60  ;;  %v7468_v40 = vmul.f32 %v7467_v6, %v16758_v17  ;;  %v7637_v57 = vmul.f32 3.8918573e-05, %v16864_v45  ;;  %v17929_v55 = vld [vmem:[#allocation71_spill] sm:$0xff] }
 0xacd   : > { %8466 = vmatpush.bf16.msra.mxu1 %v9763_v7  ;;  %v16886_v10 = vpack.c.bf16 %v16560_v63, %v16355_v34  ;;  %v7295_v52 = vsel %vm16877_vm13, %v16783_v44, %v7291_v46  ;;  %vm7333_vm14 = vweird.f32 %v16803_v41  ;;  %10664 = vrcp.f32 %v16861_v43  ;;  %v16898_v63 = vpop.f32.mrf.mxu0  ;;  %v9880_v44 = vld [vmem:[#allocation16 + $0x178] sm:$0xf0] }
 0xace   : > { %v16893_v33 = vadd.f32 1.0, %v7485_v20  ;;  %8418 = vmatmul.bf16.vlgmr.msra.gmra.mxu0 %v17928_v15  ;;  %v7331_v59 = vadd.f32 %v16803_v41, %v7330_v54  ;;  %v7590_v5 = vmul.f32 %v7589_v16, %v16785_v58  ;;  %v7604_v14 = vadd.f32 0.4994258, %v7603_v4  ;;  %v9872_v15 = vld [vmem:[#allocation16 + $0x168] sm:$0xf0] }
 0xacf   : > { %v7627_v34 = vadd.f32 0.00028619796, %v7626_v38  ;;  %8340 = vmatmul.bf16.gmra.mxu2 %v16886_v10  ;;  %vm7332_vm15 = vweird.f32 %v16754_v50  ;;  %v7336_v9 = vand.u32 2147483647, %v16754_v50  ;;  %v7339_v53 = vor.u32 1.1754944e-38, %v7338_v61 }
 0xad0   : > { %v7638_v46 = vadd.f32 0.001143296, %v7637_v57  ;;  %8467 = vmatmul.bf16.vlgmr.msra.gmra.mxu1 %v17929_v55  ;;  %v7300_v6 = vsel %vm16852_vm12, %v7299_v37, %v7295_v52  ;;  %v7433_v49 = vadd.f32 0.18741608, %v7432_v25  ;;  %v7469_v20 = vadd.f32 0.0036580483, %v7468_v40  ;;  %vm16909_vm0 = vmor %vm7332_vm15, %vm7333_vm14 }
 0xad1   : > { %v7605_v32 = vmul.f32 %v7604_v14, %v16785_v58  ;;  %v7628_v16 = vmul.f32 %v7627_v34, %v16864_v45  ;;  %v9883_v7 = vor.u32 %v10192_v27, %v9880_v44  ;;  %v16917_v61 = vpack.c.bf16 %v16581_v18, %v16386_v48  ;;  %v9944_v40 = vld [vmem:[#allocation16 + $0x1f8] sm:$0xf0]  ;;  %v10206_v14 = vld [vmem:[#allocation16 + $0x1e4] sm:$0xf]  ;;  %v9936_v34 = vld [vmem:[#allocation16 + $0x1e8] sm:$0xf0] }
 0xad2   : > { %v7639_v50 = vmul.f32 %v7638_v46, %v16864_v45  ;;  %v7335_v37 = vsel %vm16909_vm0, %v16803_v41, %v7331_v59  ;;  %10666 = vrcp.f32 %v16893_v33  ;;  %v7591_v13 = vadd.f32 0.05243302, %v7590_v5  ;;  %v10208_v41 = vld [vmem:[#allocation16 + $0x1f4] sm:$0xf]  ;;  %v9864_v54 = vld [vmem:[#allocation16 + $0x158] sm:$0xf0] }
 0xad3   : > { %v16923_v4 = vadd.f32 1.0, %v7605_v32  ;;  %v16925_v38 = vpop.eup %10664  ;;  %v16929_v0 = vmul.f32 %v16618_v47, %v16452_v28  ;;  %v7774_v25 = vmul.f32 %v16761_v35, %v16586_v39  ;;  %v7301_v48 = vmul.f32 %v7300_v6, %v16821_v24  ;;  %8508 = vmatpush.bf16.msra.mxu2 %v9883_v7  ;;  %8389 = vmatmul.bf16.gmra.mxu3 %v16917_v61  ;;  %v16942_v28 = vld [vmem:[%s17299_s11] sm:$0x3]  ;;  %v16944_v39 = vpop.f32.mrf.mxu1  ;;  %v10190_v24 = vld [vmem:[#allocation16 + $0x164] sm:$0xf] }
 0xad4   : > { %v7640_v18 = vadd.f32 0.014752088, %v7639_v50  ;;  %v7714_v57 = vadd.f32 1.0, %v9678_v26  ;;  %vm7337_vm1 = vcmp.eq.f32.partialorder %v7336_v9, 8.507059e+37  ;;  %v7434_v52 = vmul.f32 %v7433_v49, %v16666_v60 }
 0xad5   : > { %10668 = vrcp.f32 %v16923_v4  ;;  %v16948_v47 = vmul.f32 %v16811_v56, %v16593_v1  ;;  %v7340_v35 = vsel %vm7337_vm1, %v7339_v53, %v7335_v37  ;;  %v7470_v21 = vmul.f32 %v7469_v20, %v16758_v17  ;;  %v16969_v49 = vpop.f32.mrf.mxu0 }
 0xad6   : > { %v7629_v26 = vadd.f32 0.0036580483, %v7628_v16  ;;  %v7448_v60 = vmul.f32 %v16925_v38, %v16861_v43  ;;  %v7592_v27 = vmul.f32 %v7591_v13, %v16785_v58  ;;  %v7641_v59 = vmul.f32 %v7640_v18, %v16864_v45 }
 0xad7   : > { %v9947_v5 = vor.u32 %v10208_v41, %v9944_v40  ;;  %v16957_v1 = vadd.f32 1.0, %v9679_v22  ;;  %v9682_v56 = vclamps-f32 %v7301_v48, 1.0  ;;  %v7316_v44 = vmul.f32 %v16868_v2, %v16573_v42  ;;  %v10188_v2 = vld [vmem:[#allocation16 + $0x154] sm:$0xf] }
 0xad8   : > { %v16962_v9 = vperm.slane %v16942_v28, 0  ;;  %v16964_v53 = vpop.eup %10666  ;;  %v16966_v46 = vadd.f32 1.1283791, %v7434_v52  ;;  %v7456_v55 = vand.u32 2147483647, %v16861_v43  ;;  %v9875_v8 = vor.u32 %v10190_v24, %v9872_v15 }
 0xad9   : > { %v7642_v6 = vadd.f32 0.112945676, %v7641_v59  ;;  %8557 = vmatpush.bf16.msra.mxu3 %v9947_v5  ;;  %v16971_v22 = vmul.f32 %v7340_v35, %v7316_v44  ;;  %v7471_v20 = vadd.f32 0.05243302, %v7470_v21  ;;  %v7630_v32 = vmul.f32 %v7629_v26, %v16864_v45  ;;  %v10204_v52 = vld [vmem:[#allocation16 + $0x1d4] sm:$0xf] }
 0xada   : > { %v9939_v42 = vor.u32 %v10206_v14, %v9936_v34  ;;  %v7449_v50 = vsub.f32 1.0, %v7448_v60  ;;  %v7593_v7 = vadd.f32 0.18741608, %v7592_v27  ;;  %v16978_v13 = vpack.c.bf16 %v7774_v25, %v16789_v62  ;;  %8509 = vmatpush.bf16.msra.mxu2 %v9875_v8  ;;  %v9928_v35 = vld [vmem:[#allocation16 + $0x1d8] sm:$0xf0]  ;;  %v17932_v5 = vld [vmem:[#allocation76_spill] sm:$0xff] }
 0xadb   : > { %v16974_v16 = vpop.eup %10668  ;;  %v7643_v37 = vmul.f32 %v7642_v6, %v16864_v45  ;;  %v16980_v48 = vadd.f32 1.0, %v9682_v56  ;;  %v7458_v18 = vand.u32 2147483648, %v16861_v43  ;;  %v7488_v41 = vmul.f32 %v16964_v53, %v16893_v33  ;;  %v10186_v26 = vld [vmem:[#allocation16 + $0x144] sm:$0xf]  ;;  %v9856_v24 = vld [vmem:[#allocation16 + $0x148] sm:$0xf0]  ;;  %v16997_v34 = vpop.f32.mrf.mxu1 }
 0xadc   : > { %v7608_v40 = vmul.f32 %v16974_v16, %v16923_v4  ;;  %v16988_v21 = vmul.f32 %v7714_v57, %v16601_v31  ;;  %vm7452_vm2 = vweird.f32 %v16861_v43  ;;  %v9867_v25 = vor.u32 %v10188_v2, %v9864_v54  ;;  %v10202_v44 = vld [vmem:[#allocation16 + $0x1c4] sm:$0xf]  ;;  %v9920_v6 = vld [vmem:[#allocation16 + $0x1c8] sm:$0xf0] }
 0xadd   : > { %v7644_v62 = vadd.f32 0.4994258, %v7643_v37  ;;  %8558 = vmatpush.bf16.msra.mxu3 %v9939_v42  ;;  %v9683_v15 = vclamps-f32 %v16971_v22, 1.0  ;;  %v7472_v60 = vmul.f32 %v7471_v20, %v16758_v17  ;;  %v7631_v59 = vadd.f32 0.05243302, %v7630_v32  ;;  %v17933_v20 = vld [vmem:[#allocation77_spill] sm:$0xff] }
 0xade   : > { %v7609_v27 = vsub.f32 1.0, %v7608_v40  ;;  %8423 = vmatmul.bf16.gmra.mxu0 %v17932_v5  ;;  %v7450_v14 = vmul.f32 %v16925_v38, %v7449_v50  ;;  %v7594_v31 = vmul.f32 %v7593_v7, %v16785_v58  ;;  %v9931_v56 = vor.u32 %v10204_v52, %v9928_v35  ;;  %8510 = vmatpush.bf16.msra.mxu2 %v9867_v25  ;;  %v10184_v50 = vld [vmem:[#allocation16 + $0x134] sm:$0xf]  ;;  %v9848_v7 = vld [vmem:[#allocation16 + $0x138] sm:$0xf0]  ;;  %v17021_v52 = vpop.f32.mrf.mxu0 }
 0xadf   : > { %v7645_v57 = vmul.f32 %v7644_v62, %v16864_v45  ;;  %8345 = vmatmul.bf16.gmra.mxu2 %v16978_v13  ;;  %v7489_v8 = vsub.f32 1.0, %v7488_v41  ;;  %v17004_v32 = vpack.c.bf16 %v16948_v47, %v16929_v0  ;;  %v9859_v58 = vor.u32 %v10186_v26, %v9856_v24  ;;  %v10200_v35 = vld [vmem:[#allocation16 + $0x1b4] sm:$0xf]  ;;  %v10182_v5 = vld [vmem:[#allocation16 + $0x124] sm:$0xf] }
 0xae0   : > { %v7610_v22 = vmul.f32 %v16974_v16, %v7609_v27  ;;  %8472 = vmatmul.bf16.gmra.mxu1 %v17933_v20  ;;  %vm17006_vm3 = vcmp.eq.f32.partialorder %v7456_v55, 8.507059e+37  ;;  %vm7613_vm4 = vweird.f32 %v16974_v16  ;;  %v7618_v2 = vand.u32 2147483648, %v16923_v4  ;;  %v9904_v20 = vld [vmem:[#allocation16 + $0x1a8] sm:$0xf0] }
 0xae1   : > { %v17012_v54 = vadd.f32 1.0, %v7645_v57  ;;  %8559 = vmatpush.bf16.msra.mxu3 %v9931_v56  ;;  %v9923_v37 = vor.u32 %v10202_v44, %v9920_v6  ;;  %vm7453_vm5 = vweird.f32 %v16925_v38  ;;  %v7473_v0 = vadd.f32 0.18741608, %v7472_v60  ;;  %v17938_v57 = vld [vmem:[#allocation73_spill] sm:$0xff]  ;;  %v17939_v6 = vld [vmem:[#allocation75_spill] sm:$0xff] }
 0xae2   : > { %v7611_v47 = vadd.f32 %v16974_v16, %v7610_v22  ;;  %v7632_v55 = vmul.f32 %v7631_v59, %v16864_v45  ;;  %v7451_v41 = vadd.f32 %v16925_v38, %v7450_v14  ;;  %vm7612_vm6 = vweird.f32 %v16923_v4  ;;  %8511 = vmatpush.bf16.msra.mxu2 %v9859_v58  ;;  %v9840_v14 = vld [vmem:[#allocation16 + $0x128] sm:$0xf0]  ;;  %vm17046_vm8 = vmor %vm7452_vm2, %vm7453_vm5  ;;  %v10198_v22 = vld [vmem:[#allocation16 + $0x1a4] sm:$0xf] }
 0xae3   : > { %v7616_v40 = vand.u32 2147483647, %v16923_v4  ;;  %10670 = vrcp.f32 %v17012_v54  ;;  %v7459_v62 = vor.u32 1.1754944e-38, %v7458_v18  ;;  %v7490_v25 = vmul.f32 %v16964_v53, %v7489_v8  ;;  %vm17026_vm7 = vmor %vm7612_vm6, %vm7613_vm4  ;;  %8394 = vmatmul.bf16.gmra.mxu3 %v17004_v32  ;;  %v9912_v4 = vld [vmem:[#allocation16 + $0x1b8] sm:$0xf0] }
 0xae4   : > { %v7595_v26 = vadd.f32 1.1283791, %v7594_v31  ;;  %v9851_v60 = vor.u32 %v10184_v50, %v9848_v7  ;;  %v7719_v27 = vadd.f32 1.0, %v9683_v15  ;;  %v7615_v59 = vsel %vm17026_vm7, %v16974_v16, %v7611_v47  ;;  %v10194_v16 = vld [vmem:[#allocation16 + $0x184] sm:$0xf] }
 0xae5   : > { %v7619_v18 = vor.u32 1.1754944e-38, %v7618_v2  ;;  %8560 = vmatpush.bf16.msra.mxu3 %v9923_v37  ;;  %v9915_v31 = vor.u32 %v10200_v35, %v9912_v4  ;;  %v17036_v56 = vmul.f32 %v16957_v1, %v17938_v57  ;;  %v7782_v44 = vmul.f32 %v16980_v48, %v16677_v3  ;;  %v10180_v37 = vld [vmem:[#allocation16 + $0x114] sm:$0xf]  ;;  %v9896_v35 = vld [vmem:[#allocation16 + $0x198] sm:$0xf0] }
 0xae6   : > { %v7436_v8 = vmul.f32 %v16966_v46, %v17939_v6  ;;  %v7633_v15 = vadd.f32 0.18741608, %v7632_v55  ;;  %v7455_v1 = vsel %vm17046_vm8, %v16925_v38, %v7451_v41  ;;  %v7474_v3 = vmul.f32 %v7473_v0, %v16758_v17  ;;  %8512 = vmatpush.bf16.msra.mxu2 %v9851_v60  ;;  %v17063_v17 = vpop.f32.mrf.mxu1  ;;  %v9832_v0 = vld [vmem:[#allocation16 + $0x118] sm:$0xf0]  ;;  %v17946_v57 = vld [vmem:[#allocation78_spill] sm:$0xff] }
 0xae7   : > { %v7496_v48 = vand.u32 2147483647, %v16893_v33  ;;  %vm7617_vm9 = vcmp.eq.f32.partialorder %v7616_v40, 8.507059e+37  ;;  %v7491_v46 = vadd.f32 %v16964_v53, %v7490_v25  ;;  %vm7493_vm10 = vweird.f32 %v16964_v53 }
 0xae8   : > { %v7620_v43 = vsel %vm7617_vm9, %v7619_v18, %v7615_v59  ;;  %v9843_v58 = vor.u32 %v10182_v5, %v9840_v14  ;;  %v7498_v50 = vand.u32 2147483648, %v16893_v33  ;;  %v7596_v7 = vmul.f32 %v7595_v26, %v16770_v36  ;;  %v10196_v36 = vld [vmem:[#allocation16 + $0x194] sm:$0xf]  ;;  %v17089_v59 = vpop.f32.mrf.mxu0  ;;  %v9824_v18 = vld [vmem:[#allocation16 + $0x108] sm:$0xf0] }
 0xae9   : > { %v17057_v2 = vpop.eup %10670  ;;  %v8224_v38 = vadd.f32 %v16898_v63, %v16962_v9  ;;  %8561 = vmatpush.bf16.msra.mxu3 %v9915_v31  ;;  %v9907_v47 = vor.u32 %v10198_v22, %v9904_v20  ;;  %v7460_v55 = vsel %vm17006_vm3, %v7459_v62, %v7455_v1  ;;  %vm7492_vm11 = vweird.f32 %v16893_v33  ;;  %v17947_v20 = vld [vmem:[#allocation54_spill] sm:$0xff]  ;;  %v17949_v26 = vld [vmem:[#allocation25_spill] sm:$0xff] }
 0xaea   : > { %v7634_v41 = vmul.f32 %v7633_v15, %v16864_v45  ;;  %v7648_v40 = vmul.f32 %v17057_v2, %v17012_v54  ;;  %v7783_v63 = vmul.f32 %v7719_v27, %v16766_v23  ;;  %v7475_v25 = vadd.f32 1.1283791, %v7474_v3  ;;  %vm17074_vm12 = vmor %vm7492_vm11, %vm7493_vm10  ;;  %8513 = vmatpush.bf16.msra.mxu2 %v9843_v58  ;;  %v9888_v15 = vld [vmem:[#allocation16 + $0x188] sm:$0xf0] }
 0xaeb   : > { %v7621_v42 = vmul.f32 %v7620_v43, %v7596_v7  ;;  %v17079_v62 = vpack.c.bf16 %v7782_v44, %v16988_v21  ;;  %v7495_v45 = vsel %vm17074_vm12, %v16964_v53, %v7491_v46  ;;  %vm17084_vm13 = vcmp.eq.f32.partialorder %v7496_v48, 8.507059e+37  ;;  %v10178_v21 = vld [vmem:[#allocation16 + $0x104] sm:$0xf] }
 0xaec   : > { %v7649_v23 = vsub.f32 1.0, %v7648_v40  ;;  %v9835_v24 = vor.u32 %v10180_v37, %v9832_v0  ;;  %v7461_v60 = vmul.f32 %v7460_v55, %v7436_v8  ;;  %v7499_v4 = vor.u32 1.1754944e-38, %v7498_v50 }
 0xaed   : > { %v7658_v27 = vand.u32 2147483648, %v17012_v54  ;;  %8562 = vmatpush.bf16.msra.mxu3 %v9907_v47  ;;  %v9899_v5 = vor.u32 %v10196_v36, %v9896_v35  ;;  %v7635_v14 = vadd.f32 1.1283791, %v7634_v41  ;;  %vm7653_vm14 = vweird.f32 %v17057_v2  ;;  %v8370_v41 = vpop.f32.mrf.mxu3  ;;  %v17948_v35 = vld [vmem:[#allocation72_spill] sm:$0xff] }
 0xaee   : > { %v7650_v53 = vmul.f32 %v17057_v2, %v7649_v23  ;;  %v7656_v31 = vand.u32 2147483647, %v17012_v54  ;;  %8428 = vmatmul.bf16.gmra.mxu0 %v17946_v57  ;;  %v7476_v44 = vmul.f32 %v7475_v25, %v16730_v19  ;;  %v7500_v6 = vsel %vm17084_vm13, %v7499_v4, %v7495_v45  ;;  %8514 = vmatpush.bf16.msra.mxu2 %v9835_v24  ;;  %v8321_v19 = vpop.f32.mrf.mxu2  ;;  %v8279_v0 = vpop.f32.mrf.mxu1 }
 0xaef   : > { %v9690_v8 = vclamps-f32 %v7621_v42, 1.0  ;;  %8350 = vmatmul.bf16.gmra.mxu2 %v17079_v62  ;;  %vm7652_vm15 = vweird.f32 %v17012_v54  ;;  %v17103_v1 = vpack.c.bf16 %v7783_v63, %v17036_v56  ;;  %v9827_v3 = vor.u32 %v10178_v21, %v9824_v18 }
 0xaf0   : > { %v7651_v22 = vadd.f32 %v17057_v2, %v7650_v53  ;;  %8477 = vmatmul.bf16.gmra.mxu1 %v17947_v20  ;;  %v9686_v48 = vclamps-f32 %v7461_v60, 1.0  ;;  %vm7654_vm0 = vmor %vm7652_vm15, %vm7653_vm14  ;;  %v7659_v46 = vor.u32 1.1754944e-38, %v7658_v27  ;;  %v8273_v43 = vadd.f32 %v16944_v39, %v8224_v38  ;;  %v8233_v25 = vpop.f32.mrf.mxu0 }
 0xaf1   : > { %8563 = vmatpush.bf16.msra.mxu3 %v9899_v5  ;;  %v9891_v58 = vor.u32 %v10194_v16, %v9888_v15  ;;  %v7501_v50 = vmul.f32 %v7500_v6, %v7476_v44  ;;  %v7636_v54 = vmul.f32 %v7635_v14, %v16846_v11  ;;  %vm7657_vm1 = vcmp.eq.f32.partialorder %v7656_v31, 8.507059e+37  ;;  %v17950_v14 = vld [vmem:[#allocation68_spill] sm:$0xff] }
 0xaf2   : > { %v7655_v7 = vsel %vm7654_vm0, %v17057_v2, %v7651_v22  ;;  %v7726_v56 = vadd.f32 1.0, %v9690_v8  ;;  %v8322_v47 = vadd.f32 %v8321_v19, %v8273_v43  ;;  %8515 = vmatpush.bf16.msra.mxu2 %v9827_v3  ;;  %v7722_v40 = vadd.f32 1.0, %v9686_v48  ;;  %v17952_v8 = vld [vmem:[#allocation62_spill] sm:$0xff] }
 0xaf3   : > { %v7660_v37 = vsel %vm7657_vm1, %v7659_v46, %v7655_v7  ;;  %8399 = vmatmul.bf16.gmra.mxu3 %v17103_v1  ;;  %v5031_v39 = vmul.f32 0.5, %v16732_v29  ;;  %v9687_v36 = vclamps-f32 %v7501_v50, 1.0  ;;  %v5027_v2 = vmul.f32 0.5, %v17948_v35  ;;  %v17953_v46 = vld [vmem:[#allocation28_spill] sm:$0xff]  ;;  %v17955_v7 = vld [vmem:[#allocation61_spill] sm:$0xff] }
 0xaf4   : > { %v7661_v55 = vmul.f32 %v7660_v37, %v7636_v54  ;;  %v8371_v38 = vadd.f32 %v8370_v41, %v8322_v47  ;;  %v8226_v33 = vadd.f32 %v16969_v49, %v16962_v9  ;;  %v5032_v60 = vmul.f32 0.5, %v16837_v12  ;;  %v17951_v12 = vld [vmem:[#allocation57_spill] sm:$0xff]  ;;  %v17954_v54 = vld [vmem:[#allocation52_spill] sm:$0xff] }
 0xaf5   : > { %8564 = vmatpush.bf16.msra.mxu3 %v9891_v58  ;;  %v7790_v63 = vmul.f32 %v7726_v56, %v5031_v39  ;;  %v7786_v24 = vmul.f32 %v7722_v40, %v5027_v2  ;;  %v7723_v29 = vadd.f32 1.0, %v9687_v36  ;;  %v5028_v27 = vmul.f32 0.5, %v16708_v51  ;;  %v8372_v31 = vpop.f32.mrf.mxu3  ;;  %v17956_v47 = vld [vmem:[#allocation80_spill] sm:$0xff]  ;;  %v17957_v40 = vld [vmem:[#allocation30_spill] sm:$0xff]  ;;  %v17958_v36 = vld [vmem:[#allocation65_spill] sm:$0xff] }
 0xaf6   : > { %v9691_v11 = vclamps-f32 %v7661_v55, 1.0  ;;  %v8606_v42 = vadd.f32 %v8371_v38, %v17949_v26  ;;  %v8323_v23 = vpop.f32.mrf.mxu2  ;;  %v8275_v18 = vadd.f32 %v16997_v34, %v8226_v33  ;;  %v8282_v5 = vpop.f32.mrf.mxu1  ;;  %v8229_v57 = vadd.f32 %v17021_v52, %v16962_v9 }
 0xaf7   : > { %v17122_v4 = vpack.c.bf16 %v7790_v63, %v7786_v24  ;;  %v7787_v49 = vmul.f32 %v7723_v29, %v5028_v27  ;;  %v8231_v52 = vadd.f32 %v17089_v59, %v16962_v9  ;;  %v8234_v37 = vadd.f32 %v8233_v25, %v16962_v9  ;;  %v17959_v25 = vld [vmem:[#allocation29_spill] sm:$0xff] }
 0xaf8   : > { %v7727_v45 = vadd.f32 1.0, %v9691_v11  ;;  %8638 = vst [vmem:[%s17118_s27] sm:$0xff] %v8606_v42  ;;  %v8324_v53 = vadd.f32 %v8323_v23, %v8275_v18  ;;  %v8235_v34 = vpop.f32.mrf.mxu0  ;;  %v8278_v15 = vadd.f32 %v17063_v17, %v8229_v57  ;;  %v17960_v23 = vld [vmem:[#allocation79_spill] sm:$0xff] }
 0xaf9   : > { %v8280_v50 = vadd.f32 %v8279_v0, %v8231_v52  ;;  %v8283_v38 = vadd.f32 %v8282_v5, %v8234_v37  ;;  %v8236_v2 = vadd.f32 %v8235_v34, %v16962_v9  ;;  %v17963_v5 = vld [vmem:[#allocation35_spill] sm:$0xff] }
 0xafa   : > { %v7791_v21 = vmul.f32 %v7727_v45, %v5032_v60  ;;  %v8373_v51 = vadd.f32 %v8372_v31, %v8324_v53  ;;  %v17961_v60 = vld [vmem:[#allocation53_spill] sm:$0xff]  ;;  %v17965_v57 = vld [vmem:[#allocation59_spill] sm:$0xff] }
 0xafb   : > { %v17972_v37 = vld [vmem:[#allocation55_spill] sm:$0xff] }
 0xafc   : > { %v17131_v44 = vpack.c.bf16 %v7791_v21, %v7787_v49  ;;  %v8608_v16 = vadd.f32 %v8373_v51, %v17952_v8  ;;  %v17962_v21 = vld [vmem:[#allocation24_spill] sm:$0xff] }
 0xafd   : > { %v8375_v3 = vpop.f32.mrf.mxu3  ;;  %v17966_v51 = vld [vmem:[#allocation56_spill] sm:$0xff] }
 0xafe   : > { %8433 = vmatmul.bf16.gmra.mxu0 %v17950_v14  ;;  %v8326_v6 = vpop.f32.mrf.mxu2  ;;  %8640 = vst [vmem:[%s17118_s27 + $0x10] sm:$0xff] %v8608_v16  ;;  %v8284_v20 = vpop.f32.mrf.mxu1  ;;  %v17964_v14 = vld [vmem:[#allocation70_spill] sm:$0xff] }
 0xaff   : > { %8355 = vmatmul.bf16.gmra.mxu2 %v17122_v4  ;;  %v8327_v22 = vadd.f32 %v8326_v6, %v8278_v15  ;;  %v8285_v33 = vadd.f32 %v8284_v20, %v8236_v2  ;;  %v17967_v6 = vld [vmem:[#allocation74_spill] sm:$0xff]  ;;  %v17968_v15 = vld [vmem:[#allocation67_spill] sm:$0xff] }
 0xb00   : > { %8482 = vmatmul.bf16.gmra.mxu1 %v17951_v12  ;;  %v8238_v58 = vpop.f32.mrf.mxu0 }
 0xb01   : > { %v8376_v19 = vadd.f32 %v8375_v3, %v8327_v22  ;;  %v8239_v34 = vadd.f32 %v8238_v58, %v16962_v9  ;;  %v17971_v58 = vld [vmem:[#allocation81_spill] sm:$0xff] }
 0xb03   : > { %8404 = vmatmul.bf16.gmra.mxu3 %v17131_v44  ;;  %v8610_v43 = vadd.f32 %v8376_v19, %v17953_v46  ;;  %v17969_v46 = vld [vmem:[#allocation36_spill] sm:$0xff] }
 0xb05   : > { %8642 = vst [vmem:[%s17118_s27 + $0x20] sm:$0xff] %v8610_v43  ;;  %v8377_v56 = vpop.f32.mrf.mxu3 }
 0xb06   : > { %v8328_v48 = vpop.f32.mrf.mxu2  ;;  %v8287_v59 = vpop.f32.mrf.mxu1 }
 0xb07   : > { %v8329_v17 = vadd.f32 %v8328_v48, %v8280_v50  ;;  %v8288_v22 = vadd.f32 %v8287_v59, %v8239_v34 }
 0xb08   : > { %v8240_v0 = vpop.f32.mrf.mxu0 }
 0xb09   : > { %v8378_v55 = vadd.f32 %v8377_v56, %v8329_v17  ;;  %v8241_v52 = vadd.f32 %v8240_v0, %v16962_v9 }
 0xb0b   : > { %v8612_v39 = vadd.f32 %v8378_v55, %v17957_v40 }
 0xb0d   : > { %8644 = vst [vmem:[%s17118_s27 + $0x30] sm:$0xff] %v8612_v39  ;;  %v8380_v35 = vpop.f32.mrf.mxu3 }
 0xb0e   : > { %8438 = vmatmul.bf16.gmra.mxu0 %v17954_v54  ;;  %v8331_v41 = vpop.f32.mrf.mxu2  ;;  %v8289_v42 = vpop.f32.mrf.mxu1 }
 0xb0f   : > { %8516 = vmatmul.bf16.vlgmr.msra.gmra.mxu2 %v17955_v7  ;;  %v8332_v11 = vadd.f32 %v8331_v41, %v8283_v38  ;;  %v8290_v54 = vadd.f32 %v8289_v42, %v8241_v52  ;;  %v17970_v7 = vld [vmem:[#allocation58_spill] sm:$0xff]  ;;  %v17974_v42 = vld [vmem:[#allocation41_spill] sm:$0xff] }
 0xb10   : > { %8487 = vmatmul.bf16.gmra.mxu1 %v17956_v47  ;;  %v8243_v29 = vpop.f32.mrf.mxu0  ;;  %v17973_v41 = vld [vmem:[#allocation34_spill] sm:$0xff] }
 0xb11   : > { %v8381_v63 = vadd.f32 %v8380_v35, %v8332_v11 }
 0xb13   : > { %8565 = vmatmul.bf16.vlgmr.msra.gmra.mxu3 %v17958_v36  ;;  %v8614_v26 = vadd.f32 %v8381_v63, %v17959_v25  ;;  %v8244_v36 = vadd.f32 %v8243_v29, %v16962_v9 }
 0xb15   : > { %8646 = vst [vmem:[%s17118_s27 + $0x40] sm:$0xff] %v8614_v26  ;;  %v8382_v27 = vpop.f32.mrf.mxu3 }
 0xb16   : > { %v8333_v45 = vpop.f32.mrf.mxu2  ;;  %v8292_v53 = vpop.f32.mrf.mxu1 }
 0xb17   : > { %v8334_v24 = vadd.f32 %v8333_v45, %v8285_v33  ;;  %v8293_v35 = vadd.f32 %v8292_v53, %v8244_v36 }
 0xb18   : > { %v8245_v31 = vpop.f32.mrf.mxu0 }
 0xb19   : > { %v8383_v18 = vadd.f32 %v8382_v27, %v8334_v24  ;;  %v8246_v26 = vadd.f32 %v8245_v31, %v16962_v9 }
 0xb1b   : > { %v8616_v49 = vadd.f32 %v8383_v18, %v17963_v5 }
 0xb1d   : > { %8648 = vst [vmem:[%s17118_s27 + $0x50] sm:$0xff] %v8616_v49 }
 0xb1e   : > { %8443 = vmatmul.bf16.gmra.mxu0 %v17960_v23  ;;  %v8294_v12 = vpop.f32.mrf.mxu1 }
 0xb1f   : > { %8521 = vmatmul.bf16.gmra.mxu2 %v17961_v60  ;;  %v8295_v24 = vadd.f32 %v8294_v12, %v8246_v26  ;;  %v17976_v12 = vld [vmem:[#allocation46_spill] sm:$0xff] }
 0xb20   : > { %8492 = vmatmul.bf16.gmra.mxu1 %v17962_v21  ;;  %v8248_v16 = vpop.f32.mrf.mxu0  ;;  %v17975_v21 = vld [vmem:[#allocation43_spill] sm:$0xff] }
 0xb21   : > { %v8249_v60 = vadd.f32 %v8248_v16, %v16962_v9 }
 0xb23   : > { %8570 = vmatmul.bf16.gmra.mxu3 %v17964_v14 }
 0xb26   : > { %v8297_v19 = vpop.f32.mrf.mxu1 }
 0xb27   : > { %v8298_v49 = vadd.f32 %v8297_v19, %v8249_v60 }
 0xb28   : > { %v8250_v17 = vpop.f32.mrf.mxu0 }
 0xb2b   : > { %v8336_v8 = vpop.f32.mrf.mxu2 }
 0xb2c   : > { %v8337_v20 = vadd.f32 %v8336_v8, %v8288_v22 }
 0xb2e   : > { %8448 = vmatmul.bf16.gmra.mxu0 %v17965_v57  ;;  %v8299_v59 = vpop.f32.mrf.mxu1  ;;  %v8251_v57 = vadd.f32 %v8250_v17, %v16962_v9 }
 0xb2f   : > { %8526 = vmatmul.bf16.gmra.mxu2 %v17966_v51 }
 0xb30   : > { %8497 = vmatmul.bf16.gmra.mxu1 %v17967_v6  ;;  %v8253_v39 = vpop.f32.mrf.mxu0  ;;  %v8300_v8 = vadd.f32 %v8299_v59, %v8251_v57 }
 0xb33   : > { %8575 = vmatmul.bf16.gmra.mxu3 %v17968_v15  ;;  %v8338_v50 = vpop.f32.mrf.mxu2 }
 0xb34   : > { %v8339_v56 = vadd.f32 %v8338_v50, %v8290_v54 }
 0xb36   : > { %v8302_v38 = vpop.f32.mrf.mxu1 }
 0xb37   : > { %v8385_v3 = vpop.f32.mrf.mxu3 }
 0xb38   : > { %v8386_v48 = vadd.f32 %v8385_v3, %v8337_v20  ;;  %v8255_v0 = vpop.f32.mrf.mxu0  ;;  %v17977_v3 = vld [vmem:[#allocation44_spill] sm:$0xff] }
 0xb39   : > { %v8256_v54 = vadd.f32 %v8255_v0, %v16962_v9 }
 0xb3a   : > { %v8618_v43 = vadd.f32 %v8386_v48, %v17969_v46 }
 0xb3c   : > { %8650 = vst [vmem:[%s17118_s27 + $0x60] sm:$0xff] %v8618_v43 }
 0xb3e   : > { %8453 = vmatmul.bf16.gmra.mxu0 %v17970_v7  ;;  %v8304_v63 = vpop.f32.mrf.mxu1  ;;  %v17978_v7 = vld [vmem:[#allocation49_spill] sm:$0xff] }
 0xb3f   : > { %8531 = vmatmul.bf16.gmra.mxu2 %v17971_v58  ;;  %v8387_v47 = vpop.f32.mrf.mxu3 }
 0xb40   : > { %8502 = vmatmul.bf16.gmra.mxu1 %v17972_v37  ;;  %v8388_v55 = vadd.f32 %v8387_v47, %v8339_v56  ;;  %v8258_v23 = vpop.f32.mrf.mxu0  ;;  %v8305_v37 = vadd.f32 %v8304_v63, %v8256_v54 }
 0xb42   : > { %v8620_v40 = vadd.f32 %v8388_v55, %v17973_v41 }
 0xb43   : > { %8580 = vmatmul.bf16.gmra.mxu3 %v16748_v30 }
 0xb44   : > { %8652 = vst [vmem:[%s17118_s27 + $0x70] sm:$0xff] %v8620_v40  ;;  %v17979_v40 = vld [vmem:[#allocation51_spill] sm:$0xff] }
 0xb46   : > { %v8307_v27 = vpop.f32.mrf.mxu1 }
 0xb48   : > { %v8260_v14 = vpop.f32.mrf.mxu0 }
 0xb4e   : > { %v8309_v34 = vpop.f32.mrf.mxu1 }
 0xb4f   : > { %8536 = vmatmul.bf16.gmra.mxu2 %v16886_v10 }
 0xb50   : > { %v8419_v15 = vpop.f32.mrf.mxu0 }
 0xb52   : > { %v8341_v11 = vpop.f32.mrf.mxu2 }
 0xb53   : > { %8585 = vmatmul.bf16.gmra.mxu3 %v16917_v61  ;;  %v8342_v2 = vadd.f32 %v8341_v11, %v8293_v35 }
 0xb56   : > { %v8390_v25 = vpop.f32.mrf.mxu3  ;;  %v8468_v46 = vpop.f32.mrf.mxu1 }
 0xb57   : > { %v8391_v30 = vadd.f32 %v8390_v25, %v8342_v2  ;;  %v8261_v2 = vadd.f32 %v8260_v14, %v16962_v9  ;;  %v17980_v25 = vld [vmem:[#allocation69_spill] sm:$0xff]  ;;  %v17982_v14 = vld [vmem:[#allocation63_spill] sm:$0xff] }
 0xb59   : > { %v8622_v45 = vadd.f32 %v8391_v30, %v17974_v42  ;;  %v8310_v42 = vadd.f32 %v8309_v34, %v8261_v2 }
 0xb5a   : > { %v8343_v33 = vpop.f32.mrf.mxu2 }
 0xb5b   : > { %8654 = vst [vmem:[%s17118_s27 + $0x80] sm:$0xff] %v8622_v45  ;;  %v8344_v10 = vadd.f32 %v8343_v33, %v8295_v24  ;;  %v17201_v45 = vperm.slane %v16942_v28, 1 }
 0xb5e   : > { %v8392_v29 = vpop.f32.mrf.mxu3  ;;  %v8470_v55 = vpop.f32.mrf.mxu1 }
 0xb5f   : > { %8541 = vmatmul.bf16.gmra.mxu2 %v16978_v13  ;;  %v8393_v61 = vadd.f32 %v8392_v29, %v8344_v10  ;;  %v17981_v29 = vld [vmem:[#allocation66_spill] sm:$0xff] }
 0xb61   : > { %v8624_v18 = vadd.f32 %v8393_v61, %v17975_v21 }
 0xb62   : > { %v8346_v5 = vpop.f32.mrf.mxu2 }
 0xb63   : > { %8656 = vst [vmem:[%s17118_s27 + $0x90] sm:$0xff] %v8624_v18  ;;  %8590 = vmatmul.bf16.gmra.mxu3 %v17004_v32  ;;  %v8347_v53 = vadd.f32 %v8346_v5, %v8298_v49  ;;  %v8254_v32 = vadd.f32 %v8253_v39, %v16962_v9 }
 0xb65   : > { %v8303_v48 = vadd.f32 %v8302_v38, %v8254_v32 }
 0xb66   : > { %v8395_v31 = vpop.f32.mrf.mxu3 }
 0xb67   : > { %v8396_v13 = vadd.f32 %v8395_v31, %v8347_v53 }
 0xb69   : > { %v8626_v51 = vadd.f32 %v8396_v13, %v17976_v12 }
 0xb6a   : > { %v8348_v6 = vpop.f32.mrf.mxu2 }
 0xb6b   : > { %8658 = vst [vmem:[%s17118_s27 + $0xa0] sm:$0xff] %v8626_v51  ;;  %v8349_v16 = vadd.f32 %v8348_v6, %v8300_v8 }
 0xb6e   : > { %v8397_v22 = vpop.f32.mrf.mxu3 }
 0xb6f   : > { %8546 = vmatmul.bf16.gmra.mxu2 %v17079_v62  ;;  %v8398_v20 = vadd.f32 %v8397_v22, %v8349_v16  ;;  %v8421_v62 = vpop.f32.mrf.mxu0  ;;  %v17983_v16 = vld [vmem:[#allocation27_spill] sm:$0xff] }
 0xb70   : > { %v8422_v28 = vadd.f32 %v8421_v62, %v17201_v45 }
 0xb71   : > { %v8628_v52 = vadd.f32 %v8398_v20, %v17977_v3 }
 0xb72   : > { %v8351_v19 = vpop.f32.mrf.mxu2  ;;  %v8471_v57 = vadd.f32 %v8470_v55, %v8422_v28 }
 0xb73   : > { %8660 = vst [vmem:[%s17118_s27 + $0xb0] sm:$0xff] %v8628_v52  ;;  %8595 = vmatmul.bf16.gmra.mxu3 %v17103_v1  ;;  %v8352_v43 = vadd.f32 %v8351_v19, %v8303_v48  ;;  %v8259_v1 = vadd.f32 %v8258_v23, %v16962_v9 }
 0xb75   : > { %v8308_v0 = vadd.f32 %v8307_v27, %v8259_v1 }
 0xb76   : > { %v8400_v50 = vpop.f32.mrf.mxu3 }
 0xb77   : > { %v8401_v17 = vadd.f32 %v8400_v50, %v8352_v43  ;;  %v8424_v36 = vpop.f32.mrf.mxu0 }
 0xb78   : > { %v8425_v6 = vadd.f32 %v8424_v36, %v17201_v45 }
 0xb79   : > { %v8630_v58 = vadd.f32 %v8401_v17, %v17978_v7 }
 0xb7a   : > { %v8353_v56 = vpop.f32.mrf.mxu2 }
 0xb7b   : > { %8662 = vst [vmem:[%s17118_s27 + $0xc0] sm:$0xff] %v8630_v58  ;;  %v8354_v47 = vadd.f32 %v8353_v56, %v8305_v37 }
 0xb7e   : > { %v8402_v59 = vpop.f32.mrf.mxu3 }
 0xb7f   : > { %8551 = vmatmul.bf16.gmra.mxu2 %v17122_v4  ;;  %v8403_v41 = vadd.f32 %v8402_v59, %v8354_v47  ;;  %v8473_v4 = vpop.f32.mrf.mxu1  ;;  %v8426_v33 = vpop.f32.mrf.mxu0  ;;  %v17985_v47 = vld [vmem:[#allocation31_spill] sm:$0xff] }
 0xb80   : > { %v8474_v32 = vadd.f32 %v8473_v4, %v8425_v6  ;;  %v8427_v19 = vadd.f32 %v8426_v33, %v17201_v45  ;;  %v17987_v33 = vld [vmem:[#allocation32_spill] sm:$0xff] }
 0xb81   : > { %v8632_v39 = vadd.f32 %v8403_v41, %v17979_v40 }
 0xb82   : > { %v8356_v38 = vpop.f32.mrf.mxu2 }
 0xb83   : > { %8664 = vst [vmem:[%s17118_s27 + $0xd0] sm:$0xff] %v8632_v39  ;;  %8600 = vmatmul.bf16.gmra.mxu3 %v17131_v44  ;;  %v8357_v11 = vadd.f32 %v8356_v38, %v8308_v0  ;;  %v8420_v44 = vadd.f32 %v8419_v15, %v17201_v45  ;;  %v17986_v0 = vld [vmem:[#allocation33_spill] sm:$0xff] }
 0xb85   : > { %v8469_v27 = vadd.f32 %v8468_v46, %v8420_v44  ;;  %v17984_v46 = vld [vmem:[#allocation26_spill] sm:$0xff] }
 0xb86   : > { %v8405_v35 = vpop.f32.mrf.mxu3 }
 0xb87   : > { %v8406_v63 = vadd.f32 %v8405_v35, %v8357_v11  ;;  %v8475_v61 = vpop.f32.mrf.mxu1  ;;  %v8429_v18 = vpop.f32.mrf.mxu0 }
 0xb88   : > { %v8476_v17 = vadd.f32 %v8475_v61, %v8427_v19  ;;  %v8430_v58 = vadd.f32 %v8429_v18, %v17201_v45 }
 0xb89   : > { %v8634_v26 = vadd.f32 %v8406_v63, %v17980_v25 }
 0xb8a   : > { %v8358_v30 = vpop.f32.mrf.mxu2 }
 0xb8b   : > { %8666 = vst [vmem:[%s17118_s27 + $0xe0] sm:$0xff] %v8634_v26  ;;  %v8359_v23 = vadd.f32 %v8358_v30, %v8310_v42 }
 0xb8e   : > { %v8407_v24 = vpop.f32.mrf.mxu3 }
 0xb8f   : > { %v8408_v10 = vadd.f32 %v8407_v24, %v8359_v23  ;;  %v8478_v13 = vpop.f32.mrf.mxu1  ;;  %v8431_v8 = vpop.f32.mrf.mxu0 }
 0xb90   : > { %v8479_v1 = vadd.f32 %v8478_v13, %v8430_v58  ;;  %v8432_v38 = vadd.f32 %v8431_v8, %v17201_v45  ;;  %v17989_v13 = vld [vmem:[#allocation40_spill] sm:$0xff] }
 0xb91   : > { %v8636_v9 = vadd.f32 %v8408_v10, %v17981_v29 }
 0xb92   : > { %v8517_v60 = vpop.f32.mrf.mxu2 }
 0xb93   : > { %8668 = vst [vmem:[%s17118_s27 + $0xf0] sm:$0xff] %v8636_v9  ;;  %v8518_v21 = vadd.f32 %v8517_v60, %v8469_v27 }
 0xb96   : > { %v8566_v5 = vpop.f32.mrf.mxu3 }
 0xb97   : > { %v8567_v49 = vadd.f32 %v8566_v5, %v8518_v21  ;;  %v8480_v3 = vpop.f32.mrf.mxu1  ;;  %v8434_v54 = vpop.f32.mrf.mxu0  ;;  %v17988_v21 = vld [vmem:[#allocation37_spill] sm:$0xff] }
 0xb98   : > { %v8481_v63 = vadd.f32 %v8480_v3, %v8432_v38  ;;  %v8435_v30 = vadd.f32 %v8434_v54, %v17201_v45 }
 0xb99   : > { %v8607_v53 = vadd.f32 %v8567_v49, %v17982_v14 }
 0xb9a   : > { %v8519_v31 = vpop.f32.mrf.mxu2 }
 0xb9b   : > { %8639 = vst [vmem:[%s17118_s27 + $0x8] sm:$0xff] %v8607_v53  ;;  %v8520_v12 = vadd.f32 %v8519_v31, %v8471_v57 }
 0xb9e   : > { %v8568_v51 = vpop.f32.mrf.mxu3 }
 0xb9f   : > { %v8569_v34 = vadd.f32 %v8568_v51, %v8520_v12  ;;  %v8483_v37 = vpop.f32.mrf.mxu1  ;;  %v8436_v41 = vpop.f32.mrf.mxu0 }
 0xba0   : > { %v8484_v44 = vadd.f32 %v8483_v37, %v8435_v30  ;;  %v8437_v60 = vadd.f32 %v8436_v41, %v17201_v45  ;;  %v17992_v41 = vld [vmem:[#allocation39_spill] sm:$0xff] }
 0xba1   : > { %v8609_v15 = vadd.f32 %v8569_v34, %v17983_v16 }
 0xba2   : > { %v8522_v22 = vpop.f32.mrf.mxu2 }
 0xba3   : > { %8641 = vst [vmem:[%s17118_s27 + $0x18] sm:$0xff] %v8609_v15  ;;  %v8523_v20 = vadd.f32 %v8522_v22, %v8474_v32 }
 0xba6   : > { %v8571_v52 = vpop.f32.mrf.mxu3 }
 0xba7   : > { %v8572_v48 = vadd.f32 %v8571_v52, %v8523_v20  ;;  %v8485_v2 = vpop.f32.mrf.mxu1  ;;  %v8439_v25 = vpop.f32.mrf.mxu0  ;;  %v17990_v20 = vld [vmem:[#allocation38_spill] sm:$0xff] }
 0xba8   : > { %v8486_v28 = vadd.f32 %v8485_v2, %v8437_v60  ;;  %v8440_v31 = vadd.f32 %v8439_v25, %v17201_v45 }
 0xba9   : > { %v8611_v43 = vadd.f32 %v8572_v48, %v17984_v46 }
 0xbaa   : > { %v8524_v50 = vpop.f32.mrf.mxu2 }
 0xbab   : > { %8643 = vst [vmem:[%s17118_s27 + $0x28] sm:$0xff] %v8611_v43  ;;  %v8525_v62 = vadd.f32 %v8524_v50, %v8476_v17  ;;  %v17991_v17 = vld [vmem:[#allocation42_spill] sm:$0xff] }
 0xbae   : > { %v8573_v7 = vpop.f32.mrf.mxu3 }
 0xbaf   : > { %v8574_v56 = vadd.f32 %v8573_v7, %v8525_v62  ;;  %v8488_v10 = vpop.f32.mrf.mxu1  ;;  %v8441_v27 = vpop.f32.mrf.mxu0 }
 0xbb0   : > { %v8489_v34 = vadd.f32 %v8488_v10, %v8440_v31  ;;  %v8442_v15 = vadd.f32 %v8441_v27, %v17201_v45  ;;  %v17994_v10 = vld [vmem:[#allocation48_spill] sm:$0xff] }
 0xbb1   : > { %v8613_v55 = vadd.f32 %v8574_v56, %v17985_v47 }
 0xbb2   : > { %v8527_v59 = vpop.f32.mrf.mxu2 }
 0xbb3   : > { %8645 = vst [vmem:[%s17118_s27 + $0x38] sm:$0xff] %v8613_v55  ;;  %v8528_v40 = vadd.f32 %v8527_v59, %v8479_v1 }
 0xbb6   : > { %v8576_v39 = vpop.f32.mrf.mxu3 }
 0xbb7   : > { %v8577_v36 = vadd.f32 %v8576_v39, %v8528_v40  ;;  %v8490_v14 = vpop.f32.mrf.mxu1  ;;  %v8444_v6 = vpop.f32.mrf.mxu0 }
 0xbb8   : > { %v8491_v19 = vadd.f32 %v8490_v14, %v8442_v15  ;;  %v8445_v50 = vadd.f32 %v8444_v6, %v17201_v45 }
 0xbb9   : > { %v8615_v11 = vadd.f32 %v8577_v36, %v17986_v0 }
 0xbba   : > { %v8529_v35 = vpop.f32.mrf.mxu2 }
 0xbbb   : > { %8647 = vst [vmem:[%s17118_s27 + $0x48] sm:$0xff] %v8615_v11  ;;  %v8530_v4 = vadd.f32 %v8529_v35, %v8481_v63 }
 0xbbe   : > { %v8578_v26 = vpop.f32.mrf.mxu3 }
 0xbbf   : > { %v8579_v42 = vadd.f32 %v8578_v26, %v8530_v4  ;;  %v8493_v32 = vpop.f32.mrf.mxu1  ;;  %v8446_v48 = vpop.f32.mrf.mxu0  ;;  %v17993_v4 = vld [vmem:[#allocation47_spill] sm:$0xff] }
 0xbc0   : > { %v8494_v56 = vadd.f32 %v8493_v32, %v8445_v50  ;;  %v8447_v59 = vadd.f32 %v8446_v48, %v17201_v45 }
 0xbc1   : > { %v8617_v23 = vadd.f32 %v8579_v42, %v17987_v33 }
 0xbc2   : > { %v8532_v24 = vpop.f32.mrf.mxu2 }
 0xbc3   : > { %8649 = vst [vmem:[%s17118_s27 + $0x58] sm:$0xff] %v8617_v23  ;;  %v8533_v29 = vadd.f32 %v8532_v24, %v8484_v44 }
 0xbc6   : > { %v8581_v9 = vpop.f32.mrf.mxu3 }
 0xbc7   : > { %v8582_v61 = vadd.f32 %v8581_v9, %v8533_v29  ;;  %v8495_v58 = vpop.f32.mrf.mxu1  ;;  %v8449_v47 = vpop.f32.mrf.mxu0 }
 0xbc8   : > { %v8496_v38 = vadd.f32 %v8495_v58, %v8447_v59  ;;  %v8450_v35 = vadd.f32 %v8449_v47, %v17201_v45 }
 0xbc9   : > { %v8619_v18 = vadd.f32 %v8582_v61, %v17988_v21 }
 0xbca   : > { %v8534_v5 = vpop.f32.mrf.mxu2 }
 0xbcb   : > { %8651 = vst [vmem:[%s17118_s27 + $0x68] sm:$0xff] %v8619_v18  ;;  %v8535_v49 = vadd.f32 %v8534_v5, %v8486_v28 }
 0xbce   : > { %v8583_v53 = vpop.f32.mrf.mxu3 }
 0xbcf   : > { %v8584_v57 = vadd.f32 %v8583_v53, %v8535_v49  ;;  %v8498_v36 = vpop.f32.mrf.mxu1  ;;  %v8451_v63 = vpop.f32.mrf.mxu0  ;;  %v17995_v49 = vld [vmem:[#allocation45_spill] sm:$0xff] }
 0xbd0   : > { %v8499_v30 = vadd.f32 %v8498_v36, %v8450_v35  ;;  %v8452_v24 = vadd.f32 %v8451_v63, %v17201_v45 }
 0xbd1   : > { %v8621_v12 = vadd.f32 %v8584_v57, %v17989_v13 }
 0xbd2   : > { %v8537_v51 = vpop.f32.mrf.mxu2 }
 0xbd3   : > { %8653 = vst [vmem:[%s17118_s27 + $0x78] sm:$0xff] %v8621_v12  ;;  %v8538_v8 = vadd.f32 %v8537_v51, %v8489_v34  ;;  %v17996_v34 = vld [vmem:[#allocation50_spill] sm:$0xff] }
 0xbd6   : > { %v8586_v16 = vpop.f32.mrf.mxu3 }
 0xbd7   : > { %v8587_v22 = vadd.f32 %v8586_v16, %v8538_v8  ;;  %v8500_v33 = vpop.f32.mrf.mxu1  ;;  %v8454_v60 = vpop.f32.mrf.mxu0 }
 0xbd8   : > { %v8501_v61 = vadd.f32 %v8500_v33, %v8452_v24  ;;  %v8455_v18 = vadd.f32 %v8454_v60, %v17201_v45 }
 0xbd9   : > { %v8623_v3 = vadd.f32 %v8587_v22, %v17990_v20 }
 0xbda   : > { %v8539_v52 = vpop.f32.mrf.mxu2 }
 0xbdb   : > { %8655 = vst [vmem:[%s17118_s27 + $0x88] sm:$0xff] %v8623_v3  ;;  %v8540_v46 = vadd.f32 %v8539_v52, %v8491_v19  ;;  %v17998_v3 = vld [vmem:[#allocation64_spill] sm:$0xff] }
 0xbde   : > { %v8588_v43 = vpop.f32.mrf.mxu3 }
 0xbdf   : > { %v8589_v54 = vadd.f32 %v8588_v43, %v8540_v46  ;;  %v8503_v28 = vpop.f32.mrf.mxu1  ;;  %v8456_v57 = vpop.f32.mrf.mxu0 }
 0xbe0   : > { %v8504_v31 = vadd.f32 %v8503_v28, %v8455_v18  ;;  %v8457_v51 = vadd.f32 %v8456_v57, %v17201_v45 }
 0xbe1   : > { %v8625_v62 = vadd.f32 %v8589_v54, %v17991_v17 }
 0xbe2   : > { %v8542_v7 = vpop.f32.mrf.mxu2 }
 0xbe3   : > { %8657 = vst [vmem:[%s17118_s27 + $0x98] sm:$0xff] %v8625_v62  ;;  %v8543_v37 = vadd.f32 %v8542_v7, %v8494_v56 }
 0xbe6   : > { %v8591_v55 = vpop.f32.mrf.mxu3 }
 0xbe7   : > { %v8592_v1 = vadd.f32 %v8591_v55, %v8543_v37  ;;  %v8505_v16 = vpop.f32.mrf.mxu1 }
 0xbe8   : > { %v8506_v22 = vadd.f32 %v8505_v16, %v8457_v51 }
 0xbe9   : > { %v8627_v40 = vadd.f32 %v8592_v1, %v17992_v41 }
 0xbea   : > { %v8544_v39 = vpop.f32.mrf.mxu2 }
 0xbeb   : > { %8659 = vst [vmem:[%s17118_s27 + $0xa8] sm:$0xff] %v8627_v40  ;;  %v8545_v0 = vadd.f32 %v8544_v39, %v8496_v38 }
 0xbee   : > { %v8593_v11 = vpop.f32.mrf.mxu3 }
 0xbef   : > { %v8594_v2 = vadd.f32 %v8593_v11, %v8545_v0 }
 0xbf1   : > { %v8629_v25 = vadd.f32 %v8594_v2, %v17993_v4 }
 0xbf2   : > { %v8547_v26 = vpop.f32.mrf.mxu2 }
 0xbf3   : > { %8661 = vst [vmem:[%s17118_s27 + $0xb8] sm:$0xff] %v8629_v25  ;;  %v8548_v42 = vadd.f32 %v8547_v26, %v8499_v30 }
 0xbf6   : > { %v8596_v23 = vpop.f32.mrf.mxu3 }
 0xbf7   : > { %v8597_v44 = vadd.f32 %v8596_v23, %v8548_v42 }
 0xbf9   : > { %v8631_v29 = vadd.f32 %v8597_v44, %v17994_v10 }
 0xbfa   : > { %v8549_v9 = vpop.f32.mrf.mxu2 }
 0xbfb   : > { %8663 = vst [vmem:[%s17118_s27 + $0xc8] sm:$0xff] %v8631_v29  ;;  %v8550_v27 = vadd.f32 %v8549_v9, %v8501_v61 }
 0xbfe   : > { %v8598_v21 = vpop.f32.mrf.mxu3 }
 0xbff   : > { %v8599_v5 = vadd.f32 %v8598_v21, %v8550_v27 }
 0xc01   : > { %v8633_v14 = vadd.f32 %v8599_v5, %v17995_v49 }
 0xc02   : > { %v8552_v53 = vpop.f32.mrf.mxu2 }
 0xc03   : > { %8665 = vst [vmem:[%s17118_s27 + $0xd8] sm:$0xff] %v8633_v14  ;;  %v8553_v13 = vadd.f32 %v8552_v53, %v8504_v31 }
 0xc06   : > { %v8601_v12 = vpop.f32.mrf.mxu3 }
 0xc07   : > { %v8602_v6 = vadd.f32 %v8601_v12, %v8553_v13 }
 0xc09   : > { %v8635_v8 = vadd.f32 %v8602_v6, %v17996_v34 }
 0xc0a   : > { %v8554_v15 = vpop.f32.mrf.mxu2 }
 0xc0b   : > { %8667 = vst [vmem:[%s17118_s27 + $0xe8] sm:$0xff] %v8635_v8  ;;  %v8555_v32 = vadd.f32 %v8554_v15, %v8506_v22 }
 0xc0e   : > { %v8603_v20 = vpop.f32.mrf.mxu3 }
 0xc0f   : > { %v8604_v45 = vadd.f32 %v8603_v20, %v8555_v32 }
 0xc11   : > { %v8637_v52 = vadd.f32 %v8604_v45, %v17998_v3 }
 0xc13   : > { %8669 = vst [vmem:[%s17118_s27 + $0xf8] sm:$0xff] %v8637_v52 }
 0xc14   : > { %11002 = shalt.err (!%p10999_p9)
}
 0xc15   : > { %s11075_s1 = smov 256   ;;  %s11076_s27 = smov 16  }
 0xc16   : > { %10245 = dma.vmem_to_hbm [thread:$0]  (%p11252_p5), %s8684_s15, 4096, %s8686_s2, %s8671_s28, %s11075_s1, %s11075_s1, %s11076_s27  }
 0xc17 PF: > { %s8700_s26 = sand.u32 1, %s11045_s21   ;;  %p17999_p10 = scmp.ge.s32.totalorder %s11057_s24, 2 }
 0xc18   : > { %s8701_s18 = scalar_lea.sflag [#allocation4], %s8700_s26 }
 0xc19   : > { %p10277_p13 = pnand %p17999_p10, %p11256_p6 }
 0xc1b   : > { %p10278_p11 = pneg %p10277_p13 }
 0xc1d   : > { %11040 = dma.done.wait (%p10278_p11), %s8701_s18, 4096  }
 0xc1e   : > { %11042 = vsyncadd (%p10278_p11), %s8701_s18, 4294963200  ;;  %p29_p0 = scmp.ge.s32.totalorder %s11226_s25, 4   ;;  %s18000_s21 = smov %s11049_s22 }
 0xc1f   : > { %s18001_s22 = smov %s11053_s23  ;;  %s18002_s23 = smov %s11237_s12 }
 0xc20   : > { %s18003_s24 = smov %s11226_s25  ;;  %31 = sbr.rel (!%p29_p0) target bundleno = 17 (0x11), region = 145 }
 0xc25   :  { %8707 = vsyncpa [#allocation3], 1 }
 0xc26   :  { %8709 = vsyncpa [#allocation3 + $0x1], 1 }
 0xc27   :  { %8710 = vsyncpa [#allocation6], 1 }
 0xc28   :  { %8711 = vsyncpa [#allocation9], 1 }
 0xc29   :  { %8712 = vsyncpa [#allocation12], 1 }
 0xc2a   :  { %8713 = vsyncpa [#allocation15], 1 }
 0xc2b   :  { %8714 = vsyncpa [#allocation4], 1 }
 0xc2c   :  { %8716 = vsyncpa [#allocation4 + $0x1], 1 }

</bundles_post_ra>
